<compile_context>
chip_gen: v5e
topology: v5e:2x2
jax: 0.10.0
libtpu: 0.0.40
codegen_flags: <defaults>
</compile_context>

<pallas_src>
import functools

import jax
import jax.numpy as jnp
from jax import lax
from jax.experimental import pallas as pl
from jax.experimental.pallas import tpu as pltpu


def _vmem_limit_bytes():
    try:
        cap = int(pltpu.get_tpu_info().vmem_capacity_bytes)
    except Exception:
        cap = 64 << 20          # conservative (v7x) fallback
    return int(min(cap - cap // 4, 96 << 20))


def _row_tile(n, budget_elems=512 * 1024):
    """Largest multiple-of-8 divisor of n whose (tile, n) f32 slab stays small."""
    cap = max(8, min(512, budget_elems // max(n, 1)))
    best = None
    t = 8
    while t <= min(cap, n):
        if n % t == 0:
            best = t
        t += 8
    return best if best is not None else n


# ----------------------------------------------------------------------------
# Kernel 1: fused pairwise distance + in-kernel top-k + EdgeConv transforms
#   idx[i, :] = top-k neighbors (incl. self),  G = x@(Wn*s),  H = x@((Wc-Wn)*s)+b
# Grid (B, N // TM); x is a single resident (1, N, C) block per batch.
# ----------------------------------------------------------------------------
def _knn_gh_kernel(xf_ref, wg_ref, wh_ref, bh_ref, idx_ref, g_ref, h_ref,
                   *, tile_m, k):
    n = xf_ref.shape[1]
    c = xf_ref.shape[2]
    t = pl.program_id(1)
    row0 = pl.multiple_of(t * tile_m, tile_m)

    xf = xf_ref[0]                                        # [N, C]  f32 (resident)
    xt = xf_ref[0, pl.ds(row0, tile_m), :]                # [TM, C] row tile

    # negative squared distance: d[i,j] = 2*xt[i].xf[j] - |xt[i]|^2 - |xf[j]|^2
    # (factor 2 folded into the dot lhs; f32 operands keep knn ordering stable)
    inner2 = lax.dot_general(xt + xt, xf, (((1,), (1,)), ((), ())),
                             preferred_element_type=jnp.float32)      # [TM, N]
    sq_t = jnp.sum(xt * xt, axis=1, keepdims=True)                    # [TM, 1]
    ones_row = jnp.ones((1, c), jnp.float32)
    sq_f = lax.dot_general(ones_row, xf * xf, (((1,), (1,)), ((), ())),
                           preferred_element_type=jnp.float32)        # [1, N]
    d = inner2 - sq_t - sq_f

    # in-kernel top-k: k argmax+mask passes (ties -> smallest index)
    col_ids = lax.broadcasted_iota(jnp.int32, (tile_m, n), 1)
    col_f = col_ids.astype(jnp.float32)
    k_ids = lax.broadcasted_iota(jnp.int32, (tile_m, k), 1)
    idx_acc = jnp.zeros((tile_m, k), jnp.int32)
    work = d
    neg_big = jnp.float32(-3.0e38)
    big_idx = jnp.float32(n)
    for j in range(k):                                    # k is small & static
        m = jnp.max(work, axis=1, keepdims=True)                      # [TM, 1]
        hit = work == m
        pick = jnp.min(jnp.where(hit, col_f, big_idx), axis=1,
                       keepdims=True).astype(jnp.int32)               # [TM, 1]
        work = jnp.where(col_ids == pick, neg_big, work)
        idx_acc = jnp.where(k_ids == j, pick, idx_acc)
    idx_ref[0] = idx_acc

    # EdgeConv per-point transforms (BN scale pre-folded into bf16 weights)
    xt_b = xt.astype(jnp.bfloat16)
    g = jnp.dot(xt_b, wg_ref[...], preferred_element_type=jnp.float32)
    h = jnp.dot(xt_b, wh_ref[...], preferred_element_type=jnp.float32) + bh_ref[...]
    g_ref[0] = g.astype(g_ref.dtype)
    h_ref[0] = h.astype(h_ref.dtype)


def knn_and_transform(x, wg, wh, bh, k, tile_m):
    B, N, C = x.shape
    Cout = wg.shape[1]
    kern = functools.partial(_knn_gh_kernel, tile_m=tile_m, k=k)
    return pl.pallas_call(
        kern,
        out_shape=(
            jax.ShapeDtypeStruct((B, N, k), jnp.int32),        # neighbor indices
            jax.ShapeDtypeStruct((B, N, Cout), jnp.bfloat16),  # G
            jax.ShapeDtypeStruct((B, N, Cout), jnp.bfloat16),  # H
        ),
        grid=(B, N // tile_m),
        in_specs=[
            pl.BlockSpec((1, N, C), lambda b, t: (b, 0, 0)),   # resident x block
            pl.BlockSpec((C, Cout), lambda b, t: (0, 0)),
            pl.BlockSpec((C, Cout), lambda b, t: (0, 0)),
            pl.BlockSpec((1, Cout), lambda b, t: (0, 0)),
        ],
        out_specs=(
            pl.BlockSpec((1, tile_m, k), lambda b, t: (b, t, 0)),
            pl.BlockSpec((1, tile_m, Cout), lambda b, t: (b, t, 0)),
            pl.BlockSpec((1, tile_m, Cout), lambda b, t: (b, t, 0)),
        ),
        compiler_params=pltpu.CompilerParams(
            dimension_semantics=("parallel", "parallel"),
            vmem_limit_bytes=_vmem_limit_bytes()),
    )(x, wg, wh, bh)


# ----------------------------------------------------------------------------
# Kernel 2: EdgeConv combine:  out[i] = LeakyReLU(max_j G[idx[i,j]] + H[i])
# (monotonicity: activation pulled outside the max). Input is the gathered G
# rows laid out lane-dense as (B, N, K*Cout) bf16.
# ----------------------------------------------------------------------------
def _edge_max_kernel(nbr_ref, h_ref, o_ref, *, k, cout):
    g = nbr_ref[0]                                        # [TN, K*Cout] bf16
    m = g[:, 0:cout]
    for j in range(1, k):                                 # K-1 vmax in bf16
        m = jnp.maximum(m, g[:, j * cout:(j + 1) * cout])
    y = m.astype(jnp.float32) + h_ref[0].astype(jnp.float32)
    o_ref[0] = jnp.where(y > 0.0, y, 0.2 * y)             # LeakyReLU(0.2)


def edge_combine_max(nbr_g, h, k, tile_n):
    B, N, KC = nbr_g.shape
    Cout = h.shape[-1]
    kern = functools.partial(_edge_max_kernel, k=k, cout=Cout)
    return pl.pallas_call(
        kern,
        out_shape=jax.ShapeDtypeStruct((B, N, Cout), jnp.float32),
        grid=(B, N // tile_n),
        in_specs=[
            pl.BlockSpec((1, tile_n, KC), lambda b, t: (b, t, 0)),
            pl.BlockSpec((1, tile_n, Cout), lambda b, t: (b, t, 0)),
        ],
        out_specs=pl.BlockSpec((1, tile_n, Cout), lambda b, t: (b, t, 0)),
        compiler_params=pltpu.CompilerParams(
            dimension_semantics=("parallel", "parallel"),
            vmem_limit_bytes=_vmem_limit_bytes()),
    )(nbr_g, h)


# ----------------------------------------------------------------------------
# Kernel 3: conv5 (1x1 Conv1d, BN scale folded into W5, LeakyReLU) with the
# x1..x4 concat fused via row-split weights; global max/avg pool as an N-tile
# reduction with a resident (1, 2, tile_e) accumulator; emb-tile parallel axis.
# ----------------------------------------------------------------------------
def _conv5_pool_kernel(x1_ref, x2_ref, x3_ref, x4_ref,
                       w1_ref, w2_ref, w3_ref, w4_ref,
                       b_ref, o_ref, *, inv_n):
    t = pl.program_id(2)
    y = jnp.dot(x1_ref[0].astype(jnp.bfloat16), w1_ref[...],
                preferred_element_type=jnp.float32)
    y = y + jnp.dot(x2_ref[0].astype(jnp.bfloat16), w2_ref[...],
                    preferred_element_type=jnp.float32)
    y = y + jnp.dot(x3_ref[0].astype(jnp.bfloat16), w3_ref[...],
                    preferred_element_type=jnp.float32)
    y = y + jnp.dot(x4_ref[0].astype(jnp.bfloat16), w4_ref[...],
                    preferred_element_type=jnp.float32)
    y = y + b_ref[...]                                    # BN scale folded in W5
    y = jnp.where(y > 0.0, y, 0.2 * y)                    # LeakyReLU(0.2)

    tile_max = jnp.max(y, axis=0, keepdims=True)          # [1, TE]
    tile_sum = jnp.sum(y, axis=0, keepdims=True)          # [1, TE]

    @pl.when(t == 0)
    def _():
        o_ref[0, 0:1, :] = tile_max
        o_ref[0, 1:2, :] = tile_sum

    @pl.when(t > 0)
    def _():
        o_ref[0, 0:1, :] = jnp.maximum(o_ref[0, 0:1, :], tile_max)
        o_ref[0, 1:2, :] = o_ref[0, 1:2, :] + tile_sum

    @pl.when(t == pl.num_programs(2) - 1)
    def _():
        o_ref[0, 1:2, :] = o_ref[0, 1:2, :] * inv_n        # adaptive_avg_pool1d


def conv5_pool(xs, ws, bias, tile_n, tile_e):
    x1, x2, x3, x4 = xs
    w1, w2, w3, w4 = ws
    B, N, c1 = x1.shape
    c2, c3, c4 = x2.shape[-1], x3.shape[-1], x4.shape[-1]
    emb = w1.shape[1]
    kern = functools.partial(_conv5_pool_kernel, inv_n=1.0 / N)
    return pl.pallas_call(
        kern,
        out_shape=jax.ShapeDtypeStruct((B, 2, emb), jnp.float32),
        grid=(B, emb // tile_e, N // tile_n),
        in_specs=[
            pl.BlockSpec((1, tile_n, c1), lambda b, e, t: (b, t, 0)),
            pl.BlockSpec((1, tile_n, c2), lambda b, e, t: (b, t, 0)),
            pl.BlockSpec((1, tile_n, c3), lambda b, e, t: (b, t, 0)),
            pl.BlockSpec((1, tile_n, c4), lambda b, e, t: (b, t, 0)),
            pl.BlockSpec((c1, tile_e), lambda b, e, t: (0, e)),
            pl.BlockSpec((c2, tile_e), lambda b, e, t: (0, e)),
            pl.BlockSpec((c3, tile_e), lambda b, e, t: (0, e)),
            pl.BlockSpec((c4, tile_e), lambda b, e, t: (0, e)),
            pl.BlockSpec((1, tile_e), lambda b, e, t: (0, e)),
        ],
        out_specs=pl.BlockSpec((1, 2, tile_e), lambda b, e, t: (b, 0, e)),
        compiler_params=pltpu.CompilerParams(
            dimension_semantics=("parallel", "parallel", "arbitrary"),
            vmem_limit_bytes=_vmem_limit_bytes()),
    )(x1, x2, x3, x4, w1, w2, w3, w4, bias)


# ----------------------------------------------------------------------------
# Kernel 4: classification head (BN6/BN7 folded into the linear weights/biases)
# linear1 -> LReLU -> linear2 -> LReLU -> linear3 -> log_softmax.
# ----------------------------------------------------------------------------
def _head_kernel(x_ref, w1_ref, b1_ref, w2_ref, b2_ref, w3_ref, b3_ref, o_ref):
    x = x_ref[...]                                        # [B, 2*emb] f32
    h = jnp.dot(x.astype(jnp.bfloat16), w1_ref[...],
                preferred_element_type=jnp.float32) + b1_ref[...]
    h = jnp.where(h > 0.0, h, 0.2 * h)
    # TODO(synk): Dropout (dp1, dp2) runs in eval mode -> identity (no RNG mask).
    h = jnp.dot(h.astype(jnp.bfloat16), w2_ref[...],
                preferred_element_type=jnp.float32) + b2_ref[...]
    h = jnp.where(h > 0.0, h, 0.2 * h)
    logits = jnp.dot(h.astype(jnp.bfloat16), w3_ref[...],
                     preferred_element_type=jnp.float32) + b3_ref[...]
    m = jnp.max(logits, axis=1, keepdims=True)
    z = logits - m
    lse = jnp.log(jnp.sum(jnp.exp(z), axis=1, keepdims=True))
    o_ref[...] = z - lse


def head(feat, w1, b1, w2, b2, w3, b3):
    B = feat.shape[0]
    ncls = w3.shape[1]
    return pl.pallas_call(
        _head_kernel,
        out_shape=jax.ShapeDtypeStruct((B, ncls), jnp.float32),
        compiler_params=pltpu.CompilerParams(
            vmem_limit_bytes=_vmem_limit_bytes()),
    )(feat, w1, b1, w2, b2, w3, b3)


# ----------------------------------------------------------------------------
# Full forward
# ----------------------------------------------------------------------------
@functools.partial(jax.jit, static_argnames=("k",))
def dgcnn_forward(x, params, *, k):
    # x: [B, 3, N]  (same input layout as the PyTorch module)
    B, _, N = x.shape
    p = params
    x_pts = jnp.transpose(x, (0, 2, 1))                   # [B, N, 3] f32
    tile = _row_tile(N)

    def edge_layer(feat, wg, wh, bh):
        Cout = wg.shape[1]
        idx, g, h = knn_and_transform(feat, wg, wh, bh, k, tile)
        # TODO(synk): this row gather of bf16 G still runs as an XLA gather;
        # an in-kernel DMA / scalar-prefetch gather would remove the
        # [B, N, K*Cout] HBM round trip entirely.
        nbr = jnp.take_along_axis(
            g, idx.reshape(B, N * k)[:, :, None], axis=1)
        nbr = nbr.reshape(B, N, k * Cout)                 # lane-dense last dim
        return edge_combine_max(nbr, h, k, tile)          # [B, N, Cout] f32

    x1 = edge_layer(x_pts, *p["edge1"])                   # [B, N, 64]
    x2 = edge_layer(x1, *p["edge2"])                      # [B, N, 64]
    x3 = edge_layer(x2, *p["edge3"])                      # [B, N, 128]
    x4 = edge_layer(x3, *p["edge4"])                      # [B, N, 256]

    emb = p["w5"][0].shape[1]
    tile_e = emb // 2 if (emb % 2 == 0 and (emb // 2) % 128 == 0) else emb
    pooled = conv5_pool((x1, x2, x3, x4), p["w5"], p["b5"], tile, tile_e)
    feat = pooled.reshape(B, -1)                          # [max(emb) | avg(emb)]

    return head(feat, *p["head"])                         # [B, num_classes]


# ----------------------------------------------------------------------------
# Parameters: raw init (shapes from DGCNN.__init__) + one-time folding into
# the kernel-ready format (done outside the jitted forward).
# ----------------------------------------------------------------------------
def init_params(key, emb_dims, num_classes):
    ks = jax.random.split(key, 17)

    def w_init(kk, cin, cout):
        return (jax.random.normal(kk, (cin, cout), jnp.float32)
                / jnp.sqrt(jnp.float32(cin)))

    def bn_init(kk, c):
        k1, k2, k3, k4 = jax.random.split(kk, 4)
        gamma = 1.0 + 0.1 * jax.random.normal(k1, (1, c), jnp.float32)
        beta = 0.1 * jax.random.normal(k2, (1, c), jnp.float32)
        mean = 0.1 * jax.random.normal(k3, (1, c), jnp.float32)
        var = 1.0 + 0.1 * jnp.abs(jax.random.normal(k4, (1, c), jnp.float32))
        scale = gamma * lax.rsqrt(var + 1e-5)             # eval-mode BN folded
        bias = beta - mean * scale
        return scale, bias

    r = {}
    r["w1"] = w_init(ks[0], 6, 64);            r["s1"], r["b1"] = bn_init(ks[1], 64)
    r["w2"] = w_init(ks[2], 128, 64);          r["s2"], r["b2"] = bn_init(ks[3], 64)
    r["w3"] = w_init(ks[4], 128, 128);         r["s3"], r["b3"] = bn_init(ks[5], 128)
    r["w4"] = w_init(ks[6], 256, 256);         r["s4"], r["b4"] = bn_init(ks[7], 256)
    r["w5"] = w_init(ks[8], 512, emb_dims);    r["s5"], r["b5"] = bn_init(ks[9], emb_dims)
    r["wl1"] = w_init(ks[10], 2 * emb_dims, 512)
    r["s6"], r["b6"] = bn_init(ks[11], 512)
    r["wl2"] = w_init(ks[12], 512, 256)
    r["bl2"] = 0.1 * jax.random.normal(ks[13], (1, 256), jnp.float32)
    r["s7"], r["b7"] = bn_init(ks[14], 256)
    r["wl3"] = w_init(ks[15], 256, num_classes)
    r["bl3"] = 0.1 * jax.random.normal(ks[16], (1, num_classes), jnp.float32)
    return r


def fold_params(r):
    """One-time BN folding, weight splitting and bf16 casts (outside the jit)."""
    def edge(w, s, b):
        C = w.shape[0] // 2
        wn, wc = w[:C], w[C:]
        wg = (wn * s).astype(jnp.bfloat16)                # G weight
        wh = ((wc - wn) * s).astype(jnp.bfloat16)         # H weight
        return wg, wh, b

    p = {}
    p["edge1"] = edge(r["w1"], r["s1"], r["b1"])
    p["edge2"] = edge(r["w2"], r["s2"], r["b2"])
    p["edge3"] = edge(r["w3"], r["s3"], r["b3"])
    p["edge4"] = edge(r["w4"], r["s4"], r["b4"])

    w5 = (r["w5"] * r["s5"]).astype(jnp.bfloat16)         # fold BN5 scale
    p["w5"] = (w5[:64], w5[64:128], w5[128:256], w5[256:512])
    p["b5"] = r["b5"]

    w1h = (r["wl1"] * r["s6"]).astype(jnp.bfloat16)       # fold BN6 scale
    w2h = (r["wl2"] * r["s7"]).astype(jnp.bfloat16)       # fold BN7 scale
    b2h = r["bl2"] * r["s7"] + r["b7"]
    p["head"] = (w1h, r["b6"], w2h, b2h,
                 r["wl3"].astype(jnp.bfloat16), r["bl3"])
    return p


if __name__ == "__main__":
    B, N, K = 2, 32, 8          # small: batch=2, 32 points, k=8 neighbors
    EMB, NUM_CLASSES = 256, 40  # emb_dims kept modest; output_channels=40

    key = jax.random.PRNGKey(0)
    kx, kp = jax.random.split(key)
    x = jax.random.normal(kx, (B, 3, N), jnp.float32)      # [bs, 3, n_points]
    params = fold_params(init_params(kp, emb_dims=EMB, num_classes=NUM_CLASSES))

    out = dgcnn_forward(x, params, k=K)
    out = jax.block_until_ready(out)
    assert out.shape == (B, NUM_CLASSES)
    assert bool(jnp.all(jnp.isfinite(out)))
    # log_softmax rows should (exp-)sum to ~1
    assert bool(jnp.allclose(jnp.sum(jnp.exp(out), axis=1), 1.0, atol=1e-3))
    print("KERNEL_OK")
</pallas_src>

<mosaic_0001>
module attributes {stable_mosaic.version = 11 : i64} {
  func.func @_knn_gh_kernel(%arg0: i32, %arg1: i32, %arg2: memref<1x32x3xf32, #tpu.memory_space<vmem>>, %arg3: memref<3x64xbf16, #tpu.memory_space<vmem>>, %arg4: memref<3x64xbf16, #tpu.memory_space<vmem>>, %arg5: memref<1x64xf32, #tpu.memory_space<vmem>>, %arg6: memref<1x32x8xi32, #tpu.memory_space<vmem>>, %arg7: memref<1x32x64xbf16, #tpu.memory_space<vmem>>, %arg8: memref<1x32x64xbf16, #tpu.memory_space<vmem>>) attributes {dimension_semantics = [#tpu.dimension_semantics<parallel>, #tpu.dimension_semantics<parallel>], iteration_bounds = array<i64: 2, 1>, scalar_prefetch = 0 : i64, scratch_operands = 0 : i64, tpu.core_type = #tpu.core_type<tc>, window_params = [{transform_indices = @transform_0, window_bounds = array<i64: 1, 32, 3>}, {pipeline_mode = #tpu.pipeline_mode<synchronous>, transform_indices = @transform_1, window_bounds = array<i64: 3, 64>}, {pipeline_mode = #tpu.pipeline_mode<synchronous>, transform_indices = @transform_2, window_bounds = array<i64: 3, 64>}, {pipeline_mode = #tpu.pipeline_mode<synchronous>, transform_indices = @transform_3, window_bounds = array<i64: 1, 64>}, {transform_indices = @transform_4, window_bounds = array<i64: 1, 32, 8>}, {transform_indices = @transform_5, window_bounds = array<i64: 1, 32, 64>}, {transform_indices = @transform_6, window_bounds = array<i64: 1, 32, 64>}]} {
    %c32_i32 = arith.constant 32 : i32
    %0 = arith.muli %arg1, %c32_i32 : i32
    %1 = tpu.assume_multiple %0, 32 : i32
    %c0 = arith.constant 0 : index
    %c0_0 = arith.constant 0 : index
    %c0_1 = arith.constant 0 : index
    %2 = vector.load %arg2[%c0, %c0_0, %c0_1] : memref<1x32x3xf32, #tpu.memory_space<vmem>>, vector<1x32x3xf32>
    %3 = vector.shape_cast %2 : vector<1x32x3xf32> to vector<32x3xf32>
    %c0_2 = arith.constant 0 : index
    %4 = arith.index_cast %1 : i32 to index
    %c0_3 = arith.constant 0 : index
    %5 = vector.load %arg2[%c0_2, %4, %c0_3] : memref<1x32x3xf32, #tpu.memory_space<vmem>>, vector<1x32x3xf32>
    %6 = vector.shape_cast %5 : vector<1x32x3xf32> to vector<32x3xf32>
    %7 = arith.addf %6, %6 : vector<32x3xf32>
    %cst = arith.constant dense<0.000000e+00> : vector<32x32xf32>
    %8 = tpu.matmul %7, %3, %cst {dimension_numbers = #tpu.dot_dimension_numbers<[1], [1], [0], [0], [0, 0, 1, 0], [], []>} : vector<32x3xf32>, vector<32x3xf32>, vector<32x32xf32> -> vector<32x32xf32>
    %9 = arith.mulf %6, %6 : vector<32x3xf32>
    %cst_4 = arith.constant dense<0.000000e+00> : vector<32xf32>
    %10 = vector.multi_reduction <add>, %9, %cst_4 [1] : vector<32x3xf32> to vector<32xf32>
    %11 = vector.shape_cast %10 : vector<32xf32> to vector<32x1xf32>
    %cst_5 = arith.constant 1.000000e+00 : f32
    %12 = vector.broadcast %cst_5 : f32 to vector<1x3xf32>
    %13 = arith.mulf %3, %3 : vector<32x3xf32>
    %cst_6 = arith.constant dense<0.000000e+00> : vector<1x32xf32>
    %14 = tpu.matmul %12, %13, %cst_6 {dimension_numbers = #tpu.dot_dimension_numbers<[1], [1], [0], [0], [0, 0, 1, 0], [], []>} : vector<1x3xf32>, vector<32x3xf32>, vector<1x32xf32> -> vector<1x32xf32>
    %15 = vector.broadcast %11 : vector<32x1xf32> to vector<32x32xf32>
    %16 = arith.subf %8, %15 : vector<32x32xf32>
    %17 = vector.broadcast %14 : vector<1x32xf32> to vector<32x32xf32>
    %18 = arith.subf %16, %17 : vector<32x32xf32>
    %19 = tpu.iota {dimensions = array<i32: 1>} : vector<32x32xi32>
    %20 = arith.sitofp %19 : vector<32x32xi32> to vector<32x32xf32>
    %21 = tpu.iota {dimensions = array<i32: 1>} : vector<32x8xi32>
    %c0_i32 = arith.constant 0 : i32
    %22 = vector.broadcast %c0_i32 : i32 to vector<32x8xi32>
    %cst_7 = arith.constant dense<0xFF800000> : vector<32xf32>
    %23 = vector.multi_reduction <maximumf>, %18, %cst_7 [1] : vector<32x32xf32> to vector<32xf32>
    %24 = vector.shape_cast %23 : vector<32xf32> to vector<32x1xf32>
    %25 = vector.broadcast %24 : vector<32x1xf32> to vector<32x32xf32>
    %26 = arith.cmpf oeq, %18, %25 : vector<32x32xf32>
    %cst_8 = arith.constant 3.200000e+01 : f32
    %27 = vector.broadcast %cst_8 : f32 to vector<32x32xf32>
    %28 = arith.select %26, %20, %27 : vector<32x32xi1>, vector<32x32xf32>
    %cst_9 = arith.constant dense<0x7F800000> : vector<32xf32>
    %29 = vector.multi_reduction <minimumf>, %28, %cst_9 [1] : vector<32x32xf32> to vector<32xf32>
    %30 = vector.shape_cast %29 : vector<32xf32> to vector<32x1xf32>
    %31 = arith.fptosi %30 : vector<32x1xf32> to vector<32x1xi32>
    %32 = vector.broadcast %31 : vector<32x1xi32> to vector<32x32xi32>
    %33 = arith.cmpi eq, %19, %32 : vector<32x32xi32>
    %cst_10 = arith.constant -3.000000e+38 : f32
    %34 = vector.broadcast %cst_10 : f32 to vector<32x32xf32>
    %35 = arith.select %33, %34, %18 : vector<32x32xi1>, vector<32x32xf32>
    %c0_i32_11 = arith.constant 0 : i32
    %36 = vector.broadcast %c0_i32_11 : i32 to vector<32x8xi32>
    %37 = arith.cmpi eq, %21, %36 : vector<32x8xi32>
    %38 = vector.shape_cast %31 : vector<32x1xi32> to vector<32x1xi32>
    %39 = vector.broadcast %38 : vector<32x1xi32> to vector<32x8xi32>
    %40 = arith.select %37, %39, %22 : vector<32x8xi1>, vector<32x8xi32>
    %cst_12 = arith.constant dense<0xFF800000> : vector<32xf32>
    %41 = vector.multi_reduction <maximumf>, %35, %cst_12 [1] : vector<32x32xf32> to vector<32xf32>
    %42 = vector.shape_cast %41 : vector<32xf32> to vector<32x1xf32>
    %43 = vector.broadcast %42 : vector<32x1xf32> to vector<32x32xf32>
    %44 = arith.cmpf oeq, %35, %43 : vector<32x32xf32>
    %cst_13 = arith.constant 3.200000e+01 : f32
    %45 = vector.broadcast %cst_13 : f32 to vector<32x32xf32>
    %46 = arith.select %44, %20, %45 : vector<32x32xi1>, vector<32x32xf32>
    %cst_14 = arith.constant dense<0x7F800000> : vector<32xf32>
    %47 = vector.multi_reduction <minimumf>, %46, %cst_14 [1] : vector<32x32xf32> to vector<32xf32>
    %48 = vector.shape_cast %47 : vector<32xf32> to vector<32x1xf32>
    %49 = arith.fptosi %48 : vector<32x1xf32> to vector<32x1xi32>
    %50 = vector.broadcast %49 : vector<32x1xi32> to vector<32x32xi32>
    %51 = arith.cmpi eq, %19, %50 : vector<32x32xi32>
    %cst_15 = arith.constant -3.000000e+38 : f32
    %52 = vector.broadcast %cst_15 : f32 to vector<32x32xf32>
    %53 = arith.select %51, %52, %35 : vector<32x32xi1>, vector<32x32xf32>
    %c1_i32 = arith.constant 1 : i32
    %54 = vector.broadcast %c1_i32 : i32 to vector<32x8xi32>
    %55 = arith.cmpi eq, %21, %54 : vector<32x8xi32>
    %56 = vector.shape_cast %49 : vector<32x1xi32> to vector<32x1xi32>
    %57 = vector.broadcast %56 : vector<32x1xi32> to vector<32x8xi32>
    %58 = arith.select %55, %57, %40 : vector<32x8xi1>, vector<32x8xi32>
    %cst_16 = arith.constant dense<0xFF800000> : vector<32xf32>
    %59 = vector.multi_reduction <maximumf>, %53, %cst_16 [1] : vector<32x32xf32> to vector<32xf32>
    %60 = vector.shape_cast %59 : vector<32xf32> to vector<32x1xf32>
    %61 = vector.broadcast %60 : vector<32x1xf32> to vector<32x32xf32>
    %62 = arith.cmpf oeq, %53, %61 : vector<32x32xf32>
    %cst_17 = arith.constant 3.200000e+01 : f32
    %63 = vector.broadcast %cst_17 : f32 to vector<32x32xf32>
    %64 = arith.select %62, %20, %63 : vector<32x32xi1>, vector<32x32xf32>
    %cst_18 = arith.constant dense<0x7F800000> : vector<32xf32>
    %65 = vector.multi_reduction <minimumf>, %64, %cst_18 [1] : vector<32x32xf32> to vector<32xf32>
    %66 = vector.shape_cast %65 : vector<32xf32> to vector<32x1xf32>
    %67 = arith.fptosi %66 : vector<32x1xf32> to vector<32x1xi32>
    %68 = vector.broadcast %67 : vector<32x1xi32> to vector<32x32xi32>
    %69 = arith.cmpi eq, %19, %68 : vector<32x32xi32>
    %cst_19 = arith.constant -3.000000e+38 : f32
    %70 = vector.broadcast %cst_19 : f32 to vector<32x32xf32>
    %71 = arith.select %69, %70, %53 : vector<32x32xi1>, vector<32x32xf32>
    %c2_i32 = arith.constant 2 : i32
    %72 = vector.broadcast %c2_i32 : i32 to vector<32x8xi32>
    %73 = arith.cmpi eq, %21, %72 : vector<32x8xi32>
    %74 = vector.shape_cast %67 : vector<32x1xi32> to vector<32x1xi32>
    %75 = vector.broadcast %74 : vector<32x1xi32> to vector<32x8xi32>
    %76 = arith.select %73, %75, %58 : vector<32x8xi1>, vector<32x8xi32>
    %cst_20 = arith.constant dense<0xFF800000> : vector<32xf32>
    %77 = vector.multi_reduction <maximumf>, %71, %cst_20 [1] : vector<32x32xf32> to vector<32xf32>
    %78 = vector.shape_cast %77 : vector<32xf32> to vector<32x1xf32>
    %79 = vector.broadcast %78 : vector<32x1xf32> to vector<32x32xf32>
    %80 = arith.cmpf oeq, %71, %79 : vector<32x32xf32>
    %cst_21 = arith.constant 3.200000e+01 : f32
    %81 = vector.broadcast %cst_21 : f32 to vector<32x32xf32>
    %82 = arith.select %80, %20, %81 : vector<32x32xi1>, vector<32x32xf32>
    %cst_22 = arith.constant dense<0x7F800000> : vector<32xf32>
    %83 = vector.multi_reduction <minimumf>, %82, %cst_22 [1] : vector<32x32xf32> to vector<32xf32>
    %84 = vector.shape_cast %83 : vector<32xf32> to vector<32x1xf32>
    %85 = arith.fptosi %84 : vector<32x1xf32> to vector<32x1xi32>
    %86 = vector.broadcast %85 : vector<32x1xi32> to vector<32x32xi32>
    %87 = arith.cmpi eq, %19, %86 : vector<32x32xi32>
    %cst_23 = arith.constant -3.000000e+38 : f32
    %88 = vector.broadcast %cst_23 : f32 to vector<32x32xf32>
    %89 = arith.select %87, %88, %71 : vector<32x32xi1>, vector<32x32xf32>
    %c3_i32 = arith.constant 3 : i32
    %90 = vector.broadcast %c3_i32 : i32 to vector<32x8xi32>
    %91 = arith.cmpi eq, %21, %90 : vector<32x8xi32>
    %92 = vector.shape_cast %85 : vector<32x1xi32> to vector<32x1xi32>
    %93 = vector.broadcast %92 : vector<32x1xi32> to vector<32x8xi32>
    %94 = arith.select %91, %93, %76 : vector<32x8xi1>, vector<32x8xi32>
    %cst_24 = arith.constant dense<0xFF800000> : vector<32xf32>
    %95 = vector.multi_reduction <maximumf>, %89, %cst_24 [1] : vector<32x32xf32> to vector<32xf32>
    %96 = vector.shape_cast %95 : vector<32xf32> to vector<32x1xf32>
    %97 = vector.broadcast %96 : vector<32x1xf32> to vector<32x32xf32>
    %98 = arith.cmpf oeq, %89, %97 : vector<32x32xf32>
    %cst_25 = arith.constant 3.200000e+01 : f32
    %99 = vector.broadcast %cst_25 : f32 to vector<32x32xf32>
    %100 = arith.select %98, %20, %99 : vector<32x32xi1>, vector<32x32xf32>
    %cst_26 = arith.constant dense<0x7F800000> : vector<32xf32>
    %101 = vector.multi_reduction <minimumf>, %100, %cst_26 [1] : vector<32x32xf32> to vector<32xf32>
    %102 = vector.shape_cast %101 : vector<32xf32> to vector<32x1xf32>
    %103 = arith.fptosi %102 : vector<32x1xf32> to vector<32x1xi32>
    %104 = vector.broadcast %103 : vector<32x1xi32> to vector<32x32xi32>
    %105 = arith.cmpi eq, %19, %104 : vector<32x32xi32>
    %cst_27 = arith.constant -3.000000e+38 : f32
    %106 = vector.broadcast %cst_27 : f32 to vector<32x32xf32>
    %107 = arith.select %105, %106, %89 : vector<32x32xi1>, vector<32x32xf32>
    %c4_i32 = arith.constant 4 : i32
    %108 = vector.broadcast %c4_i32 : i32 to vector<32x8xi32>
    %109 = arith.cmpi eq, %21, %108 : vector<32x8xi32>
    %110 = vector.shape_cast %103 : vector<32x1xi32> to vector<32x1xi32>
    %111 = vector.broadcast %110 : vector<32x1xi32> to vector<32x8xi32>
    %112 = arith.select %109, %111, %94 : vector<32x8xi1>, vector<32x8xi32>
    %cst_28 = arith.constant dense<0xFF800000> : vector<32xf32>
    %113 = vector.multi_reduction <maximumf>, %107, %cst_28 [1] : vector<32x32xf32> to vector<32xf32>
    %114 = vector.shape_cast %113 : vector<32xf32> to vector<32x1xf32>
    %115 = vector.broadcast %114 : vector<32x1xf32> to vector<32x32xf32>
    %116 = arith.cmpf oeq, %107, %115 : vector<32x32xf32>
    %cst_29 = arith.constant 3.200000e+01 : f32
    %117 = vector.broadcast %cst_29 : f32 to vector<32x32xf32>
    %118 = arith.select %116, %20, %117 : vector<32x32xi1>, vector<32x32xf32>
    %cst_30 = arith.constant dense<0x7F800000> : vector<32xf32>
    %119 = vector.multi_reduction <minimumf>, %118, %cst_30 [1] : vector<32x32xf32> to vector<32xf32>
    %120 = vector.shape_cast %119 : vector<32xf32> to vector<32x1xf32>
    %121 = arith.fptosi %120 : vector<32x1xf32> to vector<32x1xi32>
    %122 = vector.broadcast %121 : vector<32x1xi32> to vector<32x32xi32>
    %123 = arith.cmpi eq, %19, %122 : vector<32x32xi32>
    %cst_31 = arith.constant -3.000000e+38 : f32
    %124 = vector.broadcast %cst_31 : f32 to vector<32x32xf32>
    %125 = arith.select %123, %124, %107 : vector<32x32xi1>, vector<32x32xf32>
    %c5_i32 = arith.constant 5 : i32
    %126 = vector.broadcast %c5_i32 : i32 to vector<32x8xi32>
    %127 = arith.cmpi eq, %21, %126 : vector<32x8xi32>
    %128 = vector.shape_cast %121 : vector<32x1xi32> to vector<32x1xi32>
    %129 = vector.broadcast %128 : vector<32x1xi32> to vector<32x8xi32>
    %130 = arith.select %127, %129, %112 : vector<32x8xi1>, vector<32x8xi32>
    %cst_32 = arith.constant dense<0xFF800000> : vector<32xf32>
    %131 = vector.multi_reduction <maximumf>, %125, %cst_32 [1] : vector<32x32xf32> to vector<32xf32>
    %132 = vector.shape_cast %131 : vector<32xf32> to vector<32x1xf32>
    %133 = vector.broadcast %132 : vector<32x1xf32> to vector<32x32xf32>
    %134 = arith.cmpf oeq, %125, %133 : vector<32x32xf32>
    %cst_33 = arith.constant 3.200000e+01 : f32
    %135 = vector.broadcast %cst_33 : f32 to vector<32x32xf32>
    %136 = arith.select %134, %20, %135 : vector<32x32xi1>, vector<32x32xf32>
    %cst_34 = arith.constant dense<0x7F800000> : vector<32xf32>
    %137 = vector.multi_reduction <minimumf>, %136, %cst_34 [1] : vector<32x32xf32> to vector<32xf32>
    %138 = vector.shape_cast %137 : vector<32xf32> to vector<32x1xf32>
    %139 = arith.fptosi %138 : vector<32x1xf32> to vector<32x1xi32>
    %140 = vector.broadcast %139 : vector<32x1xi32> to vector<32x32xi32>
    %141 = arith.cmpi eq, %19, %140 : vector<32x32xi32>
    %cst_35 = arith.constant -3.000000e+38 : f32
    %142 = vector.broadcast %cst_35 : f32 to vector<32x32xf32>
    %143 = arith.select %141, %142, %125 : vector<32x32xi1>, vector<32x32xf32>
    %c6_i32 = arith.constant 6 : i32
    %144 = vector.broadcast %c6_i32 : i32 to vector<32x8xi32>
    %145 = arith.cmpi eq, %21, %144 : vector<32x8xi32>
    %146 = vector.shape_cast %139 : vector<32x1xi32> to vector<32x1xi32>
    %147 = vector.broadcast %146 : vector<32x1xi32> to vector<32x8xi32>
    %148 = arith.select %145, %147, %130 : vector<32x8xi1>, vector<32x8xi32>
    %cst_36 = arith.constant dense<0xFF800000> : vector<32xf32>
    %149 = vector.multi_reduction <maximumf>, %143, %cst_36 [1] : vector<32x32xf32> to vector<32xf32>
    %150 = vector.shape_cast %149 : vector<32xf32> to vector<32x1xf32>
    %151 = vector.broadcast %150 : vector<32x1xf32> to vector<32x32xf32>
    %152 = arith.cmpf oeq, %143, %151 : vector<32x32xf32>
    %cst_37 = arith.constant 3.200000e+01 : f32
    %153 = vector.broadcast %cst_37 : f32 to vector<32x32xf32>
    %154 = arith.select %152, %20, %153 : vector<32x32xi1>, vector<32x32xf32>
    %cst_38 = arith.constant dense<0x7F800000> : vector<32xf32>
    %155 = vector.multi_reduction <minimumf>, %154, %cst_38 [1] : vector<32x32xf32> to vector<32xf32>
    %156 = vector.shape_cast %155 : vector<32xf32> to vector<32x1xf32>
    %157 = arith.fptosi %156 : vector<32x1xf32> to vector<32x1xi32>
    %c7_i32 = arith.constant 7 : i32
    %158 = vector.broadcast %c7_i32 : i32 to vector<32x8xi32>
    %159 = arith.cmpi eq, %21, %158 : vector<32x8xi32>
    %160 = vector.shape_cast %157 : vector<32x1xi32> to vector<32x1xi32>
    %161 = vector.broadcast %160 : vector<32x1xi32> to vector<32x8xi32>
    %162 = arith.select %159, %161, %148 : vector<32x8xi1>, vector<32x8xi32>
    %c0_39 = arith.constant 0 : index
    %c0_40 = arith.constant 0 : index
    %c0_41 = arith.constant 0 : index
    %163 = vector.load %arg6[%c0_39, %c0_40, %c0_41] : memref<1x32x8xi32, #tpu.memory_space<vmem>>, vector<1x32x8xi32>
    %164 = vector.shape_cast %163 : vector<1x32x8xi32> to vector<32x8xi32>
    %165 = vector.shape_cast %162 : vector<32x8xi32> to vector<1x32x8xi32>
    tpu.vector_store %arg6[%c0_39, %c0_40, %c0_41], %165 {strides = array<i32>} : memref<1x32x8xi32, #tpu.memory_space<vmem>>, vector<1x32x8xi32>,
    %166 = arith.truncf %6 : vector<32x3xf32> to vector<32x3xbf16>
    %c0_42 = arith.constant 0 : index
    %c0_43 = arith.constant 0 : index
    %167 = vector.load %arg3[%c0_42, %c0_43] : memref<3x64xbf16, #tpu.memory_space<vmem>>, vector<3x64xbf16>
    %cst_44 = arith.constant dense<0.000000e+00> : vector<32x64xf32>
    %168 = tpu.matmul %166, %167, %cst_44 {dimension_numbers = #tpu.dot_dimension_numbers<[1], [0], [0], [1], [0, 0, 1, 1], [], []>} : vector<32x3xbf16>, vector<3x64xbf16>, vector<32x64xf32> -> vector<32x64xf32>
    %c0_45 = arith.constant 0 : index
    %c0_46 = arith.constant 0 : index
    %169 = vector.load %arg4[%c0_45, %c0_46] : memref<3x64xbf16, #tpu.memory_space<vmem>>, vector<3x64xbf16>
    %cst_47 = arith.constant dense<0.000000e+00> : vector<32x64xf32>
    %170 = tpu.matmul %166, %169, %cst_47 {dimension_numbers = #tpu.dot_dimension_numbers<[1], [0], [0], [1], [0, 0, 1, 1], [], []>} : vector<32x3xbf16>, vector<3x64xbf16>, vector<32x64xf32> -> vector<32x64xf32>
    %c0_48 = arith.constant 0 : index
    %c0_49 = arith.constant 0 : index
    %171 = vector.load %arg5[%c0_48, %c0_49] : memref<1x64xf32, #tpu.memory_space<vmem>>, vector<1x64xf32>
    %172 = vector.broadcast %171 : vector<1x64xf32> to vector<32x64xf32>
    %173 = arith.addf %170, %172 : vector<32x64xf32>
    %174 = arith.truncf %168 : vector<32x64xf32> to vector<32x64xbf16>
    %c0_50 = arith.constant 0 : index
    %c0_51 = arith.constant 0 : index
    %c0_52 = arith.constant 0 : index
    %175 = vector.load %arg7[%c0_50, %c0_51, %c0_52] : memref<1x32x64xbf16, #tpu.memory_space<vmem>>, vector<1x32x64xbf16>
    %176 = vector.shape_cast %175 : vector<1x32x64xbf16> to vector<32x64xbf16>
    %177 = vector.shape_cast %174 : vector<32x64xbf16> to vector<1x32x64xbf16>
    tpu.vector_store %arg7[%c0_50, %c0_51, %c0_52], %177 {strides = array<i32>} : memref<1x32x64xbf16, #tpu.memory_space<vmem>>, vector<1x32x64xbf16>,
    %178 = arith.truncf %173 : vector<32x64xf32> to vector<32x64xbf16>
    %c0_53 = arith.constant 0 : index
    %c0_54 = arith.constant 0 : index
    %c0_55 = arith.constant 0 : index
    %179 = vector.load %arg8[%c0_53, %c0_54, %c0_55] : memref<1x32x64xbf16, #tpu.memory_space<vmem>>, vector<1x32x64xbf16>
    %180 = vector.shape_cast %179 : vector<1x32x64xbf16> to vector<32x64xbf16>
    %181 = vector.shape_cast %178 : vector<32x64xbf16> to vector<1x32x64xbf16>
    tpu.vector_store %arg8[%c0_53, %c0_54, %c0_55], %181 {strides = array<i32>} : memref<1x32x64xbf16, #tpu.memory_space<vmem>>, vector<1x32x64xbf16>,
    return
  }
  func.func @transform_0(%arg0: i32, %arg1: i32) -> (i32, i32, i32) {
    %c0_i32 = arith.constant 0 : i32
    %c0_i32_0 = arith.constant 0 : i32
    %c0_i32_1 = arith.constant 0 : i32
    return %arg0, %c0_i32, %c0_i32_0 : i32, i32, i32
  }
  func.func @transform_1(%arg0: i32, %arg1: i32) -> (i32, i32) {
    %c0_i32 = arith.constant 0 : i32
    %c0_i32_0 = arith.constant 0 : i32
    %c0_i32_1 = arith.constant 0 : i32
    return %c0_i32, %c0_i32_0 : i32, i32
  }
  func.func @transform_2(%arg0: i32, %arg1: i32) -> (i32, i32) {
    %c0_i32 = arith.constant 0 : i32
    %c0_i32_0 = arith.constant 0 : i32
    %c0_i32_1 = arith.constant 0 : i32
    return %c0_i32, %c0_i32_0 : i32, i32
  }
  func.func @transform_3(%arg0: i32, %arg1: i32) -> (i32, i32) {
    %c0_i32 = arith.constant 0 : i32
    %c0_i32_0 = arith.constant 0 : i32
    %c0_i32_1 = arith.constant 0 : i32
    return %c0_i32, %c0_i32_0 : i32, i32
  }
  func.func @transform_4(%arg0: i32, %arg1: i32) -> (i32, i32, i32) {
    %c0_i32 = arith.constant 0 : i32
    %c0_i32_0 = arith.constant 0 : i32
    return %arg0, %arg1, %c0_i32 : i32, i32, i32
  }
  func.func @transform_5(%arg0: i32, %arg1: i32) -> (i32, i32, i32) {
    %c0_i32 = arith.constant 0 : i32
    %c0_i32_0 = arith.constant 0 : i32
    return %arg0, %arg1, %c0_i32 : i32, i32, i32
  }
  func.func @transform_6(%arg0: i32, %arg1: i32) -> (i32, i32, i32) {
    %c0_i32 = arith.constant 0 : i32
    %c0_i32_0 = arith.constant 0 : i32
    return %arg0, %arg1, %c0_i32 : i32, i32, i32
  }
}

module attributes {stable_mosaic.version = 11 : i64} {
  func.func @_edge_max_kernel(%arg0: i32, %arg1: i32, %arg2: memref<1x32x512xbf16, #tpu.memory_space<vmem>>, %arg3: memref<1x32x64xbf16, #tpu.memory_space<vmem>>, %arg4: memref<1x32x64xf32, #tpu.memory_space<vmem>>) attributes {dimension_semantics = [#tpu.dimension_semantics<parallel>, #tpu.dimension_semantics<parallel>], iteration_bounds = array<i64: 2, 1>, scalar_prefetch = 0 : i64, scratch_operands = 0 : i64, tpu.core_type = #tpu.core_type<tc>, window_params = [{transform_indices = @transform_0, window_bounds = array<i64: 1, 32, 512>}, {transform_indices = @transform_1, window_bounds = array<i64: 1, 32, 64>}, {transform_indices = @transform_2, window_bounds = array<i64: 1, 32, 64>}]} {
    %c0 = arith.constant 0 : index
    %c0_0 = arith.constant 0 : index
    %c0_1 = arith.constant 0 : index
    %0 = vector.load %arg2[%c0, %c0_0, %c0_1] : memref<1x32x512xbf16, #tpu.memory_space<vmem>>, vector<1x32x512xbf16>
    %1 = vector.shape_cast %0 : vector<1x32x512xbf16> to vector<32x512xbf16>
    %2 = vector.extract_strided_slice %1 {offsets = [0, 0], sizes = [32, 64], strides = [1, 1]} : vector<32x512xbf16> to vector<32x64xbf16>
    %3 = vector.extract_strided_slice %1 {offsets = [0, 64], sizes = [32, 64], strides = [1, 1]} : vector<32x512xbf16> to vector<32x64xbf16>
    %4 = arith.maximumf %2, %3 : vector<32x64xbf16>
    %5 = vector.extract_strided_slice %1 {offsets = [0, 128], sizes = [32, 64], strides = [1, 1]} : vector<32x512xbf16> to vector<32x64xbf16>
    %6 = arith.maximumf %4, %5 : vector<32x64xbf16>
    %7 = vector.extract_strided_slice %1 {offsets = [0, 192], sizes = [32, 64], strides = [1, 1]} : vector<32x512xbf16> to vector<32x64xbf16>
    %8 = arith.maximumf %6, %7 : vector<32x64xbf16>
    %9 = vector.extract_strided_slice %1 {offsets = [0, 256], sizes = [32, 64], strides = [1, 1]} : vector<32x512xbf16> to vector<32x64xbf16>
    %10 = arith.maximumf %8, %9 : vector<32x64xbf16>
    %11 = vector.extract_strided_slice %1 {offsets = [0, 320], sizes = [32, 64], strides = [1, 1]} : vector<32x512xbf16> to vector<32x64xbf16>
    %12 = arith.maximumf %10, %11 : vector<32x64xbf16>
    %13 = vector.extract_strided_slice %1 {offsets = [0, 384], sizes = [32, 64], strides = [1, 1]} : vector<32x512xbf16> to vector<32x64xbf16>
    %14 = arith.maximumf %12, %13 : vector<32x64xbf16>
    %15 = vector.extract_strided_slice %1 {offsets = [0, 448], sizes = [32, 64], strides = [1, 1]} : vector<32x512xbf16> to vector<32x64xbf16>
    %16 = arith.maximumf %14, %15 : vector<32x64xbf16>
    %17 = arith.extf %16 : vector<32x64xbf16> to vector<32x64xf32>
    %c0_2 = arith.constant 0 : index
    %c0_3 = arith.constant 0 : index
    %c0_4 = arith.constant 0 : index
    %18 = vector.load %arg3[%c0_2, %c0_3, %c0_4] : memref<1x32x64xbf16, #tpu.memory_space<vmem>>, vector<1x32x64xbf16>
    %19 = vector.shape_cast %18 : vector<1x32x64xbf16> to vector<32x64xbf16>
    %20 = arith.extf %19 : vector<32x64xbf16> to vector<32x64xf32>
    %21 = arith.addf %17, %20 : vector<32x64xf32>
    %cst = arith.constant 0.000000e+00 : f32
    %22 = vector.broadcast %cst : f32 to vector<32x64xf32>
    %23 = arith.cmpf ogt, %21, %22 : vector<32x64xf32>
    %cst_5 = arith.constant 2.000000e-01 : f32
    %24 = vector.broadcast %cst_5 : f32 to vector<32x64xf32>
    %25 = arith.mulf %24, %21 : vector<32x64xf32>
    %26 = arith.select %23, %21, %25 : vector<32x64xi1>, vector<32x64xf32>
    %c0_6 = arith.constant 0 : index
    %c0_7 = arith.constant 0 : index
    %c0_8 = arith.constant 0 : index
    %27 = vector.load %arg4[%c0_6, %c0_7, %c0_8] : memref<1x32x64xf32, #tpu.memory_space<vmem>>, vector<1x32x64xf32>
    %28 = vector.shape_cast %27 : vector<1x32x64xf32> to vector<32x64xf32>
    %29 = vector.shape_cast %26 : vector<32x64xf32> to vector<1x32x64xf32>
    tpu.vector_store %arg4[%c0_6, %c0_7, %c0_8], %29 {strides = array<i32>} : memref<1x32x64xf32, #tpu.memory_space<vmem>>, vector<1x32x64xf32>,
    return
  }
  func.func @transform_0(%arg0: i32, %arg1: i32) -> (i32, i32, i32) {
    %c0_i32 = arith.constant 0 : i32
    %c0_i32_0 = arith.constant 0 : i32
    return %arg0, %arg1, %c0_i32 : i32, i32, i32
  }
  func.func @transform_1(%arg0: i32, %arg1: i32) -> (i32, i32, i32) {
    %c0_i32 = arith.constant 0 : i32
    %c0_i32_0 = arith.constant 0 : i32
    return %arg0, %arg1, %c0_i32 : i32, i32, i32
  }
  func.func @transform_2(%arg0: i32, %arg1: i32) -> (i32, i32, i32) {
    %c0_i32 = arith.constant 0 : i32
    %c0_i32_0 = arith.constant 0 : i32
    return %arg0, %arg1, %c0_i32 : i32, i32, i32
  }
}

module attributes {stable_mosaic.version = 11 : i64} {
  func.func @_knn_gh_kernel(%arg0: i32, %arg1: i32, %arg2: memref<1x32x64xf32, #tpu.memory_space<vmem>>, %arg3: memref<64x64xbf16, #tpu.memory_space<vmem>>, %arg4: memref<64x64xbf16, #tpu.memory_space<vmem>>, %arg5: memref<1x64xf32, #tpu.memory_space<vmem>>, %arg6: memref<1x32x8xi32, #tpu.memory_space<vmem>>, %arg7: memref<1x32x64xbf16, #tpu.memory_space<vmem>>, %arg8: memref<1x32x64xbf16, #tpu.memory_space<vmem>>) attributes {dimension_semantics = [#tpu.dimension_semantics<parallel>, #tpu.dimension_semantics<parallel>], iteration_bounds = array<i64: 2, 1>, scalar_prefetch = 0 : i64, scratch_operands = 0 : i64, tpu.core_type = #tpu.core_type<tc>, window_params = [{transform_indices = @transform_0, window_bounds = array<i64: 1, 32, 64>}, {pipeline_mode = #tpu.pipeline_mode<synchronous>, transform_indices = @transform_1, window_bounds = array<i64: 64, 64>}, {pipeline_mode = #tpu.pipeline_mode<synchronous>, transform_indices = @transform_2, window_bounds = array<i64: 64, 64>}, {pipeline_mode = #tpu.pipeline_mode<synchronous>, transform_indices = @transform_3, window_bounds = array<i64: 1, 64>}, {transform_indices = @transform_4, window_bounds = array<i64: 1, 32, 8>}, {transform_indices = @transform_5, window_bounds = array<i64: 1, 32, 64>}, {transform_indices = @transform_6, window_bounds = array<i64: 1, 32, 64>}]} {
    %c32_i32 = arith.constant 32 : i32
    %0 = arith.muli %arg1, %c32_i32 : i32
    %1 = tpu.assume_multiple %0, 32 : i32
    %c0 = arith.constant 0 : index
    %c0_0 = arith.constant 0 : index
    %c0_1 = arith.constant 0 : index
    %2 = vector.load %arg2[%c0, %c0_0, %c0_1] : memref<1x32x64xf32, #tpu.memory_space<vmem>>, vector<1x32x64xf32>
    %3 = vector.shape_cast %2 : vector<1x32x64xf32> to vector<32x64xf32>
    %c0_2 = arith.constant 0 : index
    %4 = arith.index_cast %1 : i32 to index
    %c0_3 = arith.constant 0 : index
    %5 = vector.load %arg2[%c0_2, %4, %c0_3] : memref<1x32x64xf32, #tpu.memory_space<vmem>>, vector<1x32x64xf32>
    %6 = vector.shape_cast %5 : vector<1x32x64xf32> to vector<32x64xf32>
    %7 = arith.addf %6, %6 : vector<32x64xf32>
    %cst = arith.constant dense<0.000000e+00> : vector<32x32xf32>
    %8 = tpu.matmul %7, %3, %cst {dimension_numbers = #tpu.dot_dimension_numbers<[1], [1], [0], [0], [0, 0, 1, 0], [], []>} : vector<32x64xf32>, vector<32x64xf32>, vector<32x32xf32> -> vector<32x32xf32>
    %9 = arith.mulf %6, %6 : vector<32x64xf32>
    %cst_4 = arith.constant dense<0.000000e+00> : vector<32xf32>
    %10 = vector.multi_reduction <add>, %9, %cst_4 [1] : vector<32x64xf32> to vector<32xf32>
    %11 = vector.shape_cast %10 : vector<32xf32> to vector<32x1xf32>
    %cst_5 = arith.constant 1.000000e+00 : f32
    %12 = vector.broadcast %cst_5 : f32 to vector<1x64xf32>
    %13 = arith.mulf %3, %3 : vector<32x64xf32>
    %cst_6 = arith.constant dense<0.000000e+00> : vector<1x32xf32>
    %14 = tpu.matmul %12, %13, %cst_6 {dimension_numbers = #tpu.dot_dimension_numbers<[1], [1], [0], [0], [0, 0, 1, 0], [], []>} : vector<1x64xf32>, vector<32x64xf32>, vector<1x32xf32> -> vector<1x32xf32>
    %15 = vector.broadcast %11 : vector<32x1xf32> to vector<32x32xf32>
    %16 = arith.subf %8, %15 : vector<32x32xf32>
    %17 = vector.broadcast %14 : vector<1x32xf32> to vector<32x32xf32>
    %18 = arith.subf %16, %17 : vector<32x32xf32>
    %19 = tpu.iota {dimensions = array<i32: 1>} : vector<32x32xi32>
    %20 = arith.sitofp %19 : vector<32x32xi32> to vector<32x32xf32>
    %21 = tpu.iota {dimensions = array<i32: 1>} : vector<32x8xi32>
    %c0_i32 = arith.constant 0 : i32
    %22 = vector.broadcast %c0_i32 : i32 to vector<32x8xi32>
    %cst_7 = arith.constant dense<0xFF800000> : vector<32xf32>
    %23 = vector.multi_reduction <maximumf>, %18, %cst_7 [1] : vector<32x32xf32> to vector<32xf32>
    %24 = vector.shape_cast %23 : vector<32xf32> to vector<32x1xf32>
    %25 = vector.broadcast %24 : vector<32x1xf32> to vector<32x32xf32>
    %26 = arith.cmpf oeq, %18, %25 : vector<32x32xf32>
    %cst_8 = arith.constant 3.200000e+01 : f32
    %27 = vector.broadcast %cst_8 : f32 to vector<32x32xf32>
    %28 = arith.select %26, %20, %27 : vector<32x32xi1>, vector<32x32xf32>
    %cst_9 = arith.constant dense<0x7F800000> : vector<32xf32>
    %29 = vector.multi_reduction <minimumf>, %28, %cst_9 [1] : vector<32x32xf32> to vector<32xf32>
    %30 = vector.shape_cast %29 : vector<32xf32> to vector<32x1xf32>
    %31 = arith.fptosi %30 : vector<32x1xf32> to vector<32x1xi32>
    %32 = vector.broadcast %31 : vector<32x1xi32> to vector<32x32xi32>
    %33 = arith.cmpi eq, %19, %32 : vector<32x32xi32>
    %cst_10 = arith.constant -3.000000e+38 : f32
    %34 = vector.broadcast %cst_10 : f32 to vector<32x32xf32>
    %35 = arith.select %33, %34, %18 : vector<32x32xi1>, vector<32x32xf32>
    %c0_i32_11 = arith.constant 0 : i32
    %36 = vector.broadcast %c0_i32_11 : i32 to vector<32x8xi32>
    %37 = arith.cmpi eq, %21, %36 : vector<32x8xi32>
    %38 = vector.shape_cast %31 : vector<32x1xi32> to vector<32x1xi32>
    %39 = vector.broadcast %38 : vector<32x1xi32> to vector<32x8xi32>
    %40 = arith.select %37, %39, %22 : vector<32x8xi1>, vector<32x8xi32>
    %cst_12 = arith.constant dense<0xFF800000> : vector<32xf32>
    %41 = vector.multi_reduction <maximumf>, %35, %cst_12 [1] : vector<32x32xf32> to vector<32xf32>
    %42 = vector.shape_cast %41 : vector<32xf32> to vector<32x1xf32>
    %43 = vector.broadcast %42 : vector<32x1xf32> to vector<32x32xf32>
    %44 = arith.cmpf oeq, %35, %43 : vector<32x32xf32>
    %cst_13 = arith.constant 3.200000e+01 : f32
    %45 = vector.broadcast %cst_13 : f32 to vector<32x32xf32>
    %46 = arith.select %44, %20, %45 : vector<32x32xi1>, vector<32x32xf32>
    %cst_14 = arith.constant dense<0x7F800000> : vector<32xf32>
    %47 = vector.multi_reduction <minimumf>, %46, %cst_14 [1] : vector<32x32xf32> to vector<32xf32>
    %48 = vector.shape_cast %47 : vector<32xf32> to vector<32x1xf32>
    %49 = arith.fptosi %48 : vector<32x1xf32> to vector<32x1xi32>
    %50 = vector.broadcast %49 : vector<32x1xi32> to vector<32x32xi32>
    %51 = arith.cmpi eq, %19, %50 : vector<32x32xi32>
    %cst_15 = arith.constant -3.000000e+38 : f32
    %52 = vector.broadcast %cst_15 : f32 to vector<32x32xf32>
    %53 = arith.select %51, %52, %35 : vector<32x32xi1>, vector<32x32xf32>
    %c1_i32 = arith.constant 1 : i32
    %54 = vector.broadcast %c1_i32 : i32 to vector<32x8xi32>
    %55 = arith.cmpi eq, %21, %54 : vector<32x8xi32>
    %56 = vector.shape_cast %49 : vector<32x1xi32> to vector<32x1xi32>
    %57 = vector.broadcast %56 : vector<32x1xi32> to vector<32x8xi32>
    %58 = arith.select %55, %57, %40 : vector<32x8xi1>, vector<32x8xi32>
    %cst_16 = arith.constant dense<0xFF800000> : vector<32xf32>
    %59 = vector.multi_reduction <maximumf>, %53, %cst_16 [1] : vector<32x32xf32> to vector<32xf32>
    %60 = vector.shape_cast %59 : vector<32xf32> to vector<32x1xf32>
    %61 = vector.broadcast %60 : vector<32x1xf32> to vector<32x32xf32>
    %62 = arith.cmpf oeq, %53, %61 : vector<32x32xf32>
    %cst_17 = arith.constant 3.200000e+01 : f32
    %63 = vector.broadcast %cst_17 : f32 to vector<32x32xf32>
    %64 = arith.select %62, %20, %63 : vector<32x32xi1>, vector<32x32xf32>
    %cst_18 = arith.constant dense<0x7F800000> : vector<32xf32>
    %65 = vector.multi_reduction <minimumf>, %64, %cst_18 [1] : vector<32x32xf32> to vector<32xf32>
    %66 = vector.shape_cast %65 : vector<32xf32> to vector<32x1xf32>
    %67 = arith.fptosi %66 : vector<32x1xf32> to vector<32x1xi32>
    %68 = vector.broadcast %67 : vector<32x1xi32> to vector<32x32xi32>
    %69 = arith.cmpi eq, %19, %68 : vector<32x32xi32>
    %cst_19 = arith.constant -3.000000e+38 : f32
    %70 = vector.broadcast %cst_19 : f32 to vector<32x32xf32>
    %71 = arith.select %69, %70, %53 : vector<32x32xi1>, vector<32x32xf32>
    %c2_i32 = arith.constant 2 : i32
    %72 = vector.broadcast %c2_i32 : i32 to vector<32x8xi32>
    %73 = arith.cmpi eq, %21, %72 : vector<32x8xi32>
    %74 = vector.shape_cast %67 : vector<32x1xi32> to vector<32x1xi32>
    %75 = vector.broadcast %74 : vector<32x1xi32> to vector<32x8xi32>
    %76 = arith.select %73, %75, %58 : vector<32x8xi1>, vector<32x8xi32>
    %cst_20 = arith.constant dense<0xFF800000> : vector<32xf32>
    %77 = vector.multi_reduction <maximumf>, %71, %cst_20 [1] : vector<32x32xf32> to vector<32xf32>
    %78 = vector.shape_cast %77 : vector<32xf32> to vector<32x1xf32>
    %79 = vector.broadcast %78 : vector<32x1xf32> to vector<32x32xf32>
    %80 = arith.cmpf oeq, %71, %79 : vector<32x32xf32>
    %cst_21 = arith.constant 3.200000e+01 : f32
    %81 = vector.broadcast %cst_21 : f32 to vector<32x32xf32>
    %82 = arith.select %80, %20, %81 : vector<32x32xi1>, vector<32x32xf32>
    %cst_22 = arith.constant dense<0x7F800000> : vector<32xf32>
    %83 = vector.multi_reduction <minimumf>, %82, %cst_22 [1] : vector<32x32xf32> to vector<32xf32>
    %84 = vector.shape_cast %83 : vector<32xf32> to vector<32x1xf32>
    %85 = arith.fptosi %84 : vector<32x1xf32> to vector<32x1xi32>
    %86 = vector.broadcast %85 : vector<32x1xi32> to vector<32x32xi32>
    %87 = arith.cmpi eq, %19, %86 : vector<32x32xi32>
    %cst_23 = arith.constant -3.000000e+38 : f32
    %88 = vector.broadcast %cst_23 : f32 to vector<32x32xf32>
    %89 = arith.select %87, %88, %71 : vector<32x32xi1>, vector<32x32xf32>
    %c3_i32 = arith.constant 3 : i32
    %90 = vector.broadcast %c3_i32 : i32 to vector<32x8xi32>
    %91 = arith.cmpi eq, %21, %90 : vector<32x8xi32>
    %92 = vector.shape_cast %85 : vector<32x1xi32> to vector<32x1xi32>
    %93 = vector.broadcast %92 : vector<32x1xi32> to vector<32x8xi32>
    %94 = arith.select %91, %93, %76 : vector<32x8xi1>, vector<32x8xi32>
    %cst_24 = arith.constant dense<0xFF800000> : vector<32xf32>
    %95 = vector.multi_reduction <maximumf>, %89, %cst_24 [1] : vector<32x32xf32> to vector<32xf32>
    %96 = vector.shape_cast %95 : vector<32xf32> to vector<32x1xf32>
    %97 = vector.broadcast %96 : vector<32x1xf32> to vector<32x32xf32>
    %98 = arith.cmpf oeq, %89, %97 : vector<32x32xf32>
    %cst_25 = arith.constant 3.200000e+01 : f32
    %99 = vector.broadcast %cst_25 : f32 to vector<32x32xf32>
    %100 = arith.select %98, %20, %99 : vector<32x32xi1>, vector<32x32xf32>
    %cst_26 = arith.constant dense<0x7F800000> : vector<32xf32>
    %101 = vector.multi_reduction <minimumf>, %100, %cst_26 [1] : vector<32x32xf32> to vector<32xf32>
    %102 = vector.shape_cast %101 : vector<32xf32> to vector<32x1xf32>
    %103 = arith.fptosi %102 : vector<32x1xf32> to vector<32x1xi32>
    %104 = vector.broadcast %103 : vector<32x1xi32> to vector<32x32xi32>
    %105 = arith.cmpi eq, %19, %104 : vector<32x32xi32>
    %cst_27 = arith.constant -3.000000e+38 : f32
    %106 = vector.broadcast %cst_27 : f32 to vector<32x32xf32>
    %107 = arith.select %105, %106, %89 : vector<32x32xi1>, vector<32x32xf32>
    %c4_i32 = arith.constant 4 : i32
    %108 = vector.broadcast %c4_i32 : i32 to vector<32x8xi32>
    %109 = arith.cmpi eq, %21, %108 : vector<32x8xi32>
    %110 = vector.shape_cast %103 : vector<32x1xi32> to vector<32x1xi32>
    %111 = vector.broadcast %110 : vector<32x1xi32> to vector<32x8xi32>
    %112 = arith.select %109, %111, %94 : vector<32x8xi1>, vector<32x8xi32>
    %cst_28 = arith.constant dense<0xFF800000> : vector<32xf32>
    %113 = vector.multi_reduction <maximumf>, %107, %cst_28 [1] : vector<32x32xf32> to vector<32xf32>
    %114 = vector.shape_cast %113 : vector<32xf32> to vector<32x1xf32>
    %115 = vector.broadcast %114 : vector<32x1xf32> to vector<32x32xf32>
    %116 = arith.cmpf oeq, %107, %115 : vector<32x32xf32>
    %cst_29 = arith.constant 3.200000e+01 : f32
    %117 = vector.broadcast %cst_29 : f32 to vector<32x32xf32>
    %118 = arith.select %116, %20, %117 : vector<32x32xi1>, vector<32x32xf32>
    %cst_30 = arith.constant dense<0x7F800000> : vector<32xf32>
    %119 = vector.multi_reduction <minimumf>, %118, %cst_30 [1] : vector<32x32xf32> to vector<32xf32>
    %120 = vector.shape_cast %119 : vector<32xf32> to vector<32x1xf32>
    %121 = arith.fptosi %120 : vector<32x1xf32> to vector<32x1xi32>
    %122 = vector.broadcast %121 : vector<32x1xi32> to vector<32x32xi32>
    %123 = arith.cmpi eq, %19, %122 : vector<32x32xi32>
    %cst_31 = arith.constant -3.000000e+38 : f32
    %124 = vector.broadcast %cst_31 : f32 to vector<32x32xf32>
    %125 = arith.select %123, %124, %107 : vector<32x32xi1>, vector<32x32xf32>
    %c5_i32 = arith.constant 5 : i32
    %126 = vector.broadcast %c5_i32 : i32 to vector<32x8xi32>
    %127 = arith.cmpi eq, %21, %126 : vector<32x8xi32>
    %128 = vector.shape_cast %121 : vector<32x1xi32> to vector<32x1xi32>
    %129 = vector.broadcast %128 : vector<32x1xi32> to vector<32x8xi32>
    %130 = arith.select %127, %129, %112 : vector<32x8xi1>, vector<32x8xi32>
    %cst_32 = arith.constant dense<0xFF800000> : vector<32xf32>
    %131 = vector.multi_reduction <maximumf>, %125, %cst_32 [1] : vector<32x32xf32> to vector<32xf32>
    %132 = vector.shape_cast %131 : vector<32xf32> to vector<32x1xf32>
    %133 = vector.broadcast %132 : vector<32x1xf32> to vector<32x32xf32>
    %134 = arith.cmpf oeq, %125, %133 : vector<32x32xf32>
    %cst_33 = arith.constant 3.200000e+01 : f32
    %135 = vector.broadcast %cst_33 : f32 to vector<32x32xf32>
    %136 = arith.select %134, %20, %135 : vector<32x32xi1>, vector<32x32xf32>
    %cst_34 = arith.constant dense<0x7F800000> : vector<32xf32>
    %137 = vector.multi_reduction <minimumf>, %136, %cst_34 [1] : vector<32x32xf32> to vector<32xf32>
    %138 = vector.shape_cast %137 : vector<32xf32> to vector<32x1xf32>
    %139 = arith.fptosi %138 : vector<32x1xf32> to vector<32x1xi32>
    %140 = vector.broadcast %139 : vector<32x1xi32> to vector<32x32xi32>
    %141 = arith.cmpi eq, %19, %140 : vector<32x32xi32>
    %cst_35 = arith.constant -3.000000e+38 : f32
    %142 = vector.broadcast %cst_35 : f32 to vector<32x32xf32>
    %143 = arith.select %141, %142, %125 : vector<32x32xi1>, vector<32x32xf32>
    %c6_i32 = arith.constant 6 : i32
    %144 = vector.broadcast %c6_i32 : i32 to vector<32x8xi32>
    %145 = arith.cmpi eq, %21, %144 : vector<32x8xi32>
    %146 = vector.shape_cast %139 : vector<32x1xi32> to vector<32x1xi32>
    %147 = vector.broadcast %146 : vector<32x1xi32> to vector<32x8xi32>
    %148 = arith.select %145, %147, %130 : vector<32x8xi1>, vector<32x8xi32>
    %cst_36 = arith.constant dense<0xFF800000> : vector<32xf32>
    %149 = vector.multi_reduction <maximumf>, %143, %cst_36 [1] : vector<32x32xf32> to vector<32xf32>
    %150 = vector.shape_cast %149 : vector<32xf32> to vector<32x1xf32>
    %151 = vector.broadcast %150 : vector<32x1xf32> to vector<32x32xf32>
    %152 = arith.cmpf oeq, %143, %151 : vector<32x32xf32>
    %cst_37 = arith.constant 3.200000e+01 : f32
    %153 = vector.broadcast %cst_37 : f32 to vector<32x32xf32>
    %154 = arith.select %152, %20, %153 : vector<32x32xi1>, vector<32x32xf32>
    %cst_38 = arith.constant dense<0x7F800000> : vector<32xf32>
    %155 = vector.multi_reduction <minimumf>, %154, %cst_38 [1] : vector<32x32xf32> to vector<32xf32>
    %156 = vector.shape_cast %155 : vector<32xf32> to vector<32x1xf32>
    %157 = arith.fptosi %156 : vector<32x1xf32> to vector<32x1xi32>
    %c7_i32 = arith.constant 7 : i32
    %158 = vector.broadcast %c7_i32 : i32 to vector<32x8xi32>
    %159 = arith.cmpi eq, %21, %158 : vector<32x8xi32>
    %160 = vector.shape_cast %157 : vector<32x1xi32> to vector<32x1xi32>
    %161 = vector.broadcast %160 : vector<32x1xi32> to vector<32x8xi32>
    %162 = arith.select %159, %161, %148 : vector<32x8xi1>, vector<32x8xi32>
    %c0_39 = arith.constant 0 : index
    %c0_40 = arith.constant 0 : index
    %c0_41 = arith.constant 0 : index
    %163 = vector.load %arg6[%c0_39, %c0_40, %c0_41] : memref<1x32x8xi32, #tpu.memory_space<vmem>>, vector<1x32x8xi32>
    %164 = vector.shape_cast %163 : vector<1x32x8xi32> to vector<32x8xi32>
    %165 = vector.shape_cast %162 : vector<32x8xi32> to vector<1x32x8xi32>
    tpu.vector_store %arg6[%c0_39, %c0_40, %c0_41], %165 {strides = array<i32>} : memref<1x32x8xi32, #tpu.memory_space<vmem>>, vector<1x32x8xi32>,
    %166 = arith.truncf %6 : vector<32x64xf32> to vector<32x64xbf16>
    %c0_42 = arith.constant 0 : index
    %c0_43 = arith.constant 0 : index
    %167 = vector.load %arg3[%c0_42, %c0_43] : memref<64x64xbf16, #tpu.memory_space<vmem>>, vector<64x64xbf16>
    %cst_44 = arith.constant dense<0.000000e+00> : vector<32x64xf32>
    %168 = tpu.matmul %166, %167, %cst_44 {dimension_numbers = #tpu.dot_dimension_numbers<[1], [0], [0], [1], [0, 0, 1, 1], [], []>} : vector<32x64xbf16>, vector<64x64xbf16>, vector<32x64xf32> -> vector<32x64xf32>
    %c0_45 = arith.constant 0 : index
    %c0_46 = arith.constant 0 : index
    %169 = vector.load %arg4[%c0_45, %c0_46] : memref<64x64xbf16, #tpu.memory_space<vmem>>, vector<64x64xbf16>
    %cst_47 = arith.constant dense<0.000000e+00> : vector<32x64xf32>
    %170 = tpu.matmul %166, %169, %cst_47 {dimension_numbers = #tpu.dot_dimension_numbers<[1], [0], [0], [1], [0, 0, 1, 1], [], []>} : vector<32x64xbf16>, vector<64x64xbf16>, vector<32x64xf32> -> vector<32x64xf32>
    %c0_48 = arith.constant 0 : index
    %c0_49 = arith.constant 0 : index
    %171 = vector.load %arg5[%c0_48, %c0_49] : memref<1x64xf32, #tpu.memory_space<vmem>>, vector<1x64xf32>
    %172 = vector.broadcast %171 : vector<1x64xf32> to vector<32x64xf32>
    %173 = arith.addf %170, %172 : vector<32x64xf32>
    %174 = arith.truncf %168 : vector<32x64xf32> to vector<32x64xbf16>
    %c0_50 = arith.constant 0 : index
    %c0_51 = arith.constant 0 : index
    %c0_52 = arith.constant 0 : index
    %175 = vector.load %arg7[%c0_50, %c0_51, %c0_52] : memref<1x32x64xbf16, #tpu.memory_space<vmem>>, vector<1x32x64xbf16>
    %176 = vector.shape_cast %175 : vector<1x32x64xbf16> to vector<32x64xbf16>
    %177 = vector.shape_cast %174 : vector<32x64xbf16> to vector<1x32x64xbf16>
    tpu.vector_store %arg7[%c0_50, %c0_51, %c0_52], %177 {strides = array<i32>} : memref<1x32x64xbf16, #tpu.memory_space<vmem>>, vector<1x32x64xbf16>,
    %178 = arith.truncf %173 : vector<32x64xf32> to vector<32x64xbf16>
    %c0_53 = arith.constant 0 : index
    %c0_54 = arith.constant 0 : index
    %c0_55 = arith.constant 0 : index
    %179 = vector.load %arg8[%c0_53, %c0_54, %c0_55] : memref<1x32x64xbf16, #tpu.memory_space<vmem>>, vector<1x32x64xbf16>
    %180 = vector.shape_cast %179 : vector<1x32x64xbf16> to vector<32x64xbf16>
    %181 = vector.shape_cast %178 : vector<32x64xbf16> to vector<1x32x64xbf16>
    tpu.vector_store %arg8[%c0_53, %c0_54, %c0_55], %181 {strides = array<i32>} : memref<1x32x64xbf16, #tpu.memory_space<vmem>>, vector<1x32x64xbf16>,
    return
  }
  func.func @transform_0(%arg0: i32, %arg1: i32) -> (i32, i32, i32) {
    %c0_i32 = arith.constant 0 : i32
    %c0_i32_0 = arith.constant 0 : i32
    %c0_i32_1 = arith.constant 0 : i32
    return %arg0, %c0_i32, %c0_i32_0 : i32, i32, i32
  }
  func.func @transform_1(%arg0: i32, %arg1: i32) -> (i32, i32) {
    %c0_i32 = arith.constant 0 : i32
    %c0_i32_0 = arith.constant 0 : i32
    %c0_i32_1 = arith.constant 0 : i32
    return %c0_i32, %c0_i32_0 : i32, i32
  }
  func.func @transform_2(%arg0: i32, %arg1: i32) -> (i32, i32) {
    %c0_i32 = arith.constant 0 : i32
    %c0_i32_0 = arith.constant 0 : i32
    %c0_i32_1 = arith.constant 0 : i32
    return %c0_i32, %c0_i32_0 : i32, i32
  }
  func.func @transform_3(%arg0: i32, %arg1: i32) -> (i32, i32) {
    %c0_i32 = arith.constant 0 : i32
    %c0_i32_0 = arith.constant 0 : i32
    %c0_i32_1 = arith.constant 0 : i32
    return %c0_i32, %c0_i32_0 : i32, i32
  }
  func.func @transform_4(%arg0: i32, %arg1: i32) -> (i32, i32, i32) {
    %c0_i32 = arith.constant 0 : i32
    %c0_i32_0 = arith.constant 0 : i32
    return %arg0, %arg1, %c0_i32 : i32, i32, i32
  }
  func.func @transform_5(%arg0: i32, %arg1: i32) -> (i32, i32, i32) {
    %c0_i32 = arith.constant 0 : i32
    %c0_i32_0 = arith.constant 0 : i32
    return %arg0, %arg1, %c0_i32 : i32, i32, i32
  }
  func.func @transform_6(%arg0: i32, %arg1: i32) -> (i32, i32, i32) {
    %c0_i32 = arith.constant 0 : i32
    %c0_i32_0 = arith.constant 0 : i32
    return %arg0, %arg1, %c0_i32 : i32, i32, i32
  }
}

module attributes {stable_mosaic.version = 11 : i64} {
  func.func @_knn_gh_kernel(%arg0: i32, %arg1: i32, %arg2: memref<1x32x64xf32, #tpu.memory_space<vmem>>, %arg3: memref<64x128xbf16, #tpu.memory_space<vmem>>, %arg4: memref<64x128xbf16, #tpu.memory_space<vmem>>, %arg5: memref<1x128xf32, #tpu.memory_space<vmem>>, %arg6: memref<1x32x8xi32, #tpu.memory_space<vmem>>, %arg7: memref<1x32x128xbf16, #tpu.memory_space<vmem>>, %arg8: memref<1x32x128xbf16, #tpu.memory_space<vmem>>) attributes {dimension_semantics = [#tpu.dimension_semantics<parallel>, #tpu.dimension_semantics<parallel>], iteration_bounds = array<i64: 2, 1>, scalar_prefetch = 0 : i64, scratch_operands = 0 : i64, tpu.core_type = #tpu.core_type<tc>, window_params = [{transform_indices = @transform_0, window_bounds = array<i64: 1, 32, 64>}, {pipeline_mode = #tpu.pipeline_mode<synchronous>, transform_indices = @transform_1, window_bounds = array<i64: 64, 128>}, {pipeline_mode = #tpu.pipeline_mode<synchronous>, transform_indices = @transform_2, window_bounds = array<i64: 64, 128>}, {pipeline_mode = #tpu.pipeline_mode<synchronous>, transform_indices = @transform_3, window_bounds = array<i64: 1, 128>}, {transform_indices = @transform_4, window_bounds = array<i64: 1, 32, 8>}, {transform_indices = @transform_5, window_bounds = array<i64: 1, 32, 128>}, {transform_indices = @transform_6, window_bounds = array<i64: 1, 32, 128>}]} {
    %c32_i32 = arith.constant 32 : i32
    %0 = arith.muli %arg1, %c32_i32 : i32
    %1 = tpu.assume_multiple %0, 32 : i32
    %c0 = arith.constant 0 : index
    %c0_0 = arith.constant 0 : index
    %c0_1 = arith.constant 0 : index
    %2 = vector.load %arg2[%c0, %c0_0, %c0_1] : memref<1x32x64xf32, #tpu.memory_space<vmem>>, vector<1x32x64xf32>
    %3 = vector.shape_cast %2 : vector<1x32x64xf32> to vector<32x64xf32>
    %c0_2 = arith.constant 0 : index
    %4 = arith.index_cast %1 : i32 to index
    %c0_3 = arith.constant 0 : index
    %5 = vector.load %arg2[%c0_2, %4, %c0_3] : memref<1x32x64xf32, #tpu.memory_space<vmem>>, vector<1x32x64xf32>
    %6 = vector.shape_cast %5 : vector<1x32x64xf32> to vector<32x64xf32>
    %7 = arith.addf %6, %6 : vector<32x64xf32>
    %cst = arith.constant dense<0.000000e+00> : vector<32x32xf32>
    %8 = tpu.matmul %7, %3, %cst {dimension_numbers = #tpu.dot_dimension_numbers<[1], [1], [0], [0], [0, 0, 1, 0], [], []>} : vector<32x64xf32>, vector<32x64xf32>, vector<32x32xf32> -> vector<32x32xf32>
    %9 = arith.mulf %6, %6 : vector<32x64xf32>
    %cst_4 = arith.constant dense<0.000000e+00> : vector<32xf32>
    %10 = vector.multi_reduction <add>, %9, %cst_4 [1] : vector<32x64xf32> to vector<32xf32>
    %11 = vector.shape_cast %10 : vector<32xf32> to vector<32x1xf32>
    %cst_5 = arith.constant 1.000000e+00 : f32
    %12 = vector.broadcast %cst_5 : f32 to vector<1x64xf32>
    %13 = arith.mulf %3, %3 : vector<32x64xf32>
    %cst_6 = arith.constant dense<0.000000e+00> : vector<1x32xf32>
    %14 = tpu.matmul %12, %13, %cst_6 {dimension_numbers = #tpu.dot_dimension_numbers<[1], [1], [0], [0], [0, 0, 1, 0], [], []>} : vector<1x64xf32>, vector<32x64xf32>, vector<1x32xf32> -> vector<1x32xf32>
    %15 = vector.broadcast %11 : vector<32x1xf32> to vector<32x32xf32>
    %16 = arith.subf %8, %15 : vector<32x32xf32>
    %17 = vector.broadcast %14 : vector<1x32xf32> to vector<32x32xf32>
    %18 = arith.subf %16, %17 : vector<32x32xf32>
    %19 = tpu.iota {dimensions = array<i32: 1>} : vector<32x32xi32>
    %20 = arith.sitofp %19 : vector<32x32xi32> to vector<32x32xf32>
    %21 = tpu.iota {dimensions = array<i32: 1>} : vector<32x8xi32>
    %c0_i32 = arith.constant 0 : i32
    %22 = vector.broadcast %c0_i32 : i32 to vector<32x8xi32>
    %cst_7 = arith.constant dense<0xFF800000> : vector<32xf32>
    %23 = vector.multi_reduction <maximumf>, %18, %cst_7 [1] : vector<32x32xf32> to vector<32xf32>
    %24 = vector.shape_cast %23 : vector<32xf32> to vector<32x1xf32>
    %25 = vector.broadcast %24 : vector<32x1xf32> to vector<32x32xf32>
    %26 = arith.cmpf oeq, %18, %25 : vector<32x32xf32>
    %cst_8 = arith.constant 3.200000e+01 : f32
    %27 = vector.broadcast %cst_8 : f32 to vector<32x32xf32>
    %28 = arith.select %26, %20, %27 : vector<32x32xi1>, vector<32x32xf32>
    %cst_9 = arith.constant dense<0x7F800000> : vector<32xf32>
    %29 = vector.multi_reduction <minimumf>, %28, %cst_9 [1] : vector<32x32xf32> to vector<32xf32>
    %30 = vector.shape_cast %29 : vector<32xf32> to vector<32x1xf32>
    %31 = arith.fptosi %30 : vector<32x1xf32> to vector<32x1xi32>
    %32 = vector.broadcast %31 : vector<32x1xi32> to vector<32x32xi32>
    %33 = arith.cmpi eq, %19, %32 : vector<32x32xi32>
    %cst_10 = arith.constant -3.000000e+38 : f32
    %34 = vector.broadcast %cst_10 : f32 to vector<32x32xf32>
    %35 = arith.select %33, %34, %18 : vector<32x32xi1>, vector<32x32xf32>
    %c0_i32_11 = arith.constant 0 : i32
    %36 = vector.broadcast %c0_i32_11 : i32 to vector<32x8xi32>
    %37 = arith.cmpi eq, %21, %36 : vector<32x8xi32>
    %38 = vector.shape_cast %31 : vector<32x1xi32> to vector<32x1xi32>
    %39 = vector.broadcast %38 : vector<32x1xi32> to vector<32x8xi32>
    %40 = arith.select %37, %39, %22 : vector<32x8xi1>, vector<32x8xi32>
    %cst_12 = arith.constant dense<0xFF800000> : vector<32xf32>
    %41 = vector.multi_reduction <maximumf>, %35, %cst_12 [1] : vector<32x32xf32> to vector<32xf32>
    %42 = vector.shape_cast %41 : vector<32xf32> to vector<32x1xf32>
    %43 = vector.broadcast %42 : vector<32x1xf32> to vector<32x32xf32>
    %44 = arith.cmpf oeq, %35, %43 : vector<32x32xf32>
    %cst_13 = arith.constant 3.200000e+01 : f32
    %45 = vector.broadcast %cst_13 : f32 to vector<32x32xf32>
    %46 = arith.select %44, %20, %45 : vector<32x32xi1>, vector<32x32xf32>
    %cst_14 = arith.constant dense<0x7F800000> : vector<32xf32>
    %47 = vector.multi_reduction <minimumf>, %46, %cst_14 [1] : vector<32x32xf32> to vector<32xf32>
    %48 = vector.shape_cast %47 : vector<32xf32> to vector<32x1xf32>
    %49 = arith.fptosi %48 : vector<32x1xf32> to vector<32x1xi32>
    %50 = vector.broadcast %49 : vector<32x1xi32> to vector<32x32xi32>
    %51 = arith.cmpi eq, %19, %50 : vector<32x32xi32>
    %cst_15 = arith.constant -3.000000e+38 : f32
    %52 = vector.broadcast %cst_15 : f32 to vector<32x32xf32>
    %53 = arith.select %51, %52, %35 : vector<32x32xi1>, vector<32x32xf32>
    %c1_i32 = arith.constant 1 : i32
    %54 = vector.broadcast %c1_i32 : i32 to vector<32x8xi32>
    %55 = arith.cmpi eq, %21, %54 : vector<32x8xi32>
    %56 = vector.shape_cast %49 : vector<32x1xi32> to vector<32x1xi32>
    %57 = vector.broadcast %56 : vector<32x1xi32> to vector<32x8xi32>
    %58 = arith.select %55, %57, %40 : vector<32x8xi1>, vector<32x8xi32>
    %cst_16 = arith.constant dense<0xFF800000> : vector<32xf32>
    %59 = vector.multi_reduction <maximumf>, %53, %cst_16 [1] : vector<32x32xf32> to vector<32xf32>
    %60 = vector.shape_cast %59 : vector<32xf32> to vector<32x1xf32>
    %61 = vector.broadcast %60 : vector<32x1xf32> to vector<32x32xf32>
    %62 = arith.cmpf oeq, %53, %61 : vector<32x32xf32>
    %cst_17 = arith.constant 3.200000e+01 : f32
    %63 = vector.broadcast %cst_17 : f32 to vector<32x32xf32>
    %64 = arith.select %62, %20, %63 : vector<32x32xi1>, vector<32x32xf32>
    %cst_18 = arith.constant dense<0x7F800000> : vector<32xf32>
    %65 = vector.multi_reduction <minimumf>, %64, %cst_18 [1] : vector<32x32xf32> to vector<32xf32>
    %66 = vector.shape_cast %65 : vector<32xf32> to vector<32x1xf32>
    %67 = arith.fptosi %66 : vector<32x1xf32> to vector<32x1xi32>
    %68 = vector.broadcast %67 : vector<32x1xi32> to vector<32x32xi32>
    %69 = arith.cmpi eq, %19, %68 : vector<32x32xi32>
    %cst_19 = arith.constant -3.000000e+38 : f32
    %70 = vector.broadcast %cst_19 : f32 to vector<32x32xf32>
    %71 = arith.select %69, %70, %53 : vector<32x32xi1>, vector<32x32xf32>
    %c2_i32 = arith.constant 2 : i32
    %72 = vector.broadcast %c2_i32 : i32 to vector<32x8xi32>
    %73 = arith.cmpi eq, %21, %72 : vector<32x8xi32>
    %74 = vector.shape_cast %67 : vector<32x1xi32> to vector<32x1xi32>
    %75 = vector.broadcast %74 : vector<32x1xi32> to vector<32x8xi32>
    %76 = arith.select %73, %75, %58 : vector<32x8xi1>, vector<32x8xi32>
    %cst_20 = arith.constant dense<0xFF800000> : vector<32xf32>
    %77 = vector.multi_reduction <maximumf>, %71, %cst_20 [1] : vector<32x32xf32> to vector<32xf32>
    %78 = vector.shape_cast %77 : vector<32xf32> to vector<32x1xf32>
    %79 = vector.broadcast %78 : vector<32x1xf32> to vector<32x32xf32>
    %80 = arith.cmpf oeq, %71, %79 : vector<32x32xf32>
    %cst_21 = arith.constant 3.200000e+01 : f32
    %81 = vector.broadcast %cst_21 : f32 to vector<32x32xf32>
    %82 = arith.select %80, %20, %81 : vector<32x32xi1>, vector<32x32xf32>
    %cst_22 = arith.constant dense<0x7F800000> : vector<32xf32>
    %83 = vector.multi_reduction <minimumf>, %82, %cst_22 [1] : vector<32x32xf32> to vector<32xf32>
    %84 = vector.shape_cast %83 : vector<32xf32> to vector<32x1xf32>
    %85 = arith.fptosi %84 : vector<32x1xf32> to vector<32x1xi32>
    %86 = vector.broadcast %85 : vector<32x1xi32> to vector<32x32xi32>
    %87 = arith.cmpi eq, %19, %86 : vector<32x32xi32>
    %cst_23 = arith.constant -3.000000e+38 : f32
    %88 = vector.broadcast %cst_23 : f32 to vector<32x32xf32>
    %89 = arith.select %87, %88, %71 : vector<32x32xi1>, vector<32x32xf32>
    %c3_i32 = arith.constant 3 : i32
    %90 = vector.broadcast %c3_i32 : i32 to vector<32x8xi32>
    %91 = arith.cmpi eq, %21, %90 : vector<32x8xi32>
    %92 = vector.shape_cast %85 : vector<32x1xi32> to vector<32x1xi32>
    %93 = vector.broadcast %92 : vector<32x1xi32> to vector<32x8xi32>
    %94 = arith.select %91, %93, %76 : vector<32x8xi1>, vector<32x8xi32>
    %cst_24 = arith.constant dense<0xFF800000> : vector<32xf32>
    %95 = vector.multi_reduction <maximumf>, %89, %cst_24 [1] : vector<32x32xf32> to vector<32xf32>
    %96 = vector.shape_cast %95 : vector<32xf32> to vector<32x1xf32>
    %97 = vector.broadcast %96 : vector<32x1xf32> to vector<32x32xf32>
    %98 = arith.cmpf oeq, %89, %97 : vector<32x32xf32>
    %cst_25 = arith.constant 3.200000e+01 : f32
    %99 = vector.broadcast %cst_25 : f32 to vector<32x32xf32>
    %100 = arith.select %98, %20, %99 : vector<32x32xi1>, vector<32x32xf32>
    %cst_26 = arith.constant dense<0x7F800000> : vector<32xf32>
    %101 = vector.multi_reduction <minimumf>, %100, %cst_26 [1] : vector<32x32xf32> to vector<32xf32>
    %102 = vector.shape_cast %101 : vector<32xf32> to vector<32x1xf32>
    %103 = arith.fptosi %102 : vector<32x1xf32> to vector<32x1xi32>
    %104 = vector.broadcast %103 : vector<32x1xi32> to vector<32x32xi32>
    %105 = arith.cmpi eq, %19, %104 : vector<32x32xi32>
    %cst_27 = arith.constant -3.000000e+38 : f32
    %106 = vector.broadcast %cst_27 : f32 to vector<32x32xf32>
    %107 = arith.select %105, %106, %89 : vector<32x32xi1>, vector<32x32xf32>
    %c4_i32 = arith.constant 4 : i32
    %108 = vector.broadcast %c4_i32 : i32 to vector<32x8xi32>
    %109 = arith.cmpi eq, %21, %108 : vector<32x8xi32>
    %110 = vector.shape_cast %103 : vector<32x1xi32> to vector<32x1xi32>
    %111 = vector.broadcast %110 : vector<32x1xi32> to vector<32x8xi32>
    %112 = arith.select %109, %111, %94 : vector<32x8xi1>, vector<32x8xi32>
    %cst_28 = arith.constant dense<0xFF800000> : vector<32xf32>
    %113 = vector.multi_reduction <maximumf>, %107, %cst_28 [1] : vector<32x32xf32> to vector<32xf32>
    %114 = vector.shape_cast %113 : vector<32xf32> to vector<32x1xf32>
    %115 = vector.broadcast %114 : vector<32x1xf32> to vector<32x32xf32>
    %116 = arith.cmpf oeq, %107, %115 : vector<32x32xf32>
    %cst_29 = arith.constant 3.200000e+01 : f32
    %117 = vector.broadcast %cst_29 : f32 to vector<32x32xf32>
    %118 = arith.select %116, %20, %117 : vector<32x32xi1>, vector<32x32xf32>
    %cst_30 = arith.constant dense<0x7F800000> : vector<32xf32>
    %119 = vector.multi_reduction <minimumf>, %118, %cst_30 [1] : vector<32x32xf32> to vector<32xf32>
    %120 = vector.shape_cast %119 : vector<32xf32> to vector<32x1xf32>
    %121 = arith.fptosi %120 : vector<32x1xf32> to vector<32x1xi32>
    %122 = vector.broadcast %121 : vector<32x1xi32> to vector<32x32xi32>
    %123 = arith.cmpi eq, %19, %122 : vector<32x32xi32>
    %cst_31 = arith.constant -3.000000e+38 : f32
    %124 = vector.broadcast %cst_31 : f32 to vector<32x32xf32>
    %125 = arith.select %123, %124, %107 : vector<32x32xi1>, vector<32x32xf32>
    %c5_i32 = arith.constant 5 : i32
    %126 = vector.broadcast %c5_i32 : i32 to vector<32x8xi32>
    %127 = arith.cmpi eq, %21, %126 : vector<32x8xi32>
    %128 = vector.shape_cast %121 : vector<32x1xi32> to vector<32x1xi32>
    %129 = vector.broadcast %128 : vector<32x1xi32> to vector<32x8xi32>
    %130 = arith.select %127, %129, %112 : vector<32x8xi1>, vector<32x8xi32>
    %cst_32 = arith.constant dense<0xFF800000> : vector<32xf32>
    %131 = vector.multi_reduction <maximumf>, %125, %cst_32 [1] : vector<32x32xf32> to vector<32xf32>
    %132 = vector.shape_cast %131 : vector<32xf32> to vector<32x1xf32>
    %133 = vector.broadcast %132 : vector<32x1xf32> to vector<32x32xf32>
    %134 = arith.cmpf oeq, %125, %133 : vector<32x32xf32>
    %cst_33 = arith.constant 3.200000e+01 : f32
    %135 = vector.broadcast %cst_33 : f32 to vector<32x32xf32>
    %136 = arith.select %134, %20, %135 : vector<32x32xi1>, vector<32x32xf32>
    %cst_34 = arith.constant dense<0x7F800000> : vector<32xf32>
    %137 = vector.multi_reduction <minimumf>, %136, %cst_34 [1] : vector<32x32xf32> to vector<32xf32>
    %138 = vector.shape_cast %137 : vector<32xf32> to vector<32x1xf32>
    %139 = arith.fptosi %138 : vector<32x1xf32> to vector<32x1xi32>
    %140 = vector.broadcast %139 : vector<32x1xi32> to vector<32x32xi32>
    %141 = arith.cmpi eq, %19, %140 : vector<32x32xi32>
    %cst_35 = arith.constant -3.000000e+38 : f32
    %142 = vector.broadcast %cst_35 : f32 to vector<32x32xf32>
    %143 = arith.select %141, %142, %125 : vector<32x32xi1>, vector<32x32xf32>
    %c6_i32 = arith.constant 6 : i32
    %144 = vector.broadcast %c6_i32 : i32 to vector<32x8xi32>
    %145 = arith.cmpi eq, %21, %144 : vector<32x8xi32>
    %146 = vector.shape_cast %139 : vector<32x1xi32> to vector<32x1xi32>
    %147 = vector.broadcast %146 : vector<32x1xi32> to vector<32x8xi32>
    %148 = arith.select %145, %147, %130 : vector<32x8xi1>, vector<32x8xi32>
    %cst_36 = arith.constant dense<0xFF800000> : vector<32xf32>
    %149 = vector.multi_reduction <maximumf>, %143, %cst_36 [1] : vector<32x32xf32> to vector<32xf32>
    %150 = vector.shape_cast %149 : vector<32xf32> to vector<32x1xf32>
    %151 = vector.broadcast %150 : vector<32x1xf32> to vector<32x32xf32>
    %152 = arith.cmpf oeq, %143, %151 : vector<32x32xf32>
    %cst_37 = arith.constant 3.200000e+01 : f32
    %153 = vector.broadcast %cst_37 : f32 to vector<32x32xf32>
    %154 = arith.select %152, %20, %153 : vector<32x32xi1>, vector<32x32xf32>
    %cst_38 = arith.constant dense<0x7F800000> : vector<32xf32>
    %155 = vector.multi_reduction <minimumf>, %154, %cst_38 [1] : vector<32x32xf32> to vector<32xf32>
    %156 = vector.shape_cast %155 : vector<32xf32> to vector<32x1xf32>
    %157 = arith.fptosi %156 : vector<32x1xf32> to vector<32x1xi32>
    %c7_i32 = arith.constant 7 : i32
    %158 = vector.broadcast %c7_i32 : i32 to vector<32x8xi32>
    %159 = arith.cmpi eq, %21, %158 : vector<32x8xi32>
    %160 = vector.shape_cast %157 : vector<32x1xi32> to vector<32x1xi32>
    %161 = vector.broadcast %160 : vector<32x1xi32> to vector<32x8xi32>
    %162 = arith.select %159, %161, %148 : vector<32x8xi1>, vector<32x8xi32>
    %c0_39 = arith.constant 0 : index
    %c0_40 = arith.constant 0 : index
    %c0_41 = arith.constant 0 : index
    %163 = vector.load %arg6[%c0_39, %c0_40, %c0_41] : memref<1x32x8xi32, #tpu.memory_space<vmem>>, vector<1x32x8xi32>
    %164 = vector.shape_cast %163 : vector<1x32x8xi32> to vector<32x8xi32>
    %165 = vector.shape_cast %162 : vector<32x8xi32> to vector<1x32x8xi32>
    tpu.vector_store %arg6[%c0_39, %c0_40, %c0_41], %165 {strides = array<i32>} : memref<1x32x8xi32, #tpu.memory_space<vmem>>, vector<1x32x8xi32>,
    %166 = arith.truncf %6 : vector<32x64xf32> to vector<32x64xbf16>
    %c0_42 = arith.constant 0 : index
    %c0_43 = arith.constant 0 : index
    %167 = vector.load %arg3[%c0_42, %c0_43] : memref<64x128xbf16, #tpu.memory_space<vmem>>, vector<64x128xbf16>
    %cst_44 = arith.constant dense<0.000000e+00> : vector<32x128xf32>
    %168 = tpu.matmul %166, %167, %cst_44 {dimension_numbers = #tpu.dot_dimension_numbers<[1], [0], [0], [1], [0, 0, 1, 1], [], []>} : vector<32x64xbf16>, vector<64x128xbf16>, vector<32x128xf32> -> vector<32x128xf32>
    %c0_45 = arith.constant 0 : index
    %c0_46 = arith.constant 0 : index
    %169 = vector.load %arg4[%c0_45, %c0_46] : memref<64x128xbf16, #tpu.memory_space<vmem>>, vector<64x128xbf16>
    %cst_47 = arith.constant dense<0.000000e+00> : vector<32x128xf32>
    %170 = tpu.matmul %166, %169, %cst_47 {dimension_numbers = #tpu.dot_dimension_numbers<[1], [0], [0], [1], [0, 0, 1, 1], [], []>} : vector<32x64xbf16>, vector<64x128xbf16>, vector<32x128xf32> -> vector<32x128xf32>
    %c0_48 = arith.constant 0 : index
    %c0_49 = arith.constant 0 : index
    %171 = vector.load %arg5[%c0_48, %c0_49] : memref<1x128xf32, #tpu.memory_space<vmem>>, vector<1x128xf32>
    %172 = vector.broadcast %171 : vector<1x128xf32> to vector<32x128xf32>
    %173 = arith.addf %170, %172 : vector<32x128xf32>
    %174 = arith.truncf %168 : vector<32x128xf32> to vector<32x128xbf16>
    %c0_50 = arith.constant 0 : index
    %c0_51 = arith.constant 0 : index
    %c0_52 = arith.constant 0 : index
    %175 = vector.load %arg7[%c0_50, %c0_51, %c0_52] : memref<1x32x128xbf16, #tpu.memory_space<vmem>>, vector<1x32x128xbf16>
    %176 = vector.shape_cast %175 : vector<1x32x128xbf16> to vector<32x128xbf16>
    %177 = vector.shape_cast %174 : vector<32x128xbf16> to vector<1x32x128xbf16>
    tpu.vector_store %arg7[%c0_50, %c0_51, %c0_52], %177 {strides = array<i32>} : memref<1x32x128xbf16, #tpu.memory_space<vmem>>, vector<1x32x128xbf16>,
    %178 = arith.truncf %173 : vector<32x128xf32> to vector<32x128xbf16>
    %c0_53 = arith.constant 0 : index
    %c0_54 = arith.constant 0 : index
    %c0_55 = arith.constant 0 : index
    %179 = vector.load %arg8[%c0_53, %c0_54, %c0_55] : memref<1x32x128xbf16, #tpu.memory_space<vmem>>, vector<1x32x128xbf16>
    %180 = vector.shape_cast %179 : vector<1x32x128xbf16> to vector<32x128xbf16>
    %181 = vector.shape_cast %178 : vector<32x128xbf16> to vector<1x32x128xbf16>
    tpu.vector_store %arg8[%c0_53, %c0_54, %c0_55], %181 {strides = array<i32>} : memref<1x32x128xbf16, #tpu.memory_space<vmem>>, vector<1x32x128xbf16>,
    return
  }
  func.func @transform_0(%arg0: i32, %arg1: i32) -> (i32, i32, i32) {
    %c0_i32 = arith.constant 0 : i32
    %c0_i32_0 = arith.constant 0 : i32
    %c0_i32_1 = arith.constant 0 : i32
    return %arg0, %c0_i32, %c0_i32_0 : i32, i32, i32
  }
  func.func @transform_1(%arg0: i32, %arg1: i32) -> (i32, i32) {
    %c0_i32 = arith.constant 0 : i32
    %c0_i32_0 = arith.constant 0 : i32
    %c0_i32_1 = arith.constant 0 : i32
    return %c0_i32, %c0_i32_0 : i32, i32
  }
  func.func @transform_2(%arg0: i32, %arg1: i32) -> (i32, i32) {
    %c0_i32 = arith.constant 0 : i32
    %c0_i32_0 = arith.constant 0 : i32
    %c0_i32_1 = arith.constant 0 : i32
    return %c0_i32, %c0_i32_0 : i32, i32
  }
  func.func @transform_3(%arg0: i32, %arg1: i32) -> (i32, i32) {
    %c0_i32 = arith.constant 0 : i32
    %c0_i32_0 = arith.constant 0 : i32
    %c0_i32_1 = arith.constant 0 : i32
    return %c0_i32, %c0_i32_0 : i32, i32
  }
  func.func @transform_4(%arg0: i32, %arg1: i32) -> (i32, i32, i32) {
    %c0_i32 = arith.constant 0 : i32
    %c0_i32_0 = arith.constant 0 : i32
    return %arg0, %arg1, %c0_i32 : i32, i32, i32
  }
  func.func @transform_5(%arg0: i32, %arg1: i32) -> (i32, i32, i32) {
    %c0_i32 = arith.constant 0 : i32
    %c0_i32_0 = arith.constant 0 : i32
    return %arg0, %arg1, %c0_i32 : i32, i32, i32
  }
  func.func @transform_6(%arg0: i32, %arg1: i32) -> (i32, i32, i32) {
    %c0_i32 = arith.constant 0 : i32
    %c0_i32_0 = arith.constant 0 : i32
    return %arg0, %arg1, %c0_i32 : i32, i32, i32
  }
}

module attributes {stable_mosaic.version = 11 : i64} {
  func.func @_knn_gh_kernel(%arg0: i32, %arg1: i32, %arg2: memref<1x32x128xf32, #tpu.memory_space<vmem>>, %arg3: memref<128x256xbf16, #tpu.memory_space<vmem>>, %arg4: memref<128x256xbf16, #tpu.memory_space<vmem>>, %arg5: memref<1x256xf32, #tpu.memory_space<vmem>>, %arg6: memref<1x32x8xi32, #tpu.memory_space<vmem>>, %arg7: memref<1x32x256xbf16, #tpu.memory_space<vmem>>, %arg8: memref<1x32x256xbf16, #tpu.memory_space<vmem>>) attributes {dimension_semantics = [#tpu.dimension_semantics<parallel>, #tpu.dimension_semantics<parallel>], iteration_bounds = array<i64: 2, 1>, scalar_prefetch = 0 : i64, scratch_operands = 0 : i64, tpu.core_type = #tpu.core_type<tc>, window_params = [{transform_indices = @transform_0, window_bounds = array<i64: 1, 32, 128>}, {pipeline_mode = #tpu.pipeline_mode<synchronous>, transform_indices = @transform_1, window_bounds = array<i64: 128, 256>}, {pipeline_mode = #tpu.pipeline_mode<synchronous>, transform_indices = @transform_2, window_bounds = array<i64: 128, 256>}, {pipeline_mode = #tpu.pipeline_mode<synchronous>, transform_indices = @transform_3, window_bounds = array<i64: 1, 256>}, {transform_indices = @transform_4, window_bounds = array<i64: 1, 32, 8>}, {transform_indices = @transform_5, window_bounds = array<i64: 1, 32, 256>}, {transform_indices = @transform_6, window_bounds = array<i64: 1, 32, 256>}]} {
    %c32_i32 = arith.constant 32 : i32
    %0 = arith.muli %arg1, %c32_i32 : i32
    %1 = tpu.assume_multiple %0, 32 : i32
    %c0 = arith.constant 0 : index
    %c0_0 = arith.constant 0 : index
    %c0_1 = arith.constant 0 : index
    %2 = vector.load %arg2[%c0, %c0_0, %c0_1] : memref<1x32x128xf32, #tpu.memory_space<vmem>>, vector<1x32x128xf32>
    %3 = vector.shape_cast %2 : vector<1x32x128xf32> to vector<32x128xf32>
    %c0_2 = arith.constant 0 : index
    %4 = arith.index_cast %1 : i32 to index
    %c0_3 = arith.constant 0 : index
    %5 = vector.load %arg2[%c0_2, %4, %c0_3] : memref<1x32x128xf32, #tpu.memory_space<vmem>>, vector<1x32x128xf32>
    %6 = vector.shape_cast %5 : vector<1x32x128xf32> to vector<32x128xf32>
    %7 = arith.addf %6, %6 : vector<32x128xf32>
    %cst = arith.constant dense<0.000000e+00> : vector<32x32xf32>
    %8 = tpu.matmul %7, %3, %cst {dimension_numbers = #tpu.dot_dimension_numbers<[1], [1], [0], [0], [0, 0, 1, 0], [], []>} : vector<32x128xf32>, vector<32x128xf32>, vector<32x32xf32> -> vector<32x32xf32>
    %9 = arith.mulf %6, %6 : vector<32x128xf32>
    %cst_4 = arith.constant dense<0.000000e+00> : vector<32xf32>
    %10 = vector.multi_reduction <add>, %9, %cst_4 [1] : vector<32x128xf32> to vector<32xf32>
    %11 = vector.shape_cast %10 : vector<32xf32> to vector<32x1xf32>
    %cst_5 = arith.constant 1.000000e+00 : f32
    %12 = vector.broadcast %cst_5 : f32 to vector<1x128xf32>
    %13 = arith.mulf %3, %3 : vector<32x128xf32>
    %cst_6 = arith.constant dense<0.000000e+00> : vector<1x32xf32>
    %14 = tpu.matmul %12, %13, %cst_6 {dimension_numbers = #tpu.dot_dimension_numbers<[1], [1], [0], [0], [0, 0, 1, 0], [], []>} : vector<1x128xf32>, vector<32x128xf32>, vector<1x32xf32> -> vector<1x32xf32>
    %15 = vector.broadcast %11 : vector<32x1xf32> to vector<32x32xf32>
    %16 = arith.subf %8, %15 : vector<32x32xf32>
    %17 = vector.broadcast %14 : vector<1x32xf32> to vector<32x32xf32>
    %18 = arith.subf %16, %17 : vector<32x32xf32>
    %19 = tpu.iota {dimensions = array<i32: 1>} : vector<32x32xi32>
    %20 = arith.sitofp %19 : vector<32x32xi32> to vector<32x32xf32>
    %21 = tpu.iota {dimensions = array<i32: 1>} : vector<32x8xi32>
    %c0_i32 = arith.constant 0 : i32
    %22 = vector.broadcast %c0_i32 : i32 to vector<32x8xi32>
    %cst_7 = arith.constant dense<0xFF800000> : vector<32xf32>
    %23 = vector.multi_reduction <maximumf>, %18, %cst_7 [1] : vector<32x32xf32> to vector<32xf32>
    %24 = vector.shape_cast %23 : vector<32xf32> to vector<32x1xf32>
    %25 = vector.broadcast %24 : vector<32x1xf32> to vector<32x32xf32>
    %26 = arith.cmpf oeq, %18, %25 : vector<32x32xf32>
    %cst_8 = arith.constant 3.200000e+01 : f32
    %27 = vector.broadcast %cst_8 : f32 to vector<32x32xf32>
    %28 = arith.select %26, %20, %27 : vector<32x32xi1>, vector<32x32xf32>
    %cst_9 = arith.constant dense<0x7F800000> : vector<32xf32>
    %29 = vector.multi_reduction <minimumf>, %28, %cst_9 [1] : vector<32x32xf32> to vector<32xf32>
    %30 = vector.shape_cast %29 : vector<32xf32> to vector<32x1xf32>
    %31 = arith.fptosi %30 : vector<32x1xf32> to vector<32x1xi32>
    %32 = vector.broadcast %31 : vector<32x1xi32> to vector<32x32xi32>
    %33 = arith.cmpi eq, %19, %32 : vector<32x32xi32>
    %cst_10 = arith.constant -3.000000e+38 : f32
    %34 = vector.broadcast %cst_10 : f32 to vector<32x32xf32>
    %35 = arith.select %33, %34, %18 : vector<32x32xi1>, vector<32x32xf32>
    %c0_i32_11 = arith.constant 0 : i32
    %36 = vector.broadcast %c0_i32_11 : i32 to vector<32x8xi32>
    %37 = arith.cmpi eq, %21, %36 : vector<32x8xi32>
    %38 = vector.shape_cast %31 : vector<32x1xi32> to vector<32x1xi32>
    %39 = vector.broadcast %38 : vector<32x1xi32> to vector<32x8xi32>
    %40 = arith.select %37, %39, %22 : vector<32x8xi1>, vector<32x8xi32>
    %cst_12 = arith.constant dense<0xFF800000> : vector<32xf32>
    %41 = vector.multi_reduction <maximumf>, %35, %cst_12 [1] : vector<32x32xf32> to vector<32xf32>
    %42 = vector.shape_cast %41 : vector<32xf32> to vector<32x1xf32>
    %43 = vector.broadcast %42 : vector<32x1xf32> to vector<32x32xf32>
    %44 = arith.cmpf oeq, %35, %43 : vector<32x32xf32>
    %cst_13 = arith.constant 3.200000e+01 : f32
    %45 = vector.broadcast %cst_13 : f32 to vector<32x32xf32>
    %46 = arith.select %44, %20, %45 : vector<32x32xi1>, vector<32x32xf32>
    %cst_14 = arith.constant dense<0x7F800000> : vector<32xf32>
    %47 = vector.multi_reduction <minimumf>, %46, %cst_14 [1] : vector<32x32xf32> to vector<32xf32>
    %48 = vector.shape_cast %47 : vector<32xf32> to vector<32x1xf32>
    %49 = arith.fptosi %48 : vector<32x1xf32> to vector<32x1xi32>
    %50 = vector.broadcast %49 : vector<32x1xi32> to vector<32x32xi32>
    %51 = arith.cmpi eq, %19, %50 : vector<32x32xi32>
    %cst_15 = arith.constant -3.000000e+38 : f32
    %52 = vector.broadcast %cst_15 : f32 to vector<32x32xf32>
    %53 = arith.select %51, %52, %35 : vector<32x32xi1>, vector<32x32xf32>
    %c1_i32 = arith.constant 1 : i32
    %54 = vector.broadcast %c1_i32 : i32 to vector<32x8xi32>
    %55 = arith.cmpi eq, %21, %54 : vector<32x8xi32>
    %56 = vector.shape_cast %49 : vector<32x1xi32> to vector<32x1xi32>
    %57 = vector.broadcast %56 : vector<32x1xi32> to vector<32x8xi32>
    %58 = arith.select %55, %57, %40 : vector<32x8xi1>, vector<32x8xi32>
    %cst_16 = arith.constant dense<0xFF800000> : vector<32xf32>
    %59 = vector.multi_reduction <maximumf>, %53, %cst_16 [1] : vector<32x32xf32> to vector<32xf32>
    %60 = vector.shape_cast %59 : vector<32xf32> to vector<32x1xf32>
    %61 = vector.broadcast %60 : vector<32x1xf32> to vector<32x32xf32>
    %62 = arith.cmpf oeq, %53, %61 : vector<32x32xf32>
    %cst_17 = arith.constant 3.200000e+01 : f32
    %63 = vector.broadcast %cst_17 : f32 to vector<32x32xf32>
    %64 = arith.select %62, %20, %63 : vector<32x32xi1>, vector<32x32xf32>
    %cst_18 = arith.constant dense<0x7F800000> : vector<32xf32>
    %65 = vector.multi_reduction <minimumf>, %64, %cst_18 [1] : vector<32x32xf32> to vector<32xf32>
    %66 = vector.shape_cast %65 : vector<32xf32> to vector<32x1xf32>
    %67 = arith.fptosi %66 : vector<32x1xf32> to vector<32x1xi32>
    %68 = vector.broadcast %67 : vector<32x1xi32> to vector<32x32xi32>
    %69 = arith.cmpi eq, %19, %68 : vector<32x32xi32>
    %cst_19 = arith.constant -3.000000e+38 : f32
    %70 = vector.broadcast %cst_19 : f32 to vector<32x32xf32>
    %71 = arith.select %69, %70, %53 : vector<32x32xi1>, vector<32x32xf32>
    %c2_i32 = arith.constant 2 : i32
    %72 = vector.broadcast %c2_i32 : i32 to vector<32x8xi32>
    %73 = arith.cmpi eq, %21, %72 : vector<32x8xi32>
    %74 = vector.shape_cast %67 : vector<32x1xi32> to vector<32x1xi32>
    %75 = vector.broadcast %74 : vector<32x1xi32> to vector<32x8xi32>
    %76 = arith.select %73, %75, %58 : vector<32x8xi1>, vector<32x8xi32>
    %cst_20 = arith.constant dense<0xFF800000> : vector<32xf32>
    %77 = vector.multi_reduction <maximumf>, %71, %cst_20 [1] : vector<32x32xf32> to vector<32xf32>
    %78 = vector.shape_cast %77 : vector<32xf32> to vector<32x1xf32>
    %79 = vector.broadcast %78 : vector<32x1xf32> to vector<32x32xf32>
    %80 = arith.cmpf oeq, %71, %79 : vector<32x32xf32>
    %cst_21 = arith.constant 3.200000e+01 : f32
    %81 = vector.broadcast %cst_21 : f32 to vector<32x32xf32>
    %82 = arith.select %80, %20, %81 : vector<32x32xi1>, vector<32x32xf32>
    %cst_22 = arith.constant dense<0x7F800000> : vector<32xf32>
    %83 = vector.multi_reduction <minimumf>, %82, %cst_22 [1] : vector<32x32xf32> to vector<32xf32>
    %84 = vector.shape_cast %83 : vector<32xf32> to vector<32x1xf32>
    %85 = arith.fptosi %84 : vector<32x1xf32> to vector<32x1xi32>
    %86 = vector.broadcast %85 : vector<32x1xi32> to vector<32x32xi32>
    %87 = arith.cmpi eq, %19, %86 : vector<32x32xi32>
    %cst_23 = arith.constant -3.000000e+38 : f32
    %88 = vector.broadcast %cst_23 : f32 to vector<32x32xf32>
    %89 = arith.select %87, %88, %71 : vector<32x32xi1>, vector<32x32xf32>
    %c3_i32 = arith.constant 3 : i32
    %90 = vector.broadcast %c3_i32 : i32 to vector<32x8xi32>
    %91 = arith.cmpi eq, %21, %90 : vector<32x8xi32>
    %92 = vector.shape_cast %85 : vector<32x1xi32> to vector<32x1xi32>
    %93 = vector.broadcast %92 : vector<32x1xi32> to vector<32x8xi32>
    %94 = arith.select %91, %93, %76 : vector<32x8xi1>, vector<32x8xi32>
    %cst_24 = arith.constant dense<0xFF800000> : vector<32xf32>
    %95 = vector.multi_reduction <maximumf>, %89, %cst_24 [1] : vector<32x32xf32> to vector<32xf32>
    %96 = vector.shape_cast %95 : vector<32xf32> to vector<32x1xf32>
    %97 = vector.broadcast %96 : vector<32x1xf32> to vector<32x32xf32>
    %98 = arith.cmpf oeq, %89, %97 : vector<32x32xf32>
    %cst_25 = arith.constant 3.200000e+01 : f32
    %99 = vector.broadcast %cst_25 : f32 to vector<32x32xf32>
    %100 = arith.select %98, %20, %99 : vector<32x32xi1>, vector<32x32xf32>
    %cst_26 = arith.constant dense<0x7F800000> : vector<32xf32>
    %101 = vector.multi_reduction <minimumf>, %100, %cst_26 [1] : vector<32x32xf32> to vector<32xf32>
    %102 = vector.shape_cast %101 : vector<32xf32> to vector<32x1xf32>
    %103 = arith.fptosi %102 : vector<32x1xf32> to vector<32x1xi32>
    %104 = vector.broadcast %103 : vector<32x1xi32> to vector<32x32xi32>
    %105 = arith.cmpi eq, %19, %104 : vector<32x32xi32>
    %cst_27 = arith.constant -3.000000e+38 : f32
    %106 = vector.broadcast %cst_27 : f32 to vector<32x32xf32>
    %107 = arith.select %105, %106, %89 : vector<32x32xi1>, vector<32x32xf32>
    %c4_i32 = arith.constant 4 : i32
    %108 = vector.broadcast %c4_i32 : i32 to vector<32x8xi32>
    %109 = arith.cmpi eq, %21, %108 : vector<32x8xi32>
    %110 = vector.shape_cast %103 : vector<32x1xi32> to vector<32x1xi32>
    %111 = vector.broadcast %110 : vector<32x1xi32> to vector<32x8xi32>
    %112 = arith.select %109, %111, %94 : vector<32x8xi1>, vector<32x8xi32>
    %cst_28 = arith.constant dense<0xFF800000> : vector<32xf32>
    %113 = vector.multi_reduction <maximumf>, %107, %cst_28 [1] : vector<32x32xf32> to vector<32xf32>
    %114 = vector.shape_cast %113 : vector<32xf32> to vector<32x1xf32>
    %115 = vector.broadcast %114 : vector<32x1xf32> to vector<32x32xf32>
    %116 = arith.cmpf oeq, %107, %115 : vector<32x32xf32>
    %cst_29 = arith.constant 3.200000e+01 : f32
    %117 = vector.broadcast %cst_29 : f32 to vector<32x32xf32>
    %118 = arith.select %116, %20, %117 : vector<32x32xi1>, vector<32x32xf32>
    %cst_30 = arith.constant dense<0x7F800000> : vector<32xf32>
    %119 = vector.multi_reduction <minimumf>, %118, %cst_30 [1] : vector<32x32xf32> to vector<32xf32>
    %120 = vector.shape_cast %119 : vector<32xf32> to vector<32x1xf32>
    %121 = arith.fptosi %120 : vector<32x1xf32> to vector<32x1xi32>
    %122 = vector.broadcast %121 : vector<32x1xi32> to vector<32x32xi32>
    %123 = arith.cmpi eq, %19, %122 : vector<32x32xi32>
    %cst_31 = arith.constant -3.000000e+38 : f32
    %124 = vector.broadcast %cst_31 : f32 to vector<32x32xf32>
    %125 = arith.select %123, %124, %107 : vector<32x32xi1>, vector<32x32xf32>
    %c5_i32 = arith.constant 5 : i32
    %126 = vector.broadcast %c5_i32 : i32 to vector<32x8xi32>
    %127 = arith.cmpi eq, %21, %126 : vector<32x8xi32>
    %128 = vector.shape_cast %121 : vector<32x1xi32> to vector<32x1xi32>
    %129 = vector.broadcast %128 : vector<32x1xi32> to vector<32x8xi32>
    %130 = arith.select %127, %129, %112 : vector<32x8xi1>, vector<32x8xi32>
    %cst_32 = arith.constant dense<0xFF800000> : vector<32xf32>
    %131 = vector.multi_reduction <maximumf>, %125, %cst_32 [1] : vector<32x32xf32> to vector<32xf32>
    %132 = vector.shape_cast %131 : vector<32xf32> to vector<32x1xf32>
    %133 = vector.broadcast %132 : vector<32x1xf32> to vector<32x32xf32>
    %134 = arith.cmpf oeq, %125, %133 : vector<32x32xf32>
    %cst_33 = arith.constant 3.200000e+01 : f32
    %135 = vector.broadcast %cst_33 : f32 to vector<32x32xf32>
    %136 = arith.select %134, %20, %135 : vector<32x32xi1>, vector<32x32xf32>
    %cst_34 = arith.constant dense<0x7F800000> : vector<32xf32>
    %137 = vector.multi_reduction <minimumf>, %136, %cst_34 [1] : vector<32x32xf32> to vector<32xf32>
    %138 = vector.shape_cast %137 : vector<32xf32> to vector<32x1xf32>
    %139 = arith.fptosi %138 : vector<32x1xf32> to vector<32x1xi32>
    %140 = vector.broadcast %139 : vector<32x1xi32> to vector<32x32xi32>
    %141 = arith.cmpi eq, %19, %140 : vector<32x32xi32>
    %cst_35 = arith.constant -3.000000e+38 : f32
    %142 = vector.broadcast %cst_35 : f32 to vector<32x32xf32>
    %143 = arith.select %141, %142, %125 : vector<32x32xi1>, vector<32x32xf32>
    %c6_i32 = arith.constant 6 : i32
    %144 = vector.broadcast %c6_i32 : i32 to vector<32x8xi32>
    %145 = arith.cmpi eq, %21, %144 : vector<32x8xi32>
    %146 = vector.shape_cast %139 : vector<32x1xi32> to vector<32x1xi32>
    %147 = vector.broadcast %146 : vector<32x1xi32> to vector<32x8xi32>
    %148 = arith.select %145, %147, %130 : vector<32x8xi1>, vector<32x8xi32>
    %cst_36 = arith.constant dense<0xFF800000> : vector<32xf32>
    %149 = vector.multi_reduction <maximumf>, %143, %cst_36 [1] : vector<32x32xf32> to vector<32xf32>
    %150 = vector.shape_cast %149 : vector<32xf32> to vector<32x1xf32>
    %151 = vector.broadcast %150 : vector<32x1xf32> to vector<32x32xf32>
    %152 = arith.cmpf oeq, %143, %151 : vector<32x32xf32>
    %cst_37 = arith.constant 3.200000e+01 : f32
    %153 = vector.broadcast %cst_37 : f32 to vector<32x32xf32>
    %154 = arith.select %152, %20, %153 : vector<32x32xi1>, vector<32x32xf32>
    %cst_38 = arith.constant dense<0x7F800000> : vector<32xf32>
    %155 = vector.multi_reduction <minimumf>, %154, %cst_38 [1] : vector<32x32xf32> to vector<32xf32>
    %156 = vector.shape_cast %155 : vector<32xf32> to vector<32x1xf32>
    %157 = arith.fptosi %156 : vector<32x1xf32> to vector<32x1xi32>
    %c7_i32 = arith.constant 7 : i32
    %158 = vector.broadcast %c7_i32 : i32 to vector<32x8xi32>
    %159 = arith.cmpi eq, %21, %158 : vector<32x8xi32>
    %160 = vector.shape_cast %157 : vector<32x1xi32> to vector<32x1xi32>
    %161 = vector.broadcast %160 : vector<32x1xi32> to vector<32x8xi32>
    %162 = arith.select %159, %161, %148 : vector<32x8xi1>, vector<32x8xi32>
    %c0_39 = arith.constant 0 : index
    %c0_40 = arith.constant 0 : index
    %c0_41 = arith.constant 0 : index
    %163 = vector.load %arg6[%c0_39, %c0_40, %c0_41] : memref<1x32x8xi32, #tpu.memory_space<vmem>>, vector<1x32x8xi32>
    %164 = vector.shape_cast %163 : vector<1x32x8xi32> to vector<32x8xi32>
    %165 = vector.shape_cast %162 : vector<32x8xi32> to vector<1x32x8xi32>
    tpu.vector_store %arg6[%c0_39, %c0_40, %c0_41], %165 {strides = array<i32>} : memref<1x32x8xi32, #tpu.memory_space<vmem>>, vector<1x32x8xi32>,
    %166 = arith.truncf %6 : vector<32x128xf32> to vector<32x128xbf16>
    %c0_42 = arith.constant 0 : index
    %c0_43 = arith.constant 0 : index
    %167 = vector.load %arg3[%c0_42, %c0_43] : memref<128x256xbf16, #tpu.memory_space<vmem>>, vector<128x256xbf16>
    %cst_44 = arith.constant dense<0.000000e+00> : vector<32x256xf32>
    %168 = tpu.matmul %166, %167, %cst_44 {dimension_numbers = #tpu.dot_dimension_numbers<[1], [0], [0], [1], [0, 0, 1, 1], [], []>} : vector<32x128xbf16>, vector<128x256xbf16>, vector<32x256xf32> -> vector<32x256xf32>
    %c0_45 = arith.constant 0 : index
    %c0_46 = arith.constant 0 : index
    %169 = vector.load %arg4[%c0_45, %c0_46] : memref<128x256xbf16, #tpu.memory_space<vmem>>, vector<128x256xbf16>
    %cst_47 = arith.constant dense<0.000000e+00> : vector<32x256xf32>
    %170 = tpu.matmul %166, %169, %cst_47 {dimension_numbers = #tpu.dot_dimension_numbers<[1], [0], [0], [1], [0, 0, 1, 1], [], []>} : vector<32x128xbf16>, vector<128x256xbf16>, vector<32x256xf32> -> vector<32x256xf32>
    %c0_48 = arith.constant 0 : index
    %c0_49 = arith.constant 0 : index
    %171 = vector.load %arg5[%c0_48, %c0_49] : memref<1x256xf32, #tpu.memory_space<vmem>>, vector<1x256xf32>
    %172 = vector.broadcast %171 : vector<1x256xf32> to vector<32x256xf32>
    %173 = arith.addf %170, %172 : vector<32x256xf32>
    %174 = arith.truncf %168 : vector<32x256xf32> to vector<32x256xbf16>
    %c0_50 = arith.constant 0 : index
    %c0_51 = arith.constant 0 : index
    %c0_52 = arith.constant 0 : index
    %175 = vector.load %arg7[%c0_50, %c0_51, %c0_52] : memref<1x32x256xbf16, #tpu.memory_space<vmem>>, vector<1x32x256xbf16>
    %176 = vector.shape_cast %175 : vector<1x32x256xbf16> to vector<32x256xbf16>
    %177 = vector.shape_cast %174 : vector<32x256xbf16> to vector<1x32x256xbf16>
    tpu.vector_store %arg7[%c0_50, %c0_51, %c0_52], %177 {strides = array<i32>} : memref<1x32x256xbf16, #tpu.memory_space<vmem>>, vector<1x32x256xbf16>,
    %178 = arith.truncf %173 : vector<32x256xf32> to vector<32x256xbf16>
    %c0_53 = arith.constant 0 : index
    %c0_54 = arith.constant 0 : index
    %c0_55 = arith.constant 0 : index
    %179 = vector.load %arg8[%c0_53, %c0_54, %c0_55] : memref<1x32x256xbf16, #tpu.memory_space<vmem>>, vector<1x32x256xbf16>
    %180 = vector.shape_cast %179 : vector<1x32x256xbf16> to vector<32x256xbf16>
    %181 = vector.shape_cast %178 : vector<32x256xbf16> to vector<1x32x256xbf16>
    tpu.vector_store %arg8[%c0_53, %c0_54, %c0_55], %181 {strides = array<i32>} : memref<1x32x256xbf16, #tpu.memory_space<vmem>>, vector<1x32x256xbf16>,
    return
  }
  func.func @transform_0(%arg0: i32, %arg1: i32) -> (i32, i32, i32) {
    %c0_i32 = arith.constant 0 : i32
    %c0_i32_0 = arith.constant 0 : i32
    %c0_i32_1 = arith.constant 0 : i32
    return %arg0, %c0_i32, %c0_i32_0 : i32, i32, i32
  }
  func.func @transform_1(%arg0: i32, %arg1: i32) -> (i32, i32) {
    %c0_i32 = arith.constant 0 : i32
    %c0_i32_0 = arith.constant 0 : i32
    %c0_i32_1 = arith.constant 0 : i32
    return %c0_i32, %c0_i32_0 : i32, i32
  }
  func.func @transform_2(%arg0: i32, %arg1: i32) -> (i32, i32) {
    %c0_i32 = arith.constant 0 : i32
    %c0_i32_0 = arith.constant 0 : i32
    %c0_i32_1 = arith.constant 0 : i32
    return %c0_i32, %c0_i32_0 : i32, i32
  }
  func.func @transform_3(%arg0: i32, %arg1: i32) -> (i32, i32) {
    %c0_i32 = arith.constant 0 : i32
    %c0_i32_0 = arith.constant 0 : i32
    %c0_i32_1 = arith.constant 0 : i32
    return %c0_i32, %c0_i32_0 : i32, i32
  }
  func.func @transform_4(%arg0: i32, %arg1: i32) -> (i32, i32, i32) {
    %c0_i32 = arith.constant 0 : i32
    %c0_i32_0 = arith.constant 0 : i32
    return %arg0, %arg1, %c0_i32 : i32, i32, i32
  }
  func.func @transform_5(%arg0: i32, %arg1: i32) -> (i32, i32, i32) {
    %c0_i32 = arith.constant 0 : i32
    %c0_i32_0 = arith.constant 0 : i32
    return %arg0, %arg1, %c0_i32 : i32, i32, i32
  }
  func.func @transform_6(%arg0: i32, %arg1: i32) -> (i32, i32, i32) {
    %c0_i32 = arith.constant 0 : i32
    %c0_i32_0 = arith.constant 0 : i32
    return %arg0, %arg1, %c0_i32 : i32, i32, i32
  }
}

module attributes {stable_mosaic.version = 11 : i64} {
  func.func @_edge_max_kernel(%arg0: i32, %arg1: i32, %arg2: memref<1x32x1024xbf16, #tpu.memory_space<vmem>>, %arg3: memref<1x32x128xbf16, #tpu.memory_space<vmem>>, %arg4: memref<1x32x128xf32, #tpu.memory_space<vmem>>) attributes {dimension_semantics = [#tpu.dimension_semantics<parallel>, #tpu.dimension_semantics<parallel>], iteration_bounds = array<i64: 2, 1>, scalar_prefetch = 0 : i64, scratch_operands = 0 : i64, tpu.core_type = #tpu.core_type<tc>, window_params = [{transform_indices = @transform_0, window_bounds = array<i64: 1, 32, 1024>}, {transform_indices = @transform_1, window_bounds = array<i64: 1, 32, 128>}, {transform_indices = @transform_2, window_bounds = array<i64: 1, 32, 128>}]} {
    %c0 = arith.constant 0 : index
    %c0_0 = arith.constant 0 : index
    %c0_1 = arith.constant 0 : index
    %0 = vector.load %arg2[%c0, %c0_0, %c0_1] : memref<1x32x1024xbf16, #tpu.memory_space<vmem>>, vector<1x32x1024xbf16>
    %1 = vector.shape_cast %0 : vector<1x32x1024xbf16> to vector<32x1024xbf16>
    %2 = vector.extract_strided_slice %1 {offsets = [0, 0], sizes = [32, 128], strides = [1, 1]} : vector<32x1024xbf16> to vector<32x128xbf16>
    %3 = vector.extract_strided_slice %1 {offsets = [0, 128], sizes = [32, 128], strides = [1, 1]} : vector<32x1024xbf16> to vector<32x128xbf16>
    %4 = arith.maximumf %2, %3 : vector<32x128xbf16>
    %5 = vector.extract_strided_slice %1 {offsets = [0, 256], sizes = [32, 128], strides = [1, 1]} : vector<32x1024xbf16> to vector<32x128xbf16>
    %6 = arith.maximumf %4, %5 : vector<32x128xbf16>
    %7 = vector.extract_strided_slice %1 {offsets = [0, 384], sizes = [32, 128], strides = [1, 1]} : vector<32x1024xbf16> to vector<32x128xbf16>
    %8 = arith.maximumf %6, %7 : vector<32x128xbf16>
    %9 = vector.extract_strided_slice %1 {offsets = [0, 512], sizes = [32, 128], strides = [1, 1]} : vector<32x1024xbf16> to vector<32x128xbf16>
    %10 = arith.maximumf %8, %9 : vector<32x128xbf16>
    %11 = vector.extract_strided_slice %1 {offsets = [0, 640], sizes = [32, 128], strides = [1, 1]} : vector<32x1024xbf16> to vector<32x128xbf16>
    %12 = arith.maximumf %10, %11 : vector<32x128xbf16>
    %13 = vector.extract_strided_slice %1 {offsets = [0, 768], sizes = [32, 128], strides = [1, 1]} : vector<32x1024xbf16> to vector<32x128xbf16>
    %14 = arith.maximumf %12, %13 : vector<32x128xbf16>
    %15 = vector.extract_strided_slice %1 {offsets = [0, 896], sizes = [32, 128], strides = [1, 1]} : vector<32x1024xbf16> to vector<32x128xbf16>
    %16 = arith.maximumf %14, %15 : vector<32x128xbf16>
    %17 = arith.extf %16 : vector<32x128xbf16> to vector<32x128xf32>
    %c0_2 = arith.constant 0 : index
    %c0_3 = arith.constant 0 : index
    %c0_4 = arith.constant 0 : index
    %18 = vector.load %arg3[%c0_2, %c0_3, %c0_4] : memref<1x32x128xbf16, #tpu.memory_space<vmem>>, vector<1x32x128xbf16>
    %19 = vector.shape_cast %18 : vector<1x32x128xbf16> to vector<32x128xbf16>
    %20 = arith.extf %19 : vector<32x128xbf16> to vector<32x128xf32>
    %21 = arith.addf %17, %20 : vector<32x128xf32>
    %cst = arith.constant 0.000000e+00 : f32
    %22 = vector.broadcast %cst : f32 to vector<32x128xf32>
    %23 = arith.cmpf ogt, %21, %22 : vector<32x128xf32>
    %cst_5 = arith.constant 2.000000e-01 : f32
    %24 = vector.broadcast %cst_5 : f32 to vector<32x128xf32>
    %25 = arith.mulf %24, %21 : vector<32x128xf32>
    %26 = arith.select %23, %21, %25 : vector<32x128xi1>, vector<32x128xf32>
    %c0_6 = arith.constant 0 : index
    %c0_7 = arith.constant 0 : index
    %c0_8 = arith.constant 0 : index
    %27 = vector.load %arg4[%c0_6, %c0_7, %c0_8] : memref<1x32x128xf32, #tpu.memory_space<vmem>>, vector<1x32x128xf32>
    %28 = vector.shape_cast %27 : vector<1x32x128xf32> to vector<32x128xf32>
    %29 = vector.shape_cast %26 : vector<32x128xf32> to vector<1x32x128xf32>
    tpu.vector_store %arg4[%c0_6, %c0_7, %c0_8], %29 {strides = array<i32>} : memref<1x32x128xf32, #tpu.memory_space<vmem>>, vector<1x32x128xf32>,
    return
  }
  func.func @transform_0(%arg0: i32, %arg1: i32) -> (i32, i32, i32) {
    %c0_i32 = arith.constant 0 : i32
    %c0_i32_0 = arith.constant 0 : i32
    return %arg0, %arg1, %c0_i32 : i32, i32, i32
  }
  func.func @transform_1(%arg0: i32, %arg1: i32) -> (i32, i32, i32) {
    %c0_i32 = arith.constant 0 : i32
    %c0_i32_0 = arith.constant 0 : i32
    return %arg0, %arg1, %c0_i32 : i32, i32, i32
  }
  func.func @transform_2(%arg0: i32, %arg1: i32) -> (i32, i32, i32) {
    %c0_i32 = arith.constant 0 : i32
    %c0_i32_0 = arith.constant 0 : i32
    return %arg0, %arg1, %c0_i32 : i32, i32, i32
  }
}

module attributes {stable_mosaic.version = 11 : i64} {
  func.func @_edge_max_kernel(%arg0: i32, %arg1: i32, %arg2: memref<1x32x2048xbf16, #tpu.memory_space<vmem>>, %arg3: memref<1x32x256xbf16, #tpu.memory_space<vmem>>, %arg4: memref<1x32x256xf32, #tpu.memory_space<vmem>>) attributes {dimension_semantics = [#tpu.dimension_semantics<parallel>, #tpu.dimension_semantics<parallel>], iteration_bounds = array<i64: 2, 1>, scalar_prefetch = 0 : i64, scratch_operands = 0 : i64, tpu.core_type = #tpu.core_type<tc>, window_params = [{transform_indices = @transform_0, window_bounds = array<i64: 1, 32, 2048>}, {transform_indices = @transform_1, window_bounds = array<i64: 1, 32, 256>}, {transform_indices = @transform_2, window_bounds = array<i64: 1, 32, 256>}]} {
    %c0 = arith.constant 0 : index
    %c0_0 = arith.constant 0 : index
    %c0_1 = arith.constant 0 : index
    %0 = vector.load %arg2[%c0, %c0_0, %c0_1] : memref<1x32x2048xbf16, #tpu.memory_space<vmem>>, vector<1x32x2048xbf16>
    %1 = vector.shape_cast %0 : vector<1x32x2048xbf16> to vector<32x2048xbf16>
    %2 = vector.extract_strided_slice %1 {offsets = [0, 0], sizes = [32, 256], strides = [1, 1]} : vector<32x2048xbf16> to vector<32x256xbf16>
    %3 = vector.extract_strided_slice %1 {offsets = [0, 256], sizes = [32, 256], strides = [1, 1]} : vector<32x2048xbf16> to vector<32x256xbf16>
    %4 = arith.maximumf %2, %3 : vector<32x256xbf16>
    %5 = vector.extract_strided_slice %1 {offsets = [0, 512], sizes = [32, 256], strides = [1, 1]} : vector<32x2048xbf16> to vector<32x256xbf16>
    %6 = arith.maximumf %4, %5 : vector<32x256xbf16>
    %7 = vector.extract_strided_slice %1 {offsets = [0, 768], sizes = [32, 256], strides = [1, 1]} : vector<32x2048xbf16> to vector<32x256xbf16>
    %8 = arith.maximumf %6, %7 : vector<32x256xbf16>
    %9 = vector.extract_strided_slice %1 {offsets = [0, 1024], sizes = [32, 256], strides = [1, 1]} : vector<32x2048xbf16> to vector<32x256xbf16>
    %10 = arith.maximumf %8, %9 : vector<32x256xbf16>
    %11 = vector.extract_strided_slice %1 {offsets = [0, 1280], sizes = [32, 256], strides = [1, 1]} : vector<32x2048xbf16> to vector<32x256xbf16>
    %12 = arith.maximumf %10, %11 : vector<32x256xbf16>
    %13 = vector.extract_strided_slice %1 {offsets = [0, 1536], sizes = [32, 256], strides = [1, 1]} : vector<32x2048xbf16> to vector<32x256xbf16>
    %14 = arith.maximumf %12, %13 : vector<32x256xbf16>
    %15 = vector.extract_strided_slice %1 {offsets = [0, 1792], sizes = [32, 256], strides = [1, 1]} : vector<32x2048xbf16> to vector<32x256xbf16>
    %16 = arith.maximumf %14, %15 : vector<32x256xbf16>
    %17 = arith.extf %16 : vector<32x256xbf16> to vector<32x256xf32>
    %c0_2 = arith.constant 0 : index
    %c0_3 = arith.constant 0 : index
    %c0_4 = arith.constant 0 : index
    %18 = vector.load %arg3[%c0_2, %c0_3, %c0_4] : memref<1x32x256xbf16, #tpu.memory_space<vmem>>, vector<1x32x256xbf16>
    %19 = vector.shape_cast %18 : vector<1x32x256xbf16> to vector<32x256xbf16>
    %20 = arith.extf %19 : vector<32x256xbf16> to vector<32x256xf32>
    %21 = arith.addf %17, %20 : vector<32x256xf32>
    %cst = arith.constant 0.000000e+00 : f32
    %22 = vector.broadcast %cst : f32 to vector<32x256xf32>
    %23 = arith.cmpf ogt, %21, %22 : vector<32x256xf32>
    %cst_5 = arith.constant 2.000000e-01 : f32
    %24 = vector.broadcast %cst_5 : f32 to vector<32x256xf32>
    %25 = arith.mulf %24, %21 : vector<32x256xf32>
    %26 = arith.select %23, %21, %25 : vector<32x256xi1>, vector<32x256xf32>
    %c0_6 = arith.constant 0 : index
    %c0_7 = arith.constant 0 : index
    %c0_8 = arith.constant 0 : index
    %27 = vector.load %arg4[%c0_6, %c0_7, %c0_8] : memref<1x32x256xf32, #tpu.memory_space<vmem>>, vector<1x32x256xf32>
    %28 = vector.shape_cast %27 : vector<1x32x256xf32> to vector<32x256xf32>
    %29 = vector.shape_cast %26 : vector<32x256xf32> to vector<1x32x256xf32>
    tpu.vector_store %arg4[%c0_6, %c0_7, %c0_8], %29 {strides = array<i32>} : memref<1x32x256xf32, #tpu.memory_space<vmem>>, vector<1x32x256xf32>,
    return
  }
  func.func @transform_0(%arg0: i32, %arg1: i32) -> (i32, i32, i32) {
    %c0_i32 = arith.constant 0 : i32
    %c0_i32_0 = arith.constant 0 : i32
    return %arg0, %arg1, %c0_i32 : i32, i32, i32
  }
  func.func @transform_1(%arg0: i32, %arg1: i32) -> (i32, i32, i32) {
    %c0_i32 = arith.constant 0 : i32
    %c0_i32_0 = arith.constant 0 : i32
    return %arg0, %arg1, %c0_i32 : i32, i32, i32
  }
  func.func @transform_2(%arg0: i32, %arg1: i32) -> (i32, i32, i32) {
    %c0_i32 = arith.constant 0 : i32
    %c0_i32_0 = arith.constant 0 : i32
    return %arg0, %arg1, %c0_i32 : i32, i32, i32
  }
}

module attributes {stable_mosaic.version = 11 : i64} {
  func.func @_conv5_pool_kernel(%arg0: i32, %arg1: i32, %arg2: i32, %arg3: memref<1x32x64xf32, #tpu.memory_space<vmem>>, %arg4: memref<1x32x64xf32, #tpu.memory_space<vmem>>, %arg5: memref<1x32x128xf32, #tpu.memory_space<vmem>>, %arg6: memref<1x32x256xf32, #tpu.memory_space<vmem>>, %arg7: memref<64x128xbf16, #tpu.memory_space<vmem>>, %arg8: memref<64x128xbf16, #tpu.memory_space<vmem>>, %arg9: memref<128x128xbf16, #tpu.memory_space<vmem>>, %arg10: memref<256x128xbf16, #tpu.memory_space<vmem>>, %arg11: memref<1x128xf32, #tpu.memory_space<vmem>>, %arg12: memref<1x2x128xf32, #tpu.memory_space<vmem>>) attributes {dimension_semantics = [#tpu.dimension_semantics<parallel>, #tpu.dimension_semantics<parallel>, #tpu.dimension_semantics<arbitrary>], iteration_bounds = array<i64: 2, 2, 1>, scalar_prefetch = 0 : i64, scratch_operands = 0 : i64, tpu.core_type = #tpu.core_type<tc>, window_params = [{transform_indices = @transform_0, window_bounds = array<i64: 1, 32, 64>}, {transform_indices = @transform_1, window_bounds = array<i64: 1, 32, 64>}, {transform_indices = @transform_2, window_bounds = array<i64: 1, 32, 128>}, {transform_indices = @transform_3, window_bounds = array<i64: 1, 32, 256>}, {transform_indices = @transform_4, window_bounds = array<i64: 64, 128>}, {transform_indices = @transform_5, window_bounds = array<i64: 64, 128>}, {transform_indices = @transform_6, window_bounds = array<i64: 128, 128>}, {transform_indices = @transform_7, window_bounds = array<i64: 256, 128>}, {transform_indices = @transform_8, window_bounds = array<i64: 1, 128>}, {transform_indices = @transform_9, window_bounds = array<i64: 1, 2, 128>}]} {
    %c0 = arith.constant 0 : index
    %c0_0 = arith.constant 0 : index
    %c0_1 = arith.constant 0 : index
    %0 = vector.load %arg3[%c0, %c0_0, %c0_1] : memref<1x32x64xf32, #tpu.memory_space<vmem>>, vector<1x32x64xf32>
    %1 = vector.shape_cast %0 : vector<1x32x64xf32> to vector<32x64xf32>
    %2 = arith.truncf %1 : vector<32x64xf32> to vector<32x64xbf16>
    %c0_2 = arith.constant 0 : index
    %c0_3 = arith.constant 0 : index
    %3 = vector.load %arg7[%c0_2, %c0_3] : memref<64x128xbf16, #tpu.memory_space<vmem>>, vector<64x128xbf16>
    %cst = arith.constant dense<0.000000e+00> : vector<32x128xf32>
    %4 = tpu.matmul %2, %3, %cst {dimension_numbers = #tpu.dot_dimension_numbers<[1], [0], [0], [1], [0, 0, 1, 1], [], []>} : vector<32x64xbf16>, vector<64x128xbf16>, vector<32x128xf32> -> vector<32x128xf32>
    %c0_4 = arith.constant 0 : index
    %c0_5 = arith.constant 0 : index
    %c0_6 = arith.constant 0 : index
    %5 = vector.load %arg4[%c0_4, %c0_5, %c0_6] : memref<1x32x64xf32, #tpu.memory_space<vmem>>, vector<1x32x64xf32>
    %6 = vector.shape_cast %5 : vector<1x32x64xf32> to vector<32x64xf32>
    %7 = arith.truncf %6 : vector<32x64xf32> to vector<32x64xbf16>
    %c0_7 = arith.constant 0 : index
    %c0_8 = arith.constant 0 : index
    %8 = vector.load %arg8[%c0_7, %c0_8] : memref<64x128xbf16, #tpu.memory_space<vmem>>, vector<64x128xbf16>
    %cst_9 = arith.constant dense<0.000000e+00> : vector<32x128xf32>
    %9 = tpu.matmul %7, %8, %cst_9 {dimension_numbers = #tpu.dot_dimension_numbers<[1], [0], [0], [1], [0, 0, 1, 1], [], []>} : vector<32x64xbf16>, vector<64x128xbf16>, vector<32x128xf32> -> vector<32x128xf32>
    %10 = arith.addf %4, %9 : vector<32x128xf32>
    %c0_10 = arith.constant 0 : index
    %c0_11 = arith.constant 0 : index
    %c0_12 = arith.constant 0 : index
    %11 = vector.load %arg5[%c0_10, %c0_11, %c0_12] : memref<1x32x128xf32, #tpu.memory_space<vmem>>, vector<1x32x128xf32>
    %12 = vector.shape_cast %11 : vector<1x32x128xf32> to vector<32x128xf32>
    %13 = arith.truncf %12 : vector<32x128xf32> to vector<32x128xbf16>
    %c0_13 = arith.constant 0 : index
    %c0_14 = arith.constant 0 : index
    %14 = vector.load %arg9[%c0_13, %c0_14] : memref<128x128xbf16, #tpu.memory_space<vmem>>, vector<128x128xbf16>
    %cst_15 = arith.constant dense<0.000000e+00> : vector<32x128xf32>
    %15 = tpu.matmul %13, %14, %cst_15 {dimension_numbers = #tpu.dot_dimension_numbers<[1], [0], [0], [1], [0, 0, 1, 1], [], []>} : vector<32x128xbf16>, vector<128x128xbf16>, vector<32x128xf32> -> vector<32x128xf32>
    %16 = arith.addf %10, %15 : vector<32x128xf32>
    %c0_16 = arith.constant 0 : index
    %c0_17 = arith.constant 0 : index
    %c0_18 = arith.constant 0 : index
    %17 = vector.load %arg6[%c0_16, %c0_17, %c0_18] : memref<1x32x256xf32, #tpu.memory_space<vmem>>, vector<1x32x256xf32>
    %18 = vector.shape_cast %17 : vector<1x32x256xf32> to vector<32x256xf32>
    %19 = arith.truncf %18 : vector<32x256xf32> to vector<32x256xbf16>
    %c0_19 = arith.constant 0 : index
    %c0_20 = arith.constant 0 : index
    %20 = vector.load %arg10[%c0_19, %c0_20] : memref<256x128xbf16, #tpu.memory_space<vmem>>, vector<256x128xbf16>
    %cst_21 = arith.constant dense<0.000000e+00> : vector<32x128xf32>
    %21 = tpu.matmul %19, %20, %cst_21 {dimension_numbers = #tpu.dot_dimension_numbers<[1], [0], [0], [1], [0, 0, 1, 1], [], []>} : vector<32x256xbf16>, vector<256x128xbf16>, vector<32x128xf32> -> vector<32x128xf32>
    %22 = arith.addf %16, %21 : vector<32x128xf32>
    %c0_22 = arith.constant 0 : index
    %c0_23 = arith.constant 0 : index
    %23 = vector.load %arg11[%c0_22, %c0_23] : memref<1x128xf32, #tpu.memory_space<vmem>>, vector<1x128xf32>
    %24 = vector.broadcast %23 : vector<1x128xf32> to vector<32x128xf32>
    %25 = arith.addf %22, %24 : vector<32x128xf32>
    %cst_24 = arith.constant 0.000000e+00 : f32
    %26 = vector.broadcast %cst_24 : f32 to vector<32x128xf32>
    %27 = arith.cmpf ogt, %25, %26 : vector<32x128xf32>
    %cst_25 = arith.constant 2.000000e-01 : f32
    %28 = vector.broadcast %cst_25 : f32 to vector<32x128xf32>
    %29 = arith.mulf %28, %25 : vector<32x128xf32>
    %30 = arith.select %27, %25, %29 : vector<32x128xi1>, vector<32x128xf32>
    %cst_26 = arith.constant dense<0xFF800000> : vector<128xf32>
    %31 = vector.multi_reduction <maximumf>, %30, %cst_26 [0] : vector<32x128xf32> to vector<128xf32>
    %32 = vector.shape_cast %31 : vector<128xf32> to vector<1x128xf32>
    %cst_27 = arith.constant dense<0.000000e+00> : vector<128xf32>
    %33 = vector.multi_reduction <add>, %30, %cst_27 [0] : vector<32x128xf32> to vector<128xf32>
    %34 = vector.shape_cast %33 : vector<128xf32> to vector<1x128xf32>
    %c0_i32 = arith.constant 0 : i32
    %35 = arith.cmpi eq, %arg2, %c0_i32 : i32
    %36 = arith.extui %35 : i1 to i32
    %c0_i32_28 = arith.constant 0 : i32
    %37 = arith.cmpi ne, %36, %c0_i32_28 : i32
    scf.if %37 {
      %c0_33 = arith.constant 0 : index
      %c0_34 = arith.constant 0 : index
      %c0_35 = arith.constant 0 : index
      %44 = vector.load %arg12[%c0_33, %c0_34, %c0_35] : memref<1x2x128xf32, #tpu.memory_space<vmem>>, vector<1x1x128xf32>
      %45 = vector.shape_cast %44 : vector<1x1x128xf32> to vector<1x128xf32>
      %46 = vector.shape_cast %32 : vector<1x128xf32> to vector<1x1x128xf32>
      tpu.vector_store %arg12[%c0_33, %c0_34, %c0_35], %46 {strides = array<i32>} : memref<1x2x128xf32, #tpu.memory_space<vmem>>, vector<1x1x128xf32>,
      %c0_36 = arith.constant 0 : index
      %c1 = arith.constant 1 : index
      %c0_37 = arith.constant 0 : index
      %47 = vector.load %arg12[%c0_36, %c1, %c0_37] : memref<1x2x128xf32, #tpu.memory_space<vmem>>, vector<1x1x128xf32>
      %48 = vector.shape_cast %47 : vector<1x1x128xf32> to vector<1x128xf32>
      %49 = vector.shape_cast %34 : vector<1x128xf32> to vector<1x1x128xf32>
      tpu.vector_store %arg12[%c0_36, %c1, %c0_37], %49 {strides = array<i32>} : memref<1x2x128xf32, #tpu.memory_space<vmem>>, vector<1x1x128xf32>,
    } else {
    }
    %c0_i32_29 = arith.constant 0 : i32
    %38 = arith.cmpi sgt, %arg2, %c0_i32_29 : i32
    %39 = arith.extui %38 : i1 to i32
    %c0_i32_30 = arith.constant 0 : i32
    %40 = arith.cmpi ne, %39, %c0_i32_30 : i32
    scf.if %40 {
      %c0_33 = arith.constant 0 : index
      %c0_34 = arith.constant 0 : index
      %c0_35 = arith.constant 0 : index
      %44 = vector.load %arg12[%c0_33, %c0_34, %c0_35] : memref<1x2x128xf32, #tpu.memory_space<vmem>>, vector<1x1x128xf32>
      %45 = vector.shape_cast %44 : vector<1x1x128xf32> to vector<1x128xf32>
      %46 = arith.maximumf %45, %32 : vector<1x128xf32>
      %c0_36 = arith.constant 0 : index
      %c0_37 = arith.constant 0 : index
      %c0_38 = arith.constant 0 : index
      %47 = vector.load %arg12[%c0_36, %c0_37, %c0_38] : memref<1x2x128xf32, #tpu.memory_space<vmem>>, vector<1x1x128xf32>
      %48 = vector.shape_cast %47 : vector<1x1x128xf32> to vector<1x128xf32>
      %49 = vector.shape_cast %46 : vector<1x128xf32> to vector<1x1x128xf32>
      tpu.vector_store %arg12[%c0_36, %c0_37, %c0_38], %49 {strides = array<i32>} : memref<1x2x128xf32, #tpu.memory_space<vmem>>, vector<1x1x128xf32>,
      %c0_39 = arith.constant 0 : index
      %c1 = arith.constant 1 : index
      %c0_40 = arith.constant 0 : index
      %50 = vector.load %arg12[%c0_39, %c1, %c0_40] : memref<1x2x128xf32, #tpu.memory_space<vmem>>, vector<1x1x128xf32>
      %51 = vector.shape_cast %50 : vector<1x1x128xf32> to vector<1x128xf32>
      %52 = arith.addf %51, %34 : vector<1x128xf32>
      %c0_41 = arith.constant 0 : index
      %c1_42 = arith.constant 1 : index
      %c0_43 = arith.constant 0 : index
      %53 = vector.load %arg12[%c0_41, %c1_42, %c0_43] : memref<1x2x128xf32, #tpu.memory_space<vmem>>, vector<1x1x128xf32>
      %54 = vector.shape_cast %53 : vector<1x1x128xf32> to vector<1x128xf32>
      %55 = vector.shape_cast %52 : vector<1x128xf32> to vector<1x1x128xf32>
      tpu.vector_store %arg12[%c0_41, %c1_42, %c0_43], %55 {strides = array<i32>} : memref<1x2x128xf32, #tpu.memory_space<vmem>>, vector<1x1x128xf32>,
    } else {
    }
    %c0_i32_31 = arith.constant 0 : i32
    %41 = arith.cmpi eq, %arg2, %c0_i32_31 : i32
    %42 = arith.extui %41 : i1 to i32
    %c0_i32_32 = arith.constant 0 : i32
    %43 = arith.cmpi ne, %42, %c0_i32_32 : i32
    scf.if %43 {
      %c0_33 = arith.constant 0 : index
      %c1 = arith.constant 1 : index
      %c0_34 = arith.constant 0 : index
      %44 = vector.load %arg12[%c0_33, %c1, %c0_34] : memref<1x2x128xf32, #tpu.memory_space<vmem>>, vector<1x1x128xf32>
      %45 = vector.shape_cast %44 : vector<1x1x128xf32> to vector<1x128xf32>
      %cst_35 = arith.constant 3.125000e-02 : f32
      %46 = vector.broadcast %cst_35 : f32 to vector<1x128xf32>
      %47 = arith.mulf %45, %46 : vector<1x128xf32>
      %c0_36 = arith.constant 0 : index
      %c1_37 = arith.constant 1 : index
      %c0_38 = arith.constant 0 : index
      %48 = vector.load %arg12[%c0_36, %c1_37, %c0_38] : memref<1x2x128xf32, #tpu.memory_space<vmem>>, vector<1x1x128xf32>
      %49 = vector.shape_cast %48 : vector<1x1x128xf32> to vector<1x128xf32>
      %50 = vector.shape_cast %47 : vector<1x128xf32> to vector<1x1x128xf32>
      tpu.vector_store %arg12[%c0_36, %c1_37, %c0_38], %50 {strides = array<i32>} : memref<1x2x128xf32, #tpu.memory_space<vmem>>, vector<1x1x128xf32>,
    } else {
    }
    return
  }
  func.func @transform_0(%arg0: i32, %arg1: i32, %arg2: i32) -> (i32, i32, i32) {
    %c0_i32 = arith.constant 0 : i32
    %c0_i32_0 = arith.constant 0 : i32
    return %arg0, %arg2, %c0_i32 : i32, i32, i32
  }
  func.func @transform_1(%arg0: i32, %arg1: i32, %arg2: i32) -> (i32, i32, i32) {
    %c0_i32 = arith.constant 0 : i32
    %c0_i32_0 = arith.constant 0 : i32
    return %arg0, %arg2, %c0_i32 : i32, i32, i32
  }
  func.func @transform_2(%arg0: i32, %arg1: i32, %arg2: i32) -> (i32, i32, i32) {
    %c0_i32 = arith.constant 0 : i32
    %c0_i32_0 = arith.constant 0 : i32
    return %arg0, %arg2, %c0_i32 : i32, i32, i32
  }
  func.func @transform_3(%arg0: i32, %arg1: i32, %arg2: i32) -> (i32, i32, i32) {
    %c0_i32 = arith.constant 0 : i32
    %c0_i32_0 = arith.constant 0 : i32
    return %arg0, %arg2, %c0_i32 : i32, i32, i32
  }
  func.func @transform_4(%arg0: i32, %arg1: i32, %arg2: i32) -> (i32, i32) {
    %c0_i32 = arith.constant 0 : i32
    %c0_i32_0 = arith.constant 0 : i32
    return %c0_i32, %arg1 : i32, i32
  }
  func.func @transform_5(%arg0: i32, %arg1: i32, %arg2: i32) -> (i32, i32) {
    %c0_i32 = arith.constant 0 : i32
    %c0_i32_0 = arith.constant 0 : i32
    return %c0_i32, %arg1 : i32, i32
  }
  func.func @transform_6(%arg0: i32, %arg1: i32, %arg2: i32) -> (i32, i32) {
    %c0_i32 = arith.constant 0 : i32
    %c0_i32_0 = arith.constant 0 : i32
    return %c0_i32, %arg1 : i32, i32
  }
  func.func @transform_7(%arg0: i32, %arg1: i32, %arg2: i32) -> (i32, i32) {
    %c0_i32 = arith.constant 0 : i32
    %c0_i32_0 = arith.constant 0 : i32
    return %c0_i32, %arg1 : i32, i32
  }
  func.func @transform_8(%arg0: i32, %arg1: i32, %arg2: i32) -> (i32, i32) {
    %c0_i32 = arith.constant 0 : i32
    %c0_i32_0 = arith.constant 0 : i32
    return %c0_i32, %arg1 : i32, i32
  }
  func.func @transform_9(%arg0: i32, %arg1: i32, %arg2: i32) -> (i32, i32, i32) {
    %c0_i32 = arith.constant 0 : i32
    %c0_i32_0 = arith.constant 0 : i32
    return %arg0, %c0_i32, %arg1 : i32, i32, i32
  }
}

module attributes {stable_mosaic.version = 11 : i64} {
  func.func @_head_kernel(%arg0: memref<2x512xf32, #tpu.memory_space<vmem>>, %arg1: memref<512x512xbf16, #tpu.memory_space<vmem>>, %arg2: memref<1x512xf32, #tpu.memory_space<vmem>>, %arg3: memref<512x256xbf16, #tpu.memory_space<vmem>>, %arg4: memref<1x256xf32, #tpu.memory_space<vmem>>, %arg5: memref<256x40xbf16, #tpu.memory_space<vmem>>, %arg6: memref<1x40xf32, #tpu.memory_space<vmem>>, %arg7: memref<2x40xf32, #tpu.memory_space<vmem>>) attributes {dimension_semantics = [], scalar_prefetch = 0 : i64, scratch_operands = 0 : i64, tpu.core_type = #tpu.core_type<tc>} {
    %c0 = arith.constant 0 : index
    %c0_0 = arith.constant 0 : index
    %0 = vector.load %arg0[%c0, %c0_0] : memref<2x512xf32, #tpu.memory_space<vmem>>, vector<2x512xf32>
    %1 = arith.truncf %0 : vector<2x512xf32> to vector<2x512xbf16>
    %c0_1 = arith.constant 0 : index
    %c0_2 = arith.constant 0 : index
    %2 = vector.load %arg1[%c0_1, %c0_2] : memref<512x512xbf16, #tpu.memory_space<vmem>>, vector<512x512xbf16>
    %cst = arith.constant dense<0.000000e+00> : vector<2x512xf32>
    %3 = tpu.matmul %1, %2, %cst {dimension_numbers = #tpu.dot_dimension_numbers<[1], [0], [0], [1], [0, 0, 1, 1], [], []>} : vector<2x512xbf16>, vector<512x512xbf16>, vector<2x512xf32> -> vector<2x512xf32>
    %c0_3 = arith.constant 0 : index
    %c0_4 = arith.constant 0 : index
    %4 = vector.load %arg2[%c0_3, %c0_4] : memref<1x512xf32, #tpu.memory_space<vmem>>, vector<1x512xf32>
    %5 = vector.broadcast %4 : vector<1x512xf32> to vector<2x512xf32>
    %6 = arith.addf %3, %5 : vector<2x512xf32>
    %cst_5 = arith.constant 0.000000e+00 : f32
    %7 = vector.broadcast %cst_5 : f32 to vector<2x512xf32>
    %8 = arith.cmpf ogt, %6, %7 : vector<2x512xf32>
    %cst_6 = arith.constant 2.000000e-01 : f32
    %9 = vector.broadcast %cst_6 : f32 to vector<2x512xf32>
    %10 = arith.mulf %9, %6 : vector<2x512xf32>
    %11 = arith.select %8, %6, %10 : vector<2x512xi1>, vector<2x512xf32>
    %12 = arith.truncf %11 : vector<2x512xf32> to vector<2x512xbf16>
    %c0_7 = arith.constant 0 : index
    %c0_8 = arith.constant 0 : index
    %13 = vector.load %arg3[%c0_7, %c0_8] : memref<512x256xbf16, #tpu.memory_space<vmem>>, vector<512x256xbf16>
    %cst_9 = arith.constant dense<0.000000e+00> : vector<2x256xf32>
    %14 = tpu.matmul %12, %13, %cst_9 {dimension_numbers = #tpu.dot_dimension_numbers<[1], [0], [0], [1], [0, 0, 1, 1], [], []>} : vector<2x512xbf16>, vector<512x256xbf16>, vector<2x256xf32> -> vector<2x256xf32>
    %c0_10 = arith.constant 0 : index
    %c0_11 = arith.constant 0 : index
    %15 = vector.load %arg4[%c0_10, %c0_11] : memref<1x256xf32, #tpu.memory_space<vmem>>, vector<1x256xf32>
    %16 = vector.broadcast %15 : vector<1x256xf32> to vector<2x256xf32>
    %17 = arith.addf %14, %16 : vector<2x256xf32>
    %cst_12 = arith.constant 0.000000e+00 : f32
    %18 = vector.broadcast %cst_12 : f32 to vector<2x256xf32>
    %19 = arith.cmpf ogt, %17, %18 : vector<2x256xf32>
    %cst_13 = arith.constant 2.000000e-01 : f32
    %20 = vector.broadcast %cst_13 : f32 to vector<2x256xf32>
    %21 = arith.mulf %20, %17 : vector<2x256xf32>
    %22 = arith.select %19, %17, %21 : vector<2x256xi1>, vector<2x256xf32>
    %23 = arith.truncf %22 : vector<2x256xf32> to vector<2x256xbf16>
    %c0_14 = arith.constant 0 : index
    %c0_15 = arith.constant 0 : index
    %24 = vector.load %arg5[%c0_14, %c0_15] : memref<256x40xbf16, #tpu.memory_space<vmem>>, vector<256x40xbf16>
    %cst_16 = arith.constant dense<0.000000e+00> : vector<2x40xf32>
    %25 = tpu.matmul %23, %24, %cst_16 {dimension_numbers = #tpu.dot_dimension_numbers<[1], [0], [0], [1], [0, 0, 1, 1], [], []>} : vector<2x256xbf16>, vector<256x40xbf16>, vector<2x40xf32> -> vector<2x40xf32>
    %c0_17 = arith.constant 0 : index
    %c0_18 = arith.constant 0 : index
    %26 = vector.load %arg6[%c0_17, %c0_18] : memref<1x40xf32, #tpu.memory_space<vmem>>, vector<1x40xf32>
    %27 = vector.broadcast %26 : vector<1x40xf32> to vector<2x40xf32>
    %28 = arith.addf %25, %27 : vector<2x40xf32>
    %cst_19 = arith.constant dense<0xFF800000> : vector<2xf32>
    %29 = vector.multi_reduction <maximumf>, %28, %cst_19 [1] : vector<2x40xf32> to vector<2xf32>
    %30 = vector.shape_cast %29 : vector<2xf32> to vector<2x1xf32>
    %31 = vector.broadcast %30 : vector<2x1xf32> to vector<2x40xf32>
    %32 = arith.subf %28, %31 : vector<2x40xf32>
    %33 = math.exp %32 : vector<2x40xf32>
    %cst_20 = arith.constant dense<0.000000e+00> : vector<2xf32>
    %34 = vector.multi_reduction <add>, %33, %cst_20 [1] : vector<2x40xf32> to vector<2xf32>
    %35 = vector.shape_cast %34 : vector<2xf32> to vector<2x1xf32>
    %36 = math.log %35 : vector<2x1xf32>
    %37 = vector.broadcast %36 : vector<2x1xf32> to vector<2x40xf32>
    %38 = arith.subf %32, %37 : vector<2x40xf32>
    %c0_21 = arith.constant 0 : index
    %c0_22 = arith.constant 0 : index
    %39 = vector.load %arg7[%c0_21, %c0_22] : memref<2x40xf32, #tpu.memory_space<vmem>>, vector<2x40xf32>
    tpu.vector_store %arg7[%c0_21, %c0_22], %38 {strides = array<i32>} : memref<2x40xf32, #tpu.memory_space<vmem>>, vector<2x40xf32>,
    return
  }
}

</mosaic_0001>

<bundles_post_ra>
// kernel: dgcnn_forward.10
= control target key start
LH: loop header
LB: loop body
LE: loop exit
PB: predicated region body
PF: predicated region fallthrough
CT: control target
= control target key end

     0   :  { %s1396_s21 = smov 0   ;;  %s1398_s22 = smov 0   ;;  %s1947_s0 = inlined_call_operand.vmem [shape: f32[2,32,3], index: 0, kind: input, shape index: {}]   ;;  %s1948_s1 = inlined_call_operand.vmem [shape: bf16[3,64], index: 1, kind: input, shape index: {}]   ;;  %s1949_s2 = inlined_call_operand.vmem [shape: bf16[3,64], index: 2, kind: input, shape index: {}]   ;;  %s1950_s3 = inlined_call_operand.vmem [shape: f32[1,64], index: 3, kind: input, shape index: {}]   ;;  %s1951_s4 = inlined_call_operand.vmem [shape: s32[2,32,8], index: 4, kind: output, shape index: {0}]   ;;  %s1952_s5 = inlined_call_operand.vmem [shape: bf16[2,32,64], index: 5, kind: output, shape index: {1}]   ;;  %s1953_s6 = inlined_call_operand.vmem [shape: bf16[2,32,64], index: 6, kind: output, shape index: {2}]  }
   0x1   :  { %s1400_s23 = smov 0  }
   0x2 LB: > { %s29_s24 = sadd.s32 1, %s1353_s22  ;;  %p1114_p0 = scmp.ge.s32.totalorder %s1357_s23, 1  ;;  %s1357_s23 = sphi %s1400_s23, %s17_s23   ;;  %s1353_s22 = sphi %s1398_s22, %s1955_s22   ;;  %s1349_s21 = sphi %s1396_s21, %s1954_s21  }
   0x3   : > { %p31_p1 = scmp.ge.s32.totalorder %s29_s24, 2  ;;  %p235_p2 = scmp.lt.s32.totalorder %s1357_s23, 3 }
   0x5   : > { %s1957_s24 = smov (%p31_p1, %s29_s24), 0  ;;  %p236_p3 = pnand %p1114_p0, %p235_p2 }
   0x6   : > { %p287_p4 = scmp.lt.s32.totalorder (!%p236_p3), %s1349_s21, 1 }
   0x7   : > { %239 = sbr.rel (%p236_p3) target bundleno = 2129 (0x851), region = 36 }
   0xc   : > { %s1959_s21 = smov (!%p287_p4, %s1349_s21), 1  ;;  %vm337_vm0 = vcmask 23552   ;;  %v1359_v13 = vmov 1.0   ;;  %vm458_vm1 = vcmask 261120   ;;  %v455_v39 = vlaneseq }
   0xd   : > { %s1142_s25 = sshll.u32 %s1959_s21, 5  ;;  %s1144_s11 = sshll.u32 %s1959_s21, 4 }
   0xe   : > { %s1422_s28 = scalar_lea.vmem %s1947_s0, %s1142_s25  ;;  %v1466_v40 = vand.u32 127, %v455_v39  ;;  %s1889_s14 = scalar_lea.vmem %s1952_s5, %s1144_s11 }
   0xf   : > { %v327_v0 = vld [vmem:[%s1422_s28 + $0x18] sm:$0xff]  ;;  %v326_v1 = vld [vmem:[%s1422_s28 + $0x10] sm:$0xff]  ;;  %v1428_v3 = vld [vmem:[%s1422_s28] sm:$0xff]  ;;  %s1895_s17 = scalar_lea.vmem %s1953_s6, %s1144_s11  ;;  %s300_s20 = scalar_lea.vmem %s1951_s4, %s1142_s25 }
  0x10   : > { %1123 = vmatpush.xpose.msk.msra.mxu0 %vm337_vm0, %v327_v0  ;;  %v410_v2 = vmul.f32 %v327_v0, %v327_v0  ;;  %v407_v4 = vmul.f32 %v1428_v3, %v1428_v3  ;;  %v409_v5 = vmul.f32 %v326_v1, %v326_v1  ;;  %v1434_v6 = vld [vmem:[%s1422_s28 + $0x8] sm:$0xff]  ;;  %v333_v11 = vadd.f32 %v1428_v3, %v1428_v3 }
  0x11   : > { %v408_v8 = vmul.f32 %v1434_v6, %v1434_v6  ;;  %v334_v14 = vadd.f32 %v1434_v6, %v1434_v6  ;;  %v335_v15 = vadd.f32 %v326_v1, %v326_v1  ;;  %v336_v16 = vadd.f32 %v327_v0, %v327_v0 }
  0x12   : > { %1131 = vmatpush.xpose.msk.msra.mxu1 %vm337_vm0, %v410_v2  ;;  %v395_v7 = vsel %vm337_vm0, %v407_v4, 0.0  ;;  %v401_v9 = vsel %vm337_vm0, %v409_v5, 0.0  ;;  %v404_v12 = vsel %vm337_vm0, %v410_v2, 0.0  ;;  %v1469_v41 = vcvt.s32.f32 %v1466_v40 }
  0x13   : > { %396 = vadd.xlane.f32.xlu0 %v395_v7  ;;  %402 = vadd.xlane.f32.xlu1 %v401_v9  ;;  %v398_v10 = vsel %vm337_vm0, %v408_v8, 0.0 }
  0x14   : > { %1124 = vmatpush.xpose.msk.msra.mxu0 %vm337_vm0, %v326_v1 }
  0x16   : > { %1132 = vmatpush.xpose.msk.msra.mxu1 %vm337_vm0, %v409_v5 }
  0x18   : > { %1125 = vmatpush.xpose.msk.msra.mxu0 %vm337_vm0, %v1434_v6 }
  0x1a   : > { %1133 = vmatpush.xpose.msk.msra.mxu1 %vm337_vm0, %v408_v8 }
  0x1b   : > { %399 = vadd.xlane.f32.xlu0 %v398_v10  ;;  %405 = vadd.xlane.f32.xlu1 %v404_v12 }
  0x1c   : > { %1126 = vmatpush.xpose.msk.msra.mxu0 %vm337_vm0, %v1428_v3 }
  0x1e   : > { %1134 = vmatpush.xpose.msk.msra.mxu1 %vm337_vm0, %v407_v4 }
  0x1f   : > { %1127 = vmatmul.msk.f32.vlgmr.msra.gmra.mxu0 %vm337_vm0, %v333_v11 }
  0x21   : > { %1135 = vmatmul.msk.f32.vlgmr.msra.gmra.mxu1 %vm337_vm0, %v1359_v13 }
  0x27   : > { %1128 = vmatmul.msk.f32.gmra.mxu0 %vm337_vm0, %v334_v14 }
  0x2f   : > { %1129 = vmatmul.msk.f32.gmra.mxu0 %vm337_vm0, %v335_v15 }
  0x37   : > { %1130 = vmatmul.msk.f32.gmra.mxu0 %vm337_vm0, %v336_v16 }
  0x86   : > { %v397_v17 = vpop.xlane.xlu0 %396  ;;  %v403_v28 = vpop.xlane.xlu1 %402 }
  0x8e   : > { %v400_v23 = vpop.xlane.xlu0 %399  ;;  %v406_v34 = vpop.xlane.xlu1 %405 }
  0x9c   : > { %v379_v18 = vpop.f32.mrf.mxu0 }
  0x9d   : > { %v446_v20 = vsub.f32 %v379_v18, %v397_v17 }
  0x9e   : > { %v443_v19 = vpop.f32.mrf.mxu1 }
  0x9f   : > { %v450_v21 = vperm.slane %v443_v19, 0 }
  0xa1   : > { %v451_v22 = vsub.f32 %v446_v20, %v450_v21 }
  0xa3   : > { %v459_v24 = vsel %vm458_vm1, %v451_v22, -inf }
  0xa4   : > { %460 = vmax.xlane.f32.xlu2 %v459_v24  ;;  %v382_v25 = vpop.f32.mrf.mxu0 }
  0xa5   : > { %v447_v26 = vsub.f32 %v382_v25, %v400_v23 }
  0xa7   : > { %v452_v27 = vsub.f32 %v447_v26, %v450_v21 }
  0xa9   : > { %v462_v29 = vsel %vm458_vm1, %v452_v27, -inf }
  0xac   : > { %463 = vmax.xlane.f32.xlu2 %v462_v29  ;;  %v385_v30 = vpop.f32.mrf.mxu0 }
  0xad   : > { %v448_v31 = vsub.f32 %v385_v30, %v403_v28 }
  0xaf   : > { %v453_v32 = vsub.f32 %v448_v31, %v450_v21 }
  0xb1   : > { %v465_v33 = vsel %vm458_vm1, %v453_v32, -inf }
  0xb2   : > { %466 = vmax.xlane.f32.xlu0 %v465_v33 }
  0xb4   : > { %v388_v35 = vpop.f32.mrf.mxu0 }
  0xb5   : > { %v449_v36 = vsub.f32 %v388_v35, %v406_v34 }
  0xb7   : > { %v1462_v37 = vsub.f32 %v449_v36, %v450_v21 }
  0xb9   : > { %v468_v38 = vsel %vm458_vm1, %v1462_v37, -inf }
  0xba   : > { %469 = vmax.xlane.f32.xlu1 %v468_v38 }
 0x117   : > { %v461_v42 = vpop.xlane.xlu2 %460 }
 0x118   : > { %vm471_vm2 = vcmp.eq.f32.partialorder %v451_v22, %v461_v42 }
 0x119   : > { %v475_v43 = vsel %vm471_vm2, %v1469_v41, 32.0 }
 0x11a   : > { %v479_v44 = vsel %vm458_vm1, %v475_v43, inf }
 0x11b   : > { %480 = vmin.xlane.f32.xlu2 %v479_v44 }
 0x11f   : > { %v464_v45 = vpop.xlane.xlu2 %463 }
 0x120   : > { %vm472_vm3 = vcmp.eq.f32.partialorder %v452_v27, %v464_v45 }
 0x121   : > { %v476_v46 = vsel %vm472_vm3, %v1469_v41, 32.0 }
 0x122   : > { %v482_v47 = vsel %vm458_vm1, %v476_v46, inf }
 0x123   : > { %483 = vmin.xlane.f32.xlu0 %v482_v47 }
 0x125   : > { %v467_v48 = vpop.xlane.xlu0 %466 }
 0x126   : > { %vm473_vm4 = vcmp.eq.f32.partialorder %v453_v32, %v467_v48 }
 0x127   : > { %v477_v49 = vsel %vm473_vm4, %v1469_v41, 32.0 }
 0x128   : > { %v485_v50 = vsel %vm458_vm1, %v477_v49, inf }
 0x129   : > { %486 = vmin.xlane.f32.xlu1 %v485_v50 }
 0x12d   : > { %v470_v51 = vpop.xlane.xlu1 %469 }
 0x12e   : > { %vm474_vm5 = vcmp.eq.f32.partialorder %v1462_v37, %v470_v51 }
 0x12f   : > { %v478_v52 = vsel %vm474_vm5, %v1469_v41, 32.0  ;;  %vm503_vm5 = vcmp.eq.s32.totalorder %v1466_v40, 0 }
 0x130   : > { %v488_v53 = vsel %vm458_vm1, %v478_v52, inf }
 0x131   : > { %489 = vmin.xlane.f32.xlu2 %v488_v53 }
 0x18e   : > { %v481_v54 = vpop.xlane.xlu2 %480 }
 0x18f   : > { %vm1146_vm6 = vcmp.lt.s32.totalorder %v481_v54, 0  ;;  %v1147_v55 = vceil.f32 %v481_v54  ;;  %v1148_v56 = vfloor.f32 %v481_v54 }
 0x191   : > { %v1480_v57 = vsel %vm1146_vm6, %v1147_v55, %v1148_v56  ;;  %vm552_vm6 = vcmp.eq.s32.totalorder %v1466_v40, 1 }
 0x192   : > { %v1150_v58 = vcvt.f32.s32 %v1480_v57 }
 0x194   : > { %vm495_vm7 = vcmp.eq.s32.totalorder %v1466_v40, %v1150_v58 }
 0x195   : > { %v1486_v59 = vsel %vm495_vm7, -3e+38, %v451_v22 }
 0x196   : > { %v484_v60 = vpop.xlane.xlu0 %483  ;;  %v508_v61 = vsel %vm458_vm1, %v1486_v59, -inf }
 0x197   : > { %vm1151_vm8 = vcmp.lt.s32.totalorder %v484_v60, 0  ;;  %v1152_v62 = vceil.f32 %v484_v60  ;;  %v1153_v63 = vfloor.f32 %v484_v60  ;;  %509 = vmax.xlane.f32.xlu0 %v508_v61 }
 0x199   : > { %v1490_v0 = vsel %vm1151_vm8, %v1152_v62, %v1153_v63 }
 0x19a   : > { %v1155_v1 = vcvt.f32.s32 %v1490_v0 }
 0x19c   : > { %v487_v2 = vpop.xlane.xlu1 %486  ;;  %vm496_vm9 = vcmp.eq.s32.totalorder %v1466_v40, %v1155_v1  ;;  %v505_v48 = vsel %vm503_vm5, %v1155_v1, 0 }
 0x19d   : > { %vm1156_vm10 = vcmp.lt.s32.totalorder %v487_v2, 0  ;;  %v1157_v4 = vceil.f32 %v487_v2  ;;  %v1158_v5 = vfloor.f32 %v487_v2  ;;  %v1496_v7 = vsel %vm496_vm9, -3e+38, %v452_v27 }
 0x19e   : > { %v511_v8 = vsel %vm458_vm1, %v1496_v7, -inf }
 0x19f   : > { %v1500_v9 = vsel %vm1156_vm10, %v1157_v4, %v1158_v5  ;;  %512 = vmax.xlane.f32.xlu1 %v511_v8 }
 0x1a0   : > { %v1160_v10 = vcvt.f32.s32 %v1500_v9 }
 0x1a2   : > { %vm497_vm11 = vcmp.eq.s32.totalorder %v1466_v40, %v1160_v10  ;;  %v506_v57 = vsel %vm503_vm5, %v1160_v10, 0 }
 0x1a3   : > { %v1506_v11 = vsel %vm497_vm11, -3e+38, %v453_v32 }
 0x1a4   : > { %v490_v12 = vpop.xlane.xlu2 %489  ;;  %v514_v13 = vsel %vm458_vm1, %v1506_v11, -inf }
 0x1a5   : > { %vm1161_vm12 = vcmp.lt.s32.totalorder %v490_v12, 0  ;;  %v1162_v14 = vceil.f32 %v490_v12  ;;  %v1163_v15 = vfloor.f32 %v490_v12  ;;  %515 = vmax.xlane.f32.xlu2 %v514_v13 }
 0x1a7   : > { %v1510_v16 = vsel %vm1161_vm12, %v1162_v14, %v1163_v15 }
 0x1a8   : > { %v1165_v17 = vcvt.f32.s32 %v1510_v16 }
 0x1aa   : > { %vm498_vm13 = vcmp.eq.s32.totalorder %v1466_v40, %v1165_v17  ;;  %v507_v2 = vsel %vm503_vm5, %v1165_v17, 0 }
 0x1ab   : > { %v1517_v18 = vsel %vm498_vm13, -3e+38, %v1462_v37  ;;  %v504_v37 = vsel %vm503_vm5, %v1150_v58, 0  ;;  %vm601_vm5 = vcmp.eq.s32.totalorder %v1466_v40, 2 }
 0x1ac   : > { %v517_v19 = vsel %vm458_vm1, %v1517_v18, -inf }
 0x1ad   : > { %518 = vmax.xlane.f32.xlu0 %v517_v19 }
 0x20a   : > { %v510_v20 = vpop.xlane.xlu0 %509 }
 0x20b   : > { %vm520_vm14 = vcmp.eq.f32.partialorder %v1486_v59, %v510_v20 }
 0x20c   : > { %v524_v21 = vsel %vm520_vm14, %v1469_v41, 32.0 }
 0x20d   : > { %v528_v22 = vsel %vm458_vm1, %v524_v21, inf }
 0x20e   : > { %529 = vmin.xlane.f32.xlu1 %v528_v22 }
 0x212   : > { %v513_v23 = vpop.xlane.xlu1 %512 }
 0x213   : > { %vm521_vm15 = vcmp.eq.f32.partialorder %v1496_v7, %v513_v23 }
 0x214   : > { %v525_v24 = vsel %vm521_vm15, %v1469_v41, 32.0 }
 0x215   : > { %v531_v25 = vsel %vm458_vm1, %v525_v24, inf }
 0x216   : > { %532 = vmin.xlane.f32.xlu2 %v531_v25 }
 0x218   : > { %v516_v26 = vpop.xlane.xlu2 %515 }
 0x219   : > { %vm522_vm2 = vcmp.eq.f32.partialorder %v1506_v11, %v516_v26 }
 0x21a   : > { %v526_v27 = vsel %vm522_vm2, %v1469_v41, 32.0 }
 0x21b   : > { %v534_v28 = vsel %vm458_vm1, %v526_v27, inf }
 0x21c   : > { %535 = vmin.xlane.f32.xlu0 %v534_v28 }
 0x220   : > { %v519_v29 = vpop.xlane.xlu0 %518 }
 0x221   : > { %vm523_vm3 = vcmp.eq.f32.partialorder %v1517_v18, %v519_v29 }
 0x222   : > { %v527_v30 = vsel %vm523_vm3, %v1469_v41, 32.0 }
 0x223   : > { %v537_v31 = vsel %vm458_vm1, %v527_v30, inf }
 0x224   : > { %538 = vmin.xlane.f32.xlu1 %v537_v31 }
 0x281   : > { %v530_v32 = vpop.xlane.xlu1 %529 }
 0x282   : > { %vm1166_vm4 = vcmp.lt.s32.totalorder %v530_v32, 0  ;;  %v1167_v33 = vceil.f32 %v530_v32  ;;  %v1168_v34 = vfloor.f32 %v530_v32 }
 0x284   : > { %v1169_v35 = vsel %vm1166_vm4, %v1167_v33, %v1168_v34 }
 0x285   : > { %v1170_v36 = vcvt.f32.s32 %v1169_v35 }
 0x287   : > { %vm544_vm7 = vcmp.eq.s32.totalorder %v1466_v40, %v1170_v36  ;;  %v1542_v38 = vsel %vm552_vm6, %v1170_v36, %v504_v37 }
 0x288   : > { %v1545_v39 = vsel %vm544_vm7, -3e+38, %v1486_v59 }
 0x289   : > { %v533_v42 = vpop.xlane.xlu2 %532  ;;  %v557_v43 = vsel %vm458_vm1, %v1545_v39, -inf }
 0x28a   : > { %vm1171_vm8 = vcmp.lt.s32.totalorder %v533_v42, 0  ;;  %v1172_v44 = vceil.f32 %v533_v42  ;;  %v1173_v45 = vfloor.f32 %v533_v42  ;;  %558 = vmax.xlane.f32.xlu2 %v557_v43 }
 0x28c   : > { %v1174_v46 = vsel %vm1171_vm8, %v1172_v44, %v1173_v45 }
 0x28d   : > { %v1175_v47 = vcvt.f32.s32 %v1174_v46 }
 0x28f   : > { %v536_v49 = vpop.xlane.xlu0 %535  ;;  %vm545_vm9 = vcmp.eq.s32.totalorder %v1466_v40, %v1175_v47  ;;  %v1556_v50 = vsel %vm552_vm6, %v1175_v47, %v505_v48 }
 0x290   : > { %vm1176_vm10 = vcmp.lt.s32.totalorder %v536_v49, 0  ;;  %v1177_v51 = vceil.f32 %v536_v49  ;;  %v1178_v52 = vfloor.f32 %v536_v49  ;;  %v1559_v53 = vsel %vm545_vm9, -3e+38, %v1496_v7 }
 0x291   : > { %v560_v54 = vsel %vm458_vm1, %v1559_v53, -inf }
 0x292   : > { %v1179_v55 = vsel %vm1176_vm10, %v1177_v51, %v1178_v52  ;;  %561 = vmax.xlane.f32.xlu0 %v560_v54 }
 0x293   : > { %v1180_v56 = vcvt.f32.s32 %v1179_v55 }
 0x295   : > { %vm546_vm11 = vcmp.eq.s32.totalorder %v1466_v40, %v1180_v56  ;;  %v1570_v58 = vsel %vm552_vm6, %v1180_v56, %v506_v57 }
 0x296   : > { %v1573_v59 = vsel %vm546_vm11, -3e+38, %v1506_v11 }
 0x297   : > { %v539_v60 = vpop.xlane.xlu1 %538  ;;  %v563_v61 = vsel %vm458_vm1, %v1573_v59, -inf }
 0x298   : > { %vm1181_vm12 = vcmp.lt.s32.totalorder %v539_v60, 0  ;;  %v1182_v62 = vceil.f32 %v539_v60  ;;  %v1183_v63 = vfloor.f32 %v539_v60  ;;  %564 = vmax.xlane.f32.xlu1 %v563_v61 }
 0x29a   : > { %v1184_v0 = vsel %vm1181_vm12, %v1182_v62, %v1183_v63 }
 0x29b   : > { %v1185_v1 = vcvt.f32.s32 %v1184_v0 }
 0x29d   : > { %vm547_vm13 = vcmp.eq.s32.totalorder %v1466_v40, %v1185_v1  ;;  %v1584_v4 = vsel %vm552_vm6, %v1185_v1, %v507_v2 }
 0x29e   : > { %v1587_v5 = vsel %vm547_vm13, -3e+38, %v1517_v18 }
 0x29f   : > { %v566_v7 = vsel %vm458_vm1, %v1587_v5, -inf }
 0x2a0   : > { %567 = vmax.xlane.f32.xlu2 %v566_v7 }
 0x2fd   : > { %v559_v8 = vpop.xlane.xlu2 %558 }
 0x2fe   : > { %vm569_vm14 = vcmp.eq.f32.partialorder %v1545_v39, %v559_v8 }
 0x2ff   : > { %v573_v9 = vsel %vm569_vm14, %v1469_v41, 32.0 }
 0x300   : > { %v577_v10 = vsel %vm458_vm1, %v573_v9, inf }
 0x301   : > { %578 = vmin.xlane.f32.xlu0 %v577_v10 }
 0x305   : > { %v562_v11 = vpop.xlane.xlu0 %561 }
 0x306   : > { %vm570_vm15 = vcmp.eq.f32.partialorder %v1559_v53, %v562_v11 }
 0x307   : > { %v574_v12 = vsel %vm570_vm15, %v1469_v41, 32.0 }
 0x308   : > { %v580_v13 = vsel %vm458_vm1, %v574_v12, inf }
 0x309   : > { %581 = vmin.xlane.f32.xlu1 %v580_v13 }
 0x30b   : > { %v565_v14 = vpop.xlane.xlu1 %564 }
 0x30c   : > { %vm571_vm2 = vcmp.eq.f32.partialorder %v1573_v59, %v565_v14 }
 0x30d   : > { %v575_v15 = vsel %vm571_vm2, %v1469_v41, 32.0 }
 0x30e   : > { %v583_v16 = vsel %vm458_vm1, %v575_v15, inf }
 0x30f   : > { %584 = vmin.xlane.f32.xlu2 %v583_v16 }
 0x313   : > { %v568_v17 = vpop.xlane.xlu2 %567 }
 0x314   : > { %vm572_vm3 = vcmp.eq.f32.partialorder %v1587_v5, %v568_v17 }
 0x315   : > { %v576_v18 = vsel %vm572_vm3, %v1469_v41, 32.0 }
 0x316   : > { %v586_v19 = vsel %vm458_vm1, %v576_v18, inf }
 0x317   : > { %587 = vmin.xlane.f32.xlu0 %v586_v19 }
 0x374   : > { %v579_v20 = vpop.xlane.xlu0 %578 }
 0x375   : > { %vm1186_vm4 = vcmp.lt.s32.totalorder %v579_v20, 0  ;;  %v1187_v21 = vceil.f32 %v579_v20  ;;  %v1188_v22 = vfloor.f32 %v579_v20 }
 0x377   : > { %v1189_v23 = vsel %vm1186_vm4, %v1187_v21, %v1188_v22  ;;  %vm650_vm4 = vcmp.eq.s32.totalorder %v1466_v40, 3 }
 0x378   : > { %v1190_v24 = vcvt.f32.s32 %v1189_v23 }
 0x37a   : > { %vm593_vm6 = vcmp.eq.s32.totalorder %v1466_v40, %v1190_v24  ;;  %v1608_v25 = vsel %vm601_vm5, %v1190_v24, %v1542_v38 }
 0x37b   : > { %v1611_v26 = vsel %vm593_vm6, -3e+38, %v1545_v39 }
 0x37c   : > { %v582_v27 = vpop.xlane.xlu1 %581  ;;  %v606_v28 = vsel %vm458_vm1, %v1611_v26, -inf }
 0x37d   : > { %vm1191_vm7 = vcmp.lt.s32.totalorder %v582_v27, 0  ;;  %v1192_v29 = vceil.f32 %v582_v27  ;;  %v1193_v30 = vfloor.f32 %v582_v27  ;;  %607 = vmax.xlane.f32.xlu1 %v606_v28 }
 0x37f   : > { %v1194_v31 = vsel %vm1191_vm7, %v1192_v29, %v1193_v30 }
 0x380   : > { %v1195_v32 = vcvt.f32.s32 %v1194_v31 }
 0x382   : > { %v585_v33 = vpop.xlane.xlu2 %584  ;;  %vm594_vm8 = vcmp.eq.s32.totalorder %v1466_v40, %v1195_v32  ;;  %v1619_v34 = vsel %vm601_vm5, %v1195_v32, %v1556_v50 }
 0x383   : > { %vm1196_vm9 = vcmp.lt.s32.totalorder %v585_v33, 0  ;;  %v1197_v35 = vceil.f32 %v585_v33  ;;  %v1198_v36 = vfloor.f32 %v585_v33  ;;  %v1622_v37 = vsel %vm594_vm8, -3e+38, %v1559_v53 }
 0x384   : > { %v609_v38 = vsel %vm458_vm1, %v1622_v37, -inf }
 0x385   : > { %v1199_v39 = vsel %vm1196_vm9, %v1197_v35, %v1198_v36  ;;  %610 = vmax.xlane.f32.xlu2 %v609_v38 }
 0x386   : > { %v1200_v42 = vcvt.f32.s32 %v1199_v39 }
 0x388   : > { %vm595_vm10 = vcmp.eq.s32.totalorder %v1466_v40, %v1200_v42  ;;  %v1630_v43 = vsel %vm601_vm5, %v1200_v42, %v1570_v58 }
 0x389   : > { %v1633_v44 = vsel %vm595_vm10, -3e+38, %v1573_v59 }
 0x38a   : > { %v588_v45 = vpop.xlane.xlu0 %587  ;;  %v612_v46 = vsel %vm458_vm1, %v1633_v44, -inf }
 0x38b   : > { %vm1201_vm11 = vcmp.lt.s32.totalorder %v588_v45, 0  ;;  %v1202_v47 = vceil.f32 %v588_v45  ;;  %v1203_v48 = vfloor.f32 %v588_v45  ;;  %613 = vmax.xlane.f32.xlu0 %v612_v46 }
 0x38d   : > { %v1204_v49 = vsel %vm1201_vm11, %v1202_v47, %v1203_v48 }
 0x38e   : > { %v1205_v50 = vcvt.f32.s32 %v1204_v49 }
 0x390   : > { %vm596_vm12 = vcmp.eq.s32.totalorder %v1466_v40, %v1205_v50  ;;  %v1641_v51 = vsel %vm601_vm5, %v1205_v50, %v1584_v4 }
 0x391   : > { %v1644_v52 = vsel %vm596_vm12, -3e+38, %v1587_v5 }
 0x392   : > { %v615_v53 = vsel %vm458_vm1, %v1644_v52, -inf }
 0x393   : > { %616 = vmax.xlane.f32.xlu1 %v615_v53 }
 0x3f0   : > { %v608_v54 = vpop.xlane.xlu1 %607 }
 0x3f1   : > { %vm618_vm13 = vcmp.eq.f32.partialorder %v1611_v26, %v608_v54 }
 0x3f2   : > { %v622_v55 = vsel %vm618_vm13, %v1469_v41, 32.0 }
 0x3f3   : > { %v626_v56 = vsel %vm458_vm1, %v622_v55, inf }
 0x3f4   : > { %627 = vmin.xlane.f32.xlu2 %v626_v56 }
 0x3f8   : > { %v611_v57 = vpop.xlane.xlu2 %610 }
 0x3f9   : > { %vm619_vm14 = vcmp.eq.f32.partialorder %v1622_v37, %v611_v57 }
 0x3fa   : > { %v623_v58 = vsel %vm619_vm14, %v1469_v41, 32.0 }
 0x3fb   : > { %v629_v59 = vsel %vm458_vm1, %v623_v58, inf }
 0x3fc   : > { %630 = vmin.xlane.f32.xlu0 %v629_v59 }
 0x3fe   : > { %v614_v60 = vpop.xlane.xlu0 %613 }
 0x3ff   : > { %vm620_vm15 = vcmp.eq.f32.partialorder %v1633_v44, %v614_v60 }
 0x400   : > { %v624_v61 = vsel %vm620_vm15, %v1469_v41, 32.0 }
 0x401   : > { %v632_v62 = vsel %vm458_vm1, %v624_v61, inf }
 0x402   : > { %633 = vmin.xlane.f32.xlu1 %v632_v62 }
 0x406   : > { %v617_v63 = vpop.xlane.xlu1 %616 }
 0x407   : > { %vm621_vm2 = vcmp.eq.f32.partialorder %v1644_v52, %v617_v63 }
 0x408   : > { %v625_v0 = vsel %vm621_vm2, %v1469_v41, 32.0 }
 0x409   : > { %v635_v1 = vsel %vm458_vm1, %v625_v0, inf }
 0x40a   : > { %636 = vmin.xlane.f32.xlu2 %v635_v1 }
 0x467   : > { %v628_v2 = vpop.xlane.xlu2 %627 }
 0x468   : > { %vm1206_vm3 = vcmp.lt.s32.totalorder %v628_v2, 0  ;;  %v1207_v4 = vceil.f32 %v628_v2  ;;  %v1208_v5 = vfloor.f32 %v628_v2 }
 0x46a   : > { %v1209_v7 = vsel %vm1206_vm3, %v1207_v4, %v1208_v5  ;;  %vm699_vm3 = vcmp.eq.s32.totalorder %v1466_v40, 4 }
 0x46b   : > { %v1210_v8 = vcvt.f32.s32 %v1209_v7 }
 0x46d   : > { %vm642_vm5 = vcmp.eq.s32.totalorder %v1466_v40, %v1210_v8  ;;  %v1665_v9 = vsel %vm650_vm4, %v1210_v8, %v1608_v25 }
 0x46e   : > { %v1668_v10 = vsel %vm642_vm5, -3e+38, %v1611_v26 }
 0x46f   : > { %v631_v11 = vpop.xlane.xlu0 %630  ;;  %v655_v12 = vsel %vm458_vm1, %v1668_v10, -inf }
 0x470   : > { %vm1211_vm6 = vcmp.lt.s32.totalorder %v631_v11, 0  ;;  %v1212_v13 = vceil.f32 %v631_v11  ;;  %v1213_v14 = vfloor.f32 %v631_v11  ;;  %656 = vmax.xlane.f32.xlu0 %v655_v12 }
 0x472   : > { %v1214_v15 = vsel %vm1211_vm6, %v1212_v13, %v1213_v14 }
 0x473   : > { %v1215_v16 = vcvt.f32.s32 %v1214_v15 }
 0x475   : > { %v634_v17 = vpop.xlane.xlu1 %633  ;;  %vm643_vm7 = vcmp.eq.s32.totalorder %v1466_v40, %v1215_v16  ;;  %v1676_v18 = vsel %vm650_vm4, %v1215_v16, %v1619_v34 }
 0x476   : > { %vm1216_vm8 = vcmp.lt.s32.totalorder %v634_v17, 0  ;;  %v1217_v19 = vceil.f32 %v634_v17  ;;  %v1218_v20 = vfloor.f32 %v634_v17  ;;  %v1679_v21 = vsel %vm643_vm7, -3e+38, %v1622_v37 }
 0x477   : > { %v658_v22 = vsel %vm458_vm1, %v1679_v21, -inf }
 0x478   : > { %v1219_v23 = vsel %vm1216_vm8, %v1217_v19, %v1218_v20  ;;  %659 = vmax.xlane.f32.xlu1 %v658_v22 }
 0x479   : > { %v1220_v24 = vcvt.f32.s32 %v1219_v23 }
 0x47b   : > { %vm644_vm9 = vcmp.eq.s32.totalorder %v1466_v40, %v1220_v24  ;;  %v1687_v25 = vsel %vm650_vm4, %v1220_v24, %v1630_v43 }
 0x47c   : > { %v1690_v26 = vsel %vm644_vm9, -3e+38, %v1633_v44 }
 0x47d   : > { %v637_v27 = vpop.xlane.xlu2 %636  ;;  %v661_v28 = vsel %vm458_vm1, %v1690_v26, -inf }
 0x47e   : > { %vm1221_vm10 = vcmp.lt.s32.totalorder %v637_v27, 0  ;;  %v1222_v29 = vceil.f32 %v637_v27  ;;  %v1223_v30 = vfloor.f32 %v637_v27  ;;  %662 = vmax.xlane.f32.xlu2 %v661_v28 }
 0x480   : > { %v1224_v31 = vsel %vm1221_vm10, %v1222_v29, %v1223_v30 }
 0x481   : > { %v1225_v32 = vcvt.f32.s32 %v1224_v31 }
 0x483   : > { %vm645_vm11 = vcmp.eq.s32.totalorder %v1466_v40, %v1225_v32  ;;  %v1698_v33 = vsel %vm650_vm4, %v1225_v32, %v1641_v51 }
 0x484   : > { %v1701_v34 = vsel %vm645_vm11, -3e+38, %v1644_v52 }
 0x485   : > { %v664_v35 = vsel %vm458_vm1, %v1701_v34, -inf }
 0x486   : > { %665 = vmax.xlane.f32.xlu0 %v664_v35 }
 0x4e3   : > { %v657_v36 = vpop.xlane.xlu0 %656 }
 0x4e4   : > { %vm667_vm12 = vcmp.eq.f32.partialorder %v1668_v10, %v657_v36 }
 0x4e5   : > { %v671_v37 = vsel %vm667_vm12, %v1469_v41, 32.0 }
 0x4e6   : > { %v675_v38 = vsel %vm458_vm1, %v671_v37, inf }
 0x4e7   : > { %676 = vmin.xlane.f32.xlu1 %v675_v38 }
 0x4eb   : > { %v660_v39 = vpop.xlane.xlu1 %659 }
 0x4ec   : > { %vm668_vm13 = vcmp.eq.f32.partialorder %v1679_v21, %v660_v39 }
 0x4ed   : > { %v672_v42 = vsel %vm668_vm13, %v1469_v41, 32.0 }
 0x4ee   : > { %v678_v43 = vsel %vm458_vm1, %v672_v42, inf }
 0x4ef   : > { %679 = vmin.xlane.f32.xlu2 %v678_v43 }
 0x4f1   : > { %v663_v44 = vpop.xlane.xlu2 %662 }
 0x4f2   : > { %vm669_vm14 = vcmp.eq.f32.partialorder %v1690_v26, %v663_v44 }
 0x4f3   : > { %v673_v45 = vsel %vm669_vm14, %v1469_v41, 32.0 }
 0x4f4   : > { %v681_v46 = vsel %vm458_vm1, %v673_v45, inf }
 0x4f5   : > { %682 = vmin.xlane.f32.xlu0 %v681_v46 }
 0x4f9   : > { %v666_v47 = vpop.xlane.xlu0 %665 }
 0x4fa   : > { %vm670_vm15 = vcmp.eq.f32.partialorder %v1701_v34, %v666_v47 }
 0x4fb   : > { %v674_v48 = vsel %vm670_vm15, %v1469_v41, 32.0 }
 0x4fc   : > { %v684_v49 = vsel %vm458_vm1, %v674_v48, inf }
 0x4fd   : > { %685 = vmin.xlane.f32.xlu1 %v684_v49 }
 0x55a   : > { %v677_v50 = vpop.xlane.xlu1 %676 }
 0x55b   : > { %vm1226_vm2 = vcmp.lt.s32.totalorder %v677_v50, 0  ;;  %v1227_v51 = vceil.f32 %v677_v50  ;;  %v1228_v52 = vfloor.f32 %v677_v50 }
 0x55d   : > { %v1229_v53 = vsel %vm1226_vm2, %v1227_v51, %v1228_v52  ;;  %vm748_vm2 = vcmp.eq.s32.totalorder %v1466_v40, 5 }
 0x55e   : > { %v1230_v54 = vcvt.f32.s32 %v1229_v53 }
 0x560   : > { %vm691_vm4 = vcmp.eq.s32.totalorder %v1466_v40, %v1230_v54  ;;  %v1722_v55 = vsel %vm699_vm3, %v1230_v54, %v1665_v9 }
 0x561   : > { %v1725_v56 = vsel %vm691_vm4, -3e+38, %v1668_v10 }
 0x562   : > { %v680_v57 = vpop.xlane.xlu2 %679  ;;  %v704_v58 = vsel %vm458_vm1, %v1725_v56, -inf }
 0x563   : > { %vm1231_vm5 = vcmp.lt.s32.totalorder %v680_v57, 0  ;;  %v1232_v59 = vceil.f32 %v680_v57  ;;  %v1233_v60 = vfloor.f32 %v680_v57  ;;  %705 = vmax.xlane.f32.xlu2 %v704_v58 }
 0x565   : > { %v1234_v61 = vsel %vm1231_vm5, %v1232_v59, %v1233_v60 }
 0x566   : > { %v1235_v62 = vcvt.f32.s32 %v1234_v61 }
 0x568   : > { %v683_v63 = vpop.xlane.xlu0 %682  ;;  %vm692_vm6 = vcmp.eq.s32.totalorder %v1466_v40, %v1235_v62  ;;  %v1733_v0 = vsel %vm699_vm3, %v1235_v62, %v1676_v18 }
 0x569   : > { %vm1236_vm7 = vcmp.lt.s32.totalorder %v683_v63, 0  ;;  %v1237_v1 = vceil.f32 %v683_v63  ;;  %v1238_v2 = vfloor.f32 %v683_v63  ;;  %v1736_v4 = vsel %vm692_vm6, -3e+38, %v1679_v21 }
 0x56a   : > { %v707_v5 = vsel %vm458_vm1, %v1736_v4, -inf }
 0x56b   : > { %v1239_v7 = vsel %vm1236_vm7, %v1237_v1, %v1238_v2  ;;  %708 = vmax.xlane.f32.xlu0 %v707_v5 }
 0x56c   : > { %v1240_v8 = vcvt.f32.s32 %v1239_v7 }
 0x56e   : > { %vm693_vm8 = vcmp.eq.s32.totalorder %v1466_v40, %v1240_v8  ;;  %v1744_v9 = vsel %vm699_vm3, %v1240_v8, %v1687_v25 }
 0x56f   : > { %v1747_v10 = vsel %vm693_vm8, -3e+38, %v1690_v26 }
 0x570   : > { %v686_v11 = vpop.xlane.xlu1 %685  ;;  %v710_v12 = vsel %vm458_vm1, %v1747_v10, -inf }
 0x571   : > { %vm1241_vm9 = vcmp.lt.s32.totalorder %v686_v11, 0  ;;  %v1242_v13 = vceil.f32 %v686_v11  ;;  %v1243_v14 = vfloor.f32 %v686_v11  ;;  %711 = vmax.xlane.f32.xlu1 %v710_v12 }
 0x573   : > { %v1244_v15 = vsel %vm1241_vm9, %v1242_v13, %v1243_v14 }
 0x574   : > { %v1245_v16 = vcvt.f32.s32 %v1244_v15 }
 0x576   : > { %vm694_vm10 = vcmp.eq.s32.totalorder %v1466_v40, %v1245_v16  ;;  %v1755_v17 = vsel %vm699_vm3, %v1245_v16, %v1698_v33  ;;  %v883_v16 = vld [vmem:[%s1949_s2] sm:$0x3] }
 0x577   : > { %v1758_v18 = vsel %vm694_vm10, -3e+38, %v1701_v34 }
 0x578   : > { %v713_v19 = vsel %vm458_vm1, %v1758_v18, -inf }
 0x579   : > { %714 = vmax.xlane.f32.xlu2 %v713_v19 }
 0x5d6   : > { %v706_v20 = vpop.xlane.xlu2 %705 }
 0x5d7   : > { %vm716_vm11 = vcmp.eq.f32.partialorder %v1725_v56, %v706_v20  ;;  %v850_v20 = vld [vmem:[%s1948_s1] sm:$0x3] }
 0x5d8   : > { %v720_v21 = vsel %vm716_vm11, %v1469_v41, 32.0 }
 0x5d9   : > { %v724_v22 = vsel %vm458_vm1, %v720_v21, inf }
 0x5da   : > { %725 = vmin.xlane.f32.xlu0 %v724_v22 }
 0x5de   : > { %v709_v23 = vpop.xlane.xlu0 %708 }
 0x5df   : > { %vm717_vm12 = vcmp.eq.f32.partialorder %v1736_v4, %v709_v23 }
 0x5e0   : > { %v721_v24 = vsel %vm717_vm12, %v1469_v41, 32.0 }
 0x5e1   : > { %v727_v25 = vsel %vm458_vm1, %v721_v24, inf }
 0x5e2   : > { %728 = vmin.xlane.f32.xlu1 %v727_v25 }
 0x5e4   : > { %v712_v26 = vpop.xlane.xlu1 %711 }
 0x5e5   : > { %vm718_vm13 = vcmp.eq.f32.partialorder %v1747_v10, %v712_v26 }
 0x5e6   : > { %v722_v27 = vsel %vm718_vm13, %v1469_v41, 32.0 }
 0x5e7   : > { %v730_v28 = vsel %vm458_vm1, %v722_v27, inf  ;;  %v848_v27 = vpack.c.bf16 %v1434_v6, %v1428_v3 }
 0x5e8   : > { %731 = vmin.xlane.f32.xlu2 %v730_v28 }
 0x5ec   : > { %v715_v29 = vpop.xlane.xlu2 %714 }
 0x5ed   : > { %vm719_vm14 = vcmp.eq.f32.partialorder %v1758_v18, %v715_v29 }
 0x5ee   : > { %v723_v30 = vsel %vm719_vm14, %v1469_v41, 32.0  ;;  %vm857_vm14 = vcmask 1040384  }
 0x5ef   : > { %v733_v31 = vsel %vm458_vm1, %v723_v30, inf }
 0x5f0   : > { %734 = vmin.xlane.f32.xlu0 %v733_v31 }
 0x64d   : > { %v726_v32 = vpop.xlane.xlu0 %725 }
 0x64e   : > { %vm1246_vm15 = vcmp.lt.s32.totalorder %v726_v32, 0  ;;  %v1247_v33 = vceil.f32 %v726_v32  ;;  %v1248_v34 = vfloor.f32 %v726_v32 }
 0x650   : > { %v1249_v35 = vsel %vm1246_vm15, %v1247_v33, %v1248_v34  ;;  %vm858_vm15 = vcmask 1041408  }
 0x651   : > { %v1250_v36 = vcvt.f32.s32 %v1249_v35 }
 0x653   : > { %vm740_vm3 = vcmp.eq.s32.totalorder %v1466_v40, %v1250_v36  ;;  %v1779_v37 = vsel %vm748_vm2, %v1250_v36, %v1722_v55 }
 0x654   : > { %v1782_v38 = vsel %vm740_vm3, -3e+38, %v1725_v56  ;;  %vm797_vm3 = vcmp.eq.s32.totalorder %v1466_v40, 6 }
 0x655   : > { %v729_v39 = vpop.xlane.xlu1 %728  ;;  %v753_v42 = vsel %vm458_vm1, %v1782_v38, -inf }
 0x656   : > { %vm1251_vm4 = vcmp.lt.s32.totalorder %v729_v39, 0  ;;  %v1252_v43 = vceil.f32 %v729_v39  ;;  %v1253_v44 = vfloor.f32 %v729_v39  ;;  %754 = vmax.xlane.f32.xlu1 %v753_v42 }
 0x658   : > { %v1254_v45 = vsel %vm1251_vm4, %v1252_v43, %v1253_v44 }
 0x659   : > { %v1255_v46 = vcvt.f32.s32 %v1254_v45  ;;  %v1333_v45 = vld [vmem:[%s1422_s28 + $0x18] sm:$0xff] }
 0x65b   : > { %v732_v47 = vpop.xlane.xlu2 %731  ;;  %vm741_vm5 = vcmp.eq.s32.totalorder %v1466_v40, %v1255_v46  ;;  %v1790_v48 = vsel %vm748_vm2, %v1255_v46, %v1733_v0  ;;  %v1334_v46 = vld [vmem:[%s1422_s28 + $0x10] sm:$0xff] }
 0x65c   : > { %vm1256_vm6 = vcmp.lt.s32.totalorder %v732_v47, 0  ;;  %v1257_v49 = vceil.f32 %v732_v47  ;;  %v1258_v50 = vfloor.f32 %v732_v47  ;;  %v1793_v51 = vsel %vm741_vm5, -3e+38, %v1736_v4 }
 0x65d   : > { %v756_v52 = vsel %vm458_vm1, %v1793_v51, -inf  ;;  %v849_v47 = vpack.c.bf16 %v1333_v45, %v1334_v46 }
 0x65e   : > { %v1259_v53 = vsel %vm1256_vm6, %v1257_v49, %v1258_v50  ;;  %757 = vmax.xlane.f32.xlu2 %v756_v52 }
 0x65f   : > { %v1260_v54 = vcvt.f32.s32 %v1259_v53 }
 0x661   : > { %vm742_vm7 = vcmp.eq.s32.totalorder %v1466_v40, %v1260_v54  ;;  %v1801_v55 = vsel %vm748_vm2, %v1260_v54, %v1744_v9 }
 0x662   : > { %v1804_v56 = vsel %vm742_vm7, -3e+38, %v1747_v10 }
 0x663   : > { %v735_v57 = vpop.xlane.xlu0 %734  ;;  %v759_v58 = vsel %vm458_vm1, %v1804_v56, -inf }
 0x664   : > { %vm1261_vm8 = vcmp.lt.s32.totalorder %v735_v57, 0  ;;  %v1262_v59 = vceil.f32 %v735_v57  ;;  %v1263_v60 = vfloor.f32 %v735_v57  ;;  %760 = vmax.xlane.f32.xlu0 %v759_v58 }
 0x666   : > { %v1264_v61 = vsel %vm1261_vm8, %v1262_v59, %v1263_v60 }
 0x667   : > { %v1265_v62 = vcvt.f32.s32 %v1264_v61 }
 0x669   : > { %vm743_vm9 = vcmp.eq.s32.totalorder %v1466_v40, %v1265_v62  ;;  %v1812_v63 = vsel %vm748_vm2, %v1265_v62, %v1755_v17 }
 0x66a   : > { %v1815_v0 = vsel %vm743_vm9, -3e+38, %v1758_v18  ;;  %v1360_v18 = vmov 65535  }
 0x66b   : > { %v762_v1 = vsel %vm458_vm1, %v1815_v0, -inf  ;;  %v859_v19 = vsel %vm857_vm14, 4294967295, %v1360_v18 }
 0x66c   : > { %763 = vmax.xlane.f32.xlu1 %v762_v1  ;;  %v860_v23 = vsel %vm858_vm15, %v859_v19, 0  ;;  %vm838_vm15 = vcmp.eq.s32.totalorder %v1466_v40, 7 }
 0x66d   : > { %v889_v24 = vand.u32 %v883_v16, %v860_v23  ;;  %v862_v25 = vand.u32 %v860_v23, %v850_v20 }
 0x66f   : > { %898 = vmatpush.bf16.msra.mxu3 %v889_v24  ;;  %871 = vmatpush.bf16.msra.mxu2 %v862_v25 }
 0x672   : > { %1138 = vmatmul.msk.bf16.vlgmr.msra.gmra.mxu3 %vm337_vm0, %v848_v27  ;;  %1136 = vmatmul.msk.bf16.vlgmr.msra.gmra.mxu2 %vm337_vm0, %v848_v27 }
 0x682   : > { %1139 = vmatmul.msk.bf16.gmra.mxu3 %vm337_vm0, %v849_v47  ;;  %1137 = vmatmul.msk.bf16.gmra.mxu2 %vm337_vm0, %v849_v47 }
 0x6c9   : > { %v755_v2 = vpop.xlane.xlu1 %754 }
 0x6ca   : > { %vm765_vm10 = vcmp.eq.f32.partialorder %v1782_v38, %v755_v2 }
 0x6cb   : > { %v769_v4 = vsel %vm765_vm10, %v1469_v41, 32.0 }
 0x6cc   : > { %v773_v5 = vsel %vm458_vm1, %v769_v4, inf }
 0x6cd   : > { %774 = vmin.xlane.f32.xlu2 %v773_v5 }
 0x6d1   : > { %v758_v7 = vpop.xlane.xlu2 %757 }
 0x6d2   : > { %vm766_vm11 = vcmp.eq.f32.partialorder %v1793_v51, %v758_v7 }
 0x6d3   : > { %v770_v8 = vsel %vm766_vm11, %v1469_v41, 32.0 }
 0x6d4   : > { %v776_v9 = vsel %vm458_vm1, %v770_v8, inf }
 0x6d5   : > { %777 = vmin.xlane.f32.xlu0 %v776_v9 }
 0x6d7   : > { %v761_v10 = vpop.xlane.xlu0 %760 }
 0x6d8   : > { %vm767_vm12 = vcmp.eq.f32.partialorder %v1804_v56, %v761_v10 }
 0x6d9   : > { %v771_v11 = vsel %vm767_vm12, %v1469_v41, 32.0 }
 0x6da   : > { %v779_v12 = vsel %vm458_vm1, %v771_v11, inf }
 0x6db   : > { %780 = vmin.xlane.f32.xlu1 %v779_v12 }
 0x6df   : > { %v764_v13 = vpop.xlane.xlu1 %763 }
 0x6e0   : > { %vm768_vm13 = vcmp.eq.f32.partialorder %v1815_v0, %v764_v13 }
 0x6e1   : > { %v772_v14 = vsel %vm768_vm13, %v1469_v41, 32.0  ;;  %vm914_vm13 = vcmask 519168  }
 0x6e2   : > { %v782_v15 = vsel %vm458_vm1, %v772_v14, inf }
 0x6e3   : > { %783 = vmin.xlane.f32.xlu2 %v782_v15 }
 0x6f5   : > { %v900_v4 = vpop.f32.mrf.mxu3  ;;  %v873_v7 = vpop.f32.mrf.mxu2 }
 0x6f6   : > { %v910_v9 = vpack.c.bf16 %v873_v7, %v873_v7 }
 0x6f8   : > { %915 = vst.msk [vmem:[%s1889_s14] sm:$0xf] %vm914_vm13, %v910_v9 }
 0x6fd   : > { %v902_v13 = vpop.f32.mrf.mxu3  ;;  %v875_v18 = vpop.f32.mrf.mxu2 }
 0x6fe   : > { %v911_v19 = vpack.c.bf16 %v875_v18, %v875_v18 }
 0x700   : > { %916 = vst.msk [vmem:[%s1889_s14 + $0x4] sm:$0xf] %vm914_vm13, %v911_v19 }
 0x705   : > { %v905_v20 = vpop.f32.mrf.mxu3  ;;  %v878_v23 = vpop.f32.mrf.mxu2 }
 0x70d   : > { %v907_v24 = vpop.f32.mrf.mxu3 }
 0x740   : > { %v775_v17 = vpop.xlane.xlu2 %774 }
 0x741   : > { %vm1266_vm2 = vcmp.lt.s32.totalorder %v775_v17, 0  ;;  %v1267_v21 = vceil.f32 %v775_v17  ;;  %v1268_v22 = vfloor.f32 %v775_v17 }
 0x743   : > { %v1269_v26 = vsel %vm1266_vm2, %v1267_v21, %v1268_v22  ;;  %vm843_vm2 = vcmask 64512  }
 0x744   : > { %v1270_v28 = vcvt.f32.s32 %v1269_v26  ;;  %v880_v26 = vpop.f32.mrf.mxu2 }
 0x746   : > { %vm789_vm4 = vcmp.eq.s32.totalorder %v1466_v40, %v1270_v28  ;;  %v1844_v29 = vsel %vm797_vm3, %v1270_v28, %v1779_v37  ;;  %v913_v28 = vpack.c.bf16 %v880_v26, %v880_v26 }
 0x747   : > { %v793_v30 = vsel %vm789_vm4, -3e+38, %v1782_v38 }
 0x748   : > { %v778_v31 = vpop.xlane.xlu0 %777  ;;  %v802_v32 = vsel %vm458_vm1, %v793_v30, -inf  ;;  %918 = vst.msk [vmem:[%s1889_s14 + $0xc] sm:$0xf] %vm914_vm13, %v913_v28 }
 0x749   : > { %vm1271_vm5 = vcmp.lt.s32.totalorder %v778_v31, 0  ;;  %v1272_v3 = vceil.f32 %v778_v31  ;;  %v1273_v6 = vfloor.f32 %v778_v31  ;;  %803 = vmax.xlane.f32.xlu0 %v802_v32 }
 0x74b   : > { %v1274_v33 = vsel %vm1271_vm5, %v1272_v3, %v1273_v6 }
 0x74c   : > { %v1275_v34 = vcvt.f32.s32 %v1274_v33 }
 0x74e   : > { %v781_v35 = vpop.xlane.xlu1 %780  ;;  %vm790_vm6 = vcmp.eq.s32.totalorder %v1466_v40, %v1275_v34  ;;  %v1854_v36 = vsel %vm797_vm3, %v1275_v34, %v1790_v48 }
 0x74f   : > { %vm1276_vm7 = vcmp.lt.s32.totalorder %v781_v35, 0  ;;  %v1277_v37 = vceil.f32 %v781_v35  ;;  %v1278_v38 = vfloor.f32 %v781_v35  ;;  %v794_v39 = vsel %vm790_vm6, -3e+38, %v1793_v51 }
 0x750   : > { %v805_v42 = vsel %vm458_vm1, %v794_v39, -inf }
 0x751   : > { %806 = vmax.xlane.f32.xlu1 %v805_v42  ;;  %v1279_v43 = vsel %vm1276_vm7, %v1277_v37, %v1278_v38 }
 0x752   : > { %v1280_v44 = vcvt.f32.s32 %v1279_v43 }
 0x754   : > { %vm791_vm8 = vcmp.eq.s32.totalorder %v1466_v40, %v1280_v44  ;;  %v1864_v48 = vsel %vm797_vm3, %v1280_v44, %v1801_v55 }
 0x755   : > { %v795_v49 = vsel %vm791_vm8, -3e+38, %v1804_v56 }
 0x756   : > { %v784_v50 = vpop.xlane.xlu2 %783  ;;  %v808_v51 = vsel %vm458_vm1, %v795_v49, -inf }
 0x757   : > { %vm1281_vm9 = vcmp.lt.s32.totalorder %v784_v50, 0  ;;  %v1282_v52 = vceil.f32 %v784_v50  ;;  %v1283_v53 = vfloor.f32 %v784_v50  ;;  %809 = vmax.xlane.f32.xlu2 %v808_v51 }
 0x759   : > { %v1284_v54 = vsel %vm1281_vm9, %v1282_v52, %v1283_v53 }
 0x75a   : > { %v1285_v57 = vcvt.f32.s32 %v1284_v54 }
 0x75c   : > { %vm792_vm10 = vcmp.eq.s32.totalorder %v1466_v40, %v1285_v57  ;;  %v1874_v55 = vsel %vm797_vm3, %v1285_v57, %v1812_v63  ;;  %v1332_v63 = vld [vmem:[%s1950_s3] ss:$0 sm:$0xff] }
 0x75d   : > { %v796_v56 = vsel %vm792_vm10, -3e+38, %v1815_v0  ;;  %v901_v5 = vadd.f32 %v1332_v63, %v900_v4  ;;  %v903_v14 = vadd.f32 %v1332_v63, %v902_v13  ;;  %v906_v21 = vadd.f32 %v1332_v63, %v905_v20 }
 0x75e   : > { %v811_v58 = vsel %vm458_vm1, %v796_v56, -inf  ;;  %v908_v25 = vadd.f32 %v1332_v63, %v907_v24 }
 0x75f   : > { %812 = vmax.xlane.f32.xlu0 %v811_v58  ;;  %v919_v11 = vpack.c.bf16 %v901_v5, %v901_v5  ;;  %v920_v17 = vpack.c.bf16 %v903_v14, %v903_v14  ;;  %v921_v22 = vpack.c.bf16 %v906_v21, %v906_v21 }
 0x760   : > { %v922_v27 = vpack.c.bf16 %v908_v25, %v908_v25 }
 0x761   : > { %923 = vst.msk [vmem:[%s1895_s17] sm:$0xf] %vm914_vm13, %v919_v11 }
 0x762   : > { %924 = vst.msk [vmem:[%s1895_s17 + $0x4] sm:$0xf] %vm914_vm13, %v920_v17 }
 0x763   : > { %925 = vst.msk [vmem:[%s1895_s17 + $0x8] sm:$0xf] %vm914_vm13, %v921_v22 }
 0x764   : > { %926 = vst.msk [vmem:[%s1895_s17 + $0xc] sm:$0xf] %vm914_vm13, %v922_v27 }
 0x7bc   : > { %v804_v59 = vpop.xlane.xlu0 %803 }
 0x7bd   : > { %vm814_vm11 = vcmp.eq.f32.partialorder %v793_v30, %v804_v59 }
 0x7be   : > { %v818_v60 = vsel %vm814_vm11, %v1469_v41, 32.0 }
 0x7bf   : > { %v822_v61 = vsel %vm458_vm1, %v818_v60, inf }
 0x7c0   : > { %823 = vmin.xlane.f32.xlu1 %v822_v61 }
 0x7c4   : > { %v807_v62 = vpop.xlane.xlu1 %806 }
 0x7c5   : > { %vm815_vm0 = vcmp.eq.f32.partialorder %v794_v39, %v807_v62 }
 0x7c6   : > { %v819_v1 = vsel %vm815_vm0, %v1469_v41, 32.0 }
 0x7c7   : > { %v825_v2 = vsel %vm458_vm1, %v819_v1, inf }
 0x7c8   : > { %826 = vmin.xlane.f32.xlu2 %v825_v2 }
 0x7ca   : > { %v810_v0 = vpop.xlane.xlu2 %809 }
 0x7cb   : > { %vm816_vm12 = vcmp.eq.f32.partialorder %v795_v49, %v810_v0 }
 0x7cc   : > { %v820_v8 = vsel %vm816_vm12, %v1469_v41, 32.0 }
 0x7cd   : > { %v828_v10 = vsel %vm458_vm1, %v820_v8, inf }
 0x7ce   : > { %829 = vmin.xlane.f32.xlu0 %v828_v10 }
 0x7d2   : > { %v813_v12 = vpop.xlane.xlu0 %812 }
 0x7d3   : > { %vm817_vm14 = vcmp.eq.f32.partialorder %v796_v56, %v813_v12 }
 0x7d4   : > { %v821_v15 = vsel %vm817_vm14, %v1469_v41, 32.0  ;;  %v912_v41 = vpack.c.bf16 %v878_v23, %v878_v23 }
 0x7d5   : > { %v831_v16 = vsel %vm458_vm1, %v821_v15, inf }
 0x7d6   : > { %832 = vmin.xlane.f32.xlu1 %v831_v16  ;;  %917 = vst.msk [vmem:[%s1889_s14 + $0x8] sm:$0xf] %vm914_vm13, %v912_v41 }
 0x833   : > { %v824_v30 = vpop.xlane.xlu1 %823 }
 0x834   : > { %vm1286_vm1 = vcmp.lt.s32.totalorder %v824_v30, 0  ;;  %v1287_v31 = vceil.f32 %v824_v30  ;;  %v1288_v32 = vfloor.f32 %v824_v30 }
 0x836   : > { %v1289_v3 = vsel %vm1286_vm1, %v1287_v31, %v1288_v32 }
 0x837   : > { %v1290_v6 = vcvt.f32.s32 %v1289_v3 }
 0x839   : > { %v839_v33 = vsel %vm838_vm15, %v1290_v6, %v1844_v29 }
 0x83a   : > { %844 = vst.msk [vmem:[%s300_s20] sm:$0xff] %vm843_vm2, %v839_v33 }
 0x83b   : > { %v827_v34 = vpop.xlane.xlu2 %826 }
 0x83c   : > { %vm1291_vm3 = vcmp.lt.s32.totalorder %v827_v34, 0  ;;  %v1292_v35 = vceil.f32 %v827_v34  ;;  %v1293_v37 = vfloor.f32 %v827_v34 }
 0x83e   : > { %v1294_v38 = vsel %vm1291_vm3, %v1292_v35, %v1293_v37 }
 0x83f   : > { %v1295_v39 = vcvt.f32.s32 %v1294_v38 }
 0x841   : > { %v840_v42 = vsel %vm838_vm15, %v1295_v39, %v1854_v36  ;;  %v830_v43 = vpop.xlane.xlu0 %829 }
 0x842   : > { %845 = vst.msk [vmem:[%s300_s20 + $0x8] sm:$0xff] %vm843_vm2, %v840_v42  ;;  %vm1296_vm4 = vcmp.lt.s32.totalorder %v830_v43, 0  ;;  %v1297_v44 = vceil.f32 %v830_v43  ;;  %v1298_v45 = vfloor.f32 %v830_v43 }
 0x844   : > { %v1299_v46 = vsel %vm1296_vm4, %v1297_v44, %v1298_v45 }
 0x845   : > { %v1300_v29 = vcvt.f32.s32 %v1299_v46 }
 0x847   : > { %v841_v47 = vsel %vm838_vm15, %v1300_v29, %v1864_v48 }
 0x848   : > { %846 = vst.msk [vmem:[%s300_s20 + $0x10] sm:$0xff] %vm843_vm2, %v841_v47 }
 0x849   : > { %v833_v49 = vpop.xlane.xlu1 %832 }
 0x84a   : > { %vm1301_vm5 = vcmp.lt.s32.totalorder %v833_v49, 0  ;;  %v1302_v50 = vceil.f32 %v833_v49  ;;  %v1303_v51 = vfloor.f32 %v833_v49 }
 0x84c   : > { %v1304_v52 = vsel %vm1301_vm5, %v1302_v50, %v1303_v51 }
 0x84d   : > { %v1305_v36 = vcvt.f32.s32 %v1304_v52 }
 0x84f   : > { %v842_v53 = vsel %vm838_vm15, %v1305_v36, %v1874_v55 }
 0x850   : > { %847 = vst.msk [vmem:[%s300_s20 + $0x18] sm:$0xff] %vm843_vm2, %v842_v53 }
 0x851 PF: > { %s17_s23 = sadd.s32 1, %s1357_s23   ;;  %s1954_s21 = smov %s1353_s22 }
 0x852   : > { %p14_p5 = scmp.ge.s32.totalorder %s17_s23, 4   ;;  %s1955_s22 = smov %s1957_s24 }
 0x854   :  { %16 = sbr.rel (!%p14_p5) target bundleno = 2 (0x2), region = 91 }

// kernel: dgcnn_forward.11
= control target key start
LH: loop header
LB: loop body
LE: loop exit
PB: predicated region body
PF: predicated region fallthrough
CT: control target
= control target key end

     0   :  { %s673_s9 = smov 0   ;;  %s675_s10 = smov 0   ;;  %s754_s0 = inlined_call_operand.vmem [shape: bf16[2,32,512], index: 0, kind: input, shape index: {}]   ;;  %s755_s1 = inlined_call_operand.vmem [shape: bf16[2,32,64], index: 1, kind: input, shape index: {}]   ;;  %s756_s2 = inlined_call_operand.vmem [shape: f32[2,32,64], index: 2, kind: output, shape index: {}]  }
   0x1   :  { %s677_s11 = smov 0  }
   0x2 LB: > { %s24_s12 = sadd.s32 1, %s651_s10  ;;  %p567_p0 = scmp.ge.s32.totalorder %s655_s11, 1  ;;  %s655_s11 = sphi %s677_s11, %s12_s11   ;;  %s651_s10 = sphi %s675_s10, %s758_s10   ;;  %s647_s9 = sphi %s673_s9, %s757_s9  }
   0x3   : > { %p26_p1 = scmp.ge.s32.totalorder %s24_s12, 2  ;;  %p151_p2 = scmp.lt.s32.totalorder %s655_s11, 3 }
   0x5   : > { %s760_s12 = smov (%p26_p1, %s24_s12), 0  ;;  %p152_p3 = pnand %p567_p0, %p151_p2 }
   0x6   : > { %p192_p4 = scmp.lt.s32.totalorder (!%p152_p3), %s647_s9, 1  ;;  %s657_s17 = smov (!%p152_p3), 64  }
   0x7   : > { %155 = sbr.rel (%p152_p3) target bundleno = 175 (0xaf), region = 28 }
   0xc   : > { %s762_s9 = smov (!%p192_p4, %s647_s9), 1  ;;  %vm450_vm0 = vcmask 523264  }
   0xd   : > { %s576_s13 = sshll.u32 %s762_s9, 6  ;;  %s577_s18 = sshll.u32 %s762_s9, 4 }
   0xe   : > { %s200_s16 = scalar_lea.vmem %s754_s0, %s576_s13  ;;  %s210_s21 = scalar_lea.vmem %s755_s1, %s577_s18 }
   0xf   : > { %v222_v0 = vld [vmem:[%s200_s16] sm:$0xff]  ;;  %v224_v1 = vld [vmem:[%s200_s16 + $0x10] sm:$0xff]  ;;  %v697_v9 = vld [vmem:[%s200_s16 + $0x28] sm:$0xff]  ;;  %s578_s22 = sshll.u32 %s762_s9, 5 }
  0x10   : > { %290 = vrot.lane.b32.xlu1 %v222_v0, %s657_s17  ;;  %v230_v2 = vunpack.c.l.bf16 %v222_v0  ;;  %v231_v3 = vunpack.c.l.bf16 %v224_v1  ;;  %v226_v4 = vld [vmem:[%s200_s16 + $0x20] sm:$0xff]  ;;  %v228_v5 = vld [vmem:[%s200_s16 + $0x30] sm:$0xff]  ;;  %v699_v10 = vld [vmem:[%s200_s16 + $0x38] sm:$0xff]  ;;  %v324_v12 = vunpack.c.l.bf16 %v697_v9  ;;  %v266_v24 = vrot.slane %v222_v0, 4  ;;  %s220_s25 = scalar_lea.vmem %s756_s2, %s578_s22 }
  0x11   : > { %294 = vrot.lane.b32.xlu2 %v226_v4, %s657_s17  ;;  %v232_v7 = vunpack.c.l.bf16 %v226_v4  ;;  %v233_v8 = vunpack.c.l.bf16 %v228_v5  ;;  %v325_v13 = vunpack.c.l.bf16 %v699_v10  ;;  %v703_v14 = vld [vmem:[%s200_s16 + $0x8] sm:$0xff]  ;;  %v705_v15 = vld [vmem:[%s200_s16 + $0x18] sm:$0xff]  ;;  %v268_v28 = vrot.slane %v226_v4, 4 }
  0x12   : > { %v613_v6 = vpack.i.bf16 %v231_v3, %v230_v2  ;;  %v322_v17 = vunpack.c.l.bf16 %v703_v14  ;;  %v323_v18 = vunpack.c.l.bf16 %v705_v15  ;;  %v269_v29 = vrot.slane %v228_v5, 4 }
  0x13   : > { %v618_v11 = vpack.i.bf16 %v233_v8, %v232_v7  ;;  %v628_v16 = vpack.i.bf16 %v325_v13, %v324_v12  ;;  %v274_v30 = vunpack.c.l.bf16 %v266_v24  ;;  %v267_v33 = vrot.slane %v224_v1, 4 }
  0x14   : > { %614 = vrot.lane.b32.xlu0 %v613_v6, %s657_s17  ;;  %v623_v19 = vpack.i.bf16 %v323_v18, %v322_v17  ;;  %v276_v37 = vunpack.c.l.bf16 %v268_v28  ;;  %v277_v38 = vunpack.c.l.bf16 %v269_v29  ;;  %v370_v53 = vrot.slane %v703_v14, 4 }
  0x15   : > { %v275_v45 = vunpack.c.l.bf16 %v267_v33  ;;  %v373_v54 = vrot.slane %v699_v10, 4  ;;  %v372_v61 = vrot.slane %v697_v9, 4 }
  0x16   : > { %v378_v4 = vunpack.c.l.bf16 %v370_v53 }
  0x17   : > { %v381_v6 = vunpack.c.l.bf16 %v373_v54 }
  0x18   : > { %292 = vrot.lane.b32.xlu1 %v224_v1, %s657_s17 }
  0x19   : > { %296 = vrot.lane.b32.xlu2 %v228_v5, %s657_s17 }
  0x1c   : > { %619 = vrot.lane.b32.xlu0 %v618_v11, %s657_s17 }
  0x20   : > { %629 = vrot.lane.b32.xlu1 %v628_v16, %s657_s17 }
  0x21   : > { %394 = vrot.lane.b32.xlu2 %v703_v14, %s657_s17  ;;  %v587_v14 = vld [vmem:[%s210_s21 + $0x8] sm:$0xff]  }
  0x24   : > { %624 = vrot.lane.b32.xlu0 %v623_v19, %s657_s17 }
  0x28   : > { %398 = vrot.lane.b32.xlu1 %v697_v9, %s657_s17 }
  0x29   : > { %400 = vrot.lane.b32.xlu2 %v699_v10, %s657_s17 }
  0x2c   : > { %396 = vrot.lane.b32.xlu0 %v705_v15, %s657_s17 }
  0x6b   : > { %v295_v20 = vpop.permute.xlu2 %294 }
  0x6c   : > { %v300_v35 = vrot.slane %v295_v20, 4  ;;  %v380_v20 = vunpack.c.l.bf16 %v372_v61 }
  0x6e   : > { %v308_v50 = vunpack.c.l.bf16 %v300_v35 }
  0x73   : > { %v297_v21 = vpop.permute.xlu2 %296 }
  0x74   : > { %v301_v41 = vrot.slane %v297_v21, 4  ;;  %v371_v21 = vrot.slane %v705_v15, 4 }
  0x76   : > { %v309_v55 = vunpack.c.l.bf16 %v301_v41  ;;  %v379_v29 = vunpack.c.l.bf16 %v371_v21 }
  0x7b   : > { %v395_v26 = vpop.permute.xlu2 %394 }
  0x82   : > { %v291_v22 = vpop.permute.xlu1 %290 }
  0x83   : > { %v298_v34 = vrot.slane %v291_v22, 4  ;;  %v401_v49 = vpop.permute.xlu2 %400 }
  0x84   : > { %v405_v60 = vrot.slane %v401_v49, 4 }
  0x85   : > { %v306_v46 = vunpack.c.l.bf16 %v298_v34  ;;  %v586_v34 = vunpack.c.h.bf16 %v587_v14 }
  0x86   : > { %v615_v23 = vpop.permute.xlu0 %614  ;;  %v413_v9 = vunpack.c.l.bf16 %v405_v60 }
  0x87   : > { %v616_v25 = vunpack.i.l.bf16 %v615_v23  ;;  %v617_v32 = vunpack.i.h.bf16 %v615_v23 }
  0x89   : > { %v250_v31 = vmax.f32 %v230_v2, %v616_v25  ;;  %v251_v44 = vmax.f32 %v231_v3, %v617_v32  ;;  %v402_v3 = vrot.slane %v395_v26, 4 }
  0x8a   : > { %v293_v27 = vpop.permute.xlu1 %292 }
  0x8b   : > { %v299_v36 = vrot.slane %v293_v27, 4  ;;  %v278_v40 = vmax.f32 %v250_v31, %v274_v30  ;;  %v279_v59 = vmax.f32 %v251_v44, %v275_v45  ;;  %v580_v27 = vld [vmem:[%s210_s21] sm:$0xff]  }
  0x8c   : > { %v581_v35 = vunpack.c.l.bf16 %v580_v27  ;;  %v582_v49 = vunpack.c.h.bf16 %v580_v27 }
  0x8d   : > { %v307_v51 = vunpack.c.l.bf16 %v299_v36  ;;  %v310_v58 = vmax.f32 %v278_v40, %v306_v46 }
  0x8e   : > { %v620_v39 = vpop.permute.xlu0 %619 }
  0x8f   : > { %v622_v42 = vunpack.i.h.bf16 %v620_v39  ;;  %v621_v43 = vunpack.i.l.bf16 %v620_v39  ;;  %v311_v2 = vmax.f32 %v279_v59, %v307_v51  ;;  %v326_v16 = vmax.f32 %v310_v58, %v322_v17 }
  0x90   : > { %v585_v39 = vunpack.c.l.bf16 %v587_v14 }
  0x91   : > { %v253_v47 = vmax.f32 %v233_v8, %v622_v42  ;;  %v252_v48 = vmax.f32 %v232_v7, %v621_v43  ;;  %v327_v10 = vmax.f32 %v311_v2, %v323_v18 }
  0x92   : > { %v630_v52 = vpop.permute.xlu1 %629 }
  0x93   : > { %v281_v56 = vmax.f32 %v253_v47, %v277_v38  ;;  %v280_v57 = vmax.f32 %v252_v48, %v276_v37  ;;  %v632_v62 = vunpack.i.h.bf16 %v630_v52  ;;  %v631_v63 = vunpack.i.l.bf16 %v630_v52 }
  0x95   : > { %v312_v0 = vmax.f32 %v280_v57, %v308_v50  ;;  %v313_v1 = vmax.f32 %v281_v56, %v309_v55 }
  0x96   : > { %v625_v5 = vpop.permute.xlu0 %624 }
  0x97   : > { %v328_v7 = vmax.f32 %v312_v0, %v324_v12  ;;  %v329_v8 = vmax.f32 %v313_v1, %v325_v13  ;;  %v626_v11 = vunpack.i.l.bf16 %v625_v5  ;;  %v627_v19 = vunpack.i.h.bf16 %v625_v5 }
  0x98   : > { %v410_v13 = vunpack.c.l.bf16 %v402_v3 }
  0x99   : > { %v356_v22 = vmax.f32 %v328_v7, %v631_v63  ;;  %v357_v23 = vmax.f32 %v329_v8, %v632_v62  ;;  %v354_v24 = vmax.f32 %v326_v16, %v626_v11  ;;  %v355_v28 = vmax.f32 %v327_v10, %v627_v19 }
  0x9a   : > { %v399_v12 = vpop.permute.xlu1 %398 }
  0x9b   : > { %v382_v25 = vmax.f32 %v354_v24, %v378_v4  ;;  %v385_v17 = vmax.f32 %v357_v23, %v381_v6  ;;  %v404_v26 = vrot.slane %v399_v12, 4  ;;  %v384_v32 = vmax.f32 %v356_v22, %v380_v20 }
  0x9c   : > { %v383_v40 = vmax.f32 %v355_v28, %v379_v29 }
  0x9d   : > { %v414_v30 = vmax.f32 %v382_v25, %v410_v13  ;;  %v417_v31 = vmax.f32 %v385_v17, %v413_v9  ;;  %v412_v33 = vunpack.c.l.bf16 %v404_v26 }
  0x9e   : > { %v397_v36 = vpop.permute.xlu0 %396 }
  0x9f   : > { %v418_v37 = vpack.c.bf16 %v414_v30, %v414_v30  ;;  %v421_v15 = vpack.c.bf16 %v417_v31, %v417_v31  ;;  %v416_v18 = vmax.f32 %v384_v32, %v412_v33  ;;  %v403_v38 = vrot.slane %v397_v36, 4 }
  0xa1   : > { %v422_v41 = vunpack.c.l.bf16 %v418_v37  ;;  %v425_v42 = vunpack.c.l.bf16 %v421_v15  ;;  %v420_v43 = vpack.c.bf16 %v416_v18, %v416_v18  ;;  %v411_v44 = vunpack.c.l.bf16 %v403_v38 }
  0xa3   : > { %v437_v45 = vadd.f32 %v586_v34, %v425_v42  ;;  %v424_v46 = vunpack.c.l.bf16 %v420_v43  ;;  %v415_v47 = vmax.f32 %v383_v40, %v411_v44  ;;  %v434_v48 = vadd.f32 %v581_v35, %v422_v41 }
  0xa5   : > { %vm441_vm1 = vcmp.gt.f32.partialorder %v437_v45, 0.0  ;;  %v445_v50 = vmul.f32 0.2, %v437_v45  ;;  %v436_v51 = vadd.f32 %v585_v39, %v424_v46  ;;  %v419_v52 = vpack.c.bf16 %v415_v47, %v415_v47 }
  0xa6   : > { %vm438_vm2 = vcmp.gt.f32.partialorder %v434_v48, 0.0  ;;  %v442_v53 = vmul.f32 0.2, %v434_v48 }
  0xa7   : > { %v449_v54 = vsel %vm441_vm1, %v437_v45, %v445_v50  ;;  %vm440_vm3 = vcmp.gt.f32.partialorder %v436_v51, 0.0  ;;  %v444_v55 = vmul.f32 0.2, %v436_v51  ;;  %v423_v56 = vunpack.c.l.bf16 %v419_v52 }
  0xa8   : > { %454 = vst.msk [vmem:[%s220_s25 + $0x18] sm:$0xff] %vm450_vm0, %v449_v54  ;;  %v446_v57 = vsel %vm438_vm2, %v434_v48, %v442_v53 }
  0xa9   : > { %v448_v58 = vsel %vm440_vm3, %v436_v51, %v444_v55  ;;  %v435_v59 = vadd.f32 %v582_v49, %v423_v56  ;;  %451 = vst.msk [vmem:[%s220_s25] sm:$0xff] %vm450_vm0, %v446_v57 }
  0xaa   : > { %453 = vst.msk [vmem:[%s220_s25 + $0x10] sm:$0xff] %vm450_vm0, %v448_v58 }
  0xab   : > { %vm439_vm4 = vcmp.gt.f32.partialorder %v435_v59, 0.0  ;;  %v443_v60 = vmul.f32 0.2, %v435_v59 }
  0xad   : > { %v447_v61 = vsel %vm439_vm4, %v435_v59, %v443_v60 }
  0xae   : > { %452 = vst.msk [vmem:[%s220_s25 + $0x8] sm:$0xff] %vm450_vm0, %v447_v61 }
  0xaf PF: > { %s12_s11 = sadd.s32 1, %s655_s11   ;;  %s757_s9 = smov %s651_s10 }
  0xb0   : > { %p9_p5 = scmp.ge.s32.totalorder %s12_s11, 4   ;;  %s758_s10 = smov %s760_s12 }
  0xb2   :  { %11 = sbr.rel (!%p9_p5) target bundleno = 2 (0x2), region = 61 }

// kernel: dgcnn_forward.12
= control target key start
LH: loop header
LB: loop body
LE: loop exit
PB: predicated region body
PF: predicated region fallthrough
CT: control target
= control target key end

     0   :  { %s1486_s21 = smov 0   ;;  %s1488_s22 = smov 0   ;;  %s2043_s0 = inlined_call_operand.vmem [shape: f32[2,32,64], index: 0, kind: input, shape index: {}]   ;;  %s2044_s1 = inlined_call_operand.vmem [shape: bf16[64,64], index: 1, kind: input, shape index: {}]   ;;  %s2045_s2 = inlined_call_operand.vmem [shape: bf16[64,64], index: 2, kind: input, shape index: {}]   ;;  %s2046_s3 = inlined_call_operand.vmem [shape: f32[1,64], index: 3, kind: input, shape index: {}]   ;;  %s2047_s4 = inlined_call_operand.vmem [shape: s32[2,32,8], index: 4, kind: output, shape index: {0}]   ;;  %s2048_s5 = inlined_call_operand.vmem [shape: bf16[2,32,64], index: 5, kind: output, shape index: {1}]   ;;  %s2049_s6 = inlined_call_operand.vmem [shape: bf16[2,32,64], index: 6, kind: output, shape index: {2}]  }
   0x1   :  { %s1490_s23 = smov 0  }
   0x2 LB: > { %s29_s24 = sadd.s32 1, %s1444_s22  ;;  %p1166_p0 = scmp.ge.s32.totalorder %s1448_s23, 1  ;;  %s1448_s23 = sphi %s1490_s23, %s17_s23   ;;  %s1444_s22 = sphi %s1488_s22, %s2051_s22   ;;  %s1440_s21 = sphi %s1486_s21, %s2050_s21  }
   0x3   : > { %p31_p1 = scmp.ge.s32.totalorder %s29_s24, 2  ;;  %p235_p2 = scmp.lt.s32.totalorder %s1448_s23, 3 }
   0x5   : > { %s2053_s24 = smov (%p31_p1, %s29_s24), 0  ;;  %p236_p3 = pnand %p1166_p0, %p235_p2 }
   0x6   : > { %p287_p4 = scmp.lt.s32.totalorder (!%p236_p3), %s1440_s21, 1 }
   0x7   : > { %239 = sbr.rel (%p236_p3) target bundleno = 2129 (0x851), region = 36 }
   0xc   : > { %s2055_s21 = smov (!%p287_p4, %s1440_s21), 1  ;;  %vm337_vm0 = vcmask 523264   ;;  %v1450_v13 = vmov 1.0   ;;  %vm458_vm1 = vcmask 261120   ;;  %v455_v39 = vlaneseq }
   0xd   : > { %s1226_s25 = sshll.u32 %s2055_s21, 5 }
   0xe   : > { %s1512_s28 = scalar_lea.vmem %s2043_s0, %s1226_s25  ;;  %v1556_v40 = vand.u32 127, %v455_v39  ;;  %s300_s13 = scalar_lea.vmem %s2047_s4, %s1226_s25 }
   0xf   : > { %v327_v0 = vld [vmem:[%s1512_s28 + $0x18] sm:$0xff]  ;;  %v326_v1 = vld [vmem:[%s1512_s28 + $0x10] sm:$0xff]  ;;  %v1518_v3 = vld [vmem:[%s1512_s28] sm:$0xff] }
  0x10   : > { %1175 = vmatpush.xpose.msk.msra.mxu0 %vm337_vm0, %v327_v0  ;;  %v410_v2 = vmul.f32 %v327_v0, %v327_v0  ;;  %v407_v4 = vmul.f32 %v1518_v3, %v1518_v3  ;;  %v409_v5 = vmul.f32 %v326_v1, %v326_v1  ;;  %v1524_v6 = vld [vmem:[%s1512_s28 + $0x8] sm:$0xff]  ;;  %v333_v11 = vadd.f32 %v1518_v3, %v1518_v3 }
  0x11   : > { %v408_v8 = vmul.f32 %v1524_v6, %v1524_v6  ;;  %v334_v14 = vadd.f32 %v1524_v6, %v1524_v6  ;;  %v335_v15 = vadd.f32 %v326_v1, %v326_v1  ;;  %v336_v16 = vadd.f32 %v327_v0, %v327_v0 }
  0x12   : > { %1183 = vmatpush.xpose.msk.msra.mxu1 %vm337_vm0, %v410_v2  ;;  %v395_v7 = vsel %vm337_vm0, %v407_v4, 0.0  ;;  %v401_v9 = vsel %vm337_vm0, %v409_v5, 0.0  ;;  %v404_v12 = vsel %vm337_vm0, %v410_v2, 0.0  ;;  %v1559_v41 = vcvt.s32.f32 %v1556_v40 }
  0x13   : > { %396 = vadd.xlane.f32.xlu0 %v395_v7  ;;  %402 = vadd.xlane.f32.xlu1 %v401_v9  ;;  %v398_v10 = vsel %vm337_vm0, %v408_v8, 0.0 }
  0x14   : > { %1176 = vmatpush.xpose.msk.msra.mxu0 %vm337_vm0, %v326_v1 }
  0x16   : > { %1184 = vmatpush.xpose.msk.msra.mxu1 %vm337_vm0, %v409_v5 }
  0x18   : > { %1177 = vmatpush.xpose.msk.msra.mxu0 %vm337_vm0, %v1524_v6 }
  0x1a   : > { %1185 = vmatpush.xpose.msk.msra.mxu1 %vm337_vm0, %v408_v8 }
  0x1b   : > { %399 = vadd.xlane.f32.xlu0 %v398_v10  ;;  %405 = vadd.xlane.f32.xlu1 %v404_v12 }
  0x1c   : > { %1178 = vmatpush.xpose.msk.msra.mxu0 %vm337_vm0, %v1518_v3 }
  0x1e   : > { %1186 = vmatpush.xpose.msk.msra.mxu1 %vm337_vm0, %v407_v4 }
  0x1f   : > { %1179 = vmatmul.msk.f32.vlgmr.msra.gmra.mxu0 %vm337_vm0, %v333_v11 }
  0x21   : > { %1187 = vmatmul.msk.f32.vlgmr.msra.gmra.mxu1 %vm337_vm0, %v1450_v13 }
  0x27   : > { %1180 = vmatmul.msk.f32.gmra.mxu0 %vm337_vm0, %v334_v14 }
  0x2f   : > { %1181 = vmatmul.msk.f32.gmra.mxu0 %vm337_vm0, %v335_v15 }
  0x37   : > { %1182 = vmatmul.msk.f32.gmra.mxu0 %vm337_vm0, %v336_v16 }
  0x86   : > { %v397_v17 = vpop.xlane.xlu0 %396  ;;  %v403_v28 = vpop.xlane.xlu1 %402 }
  0x8e   : > { %v400_v23 = vpop.xlane.xlu0 %399  ;;  %v406_v34 = vpop.xlane.xlu1 %405 }
  0x9c   : > { %v379_v18 = vpop.f32.mrf.mxu0 }
  0x9d   : > { %v446_v20 = vsub.f32 %v379_v18, %v397_v17 }
  0x9e   : > { %v443_v19 = vpop.f32.mrf.mxu1 }
  0x9f   : > { %v450_v21 = vperm.slane %v443_v19, 0 }
  0xa1   : > { %v451_v22 = vsub.f32 %v446_v20, %v450_v21 }
  0xa3   : > { %v459_v24 = vsel %vm458_vm1, %v451_v22, -inf }
  0xa4   : > { %460 = vmax.xlane.f32.xlu2 %v459_v24  ;;  %v382_v25 = vpop.f32.mrf.mxu0 }
  0xa5   : > { %v447_v26 = vsub.f32 %v382_v25, %v400_v23 }
  0xa7   : > { %v452_v27 = vsub.f32 %v447_v26, %v450_v21 }
  0xa9   : > { %v462_v29 = vsel %vm458_vm1, %v452_v27, -inf }
  0xac   : > { %463 = vmax.xlane.f32.xlu2 %v462_v29  ;;  %v385_v30 = vpop.f32.mrf.mxu0 }
  0xad   : > { %v448_v31 = vsub.f32 %v385_v30, %v403_v28 }
  0xaf   : > { %v453_v32 = vsub.f32 %v448_v31, %v450_v21 }
  0xb1   : > { %v465_v33 = vsel %vm458_vm1, %v453_v32, -inf }
  0xb2   : > { %466 = vmax.xlane.f32.xlu0 %v465_v33 }
  0xb4   : > { %v388_v35 = vpop.f32.mrf.mxu0 }
  0xb5   : > { %v449_v36 = vsub.f32 %v388_v35, %v406_v34 }
  0xb7   : > { %v1552_v37 = vsub.f32 %v449_v36, %v450_v21 }
  0xb9   : > { %v468_v38 = vsel %vm458_vm1, %v1552_v37, -inf }
  0xba   : > { %469 = vmax.xlane.f32.xlu1 %v468_v38 }
 0x117   : > { %v461_v42 = vpop.xlane.xlu2 %460 }
 0x118   : > { %vm471_vm2 = vcmp.eq.f32.partialorder %v451_v22, %v461_v42 }
 0x119   : > { %v475_v43 = vsel %vm471_vm2, %v1559_v41, 32.0 }
 0x11a   : > { %v479_v44 = vsel %vm458_vm1, %v475_v43, inf }
 0x11b   : > { %480 = vmin.xlane.f32.xlu2 %v479_v44 }
 0x11f   : > { %v464_v45 = vpop.xlane.xlu2 %463 }
 0x120   : > { %vm472_vm3 = vcmp.eq.f32.partialorder %v452_v27, %v464_v45 }
 0x121   : > { %v476_v46 = vsel %vm472_vm3, %v1559_v41, 32.0 }
 0x122   : > { %v482_v47 = vsel %vm458_vm1, %v476_v46, inf }
 0x123   : > { %483 = vmin.xlane.f32.xlu0 %v482_v47 }
 0x125   : > { %v467_v48 = vpop.xlane.xlu0 %466 }
 0x126   : > { %vm473_vm4 = vcmp.eq.f32.partialorder %v453_v32, %v467_v48 }
 0x127   : > { %v477_v49 = vsel %vm473_vm4, %v1559_v41, 32.0 }
 0x128   : > { %v485_v50 = vsel %vm458_vm1, %v477_v49, inf }
 0x129   : > { %486 = vmin.xlane.f32.xlu1 %v485_v50 }
 0x12d   : > { %v470_v51 = vpop.xlane.xlu1 %469 }
 0x12e   : > { %vm474_vm5 = vcmp.eq.f32.partialorder %v1552_v37, %v470_v51 }
 0x12f   : > { %v478_v52 = vsel %vm474_vm5, %v1559_v41, 32.0  ;;  %vm503_vm5 = vcmp.eq.s32.totalorder %v1556_v40, 0 }
 0x130   : > { %v488_v53 = vsel %vm458_vm1, %v478_v52, inf }
 0x131   : > { %489 = vmin.xlane.f32.xlu2 %v488_v53 }
 0x18e   : > { %v481_v54 = vpop.xlane.xlu2 %480 }
 0x18f   : > { %vm1238_vm6 = vcmp.lt.s32.totalorder %v481_v54, 0  ;;  %v1239_v55 = vceil.f32 %v481_v54  ;;  %v1240_v56 = vfloor.f32 %v481_v54 }
 0x191   : > { %v1570_v57 = vsel %vm1238_vm6, %v1239_v55, %v1240_v56  ;;  %vm552_vm6 = vcmp.eq.s32.totalorder %v1556_v40, 1 }
 0x192   : > { %v1242_v58 = vcvt.f32.s32 %v1570_v57 }
 0x194   : > { %vm495_vm7 = vcmp.eq.s32.totalorder %v1556_v40, %v1242_v58 }
 0x195   : > { %v1576_v59 = vsel %vm495_vm7, -3e+38, %v451_v22 }
 0x196   : > { %v484_v60 = vpop.xlane.xlu0 %483  ;;  %v508_v61 = vsel %vm458_vm1, %v1576_v59, -inf }
 0x197   : > { %vm1243_vm8 = vcmp.lt.s32.totalorder %v484_v60, 0  ;;  %v1244_v62 = vceil.f32 %v484_v60  ;;  %v1245_v63 = vfloor.f32 %v484_v60  ;;  %509 = vmax.xlane.f32.xlu0 %v508_v61 }
 0x199   : > { %v1580_v0 = vsel %vm1243_vm8, %v1244_v62, %v1245_v63 }
 0x19a   : > { %v1247_v1 = vcvt.f32.s32 %v1580_v0 }
 0x19c   : > { %v487_v2 = vpop.xlane.xlu1 %486  ;;  %vm496_vm9 = vcmp.eq.s32.totalorder %v1556_v40, %v1247_v1  ;;  %v505_v48 = vsel %vm503_vm5, %v1247_v1, 0 }
 0x19d   : > { %vm1248_vm10 = vcmp.lt.s32.totalorder %v487_v2, 0  ;;  %v1249_v4 = vceil.f32 %v487_v2  ;;  %v1250_v5 = vfloor.f32 %v487_v2  ;;  %v1586_v7 = vsel %vm496_vm9, -3e+38, %v452_v27 }
 0x19e   : > { %v511_v8 = vsel %vm458_vm1, %v1586_v7, -inf }
 0x19f   : > { %v1590_v9 = vsel %vm1248_vm10, %v1249_v4, %v1250_v5  ;;  %512 = vmax.xlane.f32.xlu1 %v511_v8 }
 0x1a0   : > { %v1252_v10 = vcvt.f32.s32 %v1590_v9 }
 0x1a2   : > { %vm497_vm11 = vcmp.eq.s32.totalorder %v1556_v40, %v1252_v10  ;;  %v506_v57 = vsel %vm503_vm5, %v1252_v10, 0 }
 0x1a3   : > { %v1596_v11 = vsel %vm497_vm11, -3e+38, %v453_v32 }
 0x1a4   : > { %v490_v12 = vpop.xlane.xlu2 %489  ;;  %v514_v13 = vsel %vm458_vm1, %v1596_v11, -inf }
 0x1a5   : > { %vm1253_vm12 = vcmp.lt.s32.totalorder %v490_v12, 0  ;;  %v1254_v14 = vceil.f32 %v490_v12  ;;  %v1255_v15 = vfloor.f32 %v490_v12  ;;  %515 = vmax.xlane.f32.xlu2 %v514_v13 }
 0x1a7   : > { %v1600_v16 = vsel %vm1253_vm12, %v1254_v14, %v1255_v15 }
 0x1a8   : > { %v1257_v17 = vcvt.f32.s32 %v1600_v16 }
 0x1aa   : > { %vm498_vm13 = vcmp.eq.s32.totalorder %v1556_v40, %v1257_v17  ;;  %v507_v2 = vsel %vm503_vm5, %v1257_v17, 0 }
 0x1ab   : > { %v1607_v18 = vsel %vm498_vm13, -3e+38, %v1552_v37  ;;  %v504_v37 = vsel %vm503_vm5, %v1242_v58, 0  ;;  %vm601_vm5 = vcmp.eq.s32.totalorder %v1556_v40, 2 }
 0x1ac   : > { %v517_v19 = vsel %vm458_vm1, %v1607_v18, -inf }
 0x1ad   : > { %518 = vmax.xlane.f32.xlu0 %v517_v19 }
 0x20a   : > { %v510_v20 = vpop.xlane.xlu0 %509 }
 0x20b   : > { %vm520_vm14 = vcmp.eq.f32.partialorder %v1576_v59, %v510_v20 }
 0x20c   : > { %v524_v21 = vsel %vm520_vm14, %v1559_v41, 32.0 }
 0x20d   : > { %v528_v22 = vsel %vm458_vm1, %v524_v21, inf }
 0x20e   : > { %529 = vmin.xlane.f32.xlu1 %v528_v22 }
 0x212   : > { %v513_v23 = vpop.xlane.xlu1 %512 }
 0x213   : > { %vm521_vm15 = vcmp.eq.f32.partialorder %v1586_v7, %v513_v23 }
 0x214   : > { %v525_v24 = vsel %vm521_vm15, %v1559_v41, 32.0 }
 0x215   : > { %v531_v25 = vsel %vm458_vm1, %v525_v24, inf }
 0x216   : > { %532 = vmin.xlane.f32.xlu2 %v531_v25 }
 0x218   : > { %v516_v26 = vpop.xlane.xlu2 %515 }
 0x219   : > { %vm522_vm2 = vcmp.eq.f32.partialorder %v1596_v11, %v516_v26 }
 0x21a   : > { %v526_v27 = vsel %vm522_vm2, %v1559_v41, 32.0 }
 0x21b   : > { %v534_v28 = vsel %vm458_vm1, %v526_v27, inf }
 0x21c   : > { %535 = vmin.xlane.f32.xlu0 %v534_v28 }
 0x220   : > { %v519_v29 = vpop.xlane.xlu0 %518 }
 0x221   : > { %vm523_vm3 = vcmp.eq.f32.partialorder %v1607_v18, %v519_v29 }
 0x222   : > { %v527_v30 = vsel %vm523_vm3, %v1559_v41, 32.0 }
 0x223   : > { %v537_v31 = vsel %vm458_vm1, %v527_v30, inf }
 0x224   : > { %538 = vmin.xlane.f32.xlu1 %v537_v31 }
 0x281   : > { %v530_v32 = vpop.xlane.xlu1 %529 }
 0x282   : > { %vm1258_vm4 = vcmp.lt.s32.totalorder %v530_v32, 0  ;;  %v1259_v33 = vceil.f32 %v530_v32  ;;  %v1260_v34 = vfloor.f32 %v530_v32 }
 0x284   : > { %v1261_v35 = vsel %vm1258_vm4, %v1259_v33, %v1260_v34 }
 0x285   : > { %v1262_v36 = vcvt.f32.s32 %v1261_v35 }
 0x287   : > { %vm544_vm7 = vcmp.eq.s32.totalorder %v1556_v40, %v1262_v36  ;;  %v1632_v38 = vsel %vm552_vm6, %v1262_v36, %v504_v37 }
 0x288   : > { %v1635_v39 = vsel %vm544_vm7, -3e+38, %v1576_v59 }
 0x289   : > { %v533_v42 = vpop.xlane.xlu2 %532  ;;  %v557_v43 = vsel %vm458_vm1, %v1635_v39, -inf }
 0x28a   : > { %vm1263_vm8 = vcmp.lt.s32.totalorder %v533_v42, 0  ;;  %v1264_v44 = vceil.f32 %v533_v42  ;;  %v1265_v45 = vfloor.f32 %v533_v42  ;;  %558 = vmax.xlane.f32.xlu2 %v557_v43 }
 0x28c   : > { %v1266_v46 = vsel %vm1263_vm8, %v1264_v44, %v1265_v45 }
 0x28d   : > { %v1267_v47 = vcvt.f32.s32 %v1266_v46 }
 0x28f   : > { %v536_v49 = vpop.xlane.xlu0 %535  ;;  %vm545_vm9 = vcmp.eq.s32.totalorder %v1556_v40, %v1267_v47  ;;  %v1646_v50 = vsel %vm552_vm6, %v1267_v47, %v505_v48 }
 0x290   : > { %vm1268_vm10 = vcmp.lt.s32.totalorder %v536_v49, 0  ;;  %v1269_v51 = vceil.f32 %v536_v49  ;;  %v1270_v52 = vfloor.f32 %v536_v49  ;;  %v1649_v53 = vsel %vm545_vm9, -3e+38, %v1586_v7 }
 0x291   : > { %v560_v54 = vsel %vm458_vm1, %v1649_v53, -inf }
 0x292   : > { %v1271_v55 = vsel %vm1268_vm10, %v1269_v51, %v1270_v52  ;;  %561 = vmax.xlane.f32.xlu0 %v560_v54 }
 0x293   : > { %v1272_v56 = vcvt.f32.s32 %v1271_v55 }
 0x295   : > { %vm546_vm11 = vcmp.eq.s32.totalorder %v1556_v40, %v1272_v56  ;;  %v1660_v58 = vsel %vm552_vm6, %v1272_v56, %v506_v57 }
 0x296   : > { %v1663_v59 = vsel %vm546_vm11, -3e+38, %v1596_v11 }
 0x297   : > { %v539_v60 = vpop.xlane.xlu1 %538  ;;  %v563_v61 = vsel %vm458_vm1, %v1663_v59, -inf }
 0x298   : > { %vm1273_vm12 = vcmp.lt.s32.totalorder %v539_v60, 0  ;;  %v1274_v62 = vceil.f32 %v539_v60  ;;  %v1275_v63 = vfloor.f32 %v539_v60  ;;  %564 = vmax.xlane.f32.xlu1 %v563_v61 }
 0x29a   : > { %v1276_v0 = vsel %vm1273_vm12, %v1274_v62, %v1275_v63 }
 0x29b   : > { %v1277_v1 = vcvt.f32.s32 %v1276_v0 }
 0x29d   : > { %vm547_vm13 = vcmp.eq.s32.totalorder %v1556_v40, %v1277_v1  ;;  %v1674_v4 = vsel %vm552_vm6, %v1277_v1, %v507_v2 }
 0x29e   : > { %v1677_v5 = vsel %vm547_vm13, -3e+38, %v1607_v18 }
 0x29f   : > { %v566_v7 = vsel %vm458_vm1, %v1677_v5, -inf }
 0x2a0   : > { %567 = vmax.xlane.f32.xlu2 %v566_v7 }
 0x2fd   : > { %v559_v8 = vpop.xlane.xlu2 %558 }
 0x2fe   : > { %vm569_vm14 = vcmp.eq.f32.partialorder %v1635_v39, %v559_v8 }
 0x2ff   : > { %v573_v9 = vsel %vm569_vm14, %v1559_v41, 32.0 }
 0x300   : > { %v577_v10 = vsel %vm458_vm1, %v573_v9, inf }
 0x301   : > { %578 = vmin.xlane.f32.xlu0 %v577_v10 }
 0x305   : > { %v562_v11 = vpop.xlane.xlu0 %561 }
 0x306   : > { %vm570_vm15 = vcmp.eq.f32.partialorder %v1649_v53, %v562_v11 }
 0x307   : > { %v574_v12 = vsel %vm570_vm15, %v1559_v41, 32.0 }
 0x308   : > { %v580_v13 = vsel %vm458_vm1, %v574_v12, inf }
 0x309   : > { %581 = vmin.xlane.f32.xlu1 %v580_v13 }
 0x30b   : > { %v565_v14 = vpop.xlane.xlu1 %564 }
 0x30c   : > { %vm571_vm2 = vcmp.eq.f32.partialorder %v1663_v59, %v565_v14 }
 0x30d   : > { %v575_v15 = vsel %vm571_vm2, %v1559_v41, 32.0 }
 0x30e   : > { %v583_v16 = vsel %vm458_vm1, %v575_v15, inf }
 0x30f   : > { %584 = vmin.xlane.f32.xlu2 %v583_v16 }
 0x313   : > { %v568_v17 = vpop.xlane.xlu2 %567 }
 0x314   : > { %vm572_vm3 = vcmp.eq.f32.partialorder %v1677_v5, %v568_v17 }
 0x315   : > { %v576_v18 = vsel %vm572_vm3, %v1559_v41, 32.0 }
 0x316   : > { %v586_v19 = vsel %vm458_vm1, %v576_v18, inf }
 0x317   : > { %587 = vmin.xlane.f32.xlu0 %v586_v19 }
 0x374   : > { %v579_v20 = vpop.xlane.xlu0 %578 }
 0x375   : > { %vm1278_vm4 = vcmp.lt.s32.totalorder %v579_v20, 0  ;;  %v1279_v21 = vceil.f32 %v579_v20  ;;  %v1280_v22 = vfloor.f32 %v579_v20 }
 0x377   : > { %v1281_v23 = vsel %vm1278_vm4, %v1279_v21, %v1280_v22  ;;  %vm650_vm4 = vcmp.eq.s32.totalorder %v1556_v40, 3 }
 0x378   : > { %v1282_v24 = vcvt.f32.s32 %v1281_v23 }
 0x37a   : > { %vm593_vm6 = vcmp.eq.s32.totalorder %v1556_v40, %v1282_v24  ;;  %v1698_v25 = vsel %vm601_vm5, %v1282_v24, %v1632_v38 }
 0x37b   : > { %v1701_v26 = vsel %vm593_vm6, -3e+38, %v1635_v39 }
 0x37c   : > { %v582_v27 = vpop.xlane.xlu1 %581  ;;  %v606_v28 = vsel %vm458_vm1, %v1701_v26, -inf }
 0x37d   : > { %vm1283_vm7 = vcmp.lt.s32.totalorder %v582_v27, 0  ;;  %v1284_v29 = vceil.f32 %v582_v27  ;;  %v1285_v30 = vfloor.f32 %v582_v27  ;;  %607 = vmax.xlane.f32.xlu1 %v606_v28 }
 0x37f   : > { %v1286_v31 = vsel %vm1283_vm7, %v1284_v29, %v1285_v30 }
 0x380   : > { %v1287_v32 = vcvt.f32.s32 %v1286_v31 }
 0x382   : > { %v585_v33 = vpop.xlane.xlu2 %584  ;;  %vm594_vm8 = vcmp.eq.s32.totalorder %v1556_v40, %v1287_v32  ;;  %v1709_v34 = vsel %vm601_vm5, %v1287_v32, %v1646_v50 }
 0x383   : > { %vm1288_vm9 = vcmp.lt.s32.totalorder %v585_v33, 0  ;;  %v1289_v35 = vceil.f32 %v585_v33  ;;  %v1290_v36 = vfloor.f32 %v585_v33  ;;  %v1712_v37 = vsel %vm594_vm8, -3e+38, %v1649_v53 }
 0x384   : > { %v609_v38 = vsel %vm458_vm1, %v1712_v37, -inf }
 0x385   : > { %v1291_v39 = vsel %vm1288_vm9, %v1289_v35, %v1290_v36  ;;  %610 = vmax.xlane.f32.xlu2 %v609_v38 }
 0x386   : > { %v1292_v42 = vcvt.f32.s32 %v1291_v39 }
 0x388   : > { %vm595_vm10 = vcmp.eq.s32.totalorder %v1556_v40, %v1292_v42  ;;  %v1720_v43 = vsel %vm601_vm5, %v1292_v42, %v1660_v58 }
 0x389   : > { %v1723_v44 = vsel %vm595_vm10, -3e+38, %v1663_v59 }
 0x38a   : > { %v588_v45 = vpop.xlane.xlu0 %587  ;;  %v612_v46 = vsel %vm458_vm1, %v1723_v44, -inf }
 0x38b   : > { %vm1293_vm11 = vcmp.lt.s32.totalorder %v588_v45, 0  ;;  %v1294_v47 = vceil.f32 %v588_v45  ;;  %v1295_v48 = vfloor.f32 %v588_v45  ;;  %613 = vmax.xlane.f32.xlu0 %v612_v46 }
 0x38d   : > { %v1296_v49 = vsel %vm1293_vm11, %v1294_v47, %v1295_v48 }
 0x38e   : > { %v1297_v50 = vcvt.f32.s32 %v1296_v49 }
 0x390   : > { %vm596_vm12 = vcmp.eq.s32.totalorder %v1556_v40, %v1297_v50  ;;  %v1731_v51 = vsel %vm601_vm5, %v1297_v50, %v1674_v4 }
 0x391   : > { %v1734_v52 = vsel %vm596_vm12, -3e+38, %v1677_v5 }
 0x392   : > { %v615_v53 = vsel %vm458_vm1, %v1734_v52, -inf }
 0x393   : > { %616 = vmax.xlane.f32.xlu1 %v615_v53 }
 0x3f0   : > { %v608_v54 = vpop.xlane.xlu1 %607 }
 0x3f1   : > { %vm618_vm13 = vcmp.eq.f32.partialorder %v1701_v26, %v608_v54 }
 0x3f2   : > { %v622_v55 = vsel %vm618_vm13, %v1559_v41, 32.0 }
 0x3f3   : > { %v626_v56 = vsel %vm458_vm1, %v622_v55, inf }
 0x3f4   : > { %627 = vmin.xlane.f32.xlu2 %v626_v56 }
 0x3f8   : > { %v611_v57 = vpop.xlane.xlu2 %610 }
 0x3f9   : > { %vm619_vm14 = vcmp.eq.f32.partialorder %v1712_v37, %v611_v57 }
 0x3fa   : > { %v623_v58 = vsel %vm619_vm14, %v1559_v41, 32.0 }
 0x3fb   : > { %v629_v59 = vsel %vm458_vm1, %v623_v58, inf }
 0x3fc   : > { %630 = vmin.xlane.f32.xlu0 %v629_v59 }
 0x3fe   : > { %v614_v60 = vpop.xlane.xlu0 %613 }
 0x3ff   : > { %vm620_vm15 = vcmp.eq.f32.partialorder %v1723_v44, %v614_v60 }
 0x400   : > { %v624_v61 = vsel %vm620_vm15, %v1559_v41, 32.0 }
 0x401   : > { %v632_v62 = vsel %vm458_vm1, %v624_v61, inf }
 0x402   : > { %633 = vmin.xlane.f32.xlu1 %v632_v62 }
 0x406   : > { %v617_v63 = vpop.xlane.xlu1 %616 }
 0x407   : > { %vm621_vm2 = vcmp.eq.f32.partialorder %v1734_v52, %v617_v63 }
 0x408   : > { %v625_v0 = vsel %vm621_vm2, %v1559_v41, 32.0 }
 0x409   : > { %v635_v1 = vsel %vm458_vm1, %v625_v0, inf }
 0x40a   : > { %636 = vmin.xlane.f32.xlu2 %v635_v1 }
 0x467   : > { %v628_v2 = vpop.xlane.xlu2 %627 }
 0x468   : > { %vm1298_vm3 = vcmp.lt.s32.totalorder %v628_v2, 0  ;;  %v1299_v4 = vceil.f32 %v628_v2  ;;  %v1300_v5 = vfloor.f32 %v628_v2 }
 0x46a   : > { %v1301_v7 = vsel %vm1298_vm3, %v1299_v4, %v1300_v5  ;;  %vm699_vm3 = vcmp.eq.s32.totalorder %v1556_v40, 4 }
 0x46b   : > { %v1302_v8 = vcvt.f32.s32 %v1301_v7 }
 0x46d   : > { %vm642_vm5 = vcmp.eq.s32.totalorder %v1556_v40, %v1302_v8  ;;  %v1755_v9 = vsel %vm650_vm4, %v1302_v8, %v1698_v25 }
 0x46e   : > { %v1758_v10 = vsel %vm642_vm5, -3e+38, %v1701_v26 }
 0x46f   : > { %v631_v11 = vpop.xlane.xlu0 %630  ;;  %v655_v12 = vsel %vm458_vm1, %v1758_v10, -inf }
 0x470   : > { %vm1303_vm6 = vcmp.lt.s32.totalorder %v631_v11, 0  ;;  %v1304_v13 = vceil.f32 %v631_v11  ;;  %v1305_v14 = vfloor.f32 %v631_v11  ;;  %656 = vmax.xlane.f32.xlu0 %v655_v12 }
 0x472   : > { %v1306_v15 = vsel %vm1303_vm6, %v1304_v13, %v1305_v14 }
 0x473   : > { %v1307_v16 = vcvt.f32.s32 %v1306_v15 }
 0x475   : > { %v634_v17 = vpop.xlane.xlu1 %633  ;;  %vm643_vm7 = vcmp.eq.s32.totalorder %v1556_v40, %v1307_v16  ;;  %v1766_v18 = vsel %vm650_vm4, %v1307_v16, %v1709_v34 }
 0x476   : > { %vm1308_vm8 = vcmp.lt.s32.totalorder %v634_v17, 0  ;;  %v1309_v19 = vceil.f32 %v634_v17  ;;  %v1310_v20 = vfloor.f32 %v634_v17  ;;  %v1769_v21 = vsel %vm643_vm7, -3e+38, %v1712_v37 }
 0x477   : > { %v658_v22 = vsel %vm458_vm1, %v1769_v21, -inf }
 0x478   : > { %v1311_v23 = vsel %vm1308_vm8, %v1309_v19, %v1310_v20  ;;  %659 = vmax.xlane.f32.xlu1 %v658_v22 }
 0x479   : > { %v1312_v24 = vcvt.f32.s32 %v1311_v23 }
 0x47b   : > { %vm644_vm9 = vcmp.eq.s32.totalorder %v1556_v40, %v1312_v24  ;;  %v1777_v25 = vsel %vm650_vm4, %v1312_v24, %v1720_v43 }
 0x47c   : > { %v1780_v26 = vsel %vm644_vm9, -3e+38, %v1723_v44 }
 0x47d   : > { %v637_v27 = vpop.xlane.xlu2 %636  ;;  %v661_v28 = vsel %vm458_vm1, %v1780_v26, -inf }
 0x47e   : > { %vm1313_vm10 = vcmp.lt.s32.totalorder %v637_v27, 0  ;;  %v1314_v29 = vceil.f32 %v637_v27  ;;  %v1315_v30 = vfloor.f32 %v637_v27  ;;  %662 = vmax.xlane.f32.xlu2 %v661_v28 }
 0x480   : > { %v1316_v31 = vsel %vm1313_vm10, %v1314_v29, %v1315_v30 }
 0x481   : > { %v1317_v32 = vcvt.f32.s32 %v1316_v31 }
 0x483   : > { %vm645_vm11 = vcmp.eq.s32.totalorder %v1556_v40, %v1317_v32  ;;  %v1788_v33 = vsel %vm650_vm4, %v1317_v32, %v1731_v51 }
 0x484   : > { %v1791_v34 = vsel %vm645_vm11, -3e+38, %v1734_v52 }
 0x485   : > { %v664_v35 = vsel %vm458_vm1, %v1791_v34, -inf }
 0x486   : > { %665 = vmax.xlane.f32.xlu0 %v664_v35 }
 0x4e3   : > { %v657_v36 = vpop.xlane.xlu0 %656 }
 0x4e4   : > { %vm667_vm12 = vcmp.eq.f32.partialorder %v1758_v10, %v657_v36 }
 0x4e5   : > { %v671_v37 = vsel %vm667_vm12, %v1559_v41, 32.0 }
 0x4e6   : > { %v675_v38 = vsel %vm458_vm1, %v671_v37, inf }
 0x4e7   : > { %676 = vmin.xlane.f32.xlu1 %v675_v38 }
 0x4eb   : > { %v660_v39 = vpop.xlane.xlu1 %659 }
 0x4ec   : > { %vm668_vm13 = vcmp.eq.f32.partialorder %v1769_v21, %v660_v39 }
 0x4ed   : > { %v672_v42 = vsel %vm668_vm13, %v1559_v41, 32.0 }
 0x4ee   : > { %v678_v43 = vsel %vm458_vm1, %v672_v42, inf }
 0x4ef   : > { %679 = vmin.xlane.f32.xlu2 %v678_v43 }
 0x4f1   : > { %v663_v44 = vpop.xlane.xlu2 %662 }
 0x4f2   : > { %vm669_vm14 = vcmp.eq.f32.partialorder %v1780_v26, %v663_v44 }
 0x4f3   : > { %v673_v45 = vsel %vm669_vm14, %v1559_v41, 32.0 }
 0x4f4   : > { %v681_v46 = vsel %vm458_vm1, %v673_v45, inf }
 0x4f5   : > { %682 = vmin.xlane.f32.xlu0 %v681_v46 }
 0x4f9   : > { %v666_v47 = vpop.xlane.xlu0 %665 }
 0x4fa   : > { %vm670_vm15 = vcmp.eq.f32.partialorder %v1791_v34, %v666_v47 }
 0x4fb   : > { %v674_v48 = vsel %vm670_vm15, %v1559_v41, 32.0 }
 0x4fc   : > { %v684_v49 = vsel %vm458_vm1, %v674_v48, inf }
 0x4fd   : > { %685 = vmin.xlane.f32.xlu1 %v684_v49 }
 0x55a   : > { %v677_v50 = vpop.xlane.xlu1 %676 }
 0x55b   : > { %vm1318_vm2 = vcmp.lt.s32.totalorder %v677_v50, 0  ;;  %v1319_v51 = vceil.f32 %v677_v50  ;;  %v1320_v52 = vfloor.f32 %v677_v50 }
 0x55d   : > { %v1321_v53 = vsel %vm1318_vm2, %v1319_v51, %v1320_v52  ;;  %vm748_vm2 = vcmp.eq.s32.totalorder %v1556_v40, 5 }
 0x55e   : > { %v1322_v54 = vcvt.f32.s32 %v1321_v53 }
 0x560   : > { %vm691_vm4 = vcmp.eq.s32.totalorder %v1556_v40, %v1322_v54  ;;  %v1812_v55 = vsel %vm699_vm3, %v1322_v54, %v1755_v9 }
 0x561   : > { %v1815_v56 = vsel %vm691_vm4, -3e+38, %v1758_v10 }
 0x562   : > { %v680_v57 = vpop.xlane.xlu2 %679  ;;  %v704_v58 = vsel %vm458_vm1, %v1815_v56, -inf }
 0x563   : > { %vm1323_vm5 = vcmp.lt.s32.totalorder %v680_v57, 0  ;;  %v1324_v59 = vceil.f32 %v680_v57  ;;  %v1325_v60 = vfloor.f32 %v680_v57  ;;  %705 = vmax.xlane.f32.xlu2 %v704_v58 }
 0x565   : > { %v1326_v61 = vsel %vm1323_vm5, %v1324_v59, %v1325_v60 }
 0x566   : > { %v1327_v62 = vcvt.f32.s32 %v1326_v61 }
 0x568   : > { %v683_v63 = vpop.xlane.xlu0 %682  ;;  %vm692_vm6 = vcmp.eq.s32.totalorder %v1556_v40, %v1327_v62  ;;  %v1823_v0 = vsel %vm699_vm3, %v1327_v62, %v1766_v18 }
 0x569   : > { %vm1328_vm7 = vcmp.lt.s32.totalorder %v683_v63, 0  ;;  %v1329_v1 = vceil.f32 %v683_v63  ;;  %v1330_v2 = vfloor.f32 %v683_v63  ;;  %v1826_v4 = vsel %vm692_vm6, -3e+38, %v1769_v21 }
 0x56a   : > { %v707_v5 = vsel %vm458_vm1, %v1826_v4, -inf }
 0x56b   : > { %v1331_v7 = vsel %vm1328_vm7, %v1329_v1, %v1330_v2  ;;  %708 = vmax.xlane.f32.xlu0 %v707_v5 }
 0x56c   : > { %v1332_v8 = vcvt.f32.s32 %v1331_v7 }
 0x56e   : > { %vm693_vm8 = vcmp.eq.s32.totalorder %v1556_v40, %v1332_v8  ;;  %v1834_v9 = vsel %vm699_vm3, %v1332_v8, %v1777_v25 }
 0x56f   : > { %v1837_v10 = vsel %vm693_vm8, -3e+38, %v1780_v26 }
 0x570   : > { %v686_v11 = vpop.xlane.xlu1 %685  ;;  %v710_v12 = vsel %vm458_vm1, %v1837_v10, -inf }
 0x571   : > { %vm1333_vm9 = vcmp.lt.s32.totalorder %v686_v11, 0  ;;  %v1334_v13 = vceil.f32 %v686_v11  ;;  %v1335_v14 = vfloor.f32 %v686_v11  ;;  %711 = vmax.xlane.f32.xlu1 %v710_v12 }
 0x573   : > { %v1336_v15 = vsel %vm1333_vm9, %v1334_v13, %v1335_v14 }
 0x574   : > { %v1337_v16 = vcvt.f32.s32 %v1336_v15 }
 0x576   : > { %vm694_vm10 = vcmp.eq.s32.totalorder %v1556_v40, %v1337_v16  ;;  %v1845_v17 = vsel %vm699_vm3, %v1337_v16, %v1788_v33  ;;  %v1237_v16 = vld [vmem:[%s2045_s2 + $0x18] sm:$0xff] }
 0x577   : > { %v1848_v18 = vsel %vm694_vm10, -3e+38, %v1791_v34  ;;  %947 = vmatpush.bf16.msra.mxu3 %v1237_v16 }
 0x578   : > { %v713_v19 = vsel %vm458_vm1, %v1848_v18, -inf }
 0x579   : > { %714 = vmax.xlane.f32.xlu2 %v713_v19 }
 0x5d6   : > { %v706_v20 = vpop.xlane.xlu2 %705 }
 0x5d7   : > { %vm716_vm11 = vcmp.eq.f32.partialorder %v1815_v56, %v706_v20 }
 0x5d8   : > { %v720_v21 = vsel %vm716_vm11, %v1559_v41, 32.0 }
 0x5d9   : > { %v724_v22 = vsel %vm458_vm1, %v720_v21, inf  ;;  %v1236_v21 = vld [vmem:[%s2045_s2 + $0x10] sm:$0xff] }
 0x5da   : > { %725 = vmin.xlane.f32.xlu0 %v724_v22  ;;  %v1232_v22 = vld [vmem:[%s2044_s1 + $0x10] sm:$0xff]  ;;  %948 = vmatpush.bf16.msra.mxu3 %v1236_v21 }
 0x5de   : > { %v709_v23 = vpop.xlane.xlu0 %708 }
 0x5df   : > { %vm717_vm12 = vcmp.eq.f32.partialorder %v1826_v4, %v709_v23 }
 0x5e0   : > { %v721_v24 = vsel %vm717_vm12, %v1559_v41, 32.0 }
 0x5e1   : > { %v727_v25 = vsel %vm458_vm1, %v721_v24, inf }
 0x5e2   : > { %728 = vmin.xlane.f32.xlu1 %v727_v25  ;;  %v1235_v25 = vld [vmem:[%s2045_s2 + $0x8] sm:$0xff] }
 0x5e3   : > { %949 = vmatpush.bf16.msra.mxu3 %v1235_v25 }
 0x5e4   : > { %v712_v26 = vpop.xlane.xlu1 %711 }
 0x5e5   : > { %vm718_vm13 = vcmp.eq.f32.partialorder %v1837_v10, %v712_v26 }
 0x5e6   : > { %v722_v27 = vsel %vm718_vm13, %v1559_v41, 32.0 }
 0x5e7   : > { %v730_v28 = vsel %vm458_vm1, %v722_v27, inf  ;;  %v1231_v27 = vld [vmem:[%s2044_s1 + $0x8] sm:$0xff] }
 0x5e8   : > { %731 = vmin.xlane.f32.xlu2 %v730_v28 }
 0x5ec   : > { %v715_v29 = vpop.xlane.xlu2 %714 }
 0x5ed   : > { %vm719_vm14 = vcmp.eq.f32.partialorder %v1848_v18, %v715_v29 }
 0x5ee   : > { %v723_v30 = vsel %vm719_vm14, %v1559_v41, 32.0 }
 0x5ef   : > { %v733_v31 = vsel %vm458_vm1, %v723_v30, inf }
 0x5f0   : > { %734 = vmin.xlane.f32.xlu0 %v733_v31 }
 0x64d   : > { %v726_v32 = vpop.xlane.xlu0 %725 }
 0x64e   : > { %vm1338_vm15 = vcmp.lt.s32.totalorder %v726_v32, 0  ;;  %v1339_v33 = vceil.f32 %v726_v32  ;;  %v1340_v34 = vfloor.f32 %v726_v32 }
 0x650   : > { %v1341_v35 = vsel %vm1338_vm15, %v1339_v33, %v1340_v34  ;;  %vm797_vm15 = vcmp.eq.s32.totalorder %v1556_v40, 6  ;;  %v1234_v33 = vld [vmem:[%s2045_s2] sm:$0xff] }
 0x651   : > { %v1342_v36 = vcvt.f32.s32 %v1341_v35  ;;  %v1230_v34 = vld [vmem:[%s2044_s1] sm:$0xff]  ;;  %950 = vmatpush.bf16.msra.mxu3 %v1234_v33 }
 0x653   : > { %vm740_vm3 = vcmp.eq.s32.totalorder %v1556_v40, %v1342_v36  ;;  %v1869_v37 = vsel %vm748_vm2, %v1342_v36, %v1812_v55 }
 0x654   : > { %v1872_v38 = vsel %vm740_vm3, -3e+38, %v1815_v56 }
 0x655   : > { %v729_v39 = vpop.xlane.xlu1 %728  ;;  %v753_v42 = vsel %vm458_vm1, %v1872_v38, -inf }
 0x656   : > { %vm1343_vm4 = vcmp.lt.s32.totalorder %v729_v39, 0  ;;  %v1344_v43 = vceil.f32 %v729_v39  ;;  %v1345_v44 = vfloor.f32 %v729_v39  ;;  %754 = vmax.xlane.f32.xlu1 %v753_v42 }
 0x658   : > { %v1346_v45 = vsel %vm1343_vm4, %v1344_v43, %v1345_v44 }
 0x659   : > { %v1347_v46 = vcvt.f32.s32 %v1346_v45 }
 0x65b   : > { %v732_v47 = vpop.xlane.xlu2 %731  ;;  %vm741_vm5 = vcmp.eq.s32.totalorder %v1556_v40, %v1347_v46  ;;  %v1880_v48 = vsel %vm748_vm2, %v1347_v46, %v1823_v0 }
 0x65c   : > { %vm1348_vm6 = vcmp.lt.s32.totalorder %v732_v47, 0  ;;  %v1349_v49 = vceil.f32 %v732_v47  ;;  %v1350_v50 = vfloor.f32 %v732_v47  ;;  %v1883_v51 = vsel %vm741_vm5, -3e+38, %v1826_v4 }
 0x65d   : > { %v756_v52 = vsel %vm458_vm1, %v1883_v51, -inf }
 0x65e   : > { %v1351_v53 = vsel %vm1348_vm6, %v1349_v49, %v1350_v50  ;;  %757 = vmax.xlane.f32.xlu2 %v756_v52 }
 0x65f   : > { %v1352_v54 = vcvt.f32.s32 %v1351_v53 }
 0x661   : > { %vm742_vm7 = vcmp.eq.s32.totalorder %v1556_v40, %v1352_v54  ;;  %v1891_v55 = vsel %vm748_vm2, %v1352_v54, %v1834_v9 }
 0x662   : > { %v1894_v56 = vsel %vm742_vm7, -3e+38, %v1837_v10 }
 0x663   : > { %v735_v57 = vpop.xlane.xlu0 %734  ;;  %v759_v58 = vsel %vm458_vm1, %v1894_v56, -inf }
 0x664   : > { %vm1353_vm8 = vcmp.lt.s32.totalorder %v735_v57, 0  ;;  %v1354_v59 = vceil.f32 %v735_v57  ;;  %v1355_v60 = vfloor.f32 %v735_v57  ;;  %760 = vmax.xlane.f32.xlu0 %v759_v58  ;;  %v1425_v57 = vld [vmem:[%s1512_s28 + $0x10] sm:$0xff] }
 0x666   : > { %v1356_v61 = vsel %vm1353_vm8, %v1354_v59, %v1355_v60 }
 0x667   : > { %v1357_v62 = vcvt.f32.s32 %v1356_v61 }
 0x669   : > { %vm743_vm9 = vcmp.eq.s32.totalorder %v1556_v40, %v1357_v62  ;;  %v1902_v63 = vsel %vm748_vm2, %v1357_v62, %v1845_v17  ;;  %v1233_v17 = vld [vmem:[%s2044_s1 + $0x18] sm:$0xff] }
 0x66a   : > { %v1905_v0 = vsel %vm743_vm9, -3e+38, %v1848_v18  ;;  %892 = vmatpush.bf16.msra.mxu2 %v1233_v17 }
 0x66b   : > { %v762_v1 = vsel %vm458_vm1, %v1905_v0, -inf }
 0x66c   : > { %763 = vmax.xlane.f32.xlu1 %v762_v1 }
 0x66e   : > { %893 = vmatpush.bf16.msra.mxu2 %v1232_v22 }
 0x672   : > { %894 = vmatpush.bf16.msra.mxu2 %v1231_v27 }
 0x676   : > { %895 = vmatpush.bf16.msra.mxu2 %v1230_v34 }
 0x6c9   : > { %v755_v2 = vpop.xlane.xlu1 %754 }
 0x6ca   : > { %vm765_vm10 = vcmp.eq.f32.partialorder %v1872_v38, %v755_v2 }
 0x6cb   : > { %v769_v4 = vsel %vm765_vm10, %v1559_v41, 32.0 }
 0x6cc   : > { %v773_v5 = vsel %vm458_vm1, %v769_v4, inf }
 0x6cd   : > { %774 = vmin.xlane.f32.xlu2 %v773_v5 }
 0x6d1   : > { %v758_v7 = vpop.xlane.xlu2 %757 }
 0x6d2   : > { %vm766_vm11 = vcmp.eq.f32.partialorder %v1883_v51, %v758_v7  ;;  %v1423_v7 = vld [vmem:[%s2046_s3] ss:$0 sm:$0xff] }
 0x6d3   : > { %v770_v8 = vsel %vm766_vm11, %v1559_v41, 32.0 }
 0x6d4   : > { %v776_v9 = vsel %vm458_vm1, %v770_v8, inf }
 0x6d5   : > { %777 = vmin.xlane.f32.xlu0 %v776_v9 }
 0x6d7   : > { %v761_v10 = vpop.xlane.xlu0 %760 }
 0x6d8   : > { %vm767_vm12 = vcmp.eq.f32.partialorder %v1894_v56, %v761_v10 }
 0x6d9   : > { %v771_v11 = vsel %vm767_vm12, %v1559_v41, 32.0  ;;  %vm966_vm12 = vcmask 519168  }
 0x6da   : > { %v779_v12 = vsel %vm458_vm1, %v771_v11, inf }
 0x6db   : > { %780 = vmin.xlane.f32.xlu1 %v779_v12 }
 0x6df   : > { %v764_v13 = vpop.xlane.xlu1 %763 }
 0x6e0   : > { %vm768_vm13 = vcmp.eq.f32.partialorder %v1905_v0, %v764_v13 }
 0x6e1   : > { %v772_v14 = vsel %vm768_vm13, %v1559_v41, 32.0  ;;  %vm838_vm13 = vcmp.eq.s32.totalorder %v1556_v40, 7 }
 0x6e2   : > { %v782_v15 = vsel %vm458_vm1, %v772_v14, inf }
 0x6e3   : > { %783 = vmin.xlane.f32.xlu2 %v782_v15 }
 0x740   : > { %v775_v18 = vpop.xlane.xlu2 %774 }
 0x741   : > { %vm1358_vm14 = vcmp.lt.s32.totalorder %v775_v18, 0  ;;  %v1359_v19 = vceil.f32 %v775_v18  ;;  %v1360_v20 = vfloor.f32 %v775_v18 }
 0x743   : > { %v1361_v23 = vsel %vm1358_vm14, %v1359_v19, %v1360_v20  ;;  %vm843_vm14 = vcmask 64512  }
 0x744   : > { %v1362_v24 = vcvt.f32.s32 %v1361_v23 }
 0x746   : > { %vm789_vm2 = vcmp.eq.s32.totalorder %v1556_v40, %v1362_v24  ;;  %v1941_v26 = vsel %vm797_vm15, %v1362_v24, %v1869_v37  ;;  %v848_v37 = vpack.c.bf16 %v1524_v6, %v1518_v3 }
 0x747   : > { %v793_v28 = vsel %vm789_vm2, -3e+38, %v1872_v38 }
 0x748   : > { %v778_v29 = vpop.xlane.xlu0 %777  ;;  %v802_v30 = vsel %vm458_vm1, %v793_v28, -inf  ;;  %1222 = vmatmul.msk.bf16.vlgmr.msra.gmra.mxu3 %vm337_vm0, %v848_v37  ;;  %1204 = vmatmul.msk.bf16.vlgmr.msra.gmra.mxu2 %vm337_vm0, %v848_v37 }
 0x749   : > { %vm1363_vm3 = vcmp.lt.s32.totalorder %v778_v29, 0  ;;  %v1364_v31 = vceil.f32 %v778_v29  ;;  %v1365_v32 = vfloor.f32 %v778_v29  ;;  %803 = vmax.xlane.f32.xlu0 %v802_v30 }
 0x74b   : > { %v1366_v35 = vsel %vm1363_vm3, %v1364_v31, %v1365_v32 }
 0x74c   : > { %v1367_v36 = vcvt.f32.s32 %v1366_v35 }
 0x74e   : > { %v781_v38 = vpop.xlane.xlu1 %780  ;;  %vm790_vm4 = vcmp.eq.s32.totalorder %v1556_v40, %v1367_v36  ;;  %v1960_v39 = vsel %vm797_vm15, %v1367_v36, %v1880_v48 }
 0x74f   : > { %vm1368_vm5 = vcmp.lt.s32.totalorder %v781_v38, 0  ;;  %v1369_v42 = vceil.f32 %v781_v38  ;;  %v1370_v43 = vfloor.f32 %v781_v38  ;;  %v794_v44 = vsel %vm790_vm4, -3e+38, %v1883_v51 }
 0x750   : > { %v805_v45 = vsel %vm458_vm1, %v794_v44, -inf }
 0x751   : > { %806 = vmax.xlane.f32.xlu1 %v805_v45  ;;  %v1371_v3 = vsel %vm1368_vm5, %v1369_v42, %v1370_v43 }
 0x752   : > { %v1372_v6 = vcvt.f32.s32 %v1371_v3 }
 0x754   : > { %vm791_vm6 = vcmp.eq.s32.totalorder %v1556_v40, %v1372_v6  ;;  %v1970_v46 = vsel %vm797_vm15, %v1372_v6, %v1891_v55  ;;  %v1424_v55 = vld [vmem:[%s1512_s28 + $0x18] sm:$0xff]  ;;  %s1228_s28 = sshll.u32 %s2055_s21, 4 }
 0x755   : > { %v795_v47 = vsel %vm791_vm6, -3e+38, %v1894_v56  ;;  %v849_v58 = vpack.c.bf16 %v1424_v55, %v1425_v57  ;;  %s310_s7 = scalar_lea.vmem %s2048_s5, %s1228_s28  ;;  %s320_s10 = scalar_lea.vmem %s2049_s6, %s1228_s28 }
 0x756   : > { %v784_v48 = vpop.xlane.xlu2 %783  ;;  %v808_v49 = vsel %vm458_vm1, %v795_v47, -inf }
 0x757   : > { %vm1373_vm7 = vcmp.lt.s32.totalorder %v784_v48, 0  ;;  %v1374_v50 = vceil.f32 %v784_v48  ;;  %v1375_v51 = vfloor.f32 %v784_v48  ;;  %809 = vmax.xlane.f32.xlu2 %v808_v49 }
 0x758   : > { %1223 = vmatmul.msk.bf16.gmra.mxu3 %vm337_vm0, %v849_v58  ;;  %1205 = vmatmul.msk.bf16.gmra.mxu2 %vm337_vm0, %v849_v58 }
 0x759   : > { %v1376_v52 = vsel %vm1373_vm7, %v1374_v50, %v1375_v51 }
 0x75a   : > { %v1377_v53 = vcvt.f32.s32 %v1376_v52 }
 0x75c   : > { %vm792_vm8 = vcmp.eq.s32.totalorder %v1556_v40, %v1377_v53  ;;  %v1978_v54 = vsel %vm797_vm15, %v1377_v53, %v1902_v63 }
 0x75d   : > { %v796_v56 = vsel %vm792_vm8, -3e+38, %v1905_v0 }
 0x75e   : > { %v811_v59 = vsel %vm458_vm1, %v796_v56, -inf }
 0x75f   : > { %812 = vmax.xlane.f32.xlu0 %v811_v59 }
 0x7bc   : > { %v804_v60 = vpop.xlane.xlu0 %803 }
 0x7bd   : > { %vm814_vm9 = vcmp.eq.f32.partialorder %v793_v28, %v804_v60 }
 0x7be   : > { %v818_v61 = vsel %vm814_vm9, %v1559_v41, 32.0 }
 0x7bf   : > { %v822_v62 = vsel %vm458_vm1, %v818_v61, inf }
 0x7c0   : > { %823 = vmin.xlane.f32.xlu1 %v822_v62 }
 0x7c4   : > { %v807_v63 = vpop.xlane.xlu1 %806 }
 0x7c5   : > { %vm815_vm10 = vcmp.eq.f32.partialorder %v794_v44, %v807_v63 }
 0x7c6   : > { %v819_v1 = vsel %vm815_vm10, %v1559_v41, 32.0 }
 0x7c7   : > { %v825_v0 = vsel %vm458_vm1, %v819_v1, inf }
 0x7c8   : > { %826 = vmin.xlane.f32.xlu2 %v825_v0 }
 0x7ca   : > { %v810_v2 = vpop.xlane.xlu2 %809 }
 0x7cb   : > { %vm816_vm11 = vcmp.eq.f32.partialorder %v795_v47, %v810_v2  ;;  %v952_v9 = vpop.f32.mrf.mxu3  ;;  %v897_v12 = vpop.f32.mrf.mxu2 }
 0x7cc   : > { %v820_v4 = vsel %vm816_vm11, %v1559_v41, 32.0  ;;  %v953_v11 = vadd.f32 %v1423_v7, %v952_v9  ;;  %v962_v14 = vpack.c.bf16 %v897_v12, %v897_v12 }
 0x7cd   : > { %v828_v5 = vsel %vm458_vm1, %v820_v4, inf }
 0x7ce   : > { %829 = vmin.xlane.f32.xlu0 %v828_v5  ;;  %v971_v15 = vpack.c.bf16 %v953_v11, %v953_v11  ;;  %967 = vst.msk [vmem:[%s310_s7] sm:$0xf] %vm966_vm12, %v962_v14 }
 0x7d0   : > { %975 = vst.msk [vmem:[%s320_s10] sm:$0xf] %vm966_vm12, %v971_v15 }
 0x7d2   : > { %v813_v8 = vpop.xlane.xlu0 %812 }
 0x7d3   : > { %vm817_vm0 = vcmp.eq.f32.partialorder %v796_v56, %v813_v8  ;;  %v899_v18 = vpop.f32.mrf.mxu2 }
 0x7d4   : > { %v821_v10 = vsel %vm817_vm0, %v1559_v41, 32.0  ;;  %v954_v41 = vpop.f32.mrf.mxu3  ;;  %v963_v19 = vpack.c.bf16 %v899_v18, %v899_v18 }
 0x7d5   : > { %v831_v13 = vsel %vm458_vm1, %v821_v10, inf  ;;  %v955_v16 = vadd.f32 %v1423_v7, %v954_v41 }
 0x7d6   : > { %832 = vmin.xlane.f32.xlu1 %v831_v13  ;;  %968 = vst.msk [vmem:[%s310_s7 + $0x4] sm:$0xf] %vm966_vm12, %v963_v19 }
 0x7d7   : > { %v972_v17 = vpack.c.bf16 %v955_v16, %v955_v16 }
 0x7d9   : > { %976 = vst.msk [vmem:[%s320_s10 + $0x4] sm:$0xf] %vm966_vm12, %v972_v17 }
 0x7db   : > { %v902_v23 = vpop.f32.mrf.mxu2 }
 0x7dc   : > { %v957_v20 = vpop.f32.mrf.mxu3  ;;  %v964_v24 = vpack.c.bf16 %v902_v23, %v902_v23 }
 0x7dd   : > { %v958_v21 = vadd.f32 %v1423_v7, %v957_v20 }
 0x7de   : > { %969 = vst.msk [vmem:[%s310_s7 + $0x8] sm:$0xf] %vm966_vm12, %v964_v24 }
 0x7df   : > { %v973_v22 = vpack.c.bf16 %v958_v21, %v958_v21 }
 0x7e1   : > { %977 = vst.msk [vmem:[%s320_s10 + $0x8] sm:$0xf] %vm966_vm12, %v973_v22 }
 0x7e3   : > { %v904_v28 = vpop.f32.mrf.mxu2 }
 0x7e4   : > { %v959_v25 = vpop.f32.mrf.mxu3  ;;  %v965_v30 = vpack.c.bf16 %v904_v28, %v904_v28 }
 0x7e5   : > { %v960_v27 = vadd.f32 %v1423_v7, %v959_v25 }
 0x7e6   : > { %970 = vst.msk [vmem:[%s310_s7 + $0xc] sm:$0xf] %vm966_vm12, %v965_v30 }
 0x7e7   : > { %v974_v29 = vpack.c.bf16 %v960_v27, %v960_v27 }
 0x7e9   : > { %978 = vst.msk [vmem:[%s320_s10 + $0xc] sm:$0xf] %vm966_vm12, %v974_v29 }
 0x833   : > { %v824_v31 = vpop.xlane.xlu1 %823 }
 0x834   : > { %vm1378_vm1 = vcmp.lt.s32.totalorder %v824_v31, 0  ;;  %v1379_v32 = vceil.f32 %v824_v31  ;;  %v1380_v33 = vfloor.f32 %v824_v31 }
 0x836   : > { %v1381_v34 = vsel %vm1378_vm1, %v1379_v32, %v1380_v33 }
 0x837   : > { %v1382_v35 = vcvt.f32.s32 %v1381_v34 }
 0x839   : > { %v839_v36 = vsel %vm838_vm13, %v1382_v35, %v1941_v26 }
 0x83a   : > { %844 = vst.msk [vmem:[%s300_s13] sm:$0xff] %vm843_vm14, %v839_v36 }
 0x83b   : > { %v827_v37 = vpop.xlane.xlu2 %826 }
 0x83c   : > { %vm1383_vm15 = vcmp.lt.s32.totalorder %v827_v37, 0  ;;  %v1384_v38 = vceil.f32 %v827_v37  ;;  %v1385_v42 = vfloor.f32 %v827_v37 }
 0x83e   : > { %v1386_v43 = vsel %vm1383_vm15, %v1384_v38, %v1385_v42 }
 0x83f   : > { %v1387_v44 = vcvt.f32.s32 %v1386_v43 }
 0x841   : > { %v840_v45 = vsel %vm838_vm13, %v1387_v44, %v1960_v39  ;;  %v830_v3 = vpop.xlane.xlu0 %829 }
 0x842   : > { %845 = vst.msk [vmem:[%s300_s13 + $0x8] sm:$0xff] %vm843_vm14, %v840_v45  ;;  %vm1388_vm2 = vcmp.lt.s32.totalorder %v830_v3, 0  ;;  %v1389_v6 = vceil.f32 %v830_v3  ;;  %v1390_v47 = vfloor.f32 %v830_v3 }
 0x844   : > { %v1391_v48 = vsel %vm1388_vm2, %v1389_v6, %v1390_v47 }
 0x845   : > { %v1392_v26 = vcvt.f32.s32 %v1391_v48 }
 0x847   : > { %v841_v49 = vsel %vm838_vm13, %v1392_v26, %v1970_v46 }
 0x848   : > { %846 = vst.msk [vmem:[%s300_s13 + $0x10] sm:$0xff] %vm843_vm14, %v841_v49 }
 0x849   : > { %v833_v50 = vpop.xlane.xlu1 %832 }
 0x84a   : > { %vm1393_vm3 = vcmp.lt.s32.totalorder %v833_v50, 0  ;;  %v1394_v51 = vceil.f32 %v833_v50  ;;  %v1395_v52 = vfloor.f32 %v833_v50 }
 0x84c   : > { %v1396_v53 = vsel %vm1393_vm3, %v1394_v51, %v1395_v52 }
 0x84d   : > { %v1397_v39 = vcvt.f32.s32 %v1396_v53 }
 0x84f   : > { %v842_v55 = vsel %vm838_vm13, %v1397_v39, %v1978_v54 }
 0x850   : > { %847 = vst.msk [vmem:[%s300_s13 + $0x18] sm:$0xff] %vm843_vm14, %v842_v55 }
 0x851 PF: > { %s17_s23 = sadd.s32 1, %s1448_s23   ;;  %s2050_s21 = smov %s1444_s22 }
 0x852   : > { %p14_p5 = scmp.ge.s32.totalorder %s17_s23, 4   ;;  %s2051_s22 = smov %s2053_s24 }
 0x854   :  { %16 = sbr.rel (!%p14_p5) target bundleno = 2 (0x2), region = 91 }

// kernel: dgcnn_forward.14
= control target key start
LH: loop header
LB: loop body
LE: loop exit
PB: predicated region body
PF: predicated region fallthrough
CT: control target
= control target key end

     0   :  { %s1507_s21 = smov 0   ;;  %s1509_s22 = smov 0   ;;  %s2056_s0 = inlined_call_operand.vmem [shape: f32[2,32,64], index: 0, kind: input, shape index: {}]   ;;  %s2057_s1 = inlined_call_operand.vmem [shape: bf16[64,128], index: 1, kind: input, shape index: {}]   ;;  %s2058_s2 = inlined_call_operand.vmem [shape: bf16[64,128], index: 2, kind: input, shape index: {}]   ;;  %s2059_s3 = inlined_call_operand.vmem [shape: f32[1,128], index: 3, kind: input, shape index: {}]   ;;  %s2060_s4 = inlined_call_operand.vmem [shape: s32[2,32,8], index: 4, kind: output, shape index: {0}]   ;;  %s2061_s5 = inlined_call_operand.vmem [shape: bf16[2,32,128], index: 5, kind: output, shape index: {1}]   ;;  %s2062_s6 = inlined_call_operand.vmem [shape: bf16[2,32,128], index: 6, kind: output, shape index: {2}]  }
   0x1   :  { %s1511_s23 = smov 0  }
   0x2 LB: > { %s29_s24 = sadd.s32 1, %s1465_s22  ;;  %p1165_p0 = scmp.ge.s32.totalorder %s1469_s23, 1  ;;  %s1469_s23 = sphi %s1511_s23, %s17_s23   ;;  %s1465_s22 = sphi %s1509_s22, %s2064_s22   ;;  %s1461_s21 = sphi %s1507_s21, %s2063_s21  }
   0x3   : > { %p31_p1 = scmp.ge.s32.totalorder %s29_s24, 2  ;;  %p235_p2 = scmp.lt.s32.totalorder %s1469_s23, 3 }
   0x5   : > { %s2066_s24 = smov (%p31_p1, %s29_s24), 0  ;;  %p236_p3 = pnand %p1165_p0, %p235_p2 }
   0x6   : > { %p287_p4 = scmp.lt.s32.totalorder (!%p236_p3), %s1461_s21, 1 }
   0x7   : > { %239 = sbr.rel (%p236_p3) target bundleno = 2129 (0x851), region = 36 }
   0xc   : > { %s2068_s21 = smov (!%p287_p4, %s1461_s21), 1  ;;  %vm337_vm0 = vcmask 523264   ;;  %v1471_v13 = vmov 1.0   ;;  %vm458_vm1 = vcmask 261120   ;;  %v455_v39 = vlaneseq }
   0xd   : > { %s1225_s25 = sshll.u32 %s2068_s21, 5 }
   0xe   : > { %s1533_s28 = scalar_lea.vmem %s2056_s0, %s1225_s25  ;;  %v1577_v40 = vand.u32 127, %v455_v39  ;;  %s300_s13 = scalar_lea.vmem %s2060_s4, %s1225_s25 }
   0xf   : > { %v327_v0 = vld [vmem:[%s1533_s28 + $0x18] sm:$0xff]  ;;  %v326_v1 = vld [vmem:[%s1533_s28 + $0x10] sm:$0xff]  ;;  %v1539_v3 = vld [vmem:[%s1533_s28] sm:$0xff] }
  0x10   : > { %1174 = vmatpush.xpose.msk.msra.mxu0 %vm337_vm0, %v327_v0  ;;  %v410_v2 = vmul.f32 %v327_v0, %v327_v0  ;;  %v407_v4 = vmul.f32 %v1539_v3, %v1539_v3  ;;  %v409_v5 = vmul.f32 %v326_v1, %v326_v1  ;;  %v1545_v6 = vld [vmem:[%s1533_s28 + $0x8] sm:$0xff]  ;;  %v333_v11 = vadd.f32 %v1539_v3, %v1539_v3 }
  0x11   : > { %v408_v8 = vmul.f32 %v1545_v6, %v1545_v6  ;;  %v334_v14 = vadd.f32 %v1545_v6, %v1545_v6  ;;  %v335_v15 = vadd.f32 %v326_v1, %v326_v1  ;;  %v336_v16 = vadd.f32 %v327_v0, %v327_v0 }
  0x12   : > { %1182 = vmatpush.xpose.msk.msra.mxu1 %vm337_vm0, %v410_v2  ;;  %v395_v7 = vsel %vm337_vm0, %v407_v4, 0.0  ;;  %v401_v9 = vsel %vm337_vm0, %v409_v5, 0.0  ;;  %v404_v12 = vsel %vm337_vm0, %v410_v2, 0.0  ;;  %v1580_v41 = vcvt.s32.f32 %v1577_v40 }
  0x13   : > { %396 = vadd.xlane.f32.xlu0 %v395_v7  ;;  %402 = vadd.xlane.f32.xlu1 %v401_v9  ;;  %v398_v10 = vsel %vm337_vm0, %v408_v8, 0.0 }
  0x14   : > { %1175 = vmatpush.xpose.msk.msra.mxu0 %vm337_vm0, %v326_v1 }
  0x16   : > { %1183 = vmatpush.xpose.msk.msra.mxu1 %vm337_vm0, %v409_v5 }
  0x18   : > { %1176 = vmatpush.xpose.msk.msra.mxu0 %vm337_vm0, %v1545_v6 }
  0x1a   : > { %1184 = vmatpush.xpose.msk.msra.mxu1 %vm337_vm0, %v408_v8 }
  0x1b   : > { %399 = vadd.xlane.f32.xlu0 %v398_v10  ;;  %405 = vadd.xlane.f32.xlu1 %v404_v12 }
  0x1c   : > { %1177 = vmatpush.xpose.msk.msra.mxu0 %vm337_vm0, %v1539_v3 }
  0x1e   : > { %1185 = vmatpush.xpose.msk.msra.mxu1 %vm337_vm0, %v407_v4 }
  0x1f   : > { %1178 = vmatmul.msk.f32.vlgmr.msra.gmra.mxu0 %vm337_vm0, %v333_v11 }
  0x21   : > { %1186 = vmatmul.msk.f32.vlgmr.msra.gmra.mxu1 %vm337_vm0, %v1471_v13 }
  0x27   : > { %1179 = vmatmul.msk.f32.gmra.mxu0 %vm337_vm0, %v334_v14 }
  0x2f   : > { %1180 = vmatmul.msk.f32.gmra.mxu0 %vm337_vm0, %v335_v15 }
  0x37   : > { %1181 = vmatmul.msk.f32.gmra.mxu0 %vm337_vm0, %v336_v16 }
  0x86   : > { %v397_v17 = vpop.xlane.xlu0 %396  ;;  %v403_v28 = vpop.xlane.xlu1 %402 }
  0x8e   : > { %v400_v23 = vpop.xlane.xlu0 %399  ;;  %v406_v34 = vpop.xlane.xlu1 %405 }
  0x9c   : > { %v379_v18 = vpop.f32.mrf.mxu0 }
  0x9d   : > { %v446_v20 = vsub.f32 %v379_v18, %v397_v17 }
  0x9e   : > { %v443_v19 = vpop.f32.mrf.mxu1 }
  0x9f   : > { %v450_v21 = vperm.slane %v443_v19, 0 }
  0xa1   : > { %v451_v22 = vsub.f32 %v446_v20, %v450_v21 }
  0xa3   : > { %v459_v24 = vsel %vm458_vm1, %v451_v22, -inf }
  0xa4   : > { %460 = vmax.xlane.f32.xlu2 %v459_v24  ;;  %v382_v25 = vpop.f32.mrf.mxu0 }
  0xa5   : > { %v447_v26 = vsub.f32 %v382_v25, %v400_v23 }
  0xa7   : > { %v452_v27 = vsub.f32 %v447_v26, %v450_v21 }
  0xa9   : > { %v462_v29 = vsel %vm458_vm1, %v452_v27, -inf }
  0xac   : > { %463 = vmax.xlane.f32.xlu2 %v462_v29  ;;  %v385_v30 = vpop.f32.mrf.mxu0 }
  0xad   : > { %v448_v31 = vsub.f32 %v385_v30, %v403_v28 }
  0xaf   : > { %v453_v32 = vsub.f32 %v448_v31, %v450_v21 }
  0xb1   : > { %v465_v33 = vsel %vm458_vm1, %v453_v32, -inf }
  0xb2   : > { %466 = vmax.xlane.f32.xlu0 %v465_v33 }
  0xb4   : > { %v388_v35 = vpop.f32.mrf.mxu0 }
  0xb5   : > { %v449_v36 = vsub.f32 %v388_v35, %v406_v34 }
  0xb7   : > { %v1573_v37 = vsub.f32 %v449_v36, %v450_v21 }
  0xb9   : > { %v468_v38 = vsel %vm458_vm1, %v1573_v37, -inf }
  0xba   : > { %469 = vmax.xlane.f32.xlu1 %v468_v38 }
 0x117   : > { %v461_v42 = vpop.xlane.xlu2 %460 }
 0x118   : > { %vm471_vm2 = vcmp.eq.f32.partialorder %v451_v22, %v461_v42 }
 0x119   : > { %v475_v43 = vsel %vm471_vm2, %v1580_v41, 32.0 }
 0x11a   : > { %v479_v44 = vsel %vm458_vm1, %v475_v43, inf }
 0x11b   : > { %480 = vmin.xlane.f32.xlu2 %v479_v44 }
 0x11f   : > { %v464_v45 = vpop.xlane.xlu2 %463 }
 0x120   : > { %vm472_vm3 = vcmp.eq.f32.partialorder %v452_v27, %v464_v45 }
 0x121   : > { %v476_v46 = vsel %vm472_vm3, %v1580_v41, 32.0 }
 0x122   : > { %v482_v47 = vsel %vm458_vm1, %v476_v46, inf }
 0x123   : > { %483 = vmin.xlane.f32.xlu0 %v482_v47 }
 0x125   : > { %v467_v48 = vpop.xlane.xlu0 %466 }
 0x126   : > { %vm473_vm4 = vcmp.eq.f32.partialorder %v453_v32, %v467_v48 }
 0x127   : > { %v477_v49 = vsel %vm473_vm4, %v1580_v41, 32.0 }
 0x128   : > { %v485_v50 = vsel %vm458_vm1, %v477_v49, inf }
 0x129   : > { %486 = vmin.xlane.f32.xlu1 %v485_v50 }
 0x12d   : > { %v470_v51 = vpop.xlane.xlu1 %469 }
 0x12e   : > { %vm474_vm5 = vcmp.eq.f32.partialorder %v1573_v37, %v470_v51 }
 0x12f   : > { %v478_v52 = vsel %vm474_vm5, %v1580_v41, 32.0  ;;  %vm503_vm5 = vcmp.eq.s32.totalorder %v1577_v40, 0 }
 0x130   : > { %v488_v53 = vsel %vm458_vm1, %v478_v52, inf }
 0x131   : > { %489 = vmin.xlane.f32.xlu2 %v488_v53 }
 0x18e   : > { %v481_v54 = vpop.xlane.xlu2 %480 }
 0x18f   : > { %vm1259_vm6 = vcmp.lt.s32.totalorder %v481_v54, 0  ;;  %v1260_v55 = vceil.f32 %v481_v54  ;;  %v1261_v56 = vfloor.f32 %v481_v54 }
 0x191   : > { %v1591_v57 = vsel %vm1259_vm6, %v1260_v55, %v1261_v56  ;;  %vm552_vm6 = vcmp.eq.s32.totalorder %v1577_v40, 1 }
 0x192   : > { %v1263_v58 = vcvt.f32.s32 %v1591_v57 }
 0x194   : > { %vm495_vm7 = vcmp.eq.s32.totalorder %v1577_v40, %v1263_v58 }
 0x195   : > { %v1597_v59 = vsel %vm495_vm7, -3e+38, %v451_v22 }
 0x196   : > { %v484_v60 = vpop.xlane.xlu0 %483  ;;  %v508_v61 = vsel %vm458_vm1, %v1597_v59, -inf }
 0x197   : > { %vm1264_vm8 = vcmp.lt.s32.totalorder %v484_v60, 0  ;;  %v1265_v62 = vceil.f32 %v484_v60  ;;  %v1266_v63 = vfloor.f32 %v484_v60  ;;  %509 = vmax.xlane.f32.xlu0 %v508_v61 }
 0x199   : > { %v1601_v0 = vsel %vm1264_vm8, %v1265_v62, %v1266_v63 }
 0x19a   : > { %v1268_v1 = vcvt.f32.s32 %v1601_v0 }
 0x19c   : > { %v487_v2 = vpop.xlane.xlu1 %486  ;;  %vm496_vm9 = vcmp.eq.s32.totalorder %v1577_v40, %v1268_v1  ;;  %v505_v48 = vsel %vm503_vm5, %v1268_v1, 0 }
 0x19d   : > { %vm1269_vm10 = vcmp.lt.s32.totalorder %v487_v2, 0  ;;  %v1270_v4 = vceil.f32 %v487_v2  ;;  %v1271_v5 = vfloor.f32 %v487_v2  ;;  %v1607_v7 = vsel %vm496_vm9, -3e+38, %v452_v27 }
 0x19e   : > { %v511_v8 = vsel %vm458_vm1, %v1607_v7, -inf }
 0x19f   : > { %v1611_v9 = vsel %vm1269_vm10, %v1270_v4, %v1271_v5  ;;  %512 = vmax.xlane.f32.xlu1 %v511_v8 }
 0x1a0   : > { %v1273_v10 = vcvt.f32.s32 %v1611_v9 }
 0x1a2   : > { %vm497_vm11 = vcmp.eq.s32.totalorder %v1577_v40, %v1273_v10  ;;  %v506_v57 = vsel %vm503_vm5, %v1273_v10, 0 }
 0x1a3   : > { %v1617_v11 = vsel %vm497_vm11, -3e+38, %v453_v32 }
 0x1a4   : > { %v490_v12 = vpop.xlane.xlu2 %489  ;;  %v514_v13 = vsel %vm458_vm1, %v1617_v11, -inf }
 0x1a5   : > { %vm1274_vm12 = vcmp.lt.s32.totalorder %v490_v12, 0  ;;  %v1275_v14 = vceil.f32 %v490_v12  ;;  %v1276_v15 = vfloor.f32 %v490_v12  ;;  %515 = vmax.xlane.f32.xlu2 %v514_v13 }
 0x1a7   : > { %v1621_v16 = vsel %vm1274_vm12, %v1275_v14, %v1276_v15 }
 0x1a8   : > { %v1278_v17 = vcvt.f32.s32 %v1621_v16 }
 0x1aa   : > { %vm498_vm13 = vcmp.eq.s32.totalorder %v1577_v40, %v1278_v17  ;;  %v507_v2 = vsel %vm503_vm5, %v1278_v17, 0 }
 0x1ab   : > { %v1628_v18 = vsel %vm498_vm13, -3e+38, %v1573_v37  ;;  %v504_v37 = vsel %vm503_vm5, %v1263_v58, 0  ;;  %vm601_vm5 = vcmp.eq.s32.totalorder %v1577_v40, 2 }
 0x1ac   : > { %v517_v19 = vsel %vm458_vm1, %v1628_v18, -inf }
 0x1ad   : > { %518 = vmax.xlane.f32.xlu0 %v517_v19 }
 0x20a   : > { %v510_v20 = vpop.xlane.xlu0 %509 }
 0x20b   : > { %vm520_vm14 = vcmp.eq.f32.partialorder %v1597_v59, %v510_v20 }
 0x20c   : > { %v524_v21 = vsel %vm520_vm14, %v1580_v41, 32.0 }
 0x20d   : > { %v528_v22 = vsel %vm458_vm1, %v524_v21, inf }
 0x20e   : > { %529 = vmin.xlane.f32.xlu1 %v528_v22 }
 0x212   : > { %v513_v23 = vpop.xlane.xlu1 %512 }
 0x213   : > { %vm521_vm15 = vcmp.eq.f32.partialorder %v1607_v7, %v513_v23 }
 0x214   : > { %v525_v24 = vsel %vm521_vm15, %v1580_v41, 32.0 }
 0x215   : > { %v531_v25 = vsel %vm458_vm1, %v525_v24, inf }
 0x216   : > { %532 = vmin.xlane.f32.xlu2 %v531_v25 }
 0x218   : > { %v516_v26 = vpop.xlane.xlu2 %515 }
 0x219   : > { %vm522_vm2 = vcmp.eq.f32.partialorder %v1617_v11, %v516_v26 }
 0x21a   : > { %v526_v27 = vsel %vm522_vm2, %v1580_v41, 32.0 }
 0x21b   : > { %v534_v28 = vsel %vm458_vm1, %v526_v27, inf }
 0x21c   : > { %535 = vmin.xlane.f32.xlu0 %v534_v28 }
 0x220   : > { %v519_v29 = vpop.xlane.xlu0 %518 }
 0x221   : > { %vm523_vm3 = vcmp.eq.f32.partialorder %v1628_v18, %v519_v29 }
 0x222   : > { %v527_v30 = vsel %vm523_vm3, %v1580_v41, 32.0 }
 0x223   : > { %v537_v31 = vsel %vm458_vm1, %v527_v30, inf }
 0x224   : > { %538 = vmin.xlane.f32.xlu1 %v537_v31 }
 0x281   : > { %v530_v32 = vpop.xlane.xlu1 %529 }
 0x282   : > { %vm1279_vm4 = vcmp.lt.s32.totalorder %v530_v32, 0  ;;  %v1280_v33 = vceil.f32 %v530_v32  ;;  %v1281_v34 = vfloor.f32 %v530_v32 }
 0x284   : > { %v1282_v35 = vsel %vm1279_vm4, %v1280_v33, %v1281_v34 }
 0x285   : > { %v1283_v36 = vcvt.f32.s32 %v1282_v35 }
 0x287   : > { %vm544_vm7 = vcmp.eq.s32.totalorder %v1577_v40, %v1283_v36  ;;  %v1653_v38 = vsel %vm552_vm6, %v1283_v36, %v504_v37 }
 0x288   : > { %v1656_v39 = vsel %vm544_vm7, -3e+38, %v1597_v59 }
 0x289   : > { %v533_v42 = vpop.xlane.xlu2 %532  ;;  %v557_v43 = vsel %vm458_vm1, %v1656_v39, -inf }
 0x28a   : > { %vm1284_vm8 = vcmp.lt.s32.totalorder %v533_v42, 0  ;;  %v1285_v44 = vceil.f32 %v533_v42  ;;  %v1286_v45 = vfloor.f32 %v533_v42  ;;  %558 = vmax.xlane.f32.xlu2 %v557_v43 }
 0x28c   : > { %v1287_v46 = vsel %vm1284_vm8, %v1285_v44, %v1286_v45 }
 0x28d   : > { %v1288_v47 = vcvt.f32.s32 %v1287_v46 }
 0x28f   : > { %v536_v49 = vpop.xlane.xlu0 %535  ;;  %vm545_vm9 = vcmp.eq.s32.totalorder %v1577_v40, %v1288_v47  ;;  %v1667_v50 = vsel %vm552_vm6, %v1288_v47, %v505_v48 }
 0x290   : > { %vm1289_vm10 = vcmp.lt.s32.totalorder %v536_v49, 0  ;;  %v1290_v51 = vceil.f32 %v536_v49  ;;  %v1291_v52 = vfloor.f32 %v536_v49  ;;  %v1670_v53 = vsel %vm545_vm9, -3e+38, %v1607_v7 }
 0x291   : > { %v560_v54 = vsel %vm458_vm1, %v1670_v53, -inf }
 0x292   : > { %v1292_v55 = vsel %vm1289_vm10, %v1290_v51, %v1291_v52  ;;  %561 = vmax.xlane.f32.xlu0 %v560_v54 }
 0x293   : > { %v1293_v56 = vcvt.f32.s32 %v1292_v55 }
 0x295   : > { %vm546_vm11 = vcmp.eq.s32.totalorder %v1577_v40, %v1293_v56  ;;  %v1681_v58 = vsel %vm552_vm6, %v1293_v56, %v506_v57 }
 0x296   : > { %v1684_v59 = vsel %vm546_vm11, -3e+38, %v1617_v11 }
 0x297   : > { %v539_v60 = vpop.xlane.xlu1 %538  ;;  %v563_v61 = vsel %vm458_vm1, %v1684_v59, -inf }
 0x298   : > { %vm1294_vm12 = vcmp.lt.s32.totalorder %v539_v60, 0  ;;  %v1295_v62 = vceil.f32 %v539_v60  ;;  %v1296_v63 = vfloor.f32 %v539_v60  ;;  %564 = vmax.xlane.f32.xlu1 %v563_v61 }
 0x29a   : > { %v1297_v0 = vsel %vm1294_vm12, %v1295_v62, %v1296_v63 }
 0x29b   : > { %v1298_v1 = vcvt.f32.s32 %v1297_v0 }
 0x29d   : > { %vm547_vm13 = vcmp.eq.s32.totalorder %v1577_v40, %v1298_v1  ;;  %v1695_v4 = vsel %vm552_vm6, %v1298_v1, %v507_v2 }
 0x29e   : > { %v1698_v5 = vsel %vm547_vm13, -3e+38, %v1628_v18 }
 0x29f   : > { %v566_v7 = vsel %vm458_vm1, %v1698_v5, -inf }
 0x2a0   : > { %567 = vmax.xlane.f32.xlu2 %v566_v7 }
 0x2fd   : > { %v559_v8 = vpop.xlane.xlu2 %558 }
 0x2fe   : > { %vm569_vm14 = vcmp.eq.f32.partialorder %v1656_v39, %v559_v8 }
 0x2ff   : > { %v573_v9 = vsel %vm569_vm14, %v1580_v41, 32.0 }
 0x300   : > { %v577_v10 = vsel %vm458_vm1, %v573_v9, inf }
 0x301   : > { %578 = vmin.xlane.f32.xlu0 %v577_v10 }
 0x305   : > { %v562_v11 = vpop.xlane.xlu0 %561 }
 0x306   : > { %vm570_vm15 = vcmp.eq.f32.partialorder %v1670_v53, %v562_v11 }
 0x307   : > { %v574_v12 = vsel %vm570_vm15, %v1580_v41, 32.0 }
 0x308   : > { %v580_v13 = vsel %vm458_vm1, %v574_v12, inf }
 0x309   : > { %581 = vmin.xlane.f32.xlu1 %v580_v13 }
 0x30b   : > { %v565_v14 = vpop.xlane.xlu1 %564 }
 0x30c   : > { %vm571_vm2 = vcmp.eq.f32.partialorder %v1684_v59, %v565_v14 }
 0x30d   : > { %v575_v15 = vsel %vm571_vm2, %v1580_v41, 32.0 }
 0x30e   : > { %v583_v16 = vsel %vm458_vm1, %v575_v15, inf }
 0x30f   : > { %584 = vmin.xlane.f32.xlu2 %v583_v16 }
 0x313   : > { %v568_v17 = vpop.xlane.xlu2 %567 }
 0x314   : > { %vm572_vm3 = vcmp.eq.f32.partialorder %v1698_v5, %v568_v17 }
 0x315   : > { %v576_v18 = vsel %vm572_vm3, %v1580_v41, 32.0 }
 0x316   : > { %v586_v19 = vsel %vm458_vm1, %v576_v18, inf }
 0x317   : > { %587 = vmin.xlane.f32.xlu0 %v586_v19 }
 0x374   : > { %v579_v20 = vpop.xlane.xlu0 %578 }
 0x375   : > { %vm1299_vm4 = vcmp.lt.s32.totalorder %v579_v20, 0  ;;  %v1300_v21 = vceil.f32 %v579_v20  ;;  %v1301_v22 = vfloor.f32 %v579_v20 }
 0x377   : > { %v1302_v23 = vsel %vm1299_vm4, %v1300_v21, %v1301_v22  ;;  %vm650_vm4 = vcmp.eq.s32.totalorder %v1577_v40, 3 }
 0x378   : > { %v1303_v24 = vcvt.f32.s32 %v1302_v23 }
 0x37a   : > { %vm593_vm6 = vcmp.eq.s32.totalorder %v1577_v40, %v1303_v24  ;;  %v1719_v25 = vsel %vm601_vm5, %v1303_v24, %v1653_v38 }
 0x37b   : > { %v1722_v26 = vsel %vm593_vm6, -3e+38, %v1656_v39 }
 0x37c   : > { %v582_v27 = vpop.xlane.xlu1 %581  ;;  %v606_v28 = vsel %vm458_vm1, %v1722_v26, -inf }
 0x37d   : > { %vm1304_vm7 = vcmp.lt.s32.totalorder %v582_v27, 0  ;;  %v1305_v29 = vceil.f32 %v582_v27  ;;  %v1306_v30 = vfloor.f32 %v582_v27  ;;  %607 = vmax.xlane.f32.xlu1 %v606_v28 }
 0x37f   : > { %v1307_v31 = vsel %vm1304_vm7, %v1305_v29, %v1306_v30 }
 0x380   : > { %v1308_v32 = vcvt.f32.s32 %v1307_v31 }
 0x382   : > { %v585_v33 = vpop.xlane.xlu2 %584  ;;  %vm594_vm8 = vcmp.eq.s32.totalorder %v1577_v40, %v1308_v32  ;;  %v1730_v34 = vsel %vm601_vm5, %v1308_v32, %v1667_v50 }
 0x383   : > { %vm1309_vm9 = vcmp.lt.s32.totalorder %v585_v33, 0  ;;  %v1310_v35 = vceil.f32 %v585_v33  ;;  %v1311_v36 = vfloor.f32 %v585_v33  ;;  %v1733_v37 = vsel %vm594_vm8, -3e+38, %v1670_v53 }
 0x384   : > { %v609_v38 = vsel %vm458_vm1, %v1733_v37, -inf }
 0x385   : > { %v1312_v39 = vsel %vm1309_vm9, %v1310_v35, %v1311_v36  ;;  %610 = vmax.xlane.f32.xlu2 %v609_v38 }
 0x386   : > { %v1313_v42 = vcvt.f32.s32 %v1312_v39 }
 0x388   : > { %vm595_vm10 = vcmp.eq.s32.totalorder %v1577_v40, %v1313_v42  ;;  %v1741_v43 = vsel %vm601_vm5, %v1313_v42, %v1681_v58 }
 0x389   : > { %v1744_v44 = vsel %vm595_vm10, -3e+38, %v1684_v59 }
 0x38a   : > { %v588_v45 = vpop.xlane.xlu0 %587  ;;  %v612_v46 = vsel %vm458_vm1, %v1744_v44, -inf }
 0x38b   : > { %vm1314_vm11 = vcmp.lt.s32.totalorder %v588_v45, 0  ;;  %v1315_v47 = vceil.f32 %v588_v45  ;;  %v1316_v48 = vfloor.f32 %v588_v45  ;;  %613 = vmax.xlane.f32.xlu0 %v612_v46 }
 0x38d   : > { %v1317_v49 = vsel %vm1314_vm11, %v1315_v47, %v1316_v48 }
 0x38e   : > { %v1318_v50 = vcvt.f32.s32 %v1317_v49 }
 0x390   : > { %vm596_vm12 = vcmp.eq.s32.totalorder %v1577_v40, %v1318_v50  ;;  %v1752_v51 = vsel %vm601_vm5, %v1318_v50, %v1695_v4 }
 0x391   : > { %v1755_v52 = vsel %vm596_vm12, -3e+38, %v1698_v5 }
 0x392   : > { %v615_v53 = vsel %vm458_vm1, %v1755_v52, -inf }
 0x393   : > { %616 = vmax.xlane.f32.xlu1 %v615_v53 }
 0x3f0   : > { %v608_v54 = vpop.xlane.xlu1 %607 }
 0x3f1   : > { %vm618_vm13 = vcmp.eq.f32.partialorder %v1722_v26, %v608_v54 }
 0x3f2   : > { %v622_v55 = vsel %vm618_vm13, %v1580_v41, 32.0 }
 0x3f3   : > { %v626_v56 = vsel %vm458_vm1, %v622_v55, inf }
 0x3f4   : > { %627 = vmin.xlane.f32.xlu2 %v626_v56 }
 0x3f8   : > { %v611_v57 = vpop.xlane.xlu2 %610 }
 0x3f9   : > { %vm619_vm14 = vcmp.eq.f32.partialorder %v1733_v37, %v611_v57 }
 0x3fa   : > { %v623_v58 = vsel %vm619_vm14, %v1580_v41, 32.0 }
 0x3fb   : > { %v629_v59 = vsel %vm458_vm1, %v623_v58, inf }
 0x3fc   : > { %630 = vmin.xlane.f32.xlu0 %v629_v59 }
 0x3fe   : > { %v614_v60 = vpop.xlane.xlu0 %613 }
 0x3ff   : > { %vm620_vm15 = vcmp.eq.f32.partialorder %v1744_v44, %v614_v60 }
 0x400   : > { %v624_v61 = vsel %vm620_vm15, %v1580_v41, 32.0 }
 0x401   : > { %v632_v62 = vsel %vm458_vm1, %v624_v61, inf }
 0x402   : > { %633 = vmin.xlane.f32.xlu1 %v632_v62 }
 0x406   : > { %v617_v63 = vpop.xlane.xlu1 %616 }
 0x407   : > { %vm621_vm2 = vcmp.eq.f32.partialorder %v1755_v52, %v617_v63 }
 0x408   : > { %v625_v0 = vsel %vm621_vm2, %v1580_v41, 32.0 }
 0x409   : > { %v635_v1 = vsel %vm458_vm1, %v625_v0, inf }
 0x40a   : > { %636 = vmin.xlane.f32.xlu2 %v635_v1 }
 0x467   : > { %v628_v2 = vpop.xlane.xlu2 %627 }
 0x468   : > { %vm1319_vm3 = vcmp.lt.s32.totalorder %v628_v2, 0  ;;  %v1320_v4 = vceil.f32 %v628_v2  ;;  %v1321_v5 = vfloor.f32 %v628_v2 }
 0x46a   : > { %v1322_v7 = vsel %vm1319_vm3, %v1320_v4, %v1321_v5  ;;  %vm699_vm3 = vcmp.eq.s32.totalorder %v1577_v40, 4 }
 0x46b   : > { %v1323_v8 = vcvt.f32.s32 %v1322_v7 }
 0x46d   : > { %vm642_vm5 = vcmp.eq.s32.totalorder %v1577_v40, %v1323_v8  ;;  %v1776_v9 = vsel %vm650_vm4, %v1323_v8, %v1719_v25 }
 0x46e   : > { %v1779_v10 = vsel %vm642_vm5, -3e+38, %v1722_v26 }
 0x46f   : > { %v631_v11 = vpop.xlane.xlu0 %630  ;;  %v655_v12 = vsel %vm458_vm1, %v1779_v10, -inf }
 0x470   : > { %vm1324_vm6 = vcmp.lt.s32.totalorder %v631_v11, 0  ;;  %v1325_v13 = vceil.f32 %v631_v11  ;;  %v1326_v14 = vfloor.f32 %v631_v11  ;;  %656 = vmax.xlane.f32.xlu0 %v655_v12 }
 0x472   : > { %v1327_v15 = vsel %vm1324_vm6, %v1325_v13, %v1326_v14 }
 0x473   : > { %v1328_v16 = vcvt.f32.s32 %v1327_v15 }
 0x475   : > { %v634_v17 = vpop.xlane.xlu1 %633  ;;  %vm643_vm7 = vcmp.eq.s32.totalorder %v1577_v40, %v1328_v16  ;;  %v1787_v18 = vsel %vm650_vm4, %v1328_v16, %v1730_v34 }
 0x476   : > { %vm1329_vm8 = vcmp.lt.s32.totalorder %v634_v17, 0  ;;  %v1330_v19 = vceil.f32 %v634_v17  ;;  %v1331_v20 = vfloor.f32 %v634_v17  ;;  %v1790_v21 = vsel %vm643_vm7, -3e+38, %v1733_v37 }
 0x477   : > { %v658_v22 = vsel %vm458_vm1, %v1790_v21, -inf }
 0x478   : > { %v1332_v23 = vsel %vm1329_vm8, %v1330_v19, %v1331_v20  ;;  %659 = vmax.xlane.f32.xlu1 %v658_v22 }
 0x479   : > { %v1333_v24 = vcvt.f32.s32 %v1332_v23 }
 0x47b   : > { %vm644_vm9 = vcmp.eq.s32.totalorder %v1577_v40, %v1333_v24  ;;  %v1798_v25 = vsel %vm650_vm4, %v1333_v24, %v1741_v43 }
 0x47c   : > { %v1801_v26 = vsel %vm644_vm9, -3e+38, %v1744_v44 }
 0x47d   : > { %v637_v27 = vpop.xlane.xlu2 %636  ;;  %v661_v28 = vsel %vm458_vm1, %v1801_v26, -inf }
 0x47e   : > { %vm1334_vm10 = vcmp.lt.s32.totalorder %v637_v27, 0  ;;  %v1335_v29 = vceil.f32 %v637_v27  ;;  %v1336_v30 = vfloor.f32 %v637_v27  ;;  %662 = vmax.xlane.f32.xlu2 %v661_v28 }
 0x480   : > { %v1337_v31 = vsel %vm1334_vm10, %v1335_v29, %v1336_v30 }
 0x481   : > { %v1338_v32 = vcvt.f32.s32 %v1337_v31 }
 0x483   : > { %vm645_vm11 = vcmp.eq.s32.totalorder %v1577_v40, %v1338_v32  ;;  %v1809_v33 = vsel %vm650_vm4, %v1338_v32, %v1752_v51 }
 0x484   : > { %v1812_v34 = vsel %vm645_vm11, -3e+38, %v1755_v52 }
 0x485   : > { %v664_v35 = vsel %vm458_vm1, %v1812_v34, -inf }
 0x486   : > { %665 = vmax.xlane.f32.xlu0 %v664_v35 }
 0x4e3   : > { %v657_v36 = vpop.xlane.xlu0 %656 }
 0x4e4   : > { %vm667_vm12 = vcmp.eq.f32.partialorder %v1779_v10, %v657_v36 }
 0x4e5   : > { %v671_v37 = vsel %vm667_vm12, %v1580_v41, 32.0 }
 0x4e6   : > { %v675_v38 = vsel %vm458_vm1, %v671_v37, inf }
 0x4e7   : > { %676 = vmin.xlane.f32.xlu1 %v675_v38 }
 0x4eb   : > { %v660_v39 = vpop.xlane.xlu1 %659 }
 0x4ec   : > { %vm668_vm13 = vcmp.eq.f32.partialorder %v1790_v21, %v660_v39 }
 0x4ed   : > { %v672_v42 = vsel %vm668_vm13, %v1580_v41, 32.0 }
 0x4ee   : > { %v678_v43 = vsel %vm458_vm1, %v672_v42, inf }
 0x4ef   : > { %679 = vmin.xlane.f32.xlu2 %v678_v43 }
 0x4f1   : > { %v663_v44 = vpop.xlane.xlu2 %662 }
 0x4f2   : > { %vm669_vm14 = vcmp.eq.f32.partialorder %v1801_v26, %v663_v44 }
 0x4f3   : > { %v673_v45 = vsel %vm669_vm14, %v1580_v41, 32.0 }
 0x4f4   : > { %v681_v46 = vsel %vm458_vm1, %v673_v45, inf }
 0x4f5   : > { %682 = vmin.xlane.f32.xlu0 %v681_v46 }
 0x4f9   : > { %v666_v47 = vpop.xlane.xlu0 %665 }
 0x4fa   : > { %vm670_vm15 = vcmp.eq.f32.partialorder %v1812_v34, %v666_v47 }
 0x4fb   : > { %v674_v48 = vsel %vm670_vm15, %v1580_v41, 32.0 }
 0x4fc   : > { %v684_v49 = vsel %vm458_vm1, %v674_v48, inf }
 0x4fd   : > { %685 = vmin.xlane.f32.xlu1 %v684_v49 }
 0x55a   : > { %v677_v50 = vpop.xlane.xlu1 %676 }
 0x55b   : > { %vm1339_vm2 = vcmp.lt.s32.totalorder %v677_v50, 0  ;;  %v1340_v51 = vceil.f32 %v677_v50  ;;  %v1341_v52 = vfloor.f32 %v677_v50 }
 0x55d   : > { %v1342_v53 = vsel %vm1339_vm2, %v1340_v51, %v1341_v52  ;;  %vm748_vm2 = vcmp.eq.s32.totalorder %v1577_v40, 5 }
 0x55e   : > { %v1343_v54 = vcvt.f32.s32 %v1342_v53 }
 0x560   : > { %vm691_vm4 = vcmp.eq.s32.totalorder %v1577_v40, %v1343_v54  ;;  %v1833_v55 = vsel %vm699_vm3, %v1343_v54, %v1776_v9 }
 0x561   : > { %v1836_v56 = vsel %vm691_vm4, -3e+38, %v1779_v10 }
 0x562   : > { %v680_v57 = vpop.xlane.xlu2 %679  ;;  %v704_v58 = vsel %vm458_vm1, %v1836_v56, -inf }
 0x563   : > { %vm1344_vm5 = vcmp.lt.s32.totalorder %v680_v57, 0  ;;  %v1345_v59 = vceil.f32 %v680_v57  ;;  %v1346_v60 = vfloor.f32 %v680_v57  ;;  %705 = vmax.xlane.f32.xlu2 %v704_v58 }
 0x565   : > { %v1347_v61 = vsel %vm1344_vm5, %v1345_v59, %v1346_v60 }
 0x566   : > { %v1348_v62 = vcvt.f32.s32 %v1347_v61 }
 0x568   : > { %v683_v63 = vpop.xlane.xlu0 %682  ;;  %vm692_vm6 = vcmp.eq.s32.totalorder %v1577_v40, %v1348_v62  ;;  %v1844_v0 = vsel %vm699_vm3, %v1348_v62, %v1787_v18 }
 0x569   : > { %vm1349_vm7 = vcmp.lt.s32.totalorder %v683_v63, 0  ;;  %v1350_v1 = vceil.f32 %v683_v63  ;;  %v1351_v2 = vfloor.f32 %v683_v63  ;;  %v1847_v4 = vsel %vm692_vm6, -3e+38, %v1790_v21 }
 0x56a   : > { %v707_v5 = vsel %vm458_vm1, %v1847_v4, -inf }
 0x56b   : > { %v1352_v7 = vsel %vm1349_vm7, %v1350_v1, %v1351_v2  ;;  %708 = vmax.xlane.f32.xlu0 %v707_v5 }
 0x56c   : > { %v1353_v8 = vcvt.f32.s32 %v1352_v7 }
 0x56e   : > { %vm693_vm8 = vcmp.eq.s32.totalorder %v1577_v40, %v1353_v8  ;;  %v1855_v9 = vsel %vm699_vm3, %v1353_v8, %v1798_v25 }
 0x56f   : > { %v1858_v10 = vsel %vm693_vm8, -3e+38, %v1801_v26 }
 0x570   : > { %v686_v11 = vpop.xlane.xlu1 %685  ;;  %v710_v12 = vsel %vm458_vm1, %v1858_v10, -inf }
 0x571   : > { %vm1354_vm9 = vcmp.lt.s32.totalorder %v686_v11, 0  ;;  %v1355_v13 = vceil.f32 %v686_v11  ;;  %v1356_v14 = vfloor.f32 %v686_v11  ;;  %711 = vmax.xlane.f32.xlu1 %v710_v12 }
 0x573   : > { %v1357_v15 = vsel %vm1354_vm9, %v1355_v13, %v1356_v14 }
 0x574   : > { %v1358_v16 = vcvt.f32.s32 %v1357_v15 }
 0x576   : > { %vm694_vm10 = vcmp.eq.s32.totalorder %v1577_v40, %v1358_v16  ;;  %v1866_v17 = vsel %vm699_vm3, %v1358_v16, %v1809_v33  ;;  %v1236_v16 = vld [vmem:[%s2058_s2 + $0x18] sm:$0xff] }
 0x577   : > { %v1869_v18 = vsel %vm694_vm10, -3e+38, %v1812_v34  ;;  %947 = vmatpush.bf16.msra.mxu3 %v1236_v16 }
 0x578   : > { %v713_v19 = vsel %vm458_vm1, %v1869_v18, -inf }
 0x579   : > { %714 = vmax.xlane.f32.xlu2 %v713_v19 }
 0x5d6   : > { %v706_v20 = vpop.xlane.xlu2 %705 }
 0x5d7   : > { %vm716_vm11 = vcmp.eq.f32.partialorder %v1836_v56, %v706_v20 }
 0x5d8   : > { %v720_v21 = vsel %vm716_vm11, %v1580_v41, 32.0 }
 0x5d9   : > { %v724_v22 = vsel %vm458_vm1, %v720_v21, inf  ;;  %v1235_v21 = vld [vmem:[%s2058_s2 + $0x10] sm:$0xff] }
 0x5da   : > { %725 = vmin.xlane.f32.xlu0 %v724_v22  ;;  %v1231_v22 = vld [vmem:[%s2057_s1 + $0x10] sm:$0xff]  ;;  %948 = vmatpush.bf16.msra.mxu3 %v1235_v21 }
 0x5de   : > { %v709_v23 = vpop.xlane.xlu0 %708 }
 0x5df   : > { %vm717_vm12 = vcmp.eq.f32.partialorder %v1847_v4, %v709_v23 }
 0x5e0   : > { %v721_v24 = vsel %vm717_vm12, %v1580_v41, 32.0 }
 0x5e1   : > { %v727_v25 = vsel %vm458_vm1, %v721_v24, inf }
 0x5e2   : > { %728 = vmin.xlane.f32.xlu1 %v727_v25  ;;  %v1234_v25 = vld [vmem:[%s2058_s2 + $0x8] sm:$0xff] }
 0x5e3   : > { %949 = vmatpush.bf16.msra.mxu3 %v1234_v25 }
 0x5e4   : > { %v712_v26 = vpop.xlane.xlu1 %711 }
 0x5e5   : > { %vm718_vm13 = vcmp.eq.f32.partialorder %v1858_v10, %v712_v26 }
 0x5e6   : > { %v722_v27 = vsel %vm718_vm13, %v1580_v41, 32.0 }
 0x5e7   : > { %v730_v28 = vsel %vm458_vm1, %v722_v27, inf  ;;  %v1230_v27 = vld [vmem:[%s2057_s1 + $0x8] sm:$0xff] }
 0x5e8   : > { %731 = vmin.xlane.f32.xlu2 %v730_v28 }
 0x5ec   : > { %v715_v29 = vpop.xlane.xlu2 %714 }
 0x5ed   : > { %vm719_vm14 = vcmp.eq.f32.partialorder %v1869_v18, %v715_v29 }
 0x5ee   : > { %v723_v30 = vsel %vm719_vm14, %v1580_v41, 32.0 }
 0x5ef   : > { %v733_v31 = vsel %vm458_vm1, %v723_v30, inf }
 0x5f0   : > { %734 = vmin.xlane.f32.xlu0 %v733_v31 }
 0x64d   : > { %v726_v32 = vpop.xlane.xlu0 %725 }
 0x64e   : > { %vm1359_vm15 = vcmp.lt.s32.totalorder %v726_v32, 0  ;;  %v1360_v33 = vceil.f32 %v726_v32  ;;  %v1361_v34 = vfloor.f32 %v726_v32 }
 0x650   : > { %v1362_v35 = vsel %vm1359_vm15, %v1360_v33, %v1361_v34  ;;  %vm797_vm15 = vcmp.eq.s32.totalorder %v1577_v40, 6  ;;  %v1233_v33 = vld [vmem:[%s2058_s2] sm:$0xff] }
 0x651   : > { %v1363_v36 = vcvt.f32.s32 %v1362_v35  ;;  %v1229_v34 = vld [vmem:[%s2057_s1] sm:$0xff]  ;;  %950 = vmatpush.bf16.msra.mxu3 %v1233_v33 }
 0x653   : > { %vm740_vm3 = vcmp.eq.s32.totalorder %v1577_v40, %v1363_v36  ;;  %v1890_v37 = vsel %vm748_vm2, %v1363_v36, %v1833_v55 }
 0x654   : > { %v1893_v38 = vsel %vm740_vm3, -3e+38, %v1836_v56 }
 0x655   : > { %v729_v39 = vpop.xlane.xlu1 %728  ;;  %v753_v42 = vsel %vm458_vm1, %v1893_v38, -inf }
 0x656   : > { %vm1364_vm4 = vcmp.lt.s32.totalorder %v729_v39, 0  ;;  %v1365_v43 = vceil.f32 %v729_v39  ;;  %v1366_v44 = vfloor.f32 %v729_v39  ;;  %754 = vmax.xlane.f32.xlu1 %v753_v42 }
 0x658   : > { %v1367_v45 = vsel %vm1364_vm4, %v1365_v43, %v1366_v44 }
 0x659   : > { %v1368_v46 = vcvt.f32.s32 %v1367_v45 }
 0x65b   : > { %v732_v47 = vpop.xlane.xlu2 %731  ;;  %vm741_vm5 = vcmp.eq.s32.totalorder %v1577_v40, %v1368_v46  ;;  %v1901_v48 = vsel %vm748_vm2, %v1368_v46, %v1844_v0 }
 0x65c   : > { %vm1369_vm6 = vcmp.lt.s32.totalorder %v732_v47, 0  ;;  %v1370_v49 = vceil.f32 %v732_v47  ;;  %v1371_v50 = vfloor.f32 %v732_v47  ;;  %v1904_v51 = vsel %vm741_vm5, -3e+38, %v1847_v4 }
 0x65d   : > { %v756_v52 = vsel %vm458_vm1, %v1904_v51, -inf }
 0x65e   : > { %v1372_v53 = vsel %vm1369_vm6, %v1370_v49, %v1371_v50  ;;  %757 = vmax.xlane.f32.xlu2 %v756_v52 }
 0x65f   : > { %v1373_v54 = vcvt.f32.s32 %v1372_v53 }
 0x661   : > { %vm742_vm7 = vcmp.eq.s32.totalorder %v1577_v40, %v1373_v54  ;;  %v1912_v55 = vsel %vm748_vm2, %v1373_v54, %v1855_v9 }
 0x662   : > { %v1915_v56 = vsel %vm742_vm7, -3e+38, %v1858_v10 }
 0x663   : > { %v735_v57 = vpop.xlane.xlu0 %734  ;;  %v759_v58 = vsel %vm458_vm1, %v1915_v56, -inf }
 0x664   : > { %vm1374_vm8 = vcmp.lt.s32.totalorder %v735_v57, 0  ;;  %v1375_v59 = vceil.f32 %v735_v57  ;;  %v1376_v60 = vfloor.f32 %v735_v57  ;;  %760 = vmax.xlane.f32.xlu0 %v759_v58  ;;  %v1446_v57 = vld [vmem:[%s1533_s28 + $0x10] sm:$0xff] }
 0x666   : > { %v1377_v61 = vsel %vm1374_vm8, %v1375_v59, %v1376_v60 }
 0x667   : > { %v1378_v62 = vcvt.f32.s32 %v1377_v61 }
 0x669   : > { %vm743_vm9 = vcmp.eq.s32.totalorder %v1577_v40, %v1378_v62  ;;  %v1923_v63 = vsel %vm748_vm2, %v1378_v62, %v1866_v17  ;;  %v1232_v17 = vld [vmem:[%s2057_s1 + $0x18] sm:$0xff] }
 0x66a   : > { %v1926_v0 = vsel %vm743_vm9, -3e+38, %v1869_v18  ;;  %892 = vmatpush.bf16.msra.mxu2 %v1232_v17 }
 0x66b   : > { %v762_v1 = vsel %vm458_vm1, %v1926_v0, -inf }
 0x66c   : > { %763 = vmax.xlane.f32.xlu1 %v762_v1 }
 0x66e   : > { %893 = vmatpush.bf16.msra.mxu2 %v1231_v22 }
 0x672   : > { %894 = vmatpush.bf16.msra.mxu2 %v1230_v27 }
 0x676   : > { %895 = vmatpush.bf16.msra.mxu2 %v1229_v34 }
 0x6c9   : > { %v755_v2 = vpop.xlane.xlu1 %754 }
 0x6ca   : > { %vm765_vm10 = vcmp.eq.f32.partialorder %v1893_v38, %v755_v2 }
 0x6cb   : > { %v769_v4 = vsel %vm765_vm10, %v1580_v41, 32.0 }
 0x6cc   : > { %v773_v5 = vsel %vm458_vm1, %v769_v4, inf }
 0x6cd   : > { %774 = vmin.xlane.f32.xlu2 %v773_v5 }
 0x6d1   : > { %v758_v7 = vpop.xlane.xlu2 %757 }
 0x6d2   : > { %vm766_vm11 = vcmp.eq.f32.partialorder %v1904_v51, %v758_v7 }
 0x6d3   : > { %v770_v8 = vsel %vm766_vm11, %v1580_v41, 32.0 }
 0x6d4   : > { %v776_v9 = vsel %vm458_vm1, %v770_v8, inf }
 0x6d5   : > { %777 = vmin.xlane.f32.xlu0 %v776_v9 }
 0x6d7   : > { %v761_v10 = vpop.xlane.xlu0 %760 }
 0x6d8   : > { %vm767_vm12 = vcmp.eq.f32.partialorder %v1915_v56, %v761_v10 }
 0x6d9   : > { %v771_v11 = vsel %vm767_vm12, %v1580_v41, 32.0  ;;  %vm838_vm12 = vcmp.eq.s32.totalorder %v1577_v40, 7 }
 0x6da   : > { %v779_v12 = vsel %vm458_vm1, %v771_v11, inf  ;;  %v1444_v11 = vld [vmem:[%s2059_s3] ss:$0 sm:$0xff] }
 0x6db   : > { %780 = vmin.xlane.f32.xlu1 %v779_v12 }
 0x6df   : > { %v764_v13 = vpop.xlane.xlu1 %763 }
 0x6e0   : > { %vm768_vm13 = vcmp.eq.f32.partialorder %v1926_v0, %v764_v13 }
 0x6e1   : > { %v772_v14 = vsel %vm768_vm13, %v1580_v41, 32.0  ;;  %vm843_vm13 = vcmask 64512  }
 0x6e2   : > { %v782_v15 = vsel %vm458_vm1, %v772_v14, inf }
 0x6e3   : > { %783 = vmin.xlane.f32.xlu2 %v782_v15 }
 0x740   : > { %v775_v18 = vpop.xlane.xlu2 %774 }
 0x741   : > { %vm1379_vm14 = vcmp.lt.s32.totalorder %v775_v18, 0  ;;  %v1380_v19 = vceil.f32 %v775_v18  ;;  %v1381_v20 = vfloor.f32 %v775_v18 }
 0x743   : > { %v1382_v23 = vsel %vm1379_vm14, %v1380_v19, %v1381_v20 }
 0x744   : > { %v1383_v24 = vcvt.f32.s32 %v1382_v23 }
 0x746   : > { %vm789_vm2 = vcmp.eq.s32.totalorder %v1577_v40, %v1383_v24  ;;  %v1962_v26 = vsel %vm797_vm15, %v1383_v24, %v1890_v37  ;;  %v848_v37 = vpack.c.bf16 %v1545_v6, %v1539_v3 }
 0x747   : > { %v793_v28 = vsel %vm789_vm2, -3e+38, %v1893_v38 }
 0x748   : > { %v778_v29 = vpop.xlane.xlu0 %777  ;;  %v802_v30 = vsel %vm458_vm1, %v793_v28, -inf  ;;  %1221 = vmatmul.msk.bf16.vlgmr.msra.gmra.mxu3 %vm337_vm0, %v848_v37  ;;  %1203 = vmatmul.msk.bf16.vlgmr.msra.gmra.mxu2 %vm337_vm0, %v848_v37 }
 0x749   : > { %vm1384_vm3 = vcmp.lt.s32.totalorder %v778_v29, 0  ;;  %v1385_v31 = vceil.f32 %v778_v29  ;;  %v1386_v32 = vfloor.f32 %v778_v29  ;;  %803 = vmax.xlane.f32.xlu0 %v802_v30 }
 0x74b   : > { %v1387_v35 = vsel %vm1384_vm3, %v1385_v31, %v1386_v32 }
 0x74c   : > { %v1388_v36 = vcvt.f32.s32 %v1387_v35 }
 0x74e   : > { %v781_v38 = vpop.xlane.xlu1 %780  ;;  %vm790_vm4 = vcmp.eq.s32.totalorder %v1577_v40, %v1388_v36  ;;  %v1981_v39 = vsel %vm797_vm15, %v1388_v36, %v1901_v48 }
 0x74f   : > { %vm1389_vm5 = vcmp.lt.s32.totalorder %v781_v38, 0  ;;  %v1390_v42 = vceil.f32 %v781_v38  ;;  %v1391_v43 = vfloor.f32 %v781_v38  ;;  %v794_v44 = vsel %vm790_vm4, -3e+38, %v1904_v51 }
 0x750   : > { %v805_v45 = vsel %vm458_vm1, %v794_v44, -inf }
 0x751   : > { %806 = vmax.xlane.f32.xlu1 %v805_v45  ;;  %v1392_v3 = vsel %vm1389_vm5, %v1390_v42, %v1391_v43 }
 0x752   : > { %v1393_v6 = vcvt.f32.s32 %v1392_v3 }
 0x754   : > { %vm791_vm6 = vcmp.eq.s32.totalorder %v1577_v40, %v1393_v6  ;;  %v1991_v46 = vsel %vm797_vm15, %v1393_v6, %v1912_v55  ;;  %v1445_v55 = vld [vmem:[%s1533_s28 + $0x18] sm:$0xff]  ;;  %s1227_s28 = sshll.u32 %s2068_s21, 4 }
 0x755   : > { %v795_v47 = vsel %vm791_vm6, -3e+38, %v1915_v56  ;;  %v849_v58 = vpack.c.bf16 %v1445_v55, %v1446_v57  ;;  %s320_s7 = scalar_lea.vmem %s2062_s6, %s1227_s28  ;;  %s310_s10 = scalar_lea.vmem %s2061_s5, %s1227_s28 }
 0x756   : > { %v784_v48 = vpop.xlane.xlu2 %783  ;;  %v808_v49 = vsel %vm458_vm1, %v795_v47, -inf }
 0x757   : > { %vm1394_vm7 = vcmp.lt.s32.totalorder %v784_v48, 0  ;;  %v1395_v50 = vceil.f32 %v784_v48  ;;  %v1396_v51 = vfloor.f32 %v784_v48  ;;  %809 = vmax.xlane.f32.xlu2 %v808_v49 }
 0x758   : > { %1222 = vmatmul.msk.bf16.gmra.mxu3 %vm337_vm0, %v849_v58  ;;  %1204 = vmatmul.msk.bf16.gmra.mxu2 %vm337_vm0, %v849_v58 }
 0x759   : > { %v1397_v52 = vsel %vm1394_vm7, %v1395_v50, %v1396_v51 }
 0x75a   : > { %v1398_v53 = vcvt.f32.s32 %v1397_v52 }
 0x75c   : > { %vm792_vm8 = vcmp.eq.s32.totalorder %v1577_v40, %v1398_v53  ;;  %v1999_v54 = vsel %vm797_vm15, %v1398_v53, %v1923_v63 }
 0x75d   : > { %v796_v56 = vsel %vm792_vm8, -3e+38, %v1926_v0 }
 0x75e   : > { %v811_v59 = vsel %vm458_vm1, %v796_v56, -inf }
 0x75f   : > { %812 = vmax.xlane.f32.xlu0 %v811_v59 }
 0x7bc   : > { %v804_v60 = vpop.xlane.xlu0 %803 }
 0x7bd   : > { %vm814_vm9 = vcmp.eq.f32.partialorder %v793_v28, %v804_v60 }
 0x7be   : > { %v818_v61 = vsel %vm814_vm9, %v1580_v41, 32.0 }
 0x7bf   : > { %v822_v62 = vsel %vm458_vm1, %v818_v61, inf }
 0x7c0   : > { %823 = vmin.xlane.f32.xlu1 %v822_v62 }
 0x7c4   : > { %v807_v63 = vpop.xlane.xlu1 %806 }
 0x7c5   : > { %vm815_vm10 = vcmp.eq.f32.partialorder %v794_v44, %v807_v63 }
 0x7c6   : > { %v819_v1 = vsel %vm815_vm10, %v1580_v41, 32.0 }
 0x7c7   : > { %v825_v0 = vsel %vm458_vm1, %v819_v1, inf }
 0x7c8   : > { %826 = vmin.xlane.f32.xlu2 %v825_v0 }
 0x7ca   : > { %v810_v2 = vpop.xlane.xlu2 %809 }
 0x7cb   : > { %vm816_vm11 = vcmp.eq.f32.partialorder %v795_v47, %v810_v2  ;;  %v952_v8 = vpop.f32.mrf.mxu3  ;;  %v897_v16 = vpop.f32.mrf.mxu2 }
 0x7cc   : > { %v820_v4 = vsel %vm816_vm11, %v1580_v41, 32.0  ;;  %v953_v12 = vadd.f32 %v1444_v11, %v952_v8 }
 0x7cd   : > { %v828_v5 = vsel %vm458_vm1, %v820_v4, inf }
 0x7ce   : > { %829 = vmin.xlane.f32.xlu0 %v828_v5 }
 0x7d2   : > { %v813_v7 = vpop.xlane.xlu0 %812 }
 0x7d3   : > { %vm817_vm0 = vcmp.eq.f32.partialorder %v796_v56, %v813_v7  ;;  %v954_v13 = vpop.f32.mrf.mxu3 }
 0x7d4   : > { %v821_v9 = vsel %vm817_vm0, %v1580_v41, 32.0  ;;  %v955_v14 = vadd.f32 %v1444_v11, %v954_v13  ;;  %v899_v41 = vpop.f32.mrf.mxu2 }
 0x7d5   : > { %v831_v10 = vsel %vm458_vm1, %v821_v9, inf  ;;  %v1240_v17 = vpack.c.bf16 %v899_v41, %v897_v16 }
 0x7d6   : > { %832 = vmin.xlane.f32.xlu1 %v831_v10  ;;  %v1250_v15 = vpack.c.bf16 %v955_v14, %v953_v12 }
 0x7d7   : > { %1241 = vst [vmem:[%s310_s10] sm:$0xff] %v1240_v17  }
 0x7d8   : > { %1251 = vst [vmem:[%s320_s7] sm:$0xff] %v1250_v15  }
 0x7db   : > { %v957_v18 = vpop.f32.mrf.mxu3 }
 0x7dc   : > { %v902_v19 = vpop.f32.mrf.mxu2  ;;  %v958_v20 = vadd.f32 %v1444_v11, %v957_v18 }
 0x7e3   : > { %v959_v21 = vpop.f32.mrf.mxu3 }
 0x7e4   : > { %v960_v22 = vadd.f32 %v1444_v11, %v959_v21  ;;  %v904_v23 = vpop.f32.mrf.mxu2 }
 0x7e5   : > { %v1245_v25 = vpack.c.bf16 %v904_v23, %v902_v19 }
 0x7e6   : > { %v1255_v24 = vpack.c.bf16 %v960_v22, %v958_v20 }
 0x7e7   : > { %1257 = vst [vmem:[%s310_s10 + $0x8] sm:$0xff] %v1245_v25  }
 0x7e8   : > { %1258 = vst [vmem:[%s320_s7 + $0x8] sm:$0xff] %v1255_v24  }
 0x833   : > { %v824_v27 = vpop.xlane.xlu1 %823 }
 0x834   : > { %vm1399_vm1 = vcmp.lt.s32.totalorder %v824_v27, 0  ;;  %v1400_v28 = vceil.f32 %v824_v27  ;;  %v1401_v29 = vfloor.f32 %v824_v27 }
 0x836   : > { %v1402_v30 = vsel %vm1399_vm1, %v1400_v28, %v1401_v29 }
 0x837   : > { %v1403_v31 = vcvt.f32.s32 %v1402_v30 }
 0x839   : > { %v839_v32 = vsel %vm838_vm12, %v1403_v31, %v1962_v26 }
 0x83a   : > { %844 = vst.msk [vmem:[%s300_s13] sm:$0xff] %vm843_vm13, %v839_v32 }
 0x83b   : > { %v827_v33 = vpop.xlane.xlu2 %826 }
 0x83c   : > { %vm1404_vm14 = vcmp.lt.s32.totalorder %v827_v33, 0  ;;  %v1405_v34 = vceil.f32 %v827_v33  ;;  %v1406_v35 = vfloor.f32 %v827_v33 }
 0x83e   : > { %v1407_v36 = vsel %vm1404_vm14, %v1405_v34, %v1406_v35 }
 0x83f   : > { %v1408_v37 = vcvt.f32.s32 %v1407_v36 }
 0x841   : > { %v840_v38 = vsel %vm838_vm12, %v1408_v37, %v1981_v39  ;;  %v830_v42 = vpop.xlane.xlu0 %829 }
 0x842   : > { %845 = vst.msk [vmem:[%s300_s13 + $0x8] sm:$0xff] %vm843_vm13, %v840_v38  ;;  %vm1409_vm15 = vcmp.lt.s32.totalorder %v830_v42, 0  ;;  %v1410_v43 = vceil.f32 %v830_v42  ;;  %v1411_v44 = vfloor.f32 %v830_v42 }
 0x844   : > { %v1412_v45 = vsel %vm1409_vm15, %v1410_v43, %v1411_v44 }
 0x845   : > { %v1413_v26 = vcvt.f32.s32 %v1412_v45 }
 0x847   : > { %v841_v3 = vsel %vm838_vm12, %v1413_v26, %v1991_v46 }
 0x848   : > { %846 = vst.msk [vmem:[%s300_s13 + $0x10] sm:$0xff] %vm843_vm13, %v841_v3 }
 0x849   : > { %v833_v6 = vpop.xlane.xlu1 %832 }
 0x84a   : > { %vm1414_vm2 = vcmp.lt.s32.totalorder %v833_v6, 0  ;;  %v1415_v47 = vceil.f32 %v833_v6  ;;  %v1416_v48 = vfloor.f32 %v833_v6 }
 0x84c   : > { %v1417_v49 = vsel %vm1414_vm2, %v1415_v47, %v1416_v48 }
 0x84d   : > { %v1418_v39 = vcvt.f32.s32 %v1417_v49 }
 0x84f   : > { %v842_v50 = vsel %vm838_vm12, %v1418_v39, %v1999_v54 }
 0x850   : > { %847 = vst.msk [vmem:[%s300_s13 + $0x18] sm:$0xff] %vm843_vm13, %v842_v50 }
 0x851 PF: > { %s17_s23 = sadd.s32 1, %s1469_s23   ;;  %s2063_s21 = smov %s1465_s22 }
 0x852   : > { %p14_p5 = scmp.ge.s32.totalorder %s17_s23, 4   ;;  %s2064_s22 = smov %s2066_s24 }
 0x854   :  { %16 = sbr.rel (!%p14_p5) target bundleno = 2 (0x2), region = 91 }

// kernel: dgcnn_forward.15
= control target key start
LH: loop header
LB: loop body
LE: loop exit
PB: predicated region body
PF: predicated region fallthrough
CT: control target
= control target key end

     0   :  { %s626_s9 = smov 0   ;;  %s628_s10 = smov 0   ;;  %s689_s0 = inlined_call_operand.vmem [shape: bf16[2,32,1024], index: 0, kind: input, shape index: {}]   ;;  %s690_s1 = inlined_call_operand.vmem [shape: bf16[2,32,128], index: 1, kind: input, shape index: {}]   ;;  %s691_s2 = inlined_call_operand.vmem [shape: f32[2,32,128], index: 2, kind: output, shape index: {}]  }
   0x1   :  { %s630_s11 = smov 0  }
   0x2 LB: > { %s24_s12 = sadd.s32 1, %s605_s10  ;;  %p542_p0 = scmp.ge.s32.totalorder %s609_s11, 1  ;;  %s609_s11 = sphi %s630_s11, %s12_s11   ;;  %s605_s10 = sphi %s628_s10, %s693_s10   ;;  %s601_s9 = sphi %s626_s9, %s692_s9  }
   0x3   : > { %p26_p1 = scmp.ge.s32.totalorder %s24_s12, 2  ;;  %p151_p2 = scmp.lt.s32.totalorder %s609_s11, 3 }
   0x5   : > { %s695_s12 = smov (%p26_p1, %s24_s12), 0  ;;  %p152_p3 = pnand %p542_p0, %p151_p2 }
   0x6   : > { %p192_p4 = scmp.lt.s32.totalorder (!%p152_p3), %s601_s9, 1 }
   0x7   : > { %155 = sbr.rel (%p152_p3) target bundleno = 53 (0x35), region = 28 }
   0xc   : > { %s697_s9 = smov (!%p192_p4, %s601_s9), 1 }
   0xd   : > { %s551_s13 = sshll.u32 %s697_s9, 7  ;;  %s552_s17 = sshll.u32 %s697_s9, 4 }
   0xe   : > { %s650_s16 = scalar_lea.vmem %s689_s0, %s551_s13  ;;  %s669_s20 = scalar_lea.vmem %s690_s1, %s552_s17 }
   0xf   : > { %v222_v0 = vld [vmem:[%s650_s16] sm:$0xff]  ;;  %v223_v1 = vld [vmem:[%s650_s16 + $0x8] sm:$0xff]  ;;  %v224_v6 = vld [vmem:[%s650_s16 + $0x10] sm:$0xff]  ;;  %s553_s21 = sshll.u32 %s697_s9, 5 }
  0x10   : > { %v238_v2 = vunpack.c.l.bf16 %v222_v0  ;;  %v246_v3 = vrot.slane %v222_v0, 4  ;;  %v290_v4 = vrot.slane %v223_v1, 4  ;;  %v226_v5 = vld [vmem:[%s650_s16 + $0x20] sm:$0xff]  ;;  %v227_v7 = vld [vmem:[%s650_s16 + $0x28] sm:$0xff]  ;;  %v270_v9 = vunpack.c.l.bf16 %v223_v1  ;;  %v225_v10 = vld [vmem:[%s650_s16 + $0x18] sm:$0xff]  ;;  %s220_s24 = scalar_lea.vmem %s691_s2, %s553_s21 }
  0x11   : > { %v228_v11 = vld [vmem:[%s650_s16 + $0x30] sm:$0xff]  ;;  %v239_v12 = vunpack.c.l.bf16 %v226_v5  ;;  %v247_v13 = vrot.slane %v226_v5, 4  ;;  %v334_v16 = vrot.slane %v224_v6, 4  ;;  %v291_v17 = vrot.slane %v227_v7, 4  ;;  %v230_v18 = vld [vmem:[%s650_s16 + $0x40] sm:$0xff]  ;;  %v231_v21 = vld [vmem:[%s650_s16 + $0x48] sm:$0xff] }
  0x12   : > { %v254_v8 = vunpack.c.l.bf16 %v246_v3  ;;  %v298_v15 = vunpack.c.l.bf16 %v290_v4  ;;  %v271_v20 = vunpack.c.l.bf16 %v227_v7  ;;  %v314_v23 = vunpack.c.l.bf16 %v224_v6  ;;  %v229_v26 = vld [vmem:[%s650_s16 + $0x38] sm:$0xff]  ;;  %v232_v34 = vld [vmem:[%s650_s16 + $0x50] sm:$0xff]  ;;  %v234_v40 = vld [vmem:[%s650_s16 + $0x60] sm:$0xff] }
  0x13   : > { %v255_v19 = vunpack.c.l.bf16 %v247_v13  ;;  %v378_v24 = vrot.slane %v225_v10, 4  ;;  %v335_v25 = vrot.slane %v228_v11, 4  ;;  %v299_v28 = vunpack.c.l.bf16 %v291_v17  ;;  %v235_v41 = vld [vmem:[%s650_s16 + $0x68] sm:$0xff]  ;;  %v233_v51 = vld [vmem:[%s650_s16 + $0x58] sm:$0xff]  ;;  %v236_v59 = vld [vmem:[%s650_s16 + $0x70] sm:$0xff] }
  0x14   : > { %v258_v14 = vmax.f32 %v238_v2, %v254_v8  ;;  %v240_v29 = vunpack.c.l.bf16 %v230_v18  ;;  %v248_v30 = vrot.slane %v230_v18, 4  ;;  %v342_v32 = vunpack.c.l.bf16 %v334_v16  ;;  %v555_v0 = vld [vmem:[%s669_s20] sm:$0xff]  }
  0x15   : > { %v259_v27 = vmax.f32 %v239_v12, %v255_v19  ;;  %v358_v33 = vunpack.c.l.bf16 %v225_v10  ;;  %v292_v35 = vrot.slane %v231_v21, 4  ;;  %v315_v37 = vunpack.c.l.bf16 %v228_v11  ;;  %v237_v12 = vld [vmem:[%s650_s16 + $0x78] sm:$0xff] }
  0x16   : > { %v274_v22 = vmax.f32 %v258_v14, %v270_v9  ;;  %v256_v38 = vunpack.c.l.bf16 %v248_v30  ;;  %v272_v39 = vunpack.c.l.bf16 %v231_v21  ;;  %v386_v43 = vunpack.c.l.bf16 %v378_v24 }
  0x17   : > { %v275_v36 = vmax.f32 %v259_v27, %v271_v20  ;;  %v343_v44 = vunpack.c.l.bf16 %v335_v25  ;;  %v379_v45 = vrot.slane %v229_v26, 4  ;;  %v300_v48 = vunpack.c.l.bf16 %v292_v35 }
  0x18   : > { %v302_v31 = vmax.f32 %v274_v22, %v298_v15  ;;  %v260_v47 = vmax.f32 %v240_v29, %v256_v38  ;;  %v336_v49 = vrot.slane %v232_v34, 4  ;;  %v241_v52 = vunpack.c.l.bf16 %v234_v40 }
  0x19   : > { %v303_v46 = vmax.f32 %v275_v36, %v299_v28  ;;  %v249_v53 = vrot.slane %v234_v40, 4  ;;  %v293_v54 = vrot.slane %v235_v41, 4  ;;  %v359_v56 = vunpack.c.l.bf16 %v229_v26  ;;  %v562_v28 = vld [vmem:[%s669_s20 + $0x8] sm:$0xff]  }
  0x1a   : > { %v318_v42 = vmax.f32 %v302_v31, %v314_v23  ;;  %v276_v57 = vmax.f32 %v260_v47, %v272_v39  ;;  %v316_v58 = vunpack.c.l.bf16 %v232_v34  ;;  %v387_v61 = vunpack.c.l.bf16 %v379_v45 }
  0x1b   : > { %v319_v55 = vmax.f32 %v303_v46, %v315_v37  ;;  %v257_v62 = vunpack.c.l.bf16 %v249_v53  ;;  %v273_v63 = vunpack.c.l.bf16 %v235_v41  ;;  %v344_v3 = vunpack.c.l.bf16 %v336_v49 }
  0x1c   : > { %v346_v50 = vmax.f32 %v318_v42, %v342_v32  ;;  %v304_v2 = vmax.f32 %v276_v57, %v300_v48  ;;  %v380_v4 = vrot.slane %v233_v51, 4  ;;  %v301_v7 = vunpack.c.l.bf16 %v293_v54 }
  0x1d   : > { %v347_v1 = vmax.f32 %v319_v55, %v343_v44  ;;  %v261_v6 = vmax.f32 %v241_v52, %v257_v62  ;;  %v337_v8 = vrot.slane %v236_v59, 4  ;;  %v360_v11 = vunpack.c.l.bf16 %v233_v51 }
  0x1e   : > { %v362_v60 = vmax.f32 %v346_v50, %v358_v33  ;;  %v320_v10 = vmax.f32 %v304_v2, %v316_v58  ;;  %v556_v14 = vunpack.c.l.bf16 %v555_v0  ;;  %v317_v16 = vunpack.c.l.bf16 %v236_v59 }
  0x1f   : > { %v363_v9 = vmax.f32 %v347_v1, %v359_v56  ;;  %v277_v15 = vmax.f32 %v261_v6, %v273_v63  ;;  %v388_v19 = vunpack.c.l.bf16 %v380_v4  ;;  %v345_v22 = vunpack.c.l.bf16 %v337_v8 }
  0x20   : > { %v390_v5 = vmax.f32 %v362_v60, %v386_v43  ;;  %v348_v18 = vmax.f32 %v320_v10, %v344_v3  ;;  %v381_v23 = vrot.slane %v237_v12, 4  ;;  %v557_v25 = vunpack.c.h.bf16 %v555_v0 }
  0x21   : > { %v391_v17 = vmax.f32 %v363_v9, %v387_v61  ;;  %v305_v21 = vmax.f32 %v277_v15, %v301_v7  ;;  %v361_v30 = vunpack.c.l.bf16 %v237_v12  ;;  %v560_v38 = vunpack.c.l.bf16 %v562_v28 }
  0x22   : > { %v394_v13 = vpack.c.bf16 %v390_v5, %v390_v5  ;;  %v364_v26 = vmax.f32 %v348_v18, %v360_v11  ;;  %v389_v35 = vunpack.c.l.bf16 %v381_v23  ;;  %v561_v47 = vunpack.c.h.bf16 %v562_v28 }
  0x23   : > { %v395_v24 = vpack.c.bf16 %v391_v17, %v391_v17  ;;  %v321_v29 = vmax.f32 %v305_v21, %v317_v16 }
  0x24   : > { %v398_v20 = vunpack.c.l.bf16 %v394_v13  ;;  %v392_v32 = vmax.f32 %v364_v26, %v388_v19 }
  0x25   : > { %v399_v31 = vunpack.c.l.bf16 %v395_v24  ;;  %v349_v34 = vmax.f32 %v321_v29, %v345_v22 }
  0x26   : > { %v410_v27 = vadd.f32 %v556_v14, %v398_v20  ;;  %v396_v37 = vpack.c.bf16 %v392_v32, %v392_v32 }
  0x27   : > { %v411_v36 = vadd.f32 %v557_v25, %v399_v31  ;;  %v365_v40 = vmax.f32 %v349_v34, %v361_v30 }
  0x28   : > { %vm414_vm0 = vcmp.gt.f32.partialorder %v410_v27, 0.0  ;;  %v418_v33 = vmul.f32 0.2, %v410_v27  ;;  %v400_v42 = vunpack.c.l.bf16 %v396_v37 }
  0x29   : > { %vm415_vm1 = vcmp.gt.f32.partialorder %v411_v36, 0.0  ;;  %v419_v41 = vmul.f32 0.2, %v411_v36  ;;  %v393_v43 = vmax.f32 %v365_v40, %v389_v35 }
  0x2a   : > { %v422_v39 = vsel %vm414_vm0, %v410_v27, %v418_v33  ;;  %v412_v45 = vadd.f32 %v560_v38, %v400_v42 }
  0x2b   : > { %426 = vst [vmem:[%s220_s24] sm:$0xff] %v422_v39  ;;  %v423_v44 = vsel %vm415_vm1, %v411_v36, %v419_v41  ;;  %v397_v46 = vpack.c.bf16 %v393_v43, %v393_v43 }
  0x2c   : > { %427 = vst [vmem:[%s220_s24 + $0x8] sm:$0xff] %v423_v44  ;;  %vm416_vm2 = vcmp.gt.f32.partialorder %v412_v45, 0.0  ;;  %v420_v48 = vmul.f32 0.2, %v412_v45 }
  0x2d   : > { %v401_v49 = vunpack.c.l.bf16 %v397_v46 }
  0x2e   : > { %v424_v50 = vsel %vm416_vm2, %v412_v45, %v420_v48 }
  0x2f   : > { %428 = vst [vmem:[%s220_s24 + $0x10] sm:$0xff] %v424_v50  ;;  %v413_v51 = vadd.f32 %v561_v47, %v401_v49 }
  0x31   : > { %vm417_vm3 = vcmp.gt.f32.partialorder %v413_v51, 0.0  ;;  %v421_v52 = vmul.f32 0.2, %v413_v51 }
  0x33   : > { %v425_v53 = vsel %vm417_vm3, %v413_v51, %v421_v52 }
  0x34   : > { %429 = vst [vmem:[%s220_s24 + $0x18] sm:$0xff] %v425_v53 }
  0x35 PF: > { %s12_s11 = sadd.s32 1, %s609_s11   ;;  %s692_s9 = smov %s605_s10 }
  0x36   : > { %p9_p5 = scmp.ge.s32.totalorder %s12_s11, 4   ;;  %s693_s10 = smov %s695_s12 }
  0x38   :  { %11 = sbr.rel (!%p9_p5) target bundleno = 2 (0x2), region = 61 }

// kernel: dgcnn_forward.16
= control target key start
LH: loop header
LB: loop body
LE: loop exit
PB: predicated region body
PF: predicated region fallthrough
CT: control target
= control target key end

     0   :  { %s1718_s21 = smov 0   ;;  %s1720_s22 = smov 0   ;;  %s2424_s0 = inlined_call_operand.vmem [shape: f32[2,32,128], index: 0, kind: input, shape index: {}]   ;;  %s2425_s1 = inlined_call_operand.vmem [shape: bf16[128,256], index: 1, kind: input, shape index: {}]   ;;  %s2426_s2 = inlined_call_operand.vmem [shape: bf16[128,256], index: 2, kind: input, shape index: {}]   ;;  %s2427_s3 = inlined_call_operand.vmem [shape: f32[1,256], index: 3, kind: input, shape index: {}]   ;;  %s2428_s4 = inlined_call_operand.vmem [shape: s32[2,32,8], index: 4, kind: output, shape index: {0}]   ;;  %s2429_s5 = inlined_call_operand.vmem [shape: bf16[2,32,256], index: 5, kind: output, shape index: {1}]   ;;  %s2430_s6 = inlined_call_operand.vmem [shape: bf16[2,32,256], index: 6, kind: output, shape index: {2}]  }
   0x1   :  { %s1722_s23 = smov 0  }
   0x2 LB: > { %s29_s24 = sadd.s32 1, %s1676_s22  ;;  %p1298_p0 = scmp.ge.s32.totalorder %s1680_s23, 1  ;;  %s1680_s23 = sphi %s1722_s23, %s17_s23   ;;  %s1676_s22 = sphi %s1720_s22, %s2432_s22   ;;  %s1672_s21 = sphi %s1718_s21, %s2431_s21  }
   0x3   : > { %p31_p1 = scmp.ge.s32.totalorder %s29_s24, 2  ;;  %p235_p2 = scmp.lt.s32.totalorder %s1680_s23, 3 }
   0x5   : > { %s2434_s24 = smov (%p31_p1, %s29_s24), 0  ;;  %p236_p3 = pnand %p1298_p0, %p235_p2 }
   0x6   : > { %p289_p4 = scmp.lt.s32.totalorder (!%p236_p3), %s1672_s21, 1 }
   0x7   : > { %239 = sbr.rel (%p236_p3) target bundleno = 2129 (0x851), region = 36 }
   0xc   : > { %s2436_s21 = smov (!%p289_p4, %s1672_s21), 1  ;;  %v1682_v11 = vmov 1.0   ;;  %vm417_vm0 = vcmask 261120   ;;  %v414_v37 = vlaneseq }
   0xd   : > { %s1736_s25 = sshll.u32 %s2436_s21, 5 }
   0xe   : > { %s293_s28 = scalar_lea.vmem %s2424_s0, %s1736_s25  ;;  %v1753_v38 = vand.u32 127, %v414_v37  ;;  %s2378_s17 = scalar_lea.vmem %s2430_s6, %s1736_s25 }
   0xf   : > { %v330_v0 = vld [vmem:[%s293_s28 + $0x18] sm:$0xff]  ;;  %v329_v1 = vld [vmem:[%s293_s28 + $0x10] sm:$0xff]  ;;  %v328_v4 = vld [vmem:[%s293_s28 + $0x8] sm:$0xff]  ;;  %s2384_s20 = scalar_lea.vmem %s2429_s5, %s1736_s25  ;;  %s302_s27 = scalar_lea.vmem %s2428_s4, %s1736_s25 }
  0x10   : > { %352 = vmatpush.xpose.msra.mxu0 %v330_v0  ;;  %v384_v2 = vmul.f32 %v330_v0, %v330_v0  ;;  %v383_v3 = vmul.f32 %v329_v1, %v329_v1  ;;  %v327_v5 = vld [vmem:[%s293_s28] sm:$0xff]  ;;  %v382_v8 = vmul.f32 %v328_v4, %v328_v4  ;;  %v1744_v9 = vpack.c.bf16 %v330_v0, %v329_v1 }
  0x11   : > { %v381_v6 = vmul.f32 %v327_v5, %v327_v5  ;;  %v1742_v7 = vpack.c.bf16 %v328_v4, %v327_v5  ;;  %v336_v10 = vadd.f32 %v327_v5, %v327_v5  ;;  %v337_v12 = vadd.f32 %v328_v4, %v328_v4 }
  0x12   : > { %397 = vmatpush.xpose.msra.mxu1 %v384_v2  ;;  %377 = vadd.xlane.f32.xlu1 %v383_v3  ;;  %v338_v13 = vadd.f32 %v329_v1, %v329_v1  ;;  %v339_v14 = vadd.f32 %v330_v0, %v330_v0  ;;  %v1756_v39 = vcvt.s32.f32 %v1753_v38 }
  0x13   : > { %373 = vadd.xlane.f32.xlu0 %v381_v6 }
  0x14   : > { %353 = vmatpush.xpose.msra.mxu0 %v329_v1 }
  0x16   : > { %398 = vmatpush.xpose.msra.mxu1 %v383_v3 }
  0x18   : > { %354 = vmatpush.xpose.msra.mxu0 %v328_v4 }
  0x1a   : > { %399 = vmatpush.xpose.msra.mxu1 %v382_v8  ;;  %379 = vadd.xlane.f32.xlu1 %v384_v2 }
  0x1b   : > { %375 = vadd.xlane.f32.xlu0 %v382_v8 }
  0x1c   : > { %355 = vmatpush.xpose.msra.mxu0 %v327_v5 }
  0x1e   : > { %400 = vmatpush.xpose.msra.mxu1 %v381_v6 }
  0x1f   : > { %356 = vmatmul.f32.vlgmr.msra.gmra.mxu0 %v336_v10 }
  0x21   : > { %401 = vmatmul.f32.vlgmr.msra.gmra.mxu1 %v1682_v11 }
  0x27   : > { %359 = vmatmul.f32.gmra.mxu0 %v337_v12 }
  0x2f   : > { %362 = vmatmul.f32.gmra.mxu0 %v338_v13 }
  0x37   : > { %365 = vmatmul.f32.gmra.mxu0 %v339_v14 }
  0x85   : > { %v378_v26 = vpop.xlane.xlu1 %377 }
  0x86   : > { %v374_v15 = vpop.xlane.xlu0 %373 }
  0x8d   : > { %v380_v32 = vpop.xlane.xlu1 %379 }
  0x8e   : > { %v376_v21 = vpop.xlane.xlu0 %375 }
  0x9c   : > { %v357_v16 = vpop.f32.mrf.mxu0 }
  0x9d   : > { %v405_v18 = vsub.f32 %v357_v16, %v374_v15 }
  0x9e   : > { %v402_v17 = vpop.f32.mrf.mxu1 }
  0x9f   : > { %v409_v19 = vperm.slane %v402_v17, 0 }
  0xa1   : > { %v410_v20 = vsub.f32 %v405_v18, %v409_v19 }
  0xa3   : > { %v418_v22 = vsel %vm417_vm0, %v410_v20, -inf }
  0xa4   : > { %419 = vmax.xlane.f32.xlu2 %v418_v22  ;;  %v360_v23 = vpop.f32.mrf.mxu0 }
  0xa5   : > { %v406_v24 = vsub.f32 %v360_v23, %v376_v21 }
  0xa7   : > { %v411_v25 = vsub.f32 %v406_v24, %v409_v19 }
  0xa9   : > { %v421_v27 = vsel %vm417_vm0, %v411_v25, -inf }
  0xac   : > { %422 = vmax.xlane.f32.xlu2 %v421_v27  ;;  %v363_v28 = vpop.f32.mrf.mxu0 }
  0xad   : > { %v407_v29 = vsub.f32 %v363_v28, %v378_v26 }
  0xaf   : > { %v412_v30 = vsub.f32 %v407_v29, %v409_v19 }
  0xb1   : > { %v424_v31 = vsel %vm417_vm0, %v412_v30, -inf }
  0xb2   : > { %425 = vmax.xlane.f32.xlu0 %v424_v31 }
  0xb4   : > { %v366_v33 = vpop.f32.mrf.mxu0 }
  0xb5   : > { %v408_v34 = vsub.f32 %v366_v33, %v380_v32 }
  0xb7   : > { %v1749_v35 = vsub.f32 %v408_v34, %v409_v19 }
  0xb9   : > { %v427_v36 = vsel %vm417_vm0, %v1749_v35, -inf }
  0xba   : > { %428 = vmax.xlane.f32.xlu1 %v427_v36 }
 0x117   : > { %v420_v40 = vpop.xlane.xlu2 %419 }
 0x118   : > { %vm430_vm1 = vcmp.eq.f32.partialorder %v410_v20, %v420_v40 }
 0x119   : > { %v434_v41 = vsel %vm430_vm1, %v1756_v39, 32.0 }
 0x11a   : > { %v438_v42 = vsel %vm417_vm0, %v434_v41, inf }
 0x11b   : > { %439 = vmin.xlane.f32.xlu2 %v438_v42 }
 0x11f   : > { %v423_v43 = vpop.xlane.xlu2 %422 }
 0x120   : > { %vm431_vm2 = vcmp.eq.f32.partialorder %v411_v25, %v423_v43 }
 0x121   : > { %v435_v44 = vsel %vm431_vm2, %v1756_v39, 32.0 }
 0x122   : > { %v441_v45 = vsel %vm417_vm0, %v435_v44, inf }
 0x123   : > { %442 = vmin.xlane.f32.xlu0 %v441_v45 }
 0x125   : > { %v426_v46 = vpop.xlane.xlu0 %425 }
 0x126   : > { %vm432_vm3 = vcmp.eq.f32.partialorder %v412_v30, %v426_v46 }
 0x127   : > { %v436_v47 = vsel %vm432_vm3, %v1756_v39, 32.0  ;;  %vm462_vm3 = vcmp.eq.s32.totalorder %v1753_v38, 0 }
 0x128   : > { %v444_v48 = vsel %vm417_vm0, %v436_v47, inf }
 0x129   : > { %445 = vmin.xlane.f32.xlu1 %v444_v48 }
 0x12d   : > { %v429_v49 = vpop.xlane.xlu1 %428 }
 0x12e   : > { %vm433_vm4 = vcmp.eq.f32.partialorder %v1749_v35, %v429_v49 }
 0x12f   : > { %v437_v50 = vsel %vm433_vm4, %v1756_v39, 32.0  ;;  %vm511_vm4 = vcmp.eq.s32.totalorder %v1753_v38, 1 }
 0x130   : > { %v447_v51 = vsel %vm417_vm0, %v437_v50, inf }
 0x131   : > { %448 = vmin.xlane.f32.xlu2 %v447_v51 }
 0x18e   : > { %v440_v52 = vpop.xlane.xlu2 %439 }
 0x18f   : > { %vm1473_vm5 = vcmp.lt.s32.totalorder %v440_v52, 0  ;;  %v1474_v53 = vceil.f32 %v440_v52  ;;  %v1475_v54 = vfloor.f32 %v440_v52 }
 0x191   : > { %v1767_v55 = vsel %vm1473_vm5, %v1474_v53, %v1475_v54 }
 0x192   : > { %v1477_v56 = vcvt.f32.s32 %v1767_v55 }
 0x194   : > { %vm454_vm6 = vcmp.eq.s32.totalorder %v1753_v38, %v1477_v56 }
 0x195   : > { %v1773_v57 = vsel %vm454_vm6, -3e+38, %v410_v20 }
 0x196   : > { %v443_v58 = vpop.xlane.xlu0 %442  ;;  %v467_v59 = vsel %vm417_vm0, %v1773_v57, -inf }
 0x197   : > { %vm1478_vm7 = vcmp.lt.s32.totalorder %v443_v58, 0  ;;  %v1479_v60 = vceil.f32 %v443_v58  ;;  %v1480_v61 = vfloor.f32 %v443_v58  ;;  %468 = vmax.xlane.f32.xlu0 %v467_v59 }
 0x199   : > { %v1777_v62 = vsel %vm1478_vm7, %v1479_v60, %v1480_v61 }
 0x19a   : > { %v1482_v63 = vcvt.f32.s32 %v1777_v62 }
 0x19c   : > { %v446_v0 = vpop.xlane.xlu1 %445  ;;  %vm455_vm8 = vcmp.eq.s32.totalorder %v1753_v38, %v1482_v63  ;;  %v464_v46 = vsel %vm462_vm3, %v1482_v63, 0 }
 0x19d   : > { %vm1483_vm9 = vcmp.lt.s32.totalorder %v446_v0, 0  ;;  %v1484_v1 = vceil.f32 %v446_v0  ;;  %v1485_v2 = vfloor.f32 %v446_v0  ;;  %v1783_v3 = vsel %vm455_vm8, -3e+38, %v411_v25 }
 0x19e   : > { %v470_v4 = vsel %vm417_vm0, %v1783_v3, -inf }
 0x19f   : > { %v1787_v5 = vsel %vm1483_vm9, %v1484_v1, %v1485_v2  ;;  %471 = vmax.xlane.f32.xlu1 %v470_v4 }
 0x1a0   : > { %v1487_v6 = vcvt.f32.s32 %v1787_v5 }
 0x1a2   : > { %vm456_vm10 = vcmp.eq.s32.totalorder %v1753_v38, %v1487_v6  ;;  %v465_v55 = vsel %vm462_vm3, %v1487_v6, 0 }
 0x1a3   : > { %v1793_v8 = vsel %vm456_vm10, -3e+38, %v412_v30 }
 0x1a4   : > { %v449_v10 = vpop.xlane.xlu2 %448  ;;  %v473_v11 = vsel %vm417_vm0, %v1793_v8, -inf }
 0x1a5   : > { %vm1488_vm11 = vcmp.lt.s32.totalorder %v449_v10, 0  ;;  %v1489_v12 = vceil.f32 %v449_v10  ;;  %v1490_v13 = vfloor.f32 %v449_v10  ;;  %474 = vmax.xlane.f32.xlu2 %v473_v11 }
 0x1a7   : > { %v1797_v14 = vsel %vm1488_vm11, %v1489_v12, %v1490_v13 }
 0x1a8   : > { %v1492_v15 = vcvt.f32.s32 %v1797_v14 }
 0x1aa   : > { %vm457_vm12 = vcmp.eq.s32.totalorder %v1753_v38, %v1492_v15  ;;  %v466_v0 = vsel %vm462_vm3, %v1492_v15, 0 }
 0x1ab   : > { %v1804_v16 = vsel %vm457_vm12, -3e+38, %v1749_v35  ;;  %v463_v35 = vsel %vm462_vm3, %v1477_v56, 0 }
 0x1ac   : > { %v476_v17 = vsel %vm417_vm0, %v1804_v16, -inf }
 0x1ad   : > { %477 = vmax.xlane.f32.xlu0 %v476_v17 }
 0x20a   : > { %v469_v18 = vpop.xlane.xlu0 %468 }
 0x20b   : > { %vm479_vm13 = vcmp.eq.f32.partialorder %v1773_v57, %v469_v18 }
 0x20c   : > { %v483_v19 = vsel %vm479_vm13, %v1756_v39, 32.0 }
 0x20d   : > { %v487_v20 = vsel %vm417_vm0, %v483_v19, inf }
 0x20e   : > { %488 = vmin.xlane.f32.xlu1 %v487_v20 }
 0x212   : > { %v472_v21 = vpop.xlane.xlu1 %471 }
 0x213   : > { %vm480_vm14 = vcmp.eq.f32.partialorder %v1783_v3, %v472_v21 }
 0x214   : > { %v484_v22 = vsel %vm480_vm14, %v1756_v39, 32.0 }
 0x215   : > { %v490_v23 = vsel %vm417_vm0, %v484_v22, inf }
 0x216   : > { %491 = vmin.xlane.f32.xlu2 %v490_v23 }
 0x218   : > { %v475_v24 = vpop.xlane.xlu2 %474 }
 0x219   : > { %vm481_vm15 = vcmp.eq.f32.partialorder %v1793_v8, %v475_v24 }
 0x21a   : > { %v485_v25 = vsel %vm481_vm15, %v1756_v39, 32.0 }
 0x21b   : > { %v493_v26 = vsel %vm417_vm0, %v485_v25, inf }
 0x21c   : > { %494 = vmin.xlane.f32.xlu0 %v493_v26 }
 0x220   : > { %v478_v27 = vpop.xlane.xlu0 %477 }
 0x221   : > { %vm482_vm1 = vcmp.eq.f32.partialorder %v1804_v16, %v478_v27 }
 0x222   : > { %v486_v28 = vsel %vm482_vm1, %v1756_v39, 32.0 }
 0x223   : > { %v496_v29 = vsel %vm417_vm0, %v486_v28, inf }
 0x224   : > { %497 = vmin.xlane.f32.xlu1 %v496_v29 }
 0x281   : > { %v489_v30 = vpop.xlane.xlu1 %488 }
 0x282   : > { %vm1493_vm2 = vcmp.lt.s32.totalorder %v489_v30, 0  ;;  %v1494_v31 = vceil.f32 %v489_v30  ;;  %v1495_v32 = vfloor.f32 %v489_v30 }
 0x284   : > { %v1496_v33 = vsel %vm1493_vm2, %v1494_v31, %v1495_v32  ;;  %vm560_vm2 = vcmp.eq.s32.totalorder %v1753_v38, 2 }
 0x285   : > { %v1497_v34 = vcvt.f32.s32 %v1496_v33 }
 0x287   : > { %vm503_vm5 = vcmp.eq.s32.totalorder %v1753_v38, %v1497_v34  ;;  %v1829_v36 = vsel %vm511_vm4, %v1497_v34, %v463_v35 }
 0x288   : > { %v1832_v37 = vsel %vm503_vm5, -3e+38, %v1773_v57 }
 0x289   : > { %v492_v40 = vpop.xlane.xlu2 %491  ;;  %v516_v41 = vsel %vm417_vm0, %v1832_v37, -inf }
 0x28a   : > { %vm1498_vm6 = vcmp.lt.s32.totalorder %v492_v40, 0  ;;  %v1499_v42 = vceil.f32 %v492_v40  ;;  %v1500_v43 = vfloor.f32 %v492_v40  ;;  %517 = vmax.xlane.f32.xlu2 %v516_v41 }
 0x28c   : > { %v1501_v44 = vsel %vm1498_vm6, %v1499_v42, %v1500_v43 }
 0x28d   : > { %v1502_v45 = vcvt.f32.s32 %v1501_v44 }
 0x28f   : > { %v495_v47 = vpop.xlane.xlu0 %494  ;;  %vm504_vm7 = vcmp.eq.s32.totalorder %v1753_v38, %v1502_v45  ;;  %v1843_v48 = vsel %vm511_vm4, %v1502_v45, %v464_v46 }
 0x290   : > { %vm1503_vm8 = vcmp.lt.s32.totalorder %v495_v47, 0  ;;  %v1504_v49 = vceil.f32 %v495_v47  ;;  %v1505_v50 = vfloor.f32 %v495_v47  ;;  %v1846_v51 = vsel %vm504_vm7, -3e+38, %v1783_v3 }
 0x291   : > { %v519_v52 = vsel %vm417_vm0, %v1846_v51, -inf }
 0x292   : > { %v1506_v53 = vsel %vm1503_vm8, %v1504_v49, %v1505_v50  ;;  %520 = vmax.xlane.f32.xlu0 %v519_v52 }
 0x293   : > { %v1507_v54 = vcvt.f32.s32 %v1506_v53 }
 0x295   : > { %vm505_vm9 = vcmp.eq.s32.totalorder %v1753_v38, %v1507_v54  ;;  %v1857_v56 = vsel %vm511_vm4, %v1507_v54, %v465_v55 }
 0x296   : > { %v1860_v57 = vsel %vm505_vm9, -3e+38, %v1793_v8 }
 0x297   : > { %v498_v58 = vpop.xlane.xlu1 %497  ;;  %v522_v59 = vsel %vm417_vm0, %v1860_v57, -inf }
 0x298   : > { %vm1508_vm10 = vcmp.lt.s32.totalorder %v498_v58, 0  ;;  %v1509_v60 = vceil.f32 %v498_v58  ;;  %v1510_v61 = vfloor.f32 %v498_v58  ;;  %523 = vmax.xlane.f32.xlu1 %v522_v59 }
 0x29a   : > { %v1511_v62 = vsel %vm1508_vm10, %v1509_v60, %v1510_v61 }
 0x29b   : > { %v1512_v63 = vcvt.f32.s32 %v1511_v62 }
 0x29d   : > { %vm506_vm11 = vcmp.eq.s32.totalorder %v1753_v38, %v1512_v63  ;;  %v1871_v1 = vsel %vm511_vm4, %v1512_v63, %v466_v0 }
 0x29e   : > { %v1874_v2 = vsel %vm506_vm11, -3e+38, %v1804_v16 }
 0x29f   : > { %v525_v3 = vsel %vm417_vm0, %v1874_v2, -inf }
 0x2a0   : > { %526 = vmax.xlane.f32.xlu2 %v525_v3 }
 0x2fd   : > { %v518_v4 = vpop.xlane.xlu2 %517 }
 0x2fe   : > { %vm528_vm12 = vcmp.eq.f32.partialorder %v1832_v37, %v518_v4 }
 0x2ff   : > { %v532_v5 = vsel %vm528_vm12, %v1756_v39, 32.0 }
 0x300   : > { %v536_v6 = vsel %vm417_vm0, %v532_v5, inf }
 0x301   : > { %537 = vmin.xlane.f32.xlu0 %v536_v6 }
 0x305   : > { %v521_v8 = vpop.xlane.xlu0 %520 }
 0x306   : > { %vm529_vm13 = vcmp.eq.f32.partialorder %v1846_v51, %v521_v8 }
 0x307   : > { %v533_v10 = vsel %vm529_vm13, %v1756_v39, 32.0 }
 0x308   : > { %v539_v11 = vsel %vm417_vm0, %v533_v10, inf }
 0x309   : > { %540 = vmin.xlane.f32.xlu1 %v539_v11 }
 0x30b   : > { %v524_v12 = vpop.xlane.xlu1 %523 }
 0x30c   : > { %vm530_vm14 = vcmp.eq.f32.partialorder %v1860_v57, %v524_v12 }
 0x30d   : > { %v534_v13 = vsel %vm530_vm14, %v1756_v39, 32.0 }
 0x30e   : > { %v542_v14 = vsel %vm417_vm0, %v534_v13, inf }
 0x30f   : > { %543 = vmin.xlane.f32.xlu2 %v542_v14 }
 0x313   : > { %v527_v15 = vpop.xlane.xlu2 %526 }
 0x314   : > { %vm531_vm15 = vcmp.eq.f32.partialorder %v1874_v2, %v527_v15 }
 0x315   : > { %v535_v16 = vsel %vm531_vm15, %v1756_v39, 32.0  ;;  %vm609_vm15 = vcmp.eq.s32.totalorder %v1753_v38, 3 }
 0x316   : > { %v545_v17 = vsel %vm417_vm0, %v535_v16, inf }
 0x317   : > { %546 = vmin.xlane.f32.xlu0 %v545_v17 }
 0x374   : > { %v538_v18 = vpop.xlane.xlu0 %537 }
 0x375   : > { %vm1513_vm1 = vcmp.lt.s32.totalorder %v538_v18, 0  ;;  %v1514_v19 = vceil.f32 %v538_v18  ;;  %v1515_v20 = vfloor.f32 %v538_v18 }
 0x377   : > { %v1516_v21 = vsel %vm1513_vm1, %v1514_v19, %v1515_v20 }
 0x378   : > { %v1517_v22 = vcvt.f32.s32 %v1516_v21 }
 0x37a   : > { %vm552_vm3 = vcmp.eq.s32.totalorder %v1753_v38, %v1517_v22  ;;  %v1895_v23 = vsel %vm560_vm2, %v1517_v22, %v1829_v36 }
 0x37b   : > { %v1898_v24 = vsel %vm552_vm3, -3e+38, %v1832_v37 }
 0x37c   : > { %v541_v25 = vpop.xlane.xlu1 %540  ;;  %v565_v26 = vsel %vm417_vm0, %v1898_v24, -inf }
 0x37d   : > { %vm1518_vm4 = vcmp.lt.s32.totalorder %v541_v25, 0  ;;  %v1519_v27 = vceil.f32 %v541_v25  ;;  %v1520_v28 = vfloor.f32 %v541_v25  ;;  %566 = vmax.xlane.f32.xlu1 %v565_v26 }
 0x37f   : > { %v1521_v29 = vsel %vm1518_vm4, %v1519_v27, %v1520_v28 }
 0x380   : > { %v1522_v30 = vcvt.f32.s32 %v1521_v29 }
 0x382   : > { %v544_v31 = vpop.xlane.xlu2 %543  ;;  %vm553_vm5 = vcmp.eq.s32.totalorder %v1753_v38, %v1522_v30  ;;  %v1906_v32 = vsel %vm560_vm2, %v1522_v30, %v1843_v48 }
 0x383   : > { %vm1523_vm6 = vcmp.lt.s32.totalorder %v544_v31, 0  ;;  %v1524_v33 = vceil.f32 %v544_v31  ;;  %v1525_v34 = vfloor.f32 %v544_v31  ;;  %v1909_v35 = vsel %vm553_vm5, -3e+38, %v1846_v51 }
 0x384   : > { %v568_v36 = vsel %vm417_vm0, %v1909_v35, -inf }
 0x385   : > { %v1526_v37 = vsel %vm1523_vm6, %v1524_v33, %v1525_v34  ;;  %569 = vmax.xlane.f32.xlu2 %v568_v36 }
 0x386   : > { %v1527_v40 = vcvt.f32.s32 %v1526_v37 }
 0x388   : > { %vm554_vm7 = vcmp.eq.s32.totalorder %v1753_v38, %v1527_v40  ;;  %v1917_v41 = vsel %vm560_vm2, %v1527_v40, %v1857_v56 }
 0x389   : > { %v1920_v42 = vsel %vm554_vm7, -3e+38, %v1860_v57 }
 0x38a   : > { %v547_v43 = vpop.xlane.xlu0 %546  ;;  %v571_v44 = vsel %vm417_vm0, %v1920_v42, -inf }
 0x38b   : > { %vm1528_vm8 = vcmp.lt.s32.totalorder %v547_v43, 0  ;;  %v1529_v45 = vceil.f32 %v547_v43  ;;  %v1530_v46 = vfloor.f32 %v547_v43  ;;  %572 = vmax.xlane.f32.xlu0 %v571_v44 }
 0x38d   : > { %v1531_v47 = vsel %vm1528_vm8, %v1529_v45, %v1530_v46 }
 0x38e   : > { %v1532_v48 = vcvt.f32.s32 %v1531_v47 }
 0x390   : > { %vm555_vm9 = vcmp.eq.s32.totalorder %v1753_v38, %v1532_v48  ;;  %v1928_v49 = vsel %vm560_vm2, %v1532_v48, %v1871_v1 }
 0x391   : > { %v1931_v50 = vsel %vm555_vm9, -3e+38, %v1874_v2 }
 0x392   : > { %v574_v51 = vsel %vm417_vm0, %v1931_v50, -inf }
 0x393   : > { %575 = vmax.xlane.f32.xlu1 %v574_v51 }
 0x3f0   : > { %v567_v52 = vpop.xlane.xlu1 %566 }
 0x3f1   : > { %vm577_vm10 = vcmp.eq.f32.partialorder %v1898_v24, %v567_v52 }
 0x3f2   : > { %v581_v53 = vsel %vm577_vm10, %v1756_v39, 32.0 }
 0x3f3   : > { %v585_v54 = vsel %vm417_vm0, %v581_v53, inf }
 0x3f4   : > { %586 = vmin.xlane.f32.xlu2 %v585_v54 }
 0x3f8   : > { %v570_v55 = vpop.xlane.xlu2 %569 }
 0x3f9   : > { %vm578_vm11 = vcmp.eq.f32.partialorder %v1909_v35, %v570_v55 }
 0x3fa   : > { %v582_v56 = vsel %vm578_vm11, %v1756_v39, 32.0 }
 0x3fb   : > { %v588_v57 = vsel %vm417_vm0, %v582_v56, inf }
 0x3fc   : > { %589 = vmin.xlane.f32.xlu0 %v588_v57 }
 0x3fe   : > { %v573_v58 = vpop.xlane.xlu0 %572 }
 0x3ff   : > { %vm579_vm12 = vcmp.eq.f32.partialorder %v1920_v42, %v573_v58 }
 0x400   : > { %v583_v59 = vsel %vm579_vm12, %v1756_v39, 32.0 }
 0x401   : > { %v591_v60 = vsel %vm417_vm0, %v583_v59, inf }
 0x402   : > { %592 = vmin.xlane.f32.xlu1 %v591_v60 }
 0x406   : > { %v576_v61 = vpop.xlane.xlu1 %575 }
 0x407   : > { %vm580_vm13 = vcmp.eq.f32.partialorder %v1931_v50, %v576_v61 }
 0x408   : > { %v584_v62 = vsel %vm580_vm13, %v1756_v39, 32.0  ;;  %vm658_vm13 = vcmp.eq.s32.totalorder %v1753_v38, 4 }
 0x409   : > { %v594_v63 = vsel %vm417_vm0, %v584_v62, inf }
 0x40a   : > { %595 = vmin.xlane.f32.xlu2 %v594_v63 }
 0x467   : > { %v587_v0 = vpop.xlane.xlu2 %586 }
 0x468   : > { %vm1533_vm14 = vcmp.lt.s32.totalorder %v587_v0, 0  ;;  %v1534_v1 = vceil.f32 %v587_v0  ;;  %v1535_v2 = vfloor.f32 %v587_v0 }
 0x46a   : > { %v1536_v3 = vsel %vm1533_vm14, %v1534_v1, %v1535_v2 }
 0x46b   : > { %v1537_v4 = vcvt.f32.s32 %v1536_v3 }
 0x46d   : > { %vm601_vm1 = vcmp.eq.s32.totalorder %v1753_v38, %v1537_v4  ;;  %v1952_v5 = vsel %vm609_vm15, %v1537_v4, %v1895_v23 }
 0x46e   : > { %v1955_v6 = vsel %vm601_vm1, -3e+38, %v1898_v24 }
 0x46f   : > { %v590_v8 = vpop.xlane.xlu0 %589  ;;  %v614_v10 = vsel %vm417_vm0, %v1955_v6, -inf }
 0x470   : > { %vm1538_vm2 = vcmp.lt.s32.totalorder %v590_v8, 0  ;;  %v1539_v11 = vceil.f32 %v590_v8  ;;  %v1540_v12 = vfloor.f32 %v590_v8  ;;  %615 = vmax.xlane.f32.xlu0 %v614_v10 }
 0x472   : > { %v1541_v13 = vsel %vm1538_vm2, %v1539_v11, %v1540_v12 }
 0x473   : > { %v1542_v14 = vcvt.f32.s32 %v1541_v13 }
 0x475   : > { %v593_v15 = vpop.xlane.xlu1 %592  ;;  %vm602_vm3 = vcmp.eq.s32.totalorder %v1753_v38, %v1542_v14  ;;  %v1963_v16 = vsel %vm609_vm15, %v1542_v14, %v1906_v32 }
 0x476   : > { %vm1543_vm4 = vcmp.lt.s32.totalorder %v593_v15, 0  ;;  %v1544_v17 = vceil.f32 %v593_v15  ;;  %v1545_v18 = vfloor.f32 %v593_v15  ;;  %v1966_v19 = vsel %vm602_vm3, -3e+38, %v1909_v35 }
 0x477   : > { %v617_v20 = vsel %vm417_vm0, %v1966_v19, -inf }
 0x478   : > { %v1546_v21 = vsel %vm1543_vm4, %v1544_v17, %v1545_v18  ;;  %618 = vmax.xlane.f32.xlu1 %v617_v20 }
 0x479   : > { %v1547_v22 = vcvt.f32.s32 %v1546_v21 }
 0x47b   : > { %vm603_vm5 = vcmp.eq.s32.totalorder %v1753_v38, %v1547_v22  ;;  %v1974_v23 = vsel %vm609_vm15, %v1547_v22, %v1917_v41 }
 0x47c   : > { %v1977_v24 = vsel %vm603_vm5, -3e+38, %v1920_v42 }
 0x47d   : > { %v596_v25 = vpop.xlane.xlu2 %595  ;;  %v620_v26 = vsel %vm417_vm0, %v1977_v24, -inf }
 0x47e   : > { %vm1548_vm6 = vcmp.lt.s32.totalorder %v596_v25, 0  ;;  %v1549_v27 = vceil.f32 %v596_v25  ;;  %v1550_v28 = vfloor.f32 %v596_v25  ;;  %621 = vmax.xlane.f32.xlu2 %v620_v26 }
 0x480   : > { %v1551_v29 = vsel %vm1548_vm6, %v1549_v27, %v1550_v28 }
 0x481   : > { %v1552_v30 = vcvt.f32.s32 %v1551_v29 }
 0x483   : > { %vm604_vm7 = vcmp.eq.s32.totalorder %v1753_v38, %v1552_v30  ;;  %v1985_v31 = vsel %vm609_vm15, %v1552_v30, %v1928_v49 }
 0x484   : > { %v1988_v32 = vsel %vm604_vm7, -3e+38, %v1931_v50 }
 0x485   : > { %v623_v33 = vsel %vm417_vm0, %v1988_v32, -inf }
 0x486   : > { %624 = vmax.xlane.f32.xlu0 %v623_v33 }
 0x4e3   : > { %v616_v34 = vpop.xlane.xlu0 %615 }
 0x4e4   : > { %vm626_vm8 = vcmp.eq.f32.partialorder %v1955_v6, %v616_v34 }
 0x4e5   : > { %v630_v35 = vsel %vm626_vm8, %v1756_v39, 32.0 }
 0x4e6   : > { %v634_v36 = vsel %vm417_vm0, %v630_v35, inf }
 0x4e7   : > { %635 = vmin.xlane.f32.xlu1 %v634_v36 }
 0x4eb   : > { %v619_v37 = vpop.xlane.xlu1 %618 }
 0x4ec   : > { %vm627_vm9 = vcmp.eq.f32.partialorder %v1966_v19, %v619_v37 }
 0x4ed   : > { %v631_v40 = vsel %vm627_vm9, %v1756_v39, 32.0 }
 0x4ee   : > { %v637_v41 = vsel %vm417_vm0, %v631_v40, inf }
 0x4ef   : > { %638 = vmin.xlane.f32.xlu2 %v637_v41 }
 0x4f1   : > { %v622_v42 = vpop.xlane.xlu2 %621 }
 0x4f2   : > { %vm628_vm10 = vcmp.eq.f32.partialorder %v1977_v24, %v622_v42 }
 0x4f3   : > { %v632_v43 = vsel %vm628_vm10, %v1756_v39, 32.0 }
 0x4f4   : > { %v640_v44 = vsel %vm417_vm0, %v632_v43, inf }
 0x4f5   : > { %641 = vmin.xlane.f32.xlu0 %v640_v44 }
 0x4f9   : > { %v625_v45 = vpop.xlane.xlu0 %624 }
 0x4fa   : > { %vm629_vm11 = vcmp.eq.f32.partialorder %v1988_v32, %v625_v45 }
 0x4fb   : > { %v633_v46 = vsel %vm629_vm11, %v1756_v39, 32.0  ;;  %vm707_vm11 = vcmp.eq.s32.totalorder %v1753_v38, 5 }
 0x4fc   : > { %v643_v47 = vsel %vm417_vm0, %v633_v46, inf }
 0x4fd   : > { %644 = vmin.xlane.f32.xlu1 %v643_v47 }
 0x55a   : > { %v636_v48 = vpop.xlane.xlu1 %635 }
 0x55b   : > { %vm1553_vm12 = vcmp.lt.s32.totalorder %v636_v48, 0  ;;  %v1554_v49 = vceil.f32 %v636_v48  ;;  %v1555_v50 = vfloor.f32 %v636_v48 }
 0x55d   : > { %v1556_v51 = vsel %vm1553_vm12, %v1554_v49, %v1555_v50 }
 0x55e   : > { %v1557_v52 = vcvt.f32.s32 %v1556_v51 }
 0x560   : > { %vm650_vm14 = vcmp.eq.s32.totalorder %v1753_v38, %v1557_v52  ;;  %v2009_v53 = vsel %vm658_vm13, %v1557_v52, %v1952_v5 }
 0x561   : > { %v2012_v54 = vsel %vm650_vm14, -3e+38, %v1955_v6 }
 0x562   : > { %v639_v55 = vpop.xlane.xlu2 %638  ;;  %v663_v56 = vsel %vm417_vm0, %v2012_v54, -inf }
 0x563   : > { %vm1558_vm15 = vcmp.lt.s32.totalorder %v639_v55, 0  ;;  %v1559_v57 = vceil.f32 %v639_v55  ;;  %v1560_v58 = vfloor.f32 %v639_v55  ;;  %664 = vmax.xlane.f32.xlu2 %v663_v56 }
 0x565   : > { %v1561_v59 = vsel %vm1558_vm15, %v1559_v57, %v1560_v58 }
 0x566   : > { %v1562_v60 = vcvt.f32.s32 %v1561_v59 }
 0x568   : > { %v642_v61 = vpop.xlane.xlu0 %641  ;;  %vm651_vm1 = vcmp.eq.s32.totalorder %v1753_v38, %v1562_v60  ;;  %v2020_v62 = vsel %vm658_vm13, %v1562_v60, %v1963_v16 }
 0x569   : > { %vm1563_vm2 = vcmp.lt.s32.totalorder %v642_v61, 0  ;;  %v1564_v63 = vceil.f32 %v642_v61  ;;  %v1565_v0 = vfloor.f32 %v642_v61  ;;  %v2023_v1 = vsel %vm651_vm1, -3e+38, %v1966_v19 }
 0x56a   : > { %v666_v2 = vsel %vm417_vm0, %v2023_v1, -inf }
 0x56b   : > { %v1566_v3 = vsel %vm1563_vm2, %v1564_v63, %v1565_v0  ;;  %667 = vmax.xlane.f32.xlu0 %v666_v2 }
 0x56c   : > { %v1567_v4 = vcvt.f32.s32 %v1566_v3 }
 0x56e   : > { %vm652_vm3 = vcmp.eq.s32.totalorder %v1753_v38, %v1567_v4  ;;  %v2031_v5 = vsel %vm658_vm13, %v1567_v4, %v1974_v23 }
 0x56f   : > { %v2034_v6 = vsel %vm652_vm3, -3e+38, %v1977_v24 }
 0x570   : > { %v645_v8 = vpop.xlane.xlu1 %644  ;;  %v669_v10 = vsel %vm417_vm0, %v2034_v6, -inf }
 0x571   : > { %vm1568_vm4 = vcmp.lt.s32.totalorder %v645_v8, 0  ;;  %v1569_v11 = vceil.f32 %v645_v8  ;;  %v1570_v12 = vfloor.f32 %v645_v8  ;;  %670 = vmax.xlane.f32.xlu1 %v669_v10 }
 0x573   : > { %v1571_v13 = vsel %vm1568_vm4, %v1569_v11, %v1570_v12 }
 0x574   : > { %v1572_v14 = vcvt.f32.s32 %v1571_v13 }
 0x576   : > { %vm653_vm5 = vcmp.eq.s32.totalorder %v1753_v38, %v1572_v14  ;;  %v2042_v15 = vsel %vm658_vm13, %v1572_v14, %v1985_v31  ;;  %v1365_v14 = vld [vmem:[%s2425_s1 + $0x70] sm:$0xf] }
 0x577   : > { %v2045_v16 = vsel %vm653_vm5, -3e+38, %v1988_v32 }
 0x578   : > { %v672_v17 = vsel %vm417_vm0, %v2045_v16, -inf }
 0x579   : > { %673 = vmax.xlane.f32.xlu2 %v672_v17 }
 0x5d6   : > { %v665_v18 = vpop.xlane.xlu2 %664 }
 0x5d7   : > { %vm675_vm6 = vcmp.eq.f32.partialorder %v2012_v54, %v665_v18 }
 0x5d8   : > { %v679_v19 = vsel %vm675_vm6, %v1756_v39, 32.0 }
 0x5d9   : > { %v683_v20 = vsel %vm417_vm0, %v679_v19, inf  ;;  %v1367_v19 = vld [vmem:[%s2425_s1 + $0x78] sm:$0xf0] }
 0x5da   : > { %684 = vmin.xlane.f32.xlu0 %v683_v20  ;;  %v1357_v20 = vld [vmem:[%s2425_s1 + $0x60] sm:$0xf] }
 0x5de   : > { %v668_v21 = vpop.xlane.xlu0 %667 }
 0x5df   : > { %vm676_vm7 = vcmp.eq.f32.partialorder %v2023_v1, %v668_v21  ;;  %v1454_v21 = vld [vmem:[%s2425_s1 + $0x64] sm:$0xf0] }
 0x5e0   : > { %v680_v22 = vsel %vm676_vm7, %v1756_v39, 32.0 }
 0x5e1   : > { %v686_v23 = vsel %vm417_vm0, %v680_v22, inf }
 0x5e2   : > { %687 = vmin.xlane.f32.xlu1 %v686_v23 }
 0x5e4   : > { %v671_v24 = vpop.xlane.xlu1 %670 }
 0x5e5   : > { %vm677_vm8 = vcmp.eq.f32.partialorder %v2034_v6, %v671_v24 }
 0x5e6   : > { %v681_v25 = vsel %vm677_vm8, %v1756_v39, 32.0  ;;  %vm756_vm8 = vcmp.eq.s32.totalorder %v1753_v38, 6 }
 0x5e7   : > { %v689_v26 = vsel %vm417_vm0, %v681_v25, inf  ;;  %v1453_v25 = vld [vmem:[%s2425_s1 + $0x64] sm:$0xf] }
 0x5e8   : > { %690 = vmin.xlane.f32.xlu2 %v689_v26  ;;  %v1359_v26 = vld [vmem:[%s2425_s1 + $0x68] sm:$0xf0] }
 0x5ec   : > { %v674_v27 = vpop.xlane.xlu2 %673 }
 0x5ed   : > { %vm678_vm9 = vcmp.eq.f32.partialorder %v2045_v16, %v674_v27  ;;  %v1358_v27 = vor.u32 %v1454_v21, %v1357_v20  ;;  %v1465_v20 = vld [vmem:[%s2426_s2 + $0x44] sm:$0xf] }
 0x5ee   : > { %v682_v28 = vsel %vm678_vm9, %v1756_v39, 32.0 }
 0x5ef   : > { %v692_v29 = vsel %vm417_vm0, %v682_v28, inf  ;;  %v1429_v28 = vld [vmem:[%s2426_s2 + $0x70] sm:$0xf] }
 0x5f0   : > { %693 = vmin.xlane.f32.xlu0 %v692_v29  ;;  %v1472_v29 = vld [vmem:[%s2426_s2 + $0x74] sm:$0xf0] }
 0x64d   : > { %v685_v30 = vpop.xlane.xlu0 %684 }
 0x64e   : > { %vm1573_vm10 = vcmp.lt.s32.totalorder %v685_v30, 0  ;;  %v1574_v31 = vceil.f32 %v685_v30  ;;  %v1575_v32 = vfloor.f32 %v685_v30  ;;  %v1471_v30 = vld [vmem:[%s2426_s2 + $0x74] sm:$0xf] }
 0x650   : > { %v1576_v33 = vsel %vm1573_vm10, %v1574_v31, %v1575_v32  ;;  %v1362_v32 = vor.u32 %v1453_v25, %v1359_v26  ;;  %v1325_v26 = vld [vmem:[%s2425_s1 + $0x20] sm:$0xf] }
 0x651   : > { %v1577_v34 = vcvt.f32.s32 %v1576_v33  ;;  %v1430_v33 = vor.u32 %v1472_v29, %v1429_v28 }
 0x653   : > { %vm699_vm12 = vcmp.eq.s32.totalorder %v1753_v38, %v1577_v34  ;;  %v2066_v35 = vsel %vm707_vm11, %v1577_v34, %v2009_v53  ;;  %v1431_v34 = vld [vmem:[%s2426_s2 + $0x78] sm:$0xf0]  ;;  %1045 = vmatpush.bf16.msrb.mxu0 %v1430_v33  ;;  %v1463_v33 = vld [vmem:[%s2426_s2 + $0x34] sm:$0xf] }
 0x654   : > { %v2069_v36 = vsel %vm699_vm12, -3e+38, %v2012_v54 }
 0x655   : > { %v688_v37 = vpop.xlane.xlu1 %687  ;;  %v712_v40 = vsel %vm417_vm0, %v2069_v36, -inf }
 0x656   : > { %vm1578_vm13 = vcmp.lt.s32.totalorder %v688_v37, 0  ;;  %v1579_v41 = vceil.f32 %v688_v37  ;;  %v1580_v42 = vfloor.f32 %v688_v37  ;;  %713 = vmax.xlane.f32.xlu1 %v712_v40  ;;  %v1349_v37 = vld [vmem:[%s2425_s1 + $0x50] sm:$0xf]  ;;  %v1452_v40 = vld [vmem:[%s2425_s1 + $0x54] sm:$0xf0] }
 0x658   : > { %v1581_v43 = vsel %vm1578_vm13, %v1579_v41, %v1580_v42  ;;  %v1434_v42 = vor.u32 %v1471_v30, %v1431_v34 }
 0x659   : > { %v1582_v44 = vcvt.f32.s32 %v1581_v43  ;;  %v1451_v43 = vld [vmem:[%s2425_s1 + $0x54] sm:$0xf] }
 0x65a   : > { %1064 = vmatpush.bf16.msrb.mxu1 %v1434_v42  ;;  %v1445_v42 = vld [vmem:[%s2425_s1 + $0x24] sm:$0xf] }
 0x65b   : > { %v691_v45 = vpop.xlane.xlu2 %690  ;;  %vm700_vm14 = vcmp.eq.s32.totalorder %v1753_v38, %v1582_v44  ;;  %v2077_v46 = vsel %vm707_vm11, %v1582_v44, %v2020_v62  ;;  %v1351_v44 = vld [vmem:[%s2425_s1 + $0x58] sm:$0xf0] }
 0x65c   : > { %vm1583_vm15 = vcmp.lt.s32.totalorder %v691_v45, 0  ;;  %v1584_v47 = vceil.f32 %v691_v45  ;;  %v1585_v48 = vfloor.f32 %v691_v45  ;;  %v2080_v49 = vsel %vm700_vm14, -3e+38, %v2023_v1  ;;  %v1421_v45 = vld [vmem:[%s2426_s2 + $0x60] sm:$0xf] }
 0x65d   : > { %v715_v50 = vsel %vm417_vm0, %v2080_v49, -inf }
 0x65e   : > { %v1586_v51 = vsel %vm1583_vm15, %v1584_v47, %v1585_v48  ;;  %716 = vmax.xlane.f32.xlu2 %v715_v50  ;;  %v1350_v47 = vor.u32 %v1452_v40, %v1349_v37  ;;  %v1470_v48 = vld [vmem:[%s2426_s2 + $0x64] sm:$0xf0]  ;;  %v1469_v50 = vld [vmem:[%s2426_s2 + $0x64] sm:$0xf]  ;;  %v1399_v40 = vld [vmem:[%s2426_s2 + $0x38] sm:$0xf0] }
 0x65f   : > { %v1587_v52 = vcvt.f32.s32 %v1586_v51  ;;  %v1423_v51 = vld [vmem:[%s2426_s2 + $0x68] sm:$0xf0] }
 0x661   : > { %vm701_vm1 = vcmp.eq.s32.totalorder %v1753_v38, %v1587_v52  ;;  %v2088_v53 = vsel %vm707_vm11, %v1587_v52, %v2031_v5 }
 0x662   : > { %v2091_v54 = vsel %vm701_vm1, -3e+38, %v2034_v6 }
 0x663   : > { %v694_v55 = vpop.xlane.xlu0 %693  ;;  %v718_v56 = vsel %vm417_vm0, %v2091_v54, -inf }
 0x664   : > { %vm1588_vm2 = vcmp.lt.s32.totalorder %v694_v55, 0  ;;  %v1589_v57 = vceil.f32 %v694_v55  ;;  %v1590_v58 = vfloor.f32 %v694_v55  ;;  %719 = vmax.xlane.f32.xlu0 %v718_v56  ;;  %v1422_v55 = vor.u32 %v1470_v48, %v1421_v45  ;;  %v1341_v56 = vld [vmem:[%s2425_s1 + $0x40] sm:$0xf] }
 0x665   : > { %v1402_v48 = vor.u32 %v1463_v33, %v1399_v40 }
 0x666   : > { %v1591_v59 = vsel %vm1588_vm2, %v1589_v57, %v1590_v58  ;;  %v1450_v57 = vld [vmem:[%s2425_s1 + $0x44] sm:$0xf0]  ;;  %v1449_v58 = vld [vmem:[%s2425_s1 + $0x44] sm:$0xf]  ;;  %1046 = vmatpush.bf16.msrb.mxu0 %v1422_v55 }
 0x667   : > { %v1592_v60 = vcvt.f32.s32 %v1591_v59  ;;  %v1462_v55 = vld [vmem:[%s2426_s2 + $0x24] sm:$0xf0] }
 0x669   : > { %vm702_vm3 = vcmp.eq.s32.totalorder %v1753_v38, %v1592_v60  ;;  %v2099_v61 = vsel %vm707_vm11, %v1592_v60, %v2042_v15  ;;  %v1456_v15 = vld [vmem:[%s2425_s1 + $0x74] sm:$0xf0]  ;;  %v1426_v60 = vor.u32 %v1469_v50, %v1423_v51  ;;  %v1317_v50 = vld [vmem:[%s2425_s1 + $0x10] sm:$0xf]  ;;  %v1389_v51 = vld [vmem:[%s2426_s2 + $0x20] sm:$0xf] }
 0x66a   : > { %v2102_v62 = vsel %vm702_vm3, -3e+38, %v2045_v16  ;;  %v1455_v16 = vld [vmem:[%s2425_s1 + $0x74] sm:$0xf]  ;;  %v1366_v18 = vor.u32 %v1456_v15, %v1365_v14  ;;  %v1335_v15 = vld [vmem:[%s2425_s1 + $0x38] sm:$0xf0] }
 0x66b   : > { %v721_v63 = vsel %vm417_vm0, %v2102_v62, -inf  ;;  %v1370_v24 = vor.u32 %v1455_v16, %v1367_v19  ;;  %1065 = vmatpush.bf16.msrb.mxu1 %v1426_v60  ;;  %v1447_v14 = vld [vmem:[%s2425_s1 + $0x34] sm:$0xf]  ;;  %v1466_v19 = vld [vmem:[%s2426_s2 + $0x44] sm:$0xf0] }
 0x66c   : > { %722 = vmax.xlane.f32.xlu1 %v721_v63  ;;  %905 = vmatpush.bf16.msra.mxu2 %v1366_v18  ;;  %v1343_v63 = vld [vmem:[%s2425_s1 + $0x48] sm:$0xf0]  ;;  %v1405_v18 = vld [vmem:[%s2426_s2 + $0x40] sm:$0xf] }
 0x66d   : > { %924 = vmatpush.bf16.msra.mxu3 %v1370_v24  ;;  %v1338_v24 = vor.u32 %v1447_v14, %v1335_v15  ;;  %v1406_v25 = vor.u32 %v1466_v19, %v1405_v18  ;;  %v1383_v14 = vld [vmem:[%s2426_s2 + $0x18] sm:$0xf0]  ;;  %v1441_v15 = vld [vmem:[%s2425_s1 + $0x4] sm:$0xf] }
 0x670   : > { %906 = vmatpush.bf16.msra.mxu2 %v1358_v27  ;;  %v1446_v27 = vld [vmem:[%s2425_s1 + $0x24] sm:$0xf0] }
 0x671   : > { %925 = vmatpush.bf16.msra.mxu3 %v1362_v32  ;;  %v1464_v32 = vld [vmem:[%s2426_s2 + $0x34] sm:$0xf0] }
 0x674   : > { %907 = vmatpush.bf16.msra.mxu2 %v1350_v47  ;;  %v1326_v47 = vor.u32 %v1446_v27, %v1325_v26  ;;  %v1375_v26 = vld [vmem:[%s2426_s2 + $0x8] sm:$0xf0] }
 0x6c9   : > { %v714_v0 = vpop.xlane.xlu1 %713 }
 0x6ca   : > { %vm724_vm4 = vcmp.eq.f32.partialorder %v2069_v36, %v714_v0  ;;  %v1413_v0 = vld [vmem:[%s2426_s2 + $0x50] sm:$0xf] }
 0x6cb   : > { %v728_v1 = vsel %vm724_vm4, %v1756_v39, 32.0 }
 0x6cc   : > { %v732_v2 = vsel %vm417_vm0, %v728_v1, inf }
 0x6cd   : > { %733 = vmin.xlane.f32.xlu2 %v732_v2 }
 0x6d1   : > { %v717_v3 = vpop.xlane.xlu2 %716 }
 0x6d2   : > { %vm725_vm5 = vcmp.eq.f32.partialorder %v2080_v49, %v717_v3  ;;  %v1467_v3 = vld [vmem:[%s2426_s2 + $0x54] sm:$0xf] }
 0x6d3   : > { %v729_v4 = vsel %vm725_vm5, %v1756_v39, 32.0 }
 0x6d4   : > { %v735_v5 = vsel %vm417_vm0, %v729_v4, inf }
 0x6d5   : > { %736 = vmin.xlane.f32.xlu0 %v735_v5 }
 0x6d7   : > { %v720_v6 = vpop.xlane.xlu0 %719 }
 0x6d8   : > { %vm726_vm6 = vcmp.eq.f32.partialorder %v2091_v54, %v720_v6 }
 0x6d9   : > { %v730_v8 = vsel %vm726_vm6, %v1756_v39, 32.0  ;;  %vm797_vm6 = vcmp.eq.s32.totalorder %v1753_v38, 7 }
 0x6da   : > { %v738_v10 = vsel %vm417_vm0, %v730_v8, inf  ;;  %v1415_v8 = vld [vmem:[%s2426_s2 + $0x58] sm:$0xf0] }
 0x6db   : > { %739 = vmin.xlane.f32.xlu1 %v738_v10  ;;  %v1333_v10 = vld [vmem:[%s2425_s1 + $0x30] sm:$0xf] }
 0x6df   : > { %v723_v11 = vpop.xlane.xlu1 %722 }
 0x6e0   : > { %vm727_vm7 = vcmp.eq.f32.partialorder %v2102_v62, %v723_v11  ;;  %v1342_v11 = vor.u32 %v1450_v57, %v1341_v56  ;;  %v1444_v57 = vld [vmem:[%s2425_s1 + $0x14] sm:$0xf0] }
 0x6e1   : > { %v731_v12 = vsel %vm727_vm7, %v1756_v39, 32.0  ;;  %vm802_vm7 = vcmask 64512  }
 0x6e2   : > { %v741_v13 = vsel %vm417_vm0, %v731_v12, inf  ;;  %v1418_v12 = vor.u32 %v1467_v3, %v1415_v8  ;;  %908 = vmatpush.bf16.msra.mxu2 %v1342_v11  ;;  %v1460_v8 = vld [vmem:[%s2426_s2 + $0x14] sm:$0xf0] }
 0x6e3   : > { %742 = vmin.xlane.f32.xlu2 %v741_v13  ;;  %v1448_v13 = vld [vmem:[%s2425_s1 + $0x34] sm:$0xf0] }
 0x6e4   : > { %1066 = vmatpush.bf16.msrb.mxu1 %v1418_v12 }
 0x740   : > { %v734_v17 = vpop.xlane.xlu2 %733 }
 0x741   : > { %vm1593_vm9 = vcmp.lt.s32.totalorder %v734_v17, 0  ;;  %v1594_v22 = vceil.f32 %v734_v17  ;;  %v1595_v23 = vfloor.f32 %v734_v17  ;;  %v1346_v17 = vor.u32 %v1449_v58, %v1343_v63  ;;  %v1461_v58 = vld [vmem:[%s2426_s2 + $0x24] sm:$0xf]  ;;  %v1443_v63 = vld [vmem:[%s2425_s1 + $0x14] sm:$0xf] }
 0x743   : > { %v1596_v31 = vsel %vm1593_vm9, %v1594_v22, %v1595_v23  ;;  %v1407_v22 = vld [vmem:[%s2426_s2 + $0x48] sm:$0xf0]  ;;  %v1334_v23 = vor.u32 %v1448_v13, %v1333_v10  ;;  %v1459_v13 = vld [vmem:[%s2426_s2 + $0x14] sm:$0xf] }
 0x744   : > { %v1597_v41 = vcvt.f32.s32 %v1596_v31  ;;  %v1410_v30 = vor.u32 %v1465_v20, %v1407_v22  ;;  %v1397_v31 = vld [vmem:[%s2426_s2 + $0x30] sm:$0xf]  ;;  %v1373_v22 = vld [vmem:[%s2426_s2] sm:$0xf] }
 0x745   : > { %909 = vmatpush.bf16.msra.mxu2 %v1334_v23  ;;  %v1458_v23 = vld [vmem:[%s2426_s2 + $0x4] sm:$0xf0] }
 0x746   : > { %vm748_vm10 = vcmp.eq.s32.totalorder %v1753_v38, %v1597_v41  ;;  %v2183_v52 = vsel %vm756_vm8, %v1597_v41, %v2066_v35  ;;  %v1354_v35 = vor.u32 %v1451_v43, %v1351_v44  ;;  %v1327_v43 = vld [vmem:[%s2425_s1 + $0x28] sm:$0xf0]  ;;  %1067 = vmatpush.bf16.msrb.mxu1 %v1410_v30  ;;  %v1374_v30 = vor.u32 %v1458_v23, %v1373_v22 }
 0x747   : > { %v2195_v59 = vsel %vm748_vm10, -3e+38, %v2069_v36  ;;  %v1468_v36 = vld [vmem:[%s2426_s2 + $0x54] sm:$0xf0]  ;;  %v1330_v56 = vor.u32 %v1445_v42, %v1327_v43  ;;  %v959_v43 = vld [vmem:[%s2427_s3] sm:$0x3] }
 0x748   : > { %v737_v1 = vpop.xlane.xlu0 %736  ;;  %v761_v2 = vsel %vm417_vm0, %v2195_v59, -inf  ;;  %v1414_v6 = vor.u32 %v1468_v36, %v1413_v0  ;;  %926 = vmatpush.bf16.msra.mxu3 %v1354_v35  ;;  %v1391_v35 = vld [vmem:[%s2426_s2 + $0x28] sm:$0xf0]  ;;  %v1319_v0 = vld [vmem:[%s2425_s1 + $0x18] sm:$0xf0] }
 0x749   : > { %vm1598_vm11 = vcmp.lt.s32.totalorder %v737_v1, 0  ;;  %v1599_v4 = vceil.f32 %v737_v1  ;;  %v1600_v5 = vfloor.f32 %v737_v1  ;;  %762 = vmax.xlane.f32.xlu0 %v761_v2  ;;  %v1390_v2 = vor.u32 %v1462_v55, %v1389_v51  ;;  %v1309_v36 = vld [vmem:[%s2425_s1] sm:$0xf]  ;;  %910 = vmatpush.bf16.msra.mxu2 %v1326_v47 }
 0x74a   : > { %1047 = vmatpush.bf16.msrb.mxu0 %v1414_v6  ;;  %1068 = vmatpush.bf16.msrb.mxu1 %v1402_v48  ;;  %v1394_v6 = vor.u32 %v1461_v58, %v1391_v35  ;;  %v1322_v12 = vor.u32 %v1443_v63, %v1319_v0 }
 0x74b   : > { %v1601_v16 = vsel %vm1598_vm11, %v1599_v4, %v1600_v5  ;;  %v1318_v5 = vor.u32 %v1444_v57, %v1317_v50 }
 0x74c   : > { %v1602_v21 = vcvt.f32.s32 %v1601_v16  ;;  %927 = vmatpush.bf16.msra.mxu3 %v1346_v17  ;;  %v1311_v16 = vld [vmem:[%s2425_s1 + $0x8] sm:$0xf0] }
 0x74d   : > { %911 = vmatpush.bf16.msra.mxu2 %v1318_v5 }
 0x74e   : > { %v740_v28 = vpop.xlane.xlu1 %739  ;;  %vm749_vm12 = vcmp.eq.s32.totalorder %v1753_v38, %v1602_v21  ;;  %v2248_v29 = vsel %vm756_vm8, %v1602_v21, %v2077_v46  ;;  %1048 = vmatpush.bf16.msrb.mxu0 %v1406_v25  ;;  %1069 = vmatpush.bf16.msrb.mxu1 %v1394_v6  ;;  %v1386_v21 = vor.u32 %v1459_v13, %v1383_v14  ;;  %v1457_v25 = vld [vmem:[%s2426_s2 + $0x4] sm:$0xf] }
 0x74f   : > { %vm1603_vm13 = vcmp.lt.s32.totalorder %v740_v28, 0  ;;  %v1604_v34 = vceil.f32 %v740_v28  ;;  %v1605_v37 = vfloor.f32 %v740_v28  ;;  %v2260_v46 = vsel %vm749_vm12, -3e+38, %v2080_v49 }
 0x750   : > { %v764_v41 = vsel %vm417_vm0, %v2260_v46, -inf  ;;  %v1398_v49 = vor.u32 %v1464_v32, %v1397_v31  ;;  %928 = vmatpush.bf16.msra.mxu3 %v1338_v24  ;;  %v1314_v24 = vor.u32 %v1441_v15, %v1311_v16  ;;  %v1378_v32 = vor.u32 %v1457_v25, %v1375_v26 }
 0x751   : > { %765 = vmax.xlane.f32.xlu1 %v764_v41  ;;  %v1606_v44 = vsel %vm1603_vm13, %v1604_v34, %v1605_v37 }
 0x752   : > { %v1607_v45 = vcvt.f32.s32 %v1606_v44  ;;  %1049 = vmatpush.bf16.msrb.mxu0 %v1398_v49  ;;  %1070 = vmatpush.bf16.msrb.mxu1 %v1386_v21  ;;  %v961_v44 = vperm.slane %v959_v43, 0  ;;  %v962_v49 = vperm.slane %v959_v43, 1 }
 0x754   : > { %vm750_vm14 = vcmp.eq.s32.totalorder %v1753_v38, %v1607_v45  ;;  %v2295_v60 = vsel %vm756_vm8, %v1607_v45, %v2088_v53  ;;  %v1442_v53 = vld [vmem:[%s2425_s1 + $0x4] sm:$0xf0]  ;;  %929 = vmatpush.bf16.msra.mxu3 %v1330_v56 }
 0x755   : > { %v2304_v1 = vsel %vm750_vm14, -3e+38, %v2091_v54  ;;  %v1381_v54 = vld [vmem:[%s2426_s2 + $0x10] sm:$0xf]  ;;  %v1310_v20 = vor.u32 %v1442_v53, %v1309_v36 }
 0x756   : > { %v743_v3 = vpop.xlane.xlu2 %742  ;;  %v767_v4 = vsel %vm417_vm0, %v2304_v1, -inf  ;;  %1050 = vmatpush.bf16.msrb.mxu0 %v1390_v2  ;;  %v1382_v18 = vor.u32 %v1460_v8, %v1381_v54  ;;  %1071 = vmatpush.bf16.msrb.mxu1 %v1378_v32 }
 0x757   : > { %vm1608_vm15 = vcmp.lt.s32.totalorder %v743_v3, 0  ;;  %v1609_v10 = vceil.f32 %v743_v3  ;;  %v1610_v11 = vfloor.f32 %v743_v3  ;;  %768 = vmax.xlane.f32.xlu2 %v767_v4  ;;  %912 = vmatpush.bf16.msra.mxu2 %v1310_v20 }
 0x758   : > { %930 = vmatpush.bf16.msra.mxu3 %v1322_v12 }
 0x759   : > { %v1611_v17 = vsel %vm1608_vm15, %v1609_v10, %v1610_v11  ;;  %1072 = vmatmul.bf16.vlgmr.msrb.gmra.mxu1 %v1742_v7 }
 0x75a   : > { %v1612_v19 = vcvt.f32.s32 %v1611_v17  ;;  %1051 = vmatpush.bf16.msrb.mxu0 %v1382_v18  ;;  %913 = vmatmul.bf16.vlgmr.msra.gmra.mxu2 %v1742_v7 }
 0x75c   : > { %vm751_vm1 = vcmp.eq.s32.totalorder %v1753_v38, %v1612_v19  ;;  %v2348_v27 = vsel %vm756_vm8, %v1612_v19, %v2099_v61  ;;  %931 = vmatpush.bf16.msra.mxu3 %v1314_v24 }
 0x75d   : > { %v755_v28 = vsel %vm751_vm1, -3e+38, %v2102_v62 }
 0x75e   : > { %v770_v31 = vsel %vm417_vm0, %v755_v28, -inf  ;;  %1052 = vmatpush.bf16.msrb.mxu0 %v1374_v30 }
 0x75f   : > { %771 = vmax.xlane.f32.xlu0 %v770_v31  ;;  %932 = vmatmul.bf16.vlgmr.msra.gmra.mxu3 %v1742_v7 }
 0x761   : > { %1053 = vmatmul.bf16.vlgmr.msrb.gmra.mxu0 %v1742_v7 }
 0x769   : > { %1077 = vmatmul.bf16.gmra.mxu1 %v1744_v9 }
 0x76a   : > { %918 = vmatmul.bf16.gmra.mxu2 %v1744_v9 }
 0x76f   : > { %937 = vmatmul.bf16.gmra.mxu3 %v1744_v9 }
 0x771   : > { %1058 = vmatmul.bf16.gmra.mxu0 %v1744_v9 }
 0x7bc   : > { %v763_v61 = vpop.xlane.xlu0 %762 }
 0x7bd   : > { %vm773_vm2 = vcmp.eq.f32.partialorder %v2195_v59, %v763_v61 }
 0x7be   : > { %v777_v62 = vsel %vm773_vm2, %v1756_v39, 32.0 }
 0x7bf   : > { %v781_v33 = vsel %vm417_vm0, %v777_v62, inf }
 0x7c0   : > { %782 = vmin.xlane.f32.xlu1 %v781_v33 }
 0x7c4   : > { %v766_v34 = vpop.xlane.xlu1 %765 }
 0x7c5   : > { %vm774_vm3 = vcmp.eq.f32.partialorder %v2260_v46, %v766_v34 }
 0x7c6   : > { %v778_v7 = vsel %vm774_vm3, %v1756_v39, 32.0 }
 0x7c7   : > { %v784_v37 = vsel %vm417_vm0, %v778_v7, inf }
 0x7c8   : > { %785 = vmin.xlane.f32.xlu2 %v784_v37 }
 0x7ca   : > { %v769_v40 = vpop.xlane.xlu2 %768 }
 0x7cb   : > { %vm775_vm4 = vcmp.eq.f32.partialorder %v2304_v1, %v769_v40 }
 0x7cc   : > { %v779_v9 = vsel %vm775_vm4, %v1756_v39, 32.0 }
 0x7cd   : > { %v787_v59 = vsel %vm417_vm0, %v779_v9, inf }
 0x7ce   : > { %788 = vmin.xlane.f32.xlu0 %v787_v59 }
 0x7d2   : > { %v772_v41 = vpop.xlane.xlu0 %771 }
 0x7d3   : > { %vm776_vm5 = vcmp.eq.f32.partialorder %v755_v28, %v772_v41 }
 0x7d4   : > { %v780_v42 = vsel %vm776_vm5, %v1756_v39, 32.0 }
 0x7d5   : > { %v790_v46 = vsel %vm417_vm0, %v780_v42, inf }
 0x7d6   : > { %791 = vmin.xlane.f32.xlu1 %v790_v46  ;;  %v1073_v48 = vpop.f32.mrf.mxu1 }
 0x7d7   : > { %v1074_v50 = vadd.f32 %v1073_v48, %v962_v49 }
 0x7dd   : > { %v914_v51 = vpop.f32.mrf.mxu2 }
 0x7de   : > { %v1054_v45 = vpop.f32.mrf.mxu0  ;;  %v1075_v35 = vpop.f32.mrf.mxu1 }
 0x7df   : > { %v1055_v47 = vadd.f32 %v1054_v45, %v961_v44  ;;  %v1076_v63 = vadd.f32 %v1075_v35, %v962_v49 }
 0x7e1   : > { %v1091_v39 = vpack.c.bf16 %v1074_v50, %v1055_v47 }
 0x7e2   : > { %v933_v55 = vpop.f32.mrf.mxu3 }
 0x7e3   : > { %v1083_v56 = vpack.c.bf16 %v933_v55, %v914_v51  ;;  %1095 = vst [vmem:[%s2378_s17] sm:$0xff] %v1091_v39 }
 0x7e5   : > { %1087 = vst [vmem:[%s2384_s20] sm:$0xff] %v1083_v56  ;;  %v916_v1 = vpop.f32.mrf.mxu2 }
 0x7e6   : > { %v1056_v57 = vpop.f32.mrf.mxu0  ;;  %v1078_v3 = vpop.f32.mrf.mxu1 }
 0x7e7   : > { %v1057_v58 = vadd.f32 %v1056_v57, %v961_v44  ;;  %v1079_v5 = vadd.f32 %v1078_v3, %v962_v49 }
 0x7e9   : > { %v1092_v0 = vpack.c.bf16 %v1076_v63, %v1057_v58 }
 0x7ea   : > { %v935_v2 = vpop.f32.mrf.mxu3 }
 0x7eb   : > { %1096 = vst [vmem:[%s2378_s17 + $0x8] sm:$0xff] %v1092_v0  ;;  %v1084_v36 = vpack.c.bf16 %v935_v2, %v916_v1 }
 0x7ed   : > { %1088 = vst [vmem:[%s2384_s20 + $0x8] sm:$0xff] %v1084_v36  ;;  %v919_v54 = vpop.f32.mrf.mxu2 }
 0x7ee   : > { %v1059_v53 = vpop.f32.mrf.mxu0  ;;  %v1080_v12 = vpop.f32.mrf.mxu1 }
 0x7ef   : > { %v1060_v4 = vadd.f32 %v1059_v53, %v961_v44  ;;  %v1081_v14 = vadd.f32 %v1080_v12, %v962_v49 }
 0x7f1   : > { %v1093_v6 = vpack.c.bf16 %v1079_v5, %v1060_v4 }
 0x7f2   : > { %v938_v8 = vpop.f32.mrf.mxu3 }
 0x7f3   : > { %1097 = vst [vmem:[%s2378_s17 + $0x10] sm:$0xff] %v1093_v6  ;;  %v1085_v10 = vpack.c.bf16 %v938_v8, %v919_v54 }
 0x7f5   : > { %1089 = vst [vmem:[%s2384_s20 + $0x10] sm:$0xff] %v1085_v10  ;;  %v921_v15 = vpop.f32.mrf.mxu2 }
 0x7f6   : > { %v1061_v11 = vpop.f32.mrf.mxu0 }
 0x7f7   : > { %v1062_v13 = vadd.f32 %v1061_v11, %v961_v44 }
 0x7f9   : > { %v1094_v17 = vpack.c.bf16 %v1081_v14, %v1062_v13 }
 0x7fa   : > { %v940_v16 = vpop.f32.mrf.mxu3 }
 0x7fb   : > { %v1086_v18 = vpack.c.bf16 %v940_v16, %v921_v15  ;;  %1098 = vst [vmem:[%s2378_s17 + $0x18] sm:$0xff] %v1094_v17 }
 0x7fd   : > { %1090 = vst [vmem:[%s2384_s20 + $0x18] sm:$0xff] %v1086_v18 }
 0x833   : > { %v783_v19 = vpop.xlane.xlu1 %782 }
 0x834   : > { %vm1613_vm0 = vcmp.lt.s32.totalorder %v783_v19, 0  ;;  %v1614_v20 = vceil.f32 %v783_v19  ;;  %v1615_v21 = vfloor.f32 %v783_v19 }
 0x836   : > { %v1616_v22 = vsel %vm1613_vm0, %v1614_v20, %v1615_v21 }
 0x837   : > { %v1617_v23 = vcvt.f32.s32 %v1616_v22 }
 0x839   : > { %v798_v24 = vsel %vm797_vm6, %v1617_v23, %v2183_v52 }
 0x83a   : > { %803 = vst.msk [vmem:[%s302_s27] sm:$0xff] %vm802_vm7, %v798_v24 }
 0x83b   : > { %v786_v25 = vpop.xlane.xlu2 %785 }
 0x83c   : > { %vm1618_vm8 = vcmp.lt.s32.totalorder %v786_v25, 0  ;;  %v1619_v26 = vceil.f32 %v786_v25  ;;  %v1620_v28 = vfloor.f32 %v786_v25 }
 0x83e   : > { %v1621_v30 = vsel %vm1618_vm8, %v1619_v26, %v1620_v28 }
 0x83f   : > { %v1622_v31 = vcvt.f32.s32 %v1621_v30 }
 0x841   : > { %v799_v32 = vsel %vm797_vm6, %v1622_v31, %v2248_v29  ;;  %v789_v61 = vpop.xlane.xlu0 %788 }
 0x842   : > { %804 = vst.msk [vmem:[%s302_s27 + $0x8] sm:$0xff] %vm802_vm7, %v799_v32  ;;  %vm1623_vm9 = vcmp.lt.s32.totalorder %v789_v61, 0  ;;  %v1624_v62 = vceil.f32 %v789_v61  ;;  %v1625_v33 = vfloor.f32 %v789_v61 }
 0x844   : > { %v1626_v34 = vsel %vm1623_vm9, %v1624_v62, %v1625_v33 }
 0x845   : > { %v1627_v52 = vcvt.f32.s32 %v1626_v34 }
 0x847   : > { %v800_v7 = vsel %vm797_vm6, %v1627_v52, %v2295_v60 }
 0x848   : > { %805 = vst.msk [vmem:[%s302_s27 + $0x10] sm:$0xff] %vm802_vm7, %v800_v7 }
 0x849   : > { %v792_v37 = vpop.xlane.xlu1 %791 }
 0x84a   : > { %vm1628_vm10 = vcmp.lt.s32.totalorder %v792_v37, 0  ;;  %v1629_v40 = vceil.f32 %v792_v37  ;;  %v1630_v9 = vfloor.f32 %v792_v37 }
 0x84c   : > { %v1631_v59 = vsel %vm1628_vm10, %v1629_v40, %v1630_v9 }
 0x84d   : > { %v1632_v29 = vcvt.f32.s32 %v1631_v59 }
 0x84f   : > { %v801_v41 = vsel %vm797_vm6, %v1632_v29, %v2348_v27 }
 0x850   : > { %806 = vst.msk [vmem:[%s302_s27 + $0x18] sm:$0xff] %vm802_vm7, %v801_v41 }
 0x851 PF: > { %s17_s23 = sadd.s32 1, %s1680_s23   ;;  %s2431_s21 = smov %s1676_s22 }
 0x852   : > { %p14_p5 = scmp.ge.s32.totalorder %s17_s23, 4   ;;  %s2432_s22 = smov %s2434_s24 }
 0x854   :  { %16 = sbr.rel (!%p14_p5) target bundleno = 2 (0x2), region = 91 }

// kernel: dgcnn_forward.17
= control target key start
LH: loop header
LB: loop body
LE: loop exit
PB: predicated region body
PF: predicated region fallthrough
CT: control target
= control target key end

     0   :  { %s711_s9 = smov 0   ;;  %s713_s10 = smov 0   ;;  %s822_s0 = inlined_call_operand.vmem [shape: bf16[2,32,2048], index: 0, kind: input, shape index: {}]   ;;  %s823_s1 = inlined_call_operand.vmem [shape: bf16[2,32,256], index: 1, kind: input, shape index: {}]   ;;  %s824_s2 = inlined_call_operand.vmem [shape: f32[2,32,256], index: 2, kind: output, shape index: {}]  }
   0x1   :  { %s715_s11 = smov 0  }
   0x2 LB: > { %s24_s12 = sadd.s32 1, %s690_s10  ;;  %p636_p0 = scmp.ge.s32.totalorder %s694_s11, 1  ;;  %s694_s11 = sphi %s715_s11, %s12_s11   ;;  %s690_s10 = sphi %s713_s10, %s826_s10   ;;  %s686_s9 = sphi %s711_s9, %s825_s9  }
   0x3   : > { %p26_p1 = scmp.ge.s32.totalorder %s24_s12, 2  ;;  %p152_p2 = scmp.lt.s32.totalorder %s694_s11, 3 }
   0x5   : > { %s828_s12 = smov (%p26_p1, %s24_s12), 0  ;;  %p153_p3 = pnand %p636_p0, %p152_p2 }
   0x6   : > { %p195_p4 = scmp.lt.s32.totalorder (!%p153_p3), %s686_s9, 1 }
   0x7   : > { %156 = sbr.rel (%p153_p3) target bundleno = 72 (0x48), region = 28 }
   0xc   : > { %s830_s9 = smov (!%p195_p4, %s686_s9), 1 }
   0xd   : > { %s645_s13 = sshll.u32 %s830_s9, 8  ;;  %s646_s14 = sshll.u32 %s830_s9, 5 }
   0xe   : > { %s736_s17 = scalar_lea.vmem %s822_s0, %s645_s13  ;;  %s741_s20 = scalar_lea.vmem %s823_s1, %s646_s14 }
   0xf   : > { %v227_v0 = vld [vmem:[%s736_s17] sm:$0xff]  ;;  %v228_v1 = vld [vmem:[%s736_s17 + $0x8] sm:$0xff]  ;;  %v229_v2 = vld [vmem:[%s736_s17 + $0x10] sm:$0xff]  ;;  %s647_s21 = sshll.u32 %s830_s9, 6 }
  0x10   : > { %v230_v3 = vld [vmem:[%s736_s17 + $0x18] sm:$0xff]  ;;  %v231_v4 = vld [vmem:[%s736_s17 + $0x20] sm:$0xff]  ;;  %v232_v5 = vld [vmem:[%s736_s17 + $0x28] sm:$0xff]  ;;  %v259_v6 = vunpack.c.l.bf16 %v227_v0  ;;  %v260_v7 = vunpack.c.h.bf16 %v227_v0  ;;  %v267_v8 = vunpack.c.l.bf16 %v228_v1  ;;  %v268_v9 = vunpack.c.h.bf16 %v228_v1  ;;  %s789_s24 = scalar_lea.vmem %s824_s2, %s647_s21 }
  0x11   : > { %v233_v10 = vld [vmem:[%s736_s17 + $0x30] sm:$0xff]  ;;  %v751_v11 = vld [vmem:[%s736_s17 + $0x38] sm:$0xff]  ;;  %v295_v12 = vunpack.c.l.bf16 %v229_v2  ;;  %v296_v13 = vunpack.c.h.bf16 %v229_v2  ;;  %v323_v14 = vunpack.c.l.bf16 %v230_v3  ;;  %v324_v15 = vunpack.c.h.bf16 %v230_v3  ;;  %v754_v20 = vld [vmem:[%s741_s20] sm:$0xff] }
  0x12   : > { %v275_v16 = vmax.f32 %v259_v6, %v267_v8  ;;  %v276_v17 = vmax.f32 %v260_v7, %v268_v9  ;;  %v351_v18 = vunpack.c.l.bf16 %v231_v4  ;;  %v352_v19 = vunpack.c.h.bf16 %v231_v4  ;;  %v235_v21 = vld [vmem:[%s736_s17 + $0x40] sm:$0xff]  ;;  %v236_v26 = vld [vmem:[%s736_s17 + $0x48] sm:$0xff]  ;;  %v237_v31 = vld [vmem:[%s736_s17 + $0x50] sm:$0xff] }
  0x13   : > { %v379_v22 = vunpack.c.l.bf16 %v232_v5  ;;  %v380_v23 = vunpack.c.h.bf16 %v232_v5  ;;  %v407_v24 = vunpack.c.l.bf16 %v233_v10  ;;  %v408_v25 = vunpack.c.h.bf16 %v233_v10  ;;  %v238_v32 = vld [vmem:[%s736_s17 + $0x58] sm:$0xff]  ;;  %v239_v39 = vld [vmem:[%s736_s17 + $0x60] sm:$0xff]  ;;  %v240_v40 = vld [vmem:[%s736_s17 + $0x68] sm:$0xff] }
  0x14   : > { %v303_v27 = vmax.f32 %v275_v16, %v295_v12  ;;  %v304_v28 = vmax.f32 %v276_v17, %v296_v13  ;;  %v435_v29 = vunpack.c.l.bf16 %v751_v11  ;;  %v436_v30 = vunpack.c.h.bf16 %v751_v11  ;;  %v241_v49 = vld [vmem:[%s736_s17 + $0x70] sm:$0xff]  ;;  %v242_v50 = vld [vmem:[%s736_s17 + $0x78] sm:$0xff]  ;;  %v769_v61 = vld [vmem:[%s741_s20 + $0x8] sm:$0xff] }
  0x15   : > { %v467_v33 = vunpack.c.l.bf16 %v754_v20  ;;  %v468_v34 = vunpack.c.h.bf16 %v754_v20  ;;  %v261_v35 = vunpack.c.l.bf16 %v235_v21  ;;  %v262_v36 = vunpack.c.h.bf16 %v235_v21  ;;  %v243_v62 = vld [vmem:[%s736_s17 + $0x80] sm:$0xff]  ;;  %v244_v7 = vld [vmem:[%s736_s17 + $0x88] sm:$0xff]  ;;  %v245_v8 = vld [vmem:[%s736_s17 + $0x90] sm:$0xff] }
  0x16   : > { %v331_v37 = vmax.f32 %v303_v27, %v323_v14  ;;  %v332_v38 = vmax.f32 %v304_v28, %v324_v15  ;;  %v269_v41 = vunpack.c.l.bf16 %v236_v26  ;;  %v270_v42 = vunpack.c.h.bf16 %v236_v26  ;;  %v246_v11 = vld [vmem:[%s736_s17 + $0x98] sm:$0xff]  ;;  %v248_v27 = vld [vmem:[%s736_s17 + $0xa8] sm:$0xff] }
  0x17   : > { %v297_v43 = vunpack.c.l.bf16 %v237_v31  ;;  %v298_v44 = vunpack.c.h.bf16 %v237_v31  ;;  %v325_v45 = vunpack.c.l.bf16 %v238_v32  ;;  %v326_v46 = vunpack.c.h.bf16 %v238_v32 }
  0x18   : > { %v359_v47 = vmax.f32 %v331_v37, %v351_v18  ;;  %v360_v48 = vmax.f32 %v332_v38, %v352_v19  ;;  %v277_v51 = vmax.f32 %v261_v35, %v269_v41  ;;  %v278_v52 = vmax.f32 %v262_v36, %v270_v42  ;;  %v247_v18 = vld [vmem:[%s736_s17 + $0xa0] sm:$0xff] }
  0x19   : > { %v353_v53 = vunpack.c.l.bf16 %v239_v39  ;;  %v354_v54 = vunpack.c.h.bf16 %v239_v39  ;;  %v381_v55 = vunpack.c.l.bf16 %v240_v40  ;;  %v382_v56 = vunpack.c.h.bf16 %v240_v40  ;;  %v249_v39 = vld [vmem:[%s736_s17 + $0xb0] sm:$0xff] }
  0x1a   : > { %v387_v57 = vmax.f32 %v359_v47, %v379_v22  ;;  %v388_v58 = vmax.f32 %v360_v48, %v380_v23  ;;  %v305_v59 = vmax.f32 %v277_v51, %v297_v43  ;;  %v306_v60 = vmax.f32 %v278_v52, %v298_v44  ;;  %v250_v48 = vld [vmem:[%s736_s17 + $0xb8] sm:$0xff] }
  0x1b   : > { %v409_v63 = vunpack.c.l.bf16 %v241_v49  ;;  %v410_v0 = vunpack.c.h.bf16 %v241_v49  ;;  %v437_v1 = vunpack.c.l.bf16 %v242_v50  ;;  %v438_v2 = vunpack.c.h.bf16 %v242_v50 }
  0x1c   : > { %v415_v3 = vmax.f32 %v387_v57, %v407_v24  ;;  %v416_v4 = vmax.f32 %v388_v58, %v408_v25  ;;  %v333_v5 = vmax.f32 %v305_v59, %v325_v45  ;;  %v334_v6 = vmax.f32 %v306_v60, %v326_v46  ;;  %v251_v57 = vld [vmem:[%s736_s17 + $0xc0] sm:$0xff] }
  0x1d   : > { %v469_v9 = vunpack.c.l.bf16 %v769_v61  ;;  %v470_v10 = vunpack.c.h.bf16 %v769_v61  ;;  %v263_v12 = vunpack.c.l.bf16 %v243_v62  ;;  %v264_v13 = vunpack.c.h.bf16 %v243_v62 }
  0x1e   : > { %v443_v14 = vmax.f32 %v415_v3, %v435_v29  ;;  %v444_v15 = vmax.f32 %v416_v4, %v436_v30  ;;  %v361_v16 = vmax.f32 %v333_v5, %v353_v53  ;;  %v362_v17 = vmax.f32 %v334_v6, %v354_v54  ;;  %v252_v3 = vld [vmem:[%s736_s17 + $0xc8] sm:$0xff]  ;;  %v253_v4 = vld [vmem:[%s736_s17 + $0xd0] sm:$0xff] }
  0x1f   : > { %v271_v19 = vunpack.c.l.bf16 %v244_v7  ;;  %v272_v21 = vunpack.c.h.bf16 %v244_v7  ;;  %v299_v22 = vunpack.c.l.bf16 %v245_v8  ;;  %v300_v23 = vunpack.c.h.bf16 %v245_v8 }
  0x20   : > { %v451_v24 = vpack.c.bf16 %v444_v15, %v443_v14  ;;  %v389_v25 = vmax.f32 %v361_v16, %v381_v55  ;;  %v390_v26 = vmax.f32 %v362_v17, %v382_v56  ;;  %v327_v28 = vunpack.c.l.bf16 %v246_v11  ;;  %v465_v56 = vld [vmem:[%s741_s20 + $0x10] sm:$0xff]  ;;  %v254_v15 = vld [vmem:[%s736_s17 + $0xd8] sm:$0xff]  ;;  %v255_v16 = vld [vmem:[%s736_s17 + $0xe0] sm:$0xff] }
  0x21   : > { %v279_v31 = vmax.f32 %v263_v12, %v271_v19  ;;  %v280_v32 = vmax.f32 %v264_v13, %v272_v21  ;;  %v328_v35 = vunpack.c.h.bf16 %v246_v11  ;;  %v355_v29 = vunpack.c.l.bf16 %v247_v18 }
  0x22   : > { %v455_v30 = vunpack.c.l.bf16 %v451_v24  ;;  %v456_v36 = vunpack.c.h.bf16 %v451_v24  ;;  %v417_v37 = vmax.f32 %v389_v25, %v409_v63  ;;  %v418_v38 = vmax.f32 %v390_v26, %v410_v0 }
  0x23   : > { %v307_v40 = vmax.f32 %v279_v31, %v299_v22  ;;  %v308_v41 = vmax.f32 %v280_v32, %v300_v23  ;;  %v356_v42 = vunpack.c.h.bf16 %v247_v18  ;;  %v383_v43 = vunpack.c.l.bf16 %v248_v27  ;;  %v256_v32 = vld [vmem:[%s736_s17 + $0xe8] sm:$0xff] }
  0x24   : > { %v475_v44 = vadd.f32 %v467_v33, %v455_v30  ;;  %v476_v45 = vadd.f32 %v468_v34, %v456_v36  ;;  %v445_v46 = vmax.f32 %v417_v37, %v437_v1  ;;  %v446_v47 = vmax.f32 %v418_v38, %v438_v2 }
  0x25   : > { %v335_v49 = vmax.f32 %v307_v40, %v327_v28  ;;  %v336_v50 = vmax.f32 %v308_v41, %v328_v35  ;;  %v384_v51 = vunpack.c.h.bf16 %v248_v27  ;;  %v411_v52 = vunpack.c.l.bf16 %v249_v39 }
  0x26   : > { %vm483_vm0 = vcmp.gt.f32.partialorder %v475_v44, 0.0  ;;  %v491_v33 = vmul.f32 0.2, %v475_v44  ;;  %vm484_vm1 = vcmp.gt.f32.partialorder %v476_v45, 0.0  ;;  %v492_v20 = vmul.f32 0.2, %v476_v45 }
  0x27   : > { %v452_v34 = vpack.c.bf16 %v446_v47, %v445_v46  ;;  %v363_v53 = vmax.f32 %v335_v49, %v355_v29  ;;  %v364_v54 = vmax.f32 %v336_v50, %v356_v42  ;;  %v412_v55 = vunpack.c.h.bf16 %v249_v39  ;;  %v257_v39 = vld [vmem:[%s736_s17 + $0xf0] sm:$0xff]  ;;  %v258_v46 = vld [vmem:[%s736_s17 + $0xf8] sm:$0xff] }
  0x28   : > { %v499_v58 = vsel %vm483_vm0, %v475_v44, %v491_v33  ;;  %v500_v59 = vsel %vm484_vm1, %v476_v45, %v492_v20  ;;  %v439_v60 = vunpack.c.l.bf16 %v250_v48  ;;  %v440_v62 = vunpack.c.h.bf16 %v250_v48 }
  0x29   : > { %507 = vst [vmem:[%s789_s24] sm:$0xff] %v499_v58  ;;  %v457_v63 = vunpack.c.l.bf16 %v452_v34  ;;  %v458_v0 = vunpack.c.h.bf16 %v452_v34  ;;  %v391_v1 = vmax.f32 %v363_v53, %v383_v43  ;;  %v392_v2 = vmax.f32 %v364_v54, %v384_v51  ;;  %v466_v58 = vld [vmem:[%s741_s20 + $0x18] sm:$0xff] }
  0x2a   : > { %508 = vst [vmem:[%s789_s24 + $0x8] sm:$0xff] %v500_v59  ;;  %v471_v5 = vunpack.c.l.bf16 %v465_v56  ;;  %v472_v6 = vunpack.c.h.bf16 %v465_v56  ;;  %v265_v7 = vunpack.c.l.bf16 %v251_v57  ;;  %v266_v8 = vunpack.c.h.bf16 %v251_v57 }
  0x2b   : > { %v477_v11 = vadd.f32 %v469_v9, %v457_v63  ;;  %v478_v12 = vadd.f32 %v470_v10, %v458_v0  ;;  %v419_v13 = vmax.f32 %v391_v1, %v411_v52  ;;  %v420_v14 = vmax.f32 %v392_v2, %v412_v55 }
  0x2c   : > { %v273_v17 = vunpack.c.l.bf16 %v252_v3  ;;  %v274_v18 = vunpack.c.h.bf16 %v252_v3  ;;  %v301_v19 = vunpack.c.l.bf16 %v253_v4  ;;  %v302_v21 = vunpack.c.h.bf16 %v253_v4 }
  0x2d   : > { %vm485_vm2 = vcmp.gt.f32.partialorder %v477_v11, 0.0  ;;  %v493_v22 = vmul.f32 0.2, %v477_v11  ;;  %vm486_vm3 = vcmp.gt.f32.partialorder %v478_v12, 0.0  ;;  %v494_v23 = vmul.f32 0.2, %v478_v12 }
  0x2e   : > { %v447_v24 = vmax.f32 %v419_v13, %v439_v60  ;;  %v448_v9 = vmax.f32 %v420_v14, %v440_v62  ;;  %v281_v25 = vmax.f32 %v265_v7, %v273_v17  ;;  %v282_v61 = vmax.f32 %v266_v8, %v274_v18 }
  0x2f   : > { %v501_v10 = vsel %vm485_vm2, %v477_v11, %v493_v22  ;;  %v502_v26 = vsel %vm486_vm3, %v478_v12, %v494_v23  ;;  %v329_v27 = vunpack.c.l.bf16 %v254_v15  ;;  %v330_v28 = vunpack.c.h.bf16 %v254_v15 }
  0x30   : > { %509 = vst [vmem:[%s789_s24 + $0x10] sm:$0xff] %v501_v10  ;;  %v453_v31 = vpack.c.bf16 %v448_v9, %v447_v24  ;;  %v309_v35 = vmax.f32 %v281_v25, %v301_v19  ;;  %v310_v29 = vmax.f32 %v282_v61, %v302_v21  ;;  %v357_v30 = vunpack.c.l.bf16 %v255_v16 }
  0x31   : > { %510 = vst [vmem:[%s789_s24 + $0x18] sm:$0xff] %v502_v26  ;;  %v358_v36 = vunpack.c.h.bf16 %v255_v16  ;;  %v385_v42 = vunpack.c.l.bf16 %v256_v32  ;;  %v386_v43 = vunpack.c.h.bf16 %v256_v32  ;;  %v413_v49 = vunpack.c.l.bf16 %v257_v39 }
  0x32   : > { %v459_v37 = vunpack.c.l.bf16 %v453_v31  ;;  %v460_v38 = vunpack.c.h.bf16 %v453_v31  ;;  %v337_v40 = vmax.f32 %v309_v35, %v329_v27  ;;  %v338_v41 = vmax.f32 %v310_v29, %v330_v28 }
  0x33   : > { %v414_v50 = vunpack.c.h.bf16 %v257_v39  ;;  %v441_v34 = vunpack.c.l.bf16 %v258_v46  ;;  %v442_v53 = vunpack.c.h.bf16 %v258_v46  ;;  %v473_v63 = vunpack.c.l.bf16 %v466_v58 }
  0x34   : > { %v479_v44 = vadd.f32 %v471_v5, %v459_v37  ;;  %v480_v45 = vadd.f32 %v472_v6, %v460_v38  ;;  %v365_v47 = vmax.f32 %v337_v40, %v357_v30  ;;  %v366_v48 = vmax.f32 %v338_v41, %v358_v36 }
  0x35   : > { %v474_v0 = vunpack.c.h.bf16 %v466_v58 }
  0x36   : > { %vm487_vm4 = vcmp.gt.f32.partialorder %v479_v44, 0.0  ;;  %v495_v51 = vmul.f32 0.2, %v479_v44  ;;  %vm488_vm5 = vcmp.gt.f32.partialorder %v480_v45, 0.0  ;;  %v496_v52 = vmul.f32 0.2, %v480_v45 }
  0x37   : > { %v393_v33 = vmax.f32 %v365_v47, %v385_v42  ;;  %v394_v20 = vmax.f32 %v366_v48, %v386_v43 }
  0x38   : > { %v503_v54 = vsel %vm487_vm4, %v479_v44, %v495_v51  ;;  %v504_v55 = vsel %vm488_vm5, %v480_v45, %v496_v52 }
  0x39   : > { %511 = vst [vmem:[%s789_s24 + $0x20] sm:$0xff] %v503_v54  ;;  %v421_v56 = vmax.f32 %v393_v33, %v413_v49  ;;  %v422_v57 = vmax.f32 %v394_v20, %v414_v50 }
  0x3a   : > { %512 = vst [vmem:[%s789_s24 + $0x28] sm:$0xff] %v504_v55 }
  0x3b   : > { %v449_v59 = vmax.f32 %v421_v56, %v441_v34  ;;  %v450_v60 = vmax.f32 %v422_v57, %v442_v53 }
  0x3d   : > { %v454_v62 = vpack.c.bf16 %v450_v60, %v449_v59 }
  0x3f   : > { %v461_v1 = vunpack.c.l.bf16 %v454_v62  ;;  %v462_v2 = vunpack.c.h.bf16 %v454_v62 }
  0x41   : > { %v481_v3 = vadd.f32 %v473_v63, %v461_v1  ;;  %v482_v4 = vadd.f32 %v474_v0, %v462_v2 }
  0x43   : > { %vm489_vm6 = vcmp.gt.f32.partialorder %v481_v3, 0.0  ;;  %v497_v5 = vmul.f32 0.2, %v481_v3  ;;  %vm490_vm7 = vcmp.gt.f32.partialorder %v482_v4, 0.0  ;;  %v498_v6 = vmul.f32 0.2, %v482_v4 }
  0x45   : > { %v505_v7 = vsel %vm489_vm6, %v481_v3, %v497_v5  ;;  %v506_v8 = vsel %vm490_vm7, %v482_v4, %v498_v6 }
  0x46   : > { %513 = vst [vmem:[%s789_s24 + $0x30] sm:$0xff] %v505_v7 }
  0x47   : > { %514 = vst [vmem:[%s789_s24 + $0x38] sm:$0xff] %v506_v8 }
  0x48 PF: > { %s12_s11 = sadd.s32 1, %s694_s11   ;;  %s825_s9 = smov %s690_s10 }
  0x49   : > { %p9_p5 = scmp.ge.s32.totalorder %s12_s11, 4   ;;  %s826_s10 = smov %s828_s12 }
  0x4b   :  { %11 = sbr.rel (!%p9_p5) target bundleno = 2 (0x2), region = 61 }

// kernel: dgcnn_forward.18
= control target key start
LH: loop header
LB: loop body
LE: loop exit
PB: predicated region body
PF: predicated region fallthrough
CT: control target
= control target key end

     0   :  { %s2051_s30 = smov 0   ;;  %s2053_s10 = smov 0   ;;  %s2342_s0 = inlined_call_operand.vmem [shape: f32[2,32,64], index: 0, kind: input, shape index: {}]   ;;  %s2343_s1 = inlined_call_operand.vmem [shape: f32[2,32,64], index: 1, kind: input, shape index: {}]   ;;  %s2344_s2 = inlined_call_operand.vmem [shape: f32[2,32,128], index: 2, kind: input, shape index: {}]   ;;  %s2345_s3 = inlined_call_operand.vmem [shape: f32[2,32,256], index: 3, kind: input, shape index: {}]   ;;  %s2346_s4 = inlined_call_operand.vmem [shape: bf16[64,256], index: 4, kind: input, shape index: {}]   ;;  %s2347_s5 = inlined_call_operand.vmem [shape: bf16[64,256], index: 5, kind: input, shape index: {}]   ;;  %s2348_s6 = inlined_call_operand.vmem [shape: bf16[128,256], index: 6, kind: input, shape index: {}]   ;;  %s2349_s7 = inlined_call_operand.vmem [shape: bf16[256,256], index: 7, kind: input, shape index: {}]   ;;  %s2350_s8 = inlined_call_operand.vmem [shape: f32[1,256], index: 8, kind: input, shape index: {}]   ;;  %s2351_s9 = inlined_call_operand.vmem [shape: f32[2,2,256], index: 9, kind: output, shape index: {}]  }
   0x1   :  { %s2055_s11 = smov 0   ;;  %s2057_s12 = smov 0  }
   0x2   :  { %s2059_s13 = smov 0   ;;  %s2061_s14 = smov 0  }
   0x3   :  { %s2063_s15 = smov 0  }
   0x4 LB: > { %s34_s16 = sadd.s32 1, %s1991_s13  ;;  %s38_s17 = sadd.s32 1, %s1995_s14  ;;  %s1999_s15 = sphi %s2063_s15, %s19_s15   ;;  %s1995_s14 = sphi %s2061_s14, %s2358_s14   ;;  %s1991_s13 = sphi %s2059_s13, %s2357_s13   ;;  %s1987_s12 = sphi %s2057_s12, %s2356_s12   ;;  %s1983_s11 = sphi %s2055_s11, %s2355_s11   ;;  %s1979_s10 = sphi %s2053_s10, %s2354_s10   ;;  %s1975_s30 = sphi %s2051_s30, %s2353_s30  }
   0x5   : > { %p36_p0 = scmp.ge.s32.totalorder %s34_s16, 2  ;;  %s157_s18 = sadd.s32 1, %s1979_s10 }
   0x6   : > { %p164_p1 = scmp.ne.s32.totalorder %s1979_s10, %s1975_s30  ;;  %p165_p2 = scmp.eq.s32.totalorder %s1999_s15, 0 }
   0x7   : > { %s2360_s16 = smov (%p36_p0, %s34_s16), 0  ;;  %s2362_s17 = smov (!%p36_p0, %s38_s17), %s1995_s14 }
   0x8   : > { %s154_s19 = ssub.s32 %s1991_s13, %s2360_s16  ;;  %p2097_p3 = por %p165_p2, %p164_p1 }
   0x9   : > { %p40_p4 = scmp.ge.s32.totalorder %s2362_s17, 2  ;;  %p155_p5 = scmp.eq.s32.totalorder %s154_s19, 0 }
   0xa   : > { %p1686_p6 = scmp.ge.s32.totalorder %s1999_s15, 4 }
   0xb   : > { %s2364_s17 = smov (%p40_p4, %s2362_s17), 0 }
   0xc   : > { %s2104_s21 = scalar_select %p155_p5, %s1979_s10, %s157_s18  }
   0xd   : > { %322 = sbr.rel (%p1686_p6) target bundleno = 98 (0x62), region = 16 }
  0x12   : > { %378 = sbr.rel (!%p2097_p3) target bundleno = 30 (0x1e), region = 36  ;;  %s380_s22 = sand.u32 (%p2097_p3), 1, %s1979_s10  }
  0x13   : > { %s1688_s23 = sshll.u32 (%p2097_p3), %s1991_s13, 2  ;;  %s1687_s24 = sshll.u32 (%p2097_p3), %s380_s22, 5 }
  0x14   : > { %s384_s27 = scalar_lea.vmem (%p2097_p3), %s2346_s4, %s1688_s23  ;;  %s382_s28 = scalar_lea.vmem (%p2097_p3), [#allocation2], %s1687_s24 }
  0x15   : > { %v401_v0 = vld [vmem:[%s384_s27] sm:$0xf] (%p2097_p3)  ;;  %v403_v1 = vld [vmem:[%s384_s27 + $0x8] sm:$0xf] (%p2097_p3)  ;;  %v405_v2 = vld [vmem:[%s384_s27 + $0x10] sm:$0xf] (%p2097_p3) }
  0x16   : > { %402 = vst [vmem:[%s382_s28] sm:$0xf] (%p2097_p3), %v401_v0  ;;  %v407_v3 = vld [vmem:[%s384_s27 + $0x18] sm:$0xf] (%p2097_p3)  ;;  %v409_v4 = vld [vmem:[%s384_s27 + $0x20] sm:$0xf] (%p2097_p3) }
  0x17   : > { %404 = vst [vmem:[%s382_s28 + $0x4] sm:$0xf] %v403_v1  ;;  %v411_v5 = vld [vmem:[%s384_s27 + $0x28] sm:$0xf]  ;;  %v413_v6 = vld [vmem:[%s384_s27 + $0x30] sm:$0xf] }
  0x18   : > { %406 = vst [vmem:[%s382_s28 + $0x8] sm:$0xf] %v405_v2  ;;  %v415_v7 = vld [vmem:[%s384_s27 + $0x38] sm:$0xf] }
  0x19   : > { %408 = vst [vmem:[%s382_s28 + $0xc] sm:$0xf] %v407_v3 }
  0x1a   : > { %410 = vst [vmem:[%s382_s28 + $0x10] sm:$0xf] %v409_v4 }
  0x1b   : > { %412 = vst [vmem:[%s382_s28 + $0x14] sm:$0xf] %v411_v5 }
  0x1c   : > { %414 = vst [vmem:[%s382_s28 + $0x18] sm:$0xf] %v413_v6 }
  0x1d   : > { %416 = vst [vmem:[%s382_s28 + $0x1c] sm:$0xf] %v415_v7 }
  0x1e PF: > { %456 = sbr.rel (!%p2097_p3) target bundleno = 42 (0x2a), region = 77  ;;  %s458_s29 = sand.u32 (%p2097_p3), 1, %s1979_s10  }
  0x1f   : > { %s1690_s18 = sshll.u32 (%p2097_p3), %s1991_s13, 2  ;;  %s1689_s19 = sshll.u32 (%p2097_p3), %s458_s29, 5 }
  0x20   : > { %s462_s24 = scalar_lea.vmem (%p2097_p3), %s2347_s5, %s1690_s18  ;;  %s460_s25 = scalar_lea.vmem (%p2097_p3), [#allocation3], %s1689_s19 }
  0x21   : > { %v479_v8 = vld [vmem:[%s462_s24] sm:$0xf] (%p2097_p3)  ;;  %v481_v9 = vld [vmem:[%s462_s24 + $0x8] sm:$0xf] (%p2097_p3)  ;;  %v483_v10 = vld [vmem:[%s462_s24 + $0x10] sm:$0xf] (%p2097_p3) }
  0x22   : > { %480 = vst [vmem:[%s460_s25] sm:$0xf] (%p2097_p3), %v479_v8  ;;  %v485_v11 = vld [vmem:[%s462_s24 + $0x18] sm:$0xf] (%p2097_p3)  ;;  %v487_v12 = vld [vmem:[%s462_s24 + $0x20] sm:$0xf] (%p2097_p3) }
  0x23   : > { %482 = vst [vmem:[%s460_s25 + $0x4] sm:$0xf] %v481_v9  ;;  %v489_v13 = vld [vmem:[%s462_s24 + $0x28] sm:$0xf]  ;;  %v491_v14 = vld [vmem:[%s462_s24 + $0x30] sm:$0xf] }
  0x24   : > { %484 = vst [vmem:[%s460_s25 + $0x8] sm:$0xf] %v483_v10  ;;  %v493_v15 = vld [vmem:[%s462_s24 + $0x38] sm:$0xf] }
  0x25   : > { %486 = vst [vmem:[%s460_s25 + $0xc] sm:$0xf] %v485_v11 }
  0x26   : > { %488 = vst [vmem:[%s460_s25 + $0x10] sm:$0xf] %v487_v12 }
  0x27   : > { %490 = vst [vmem:[%s460_s25 + $0x14] sm:$0xf] %v489_v13 }
  0x28   : > { %492 = vst [vmem:[%s460_s25 + $0x18] sm:$0xf] %v491_v14 }
  0x29   : > { %494 = vst [vmem:[%s460_s25 + $0x1c] sm:$0xf] %v493_v15 }
  0x2a PF: > { %534 = sbr.rel (!%p2097_p3) target bundleno = 62 (0x3e), region = 118  ;;  %s536_s26 = sand.u32 (%p2097_p3), 1, %s1979_s10  }
  0x2b   : > { %s1692_s27 = sshll.u32 (%p2097_p3), %s1991_s13, 2  ;;  %s1691_s28 = sshll.u32 (%p2097_p3), %s536_s26, 6 }
  0x2c   : > { %s2128_s19 = scalar_lea.vmem (%p2097_p3), %s2348_s6, %s1692_s27  ;;  %s538_s22 = scalar_lea.vmem (%p2097_p3), [#allocation4], %s1691_s28 }
  0x2d   : > { %v557_v16 = vld [vmem:[%s2128_s19] sm:$0xf] (%p2097_p3)  ;;  %v559_v17 = vld [vmem:[%s2128_s19 + $0x8] sm:$0xf] (%p2097_p3)  ;;  %v561_v18 = vld [vmem:[%s2128_s19 + $0x10] sm:$0xf] (%p2097_p3) }
  0x2e   : > { %558 = vst [vmem:[%s538_s22] sm:$0xf] (%p2097_p3), %v557_v16  ;;  %v563_v19 = vld [vmem:[%s2128_s19 + $0x18] sm:$0xf] (%p2097_p3)  ;;  %v565_v20 = vld [vmem:[%s2128_s19 + $0x20] sm:$0xf] (%p2097_p3) }
  0x2f   : > { %560 = vst [vmem:[%s538_s22 + $0x4] sm:$0xf] %v559_v17  ;;  %v567_v21 = vld [vmem:[%s2128_s19 + $0x28] sm:$0xf]  ;;  %v569_v22 = vld [vmem:[%s2128_s19 + $0x30] sm:$0xf] }
  0x30   : > { %562 = vst [vmem:[%s538_s22 + $0x8] sm:$0xf] %v561_v18  ;;  %v571_v23 = vld [vmem:[%s2128_s19 + $0x38] sm:$0xf]  ;;  %v573_v24 = vld [vmem:[%s2128_s19 + $0x40] sm:$0xf] }
  0x31   : > { %564 = vst [vmem:[%s538_s22 + $0xc] sm:$0xf] %v563_v19  ;;  %v575_v25 = vld [vmem:[%s2128_s19 + $0x48] sm:$0xf]  ;;  %v577_v26 = vld [vmem:[%s2128_s19 + $0x50] sm:$0xf] }
  0x32   : > { %566 = vst [vmem:[%s538_s22 + $0x10] sm:$0xf] %v565_v20  ;;  %v579_v27 = vld [vmem:[%s2128_s19 + $0x58] sm:$0xf]  ;;  %v581_v28 = vld [vmem:[%s2128_s19 + $0x60] sm:$0xf] }
  0x33   : > { %568 = vst [vmem:[%s538_s22 + $0x14] sm:$0xf] %v567_v21  ;;  %v583_v29 = vld [vmem:[%s2128_s19 + $0x68] sm:$0xf]  ;;  %v585_v30 = vld [vmem:[%s2128_s19 + $0x70] sm:$0xf] }
  0x34   : > { %570 = vst [vmem:[%s538_s22 + $0x18] sm:$0xf] %v569_v22  ;;  %v587_v31 = vld [vmem:[%s2128_s19 + $0x78] sm:$0xf] }
  0x35   : > { %572 = vst [vmem:[%s538_s22 + $0x1c] sm:$0xf] %v571_v23 }
  0x36   : > { %574 = vst [vmem:[%s538_s22 + $0x20] sm:$0xf] %v573_v24 }
  0x37   : > { %576 = vst [vmem:[%s538_s22 + $0x24] sm:$0xf] %v575_v25 }
  0x38   : > { %578 = vst [vmem:[%s538_s22 + $0x28] sm:$0xf] %v577_v26 }
  0x39   : > { %580 = vst [vmem:[%s538_s22 + $0x2c] sm:$0xf] %v579_v27 }
  0x3a   : > { %582 = vst [vmem:[%s538_s22 + $0x30] sm:$0xf] %v581_v28 }
  0x3b   : > { %584 = vst [vmem:[%s538_s22 + $0x34] sm:$0xf] %v583_v29 }
  0x3c   : > { %586 = vst [vmem:[%s538_s22 + $0x38] sm:$0xf] %v585_v30 }
  0x3d   : > { %588 = vst [vmem:[%s538_s22 + $0x3c] sm:$0xf] %v587_v31 }
  0x3e PF: > { %644 = sbr.rel (!%p2097_p3) target bundleno = 98 (0x62), region = 159  ;;  %s646_s23 = sand.u32 (%p2097_p3), 1, %s1979_s10  }
  0x3f   : > { %s1694_s24 = sshll.u32 (%p2097_p3), %s1991_s13, 2  ;;  %s1693_s25 = sshll.u32 (%p2097_p3), %s646_s23, 7 }
  0x40   : > { %s2153_s28 = scalar_lea.vmem (%p2097_p3), %s2349_s7, %s1694_s24  ;;  %s2157_s20 = scalar_lea.vmem (%p2097_p3), [#allocation5], %s1693_s25 }
  0x41   : > { %v667_v32 = vld [vmem:[%s2153_s28] sm:$0xf] (%p2097_p3)  ;;  %v669_v33 = vld [vmem:[%s2153_s28 + $0x8] sm:$0xf] (%p2097_p3)  ;;  %v671_v34 = vld [vmem:[%s2153_s28 + $0x10] sm:$0xf] (%p2097_p3) }
  0x42   : > { %668 = vst [vmem:[%s2157_s20] sm:$0xf] (%p2097_p3), %v667_v32  ;;  %v673_v35 = vld [vmem:[%s2153_s28 + $0x18] sm:$0xf] (%p2097_p3)  ;;  %v675_v36 = vld [vmem:[%s2153_s28 + $0x20] sm:$0xf] (%p2097_p3) }
  0x43   : > { %670 = vst [vmem:[%s2157_s20 + $0x4] sm:$0xf] %v669_v33  ;;  %v677_v37 = vld [vmem:[%s2153_s28 + $0x28] sm:$0xf]  ;;  %v679_v38 = vld [vmem:[%s2153_s28 + $0x30] sm:$0xf] }
  0x44   : > { %672 = vst [vmem:[%s2157_s20 + $0x8] sm:$0xf] %v671_v34  ;;  %v681_v39 = vld [vmem:[%s2153_s28 + $0x38] sm:$0xf]  ;;  %v683_v40 = vld [vmem:[%s2153_s28 + $0x40] sm:$0xf] }
  0x45   : > { %674 = vst [vmem:[%s2157_s20 + $0xc] sm:$0xf] %v673_v35  ;;  %v685_v41 = vld [vmem:[%s2153_s28 + $0x48] sm:$0xf]  ;;  %v687_v42 = vld [vmem:[%s2153_s28 + $0x50] sm:$0xf] }
  0x46   : > { %676 = vst [vmem:[%s2157_s20 + $0x10] sm:$0xf] %v675_v36  ;;  %v689_v43 = vld [vmem:[%s2153_s28 + $0x58] sm:$0xf]  ;;  %v691_v44 = vld [vmem:[%s2153_s28 + $0x60] sm:$0xf] }
  0x47   : > { %678 = vst [vmem:[%s2157_s20 + $0x14] sm:$0xf] %v677_v37  ;;  %v693_v45 = vld [vmem:[%s2153_s28 + $0x68] sm:$0xf]  ;;  %v695_v46 = vld [vmem:[%s2153_s28 + $0x70] sm:$0xf] }
  0x48   : > { %680 = vst [vmem:[%s2157_s20 + $0x18] sm:$0xf] %v679_v38  ;;  %v697_v47 = vld [vmem:[%s2153_s28 + $0x78] sm:$0xf]  ;;  %v699_v48 = vld [vmem:[%s2153_s28 + $0x80] sm:$0xf] }
  0x49   : > { %682 = vst [vmem:[%s2157_s20 + $0x1c] sm:$0xf] %v681_v39  ;;  %v701_v49 = vld [vmem:[%s2153_s28 + $0x88] sm:$0xf]  ;;  %v703_v50 = vld [vmem:[%s2153_s28 + $0x90] sm:$0xf] }
  0x4a   : > { %684 = vst [vmem:[%s2157_s20 + $0x20] sm:$0xf] %v683_v40  ;;  %v705_v51 = vld [vmem:[%s2153_s28 + $0x98] sm:$0xf]  ;;  %v707_v52 = vld [vmem:[%s2153_s28 + $0xa0] sm:$0xf] }
  0x4b   : > { %686 = vst [vmem:[%s2157_s20 + $0x24] sm:$0xf] %v685_v41  ;;  %v709_v53 = vld [vmem:[%s2153_s28 + $0xa8] sm:$0xf]  ;;  %v711_v54 = vld [vmem:[%s2153_s28 + $0xb0] sm:$0xf] }
  0x4c   : > { %688 = vst [vmem:[%s2157_s20 + $0x28] sm:$0xf] %v687_v42  ;;  %v713_v55 = vld [vmem:[%s2153_s28 + $0xb8] sm:$0xf]  ;;  %v715_v56 = vld [vmem:[%s2153_s28 + $0xc0] sm:$0xf] }
  0x4d   : > { %690 = vst [vmem:[%s2157_s20 + $0x2c] sm:$0xf] %v689_v43  ;;  %v717_v57 = vld [vmem:[%s2153_s28 + $0xc8] sm:$0xf]  ;;  %v719_v58 = vld [vmem:[%s2153_s28 + $0xd0] sm:$0xf] }
  0x4e   : > { %692 = vst [vmem:[%s2157_s20 + $0x30] sm:$0xf] %v691_v44  ;;  %v721_v59 = vld [vmem:[%s2153_s28 + $0xd8] sm:$0xf]  ;;  %v723_v60 = vld [vmem:[%s2153_s28 + $0xe0] sm:$0xf] }
  0x4f   : > { %694 = vst [vmem:[%s2157_s20 + $0x34] sm:$0xf] %v693_v45  ;;  %v725_v61 = vld [vmem:[%s2153_s28 + $0xe8] sm:$0xf]  ;;  %v727_v62 = vld [vmem:[%s2153_s28 + $0xf0] sm:$0xf] }
  0x50   : > { %696 = vst [vmem:[%s2157_s20 + $0x38] sm:$0xf] %v695_v46  ;;  %v729_v63 = vld [vmem:[%s2153_s28 + $0xf8] sm:$0xf] }
  0x51   : > { %698 = vst [vmem:[%s2157_s20 + $0x3c] sm:$0xf] %v697_v47 }
  0x52   : > { %700 = vst [vmem:[%s2157_s20 + $0x40] sm:$0xf] %v699_v48 }
  0x53   : > { %702 = vst [vmem:[%s2157_s20 + $0x44] sm:$0xf] %v701_v49 }
  0x54   : > { %704 = vst [vmem:[%s2157_s20 + $0x48] sm:$0xf] %v703_v50 }
  0x55   : > { %706 = vst [vmem:[%s2157_s20 + $0x4c] sm:$0xf] %v705_v51 }
  0x56   : > { %708 = vst [vmem:[%s2157_s20 + $0x50] sm:$0xf] %v707_v52 }
  0x57   : > { %710 = vst [vmem:[%s2157_s20 + $0x54] sm:$0xf] %v709_v53 }
  0x58   : > { %712 = vst [vmem:[%s2157_s20 + $0x58] sm:$0xf] %v711_v54 }
  0x59   : > { %714 = vst [vmem:[%s2157_s20 + $0x5c] sm:$0xf] %v713_v55 }
  0x5a   : > { %716 = vst [vmem:[%s2157_s20 + $0x60] sm:$0xf] %v715_v56 }
  0x5b   : > { %718 = vst [vmem:[%s2157_s20 + $0x64] sm:$0xf] %v717_v57 }
  0x5c   : > { %720 = vst [vmem:[%s2157_s20 + $0x68] sm:$0xf] %v719_v58 }
  0x5d   : > { %722 = vst [vmem:[%s2157_s20 + $0x6c] sm:$0xf] %v721_v59 }
  0x5e   : > { %724 = vst [vmem:[%s2157_s20 + $0x70] sm:$0xf] %v723_v60 }
  0x5f   : > { %726 = vst [vmem:[%s2157_s20 + $0x74] sm:$0xf] %v725_v61 }
  0x60   : > { %728 = vst [vmem:[%s2157_s20 + $0x78] sm:$0xf] %v727_v62 }
  0x61   : > { %730 = vst [vmem:[%s2157_s20 + $0x7c] sm:$0xf] %v729_v63 }
  0x62 PF: > { %p1695_p7 = scmp.ge.s32.totalorder %s1999_s15, 1  ;;  %p823_p8 = scmp.lt.s32.totalorder %s1999_s15, 5 }
  0x64   : > { %p824_p9 = pnand %p1695_p7, %p823_p8 }
  0x65   : > { %s830_s29 = sand.u32 (!%p824_p9), 1, %s1975_s30   ;;  %p942_p10 = scmp.lt.s32.totalorder (!%p824_p9), %s1987_s12, 1 }
  0x66   : > { %827 = sbr.rel (%p824_p9) target bundleno = 332 (0x14c), region = 204  ;;  %s1696_s18 = sshll.u32 (!%p824_p9), %s830_s29, 5 }
  0x67   : > { %s1698_s19 = sshll.u32 (!%p824_p9), %s830_s29, 6  ;;  %s1699_s22 = sshll.u32 (!%p824_p9), %s830_s29, 7 }
  0x68   : > { %s839_s23 = scalar_lea.vmem (!%p824_p9), [#allocation3], %s1696_s18  ;;  %s2225_s24 = scalar_lea.vmem (!%p824_p9), [#allocation4], %s1698_s19 }
  0x69   : > { %s832_s25 = scalar_lea.vmem (!%p824_p9), [#allocation2], %s1696_s18  ;;  %s2228_s26 = scalar_lea.vmem (!%p824_p9), [#allocation5], %s1699_s22 }
  0x6a   : > { %p982_p11 = scmp.lt.s32.totalorder (!%p824_p9), %s1983_s11, 1 }
  0x6b   : > { %v1855_v0 = vld [vmem:[%s839_s23 + $0x18] sm:$0xff]  ;;  %v1854_v4 = vld [vmem:[%s839_s23 + $0x10] sm:$0xff]  ;;  %s2366_s12 = smov (!%p942_p10, %s1987_s12), 1  ;;  %v1853_v8 = vld [vmem:[%s839_s23 + $0x8] sm:$0xff]  ;;  %vm1046_vm0 = vcmask 523264  }
  0x6c   : > { %v1863_v1 = vld [vmem:[%s2225_s24 + $0x38] sm:$0xff]  ;;  %1057 = vmatpush.bf16.msra.mxu0 %v1855_v0  ;;  %v1862_v5 = vld [vmem:[%s2225_s24 + $0x30] sm:$0xff]  ;;  %s2239_s30 = sshll.u32 %s2366_s12, 5  ;;  %v1861_v9 = vld [vmem:[%s2225_s24 + $0x28] sm:$0xff]  ;;  %s1847_s22 = sshll.u32 %s2366_s12, 6 }
  0x6d   : > { %v1851_v2 = vld [vmem:[%s832_s25 + $0x18] sm:$0xff]  ;;  %1191 = vmatpush.bf16.msra.mxu2 %v1863_v1  ;;  %v1850_v6 = vld [vmem:[%s832_s25 + $0x10] sm:$0xff]  ;;  %v1849_v10 = vld [vmem:[%s832_s25 + $0x8] sm:$0xff]  ;;  %s2246_s20 = scalar_lea.vmem %s2343_s1, %s2239_s30  ;;  %s2253_s19 = scalar_lea.vmem %s2342_s0, %s2239_s30 }
  0x6e   : > { %v1871_v3 = vld [vmem:[%s2228_s26 + $0x38] sm:$0xff]  ;;  %1106 = vmatpush.bf16.msra.mxu1 %v1851_v2  ;;  %v1870_v7 = vld [vmem:[%s2228_s26 + $0x30] sm:$0xff]  ;;  %v1869_v11 = vld [vmem:[%s2228_s26 + $0x28] sm:$0xff]  ;;  %s2277_s27 = scalar_lea.vmem %s2344_s2, %s2239_s30  ;;  %s2285_s18 = scalar_lea.vmem %s2345_s3, %s1847_s22 }
  0x6f   : > { %1354 = vmatpush.bf16.msra.mxu3 %v1871_v3  ;;  %v1852_v12 = vld [vmem:[%s839_s23] sm:$0xff]  ;;  %v1009_v16 = vld [vmem:[%s2246_s20 + $0x8] sm:$0xff]  ;;  %v1879_v19 = vld [vmem:[%s2228_s26 + $0x78] sm:$0xff]  ;;  %s2368_s11 = smov (!%p982_p11, %s1983_s11), 1 }
  0x70   : > { %1058 = vmatpush.bf16.msra.mxu0 %v1854_v4  ;;  %v1848_v13 = vld [vmem:[%s832_s25] sm:$0xff]  ;;  %v995_v18 = vld [vmem:[%s2253_s19 + $0x8] sm:$0xff]  ;;  %v1859_v23 = vld [vmem:[%s2225_s24 + $0x18] sm:$0xff] }
  0x71   : > { %1192 = vmatpush.bf16.msra.mxu2 %v1862_v5  ;;  %v1860_v14 = vld [vmem:[%s2225_s24 + $0x20] sm:$0xff]  ;;  %v1878_v24 = vld [vmem:[%s2228_s26 + $0x70] sm:$0xff]  ;;  %v1867_v25 = vld [vmem:[%s2228_s26 + $0x18] sm:$0xff] }
  0x72   : > { %1107 = vmatpush.bf16.msra.mxu1 %v1850_v6  ;;  %v1008_v15 = vld [vmem:[%s2246_s20] sm:$0xff]  ;;  %v1858_v26 = vld [vmem:[%s2225_s24 + $0x10] sm:$0xff]  ;;  %v1877_v27 = vld [vmem:[%s2228_s26 + $0x68] sm:$0xff] }
  0x73   : > { %1355 = vmatpush.bf16.msra.mxu3 %v1870_v7  ;;  %v994_v17 = vld [vmem:[%s2253_s19] sm:$0xff]  ;;  %v1012_v21 = vpack.c.bf16 %v1009_v16, %v1008_v15  ;;  %v1866_v28 = vld [vmem:[%s2228_s26 + $0x10] sm:$0xff]  ;;  %v1857_v29 = vld [vmem:[%s2225_s24 + $0x8] sm:$0xff] }
  0x74   : > { %1059 = vmatpush.bf16.msra.mxu0 %v1853_v8  ;;  %v1868_v20 = vld [vmem:[%s2228_s26 + $0x20] sm:$0xff]  ;;  %v998_v22 = vpack.c.bf16 %v995_v18, %v994_v17  ;;  %v1865_v31 = vld [vmem:[%s2228_s26 + $0x8] sm:$0xff]  ;;  %v1010_v33 = vld [vmem:[%s2246_s20 + $0x10] sm:$0xff] }
  0x75   : > { %1193 = vmatpush.bf16.msra.mxu2 %v1861_v9  ;;  %v1876_v30 = vld [vmem:[%s2228_s26 + $0x60] sm:$0xff]  ;;  %v1011_v34 = vld [vmem:[%s2246_s20 + $0x18] sm:$0xff]  ;;  %v1122_v36 = vld [vmem:[%s2277_s27 + $0x8] sm:$0xff]  ;;  %s984_s20 = scalar_lea.vmem %s2350_s8, %s2368_s11 }
  0x76   : > { %1108 = vmatpush.bf16.msra.mxu1 %v1849_v10  ;;  %v1856_v32 = vld [vmem:[%s2225_s24] sm:$0xff]  ;;  %v996_v37 = vld [vmem:[%s2253_s19 + $0x10] sm:$0xff]  ;;  %v997_v38 = vld [vmem:[%s2253_s19 + $0x18] sm:$0xff]  ;;  %v1013_v43 = vpack.c.bf16 %v1011_v34, %v1010_v33  ;;  %s1708_s24 = sshll.u32 %s2366_s12, 1 }
  0x77   : > { %1356 = vmatpush.bf16.msra.mxu3 %v1869_v11  ;;  %v1121_v35 = vld [vmem:[%s2277_s27] sm:$0xff]  ;;  %v1875_v39 = vld [vmem:[%s2228_s26 + $0x58] sm:$0xff]  ;;  %v1216_v42 = vld [vmem:[%s2285_s18 + $0x10] sm:$0xff]  ;;  %v999_v45 = vpack.c.bf16 %v997_v38, %v996_v37  ;;  %s2315_s19 = sadd.s32 %s1708_s24, %s2368_s11 }
  0x78   : > { %1060 = vmatpush.bf16.msra.mxu0 %v1852_v12  ;;  %v1864_v40 = vld [vmem:[%s2228_s26] sm:$0xff]  ;;  %v1125_v44 = vpack.c.bf16 %v1122_v36, %v1121_v35  ;;  %v1874_v47 = vld [vmem:[%s2228_s26 + $0x50] sm:$0xff]  ;;  %v1873_v48 = vld [vmem:[%s2228_s26 + $0x48] sm:$0xff]  ;;  %s1709_s11 = sshll.u32 %s2315_s19, 1 }
  0x79   : > { %1194 = vmatpush.bf16.msra.mxu2 %v1860_v14  ;;  %v1214_v41 = vld [vmem:[%s2285_s18] sm:$0xff]  ;;  %v1123_v50 = vld [vmem:[%s2277_s27 + $0x10] sm:$0xff]  ;;  %v1124_v51 = vld [vmem:[%s2277_s27 + $0x18] sm:$0xff]  ;;  %s992_s23 = scalar_lea.vmem %s2351_s9, %s1709_s11 }
  0x7a   : > { %1109 = vmatpush.bf16.msra.mxu1 %v1848_v13  ;;  %v1222_v46 = vpack.c.bf16 %v1216_v42, %v1214_v41  ;;  %v1872_v49 = vld [vmem:[%s2228_s26 + $0x40] sm:$0xff]  ;;  %v1215_v52 = vld [vmem:[%s2285_s18 + $0x8] sm:$0xff]  ;;  %v1217_v53 = vld [vmem:[%s2285_s18 + $0x18] sm:$0xff]  ;;  %v1126_v58 = vpack.c.bf16 %v1124_v51, %v1123_v50 }
  0x7b   : > { %1357 = vmatpush.bf16.msra.mxu3 %v1868_v20  ;;  %1726 = vmatmul.msk.bf16.vlgmr.msra.gmra.mxu0 %vm1046_vm0, %v1012_v21  ;;  %v1219_v54 = vld [vmem:[%s2285_s18 + $0x28] sm:$0xff]  ;;  %v1221_v55 = vld [vmem:[%s2285_s18 + $0x38] sm:$0xff]  ;;  %v1218_v56 = vld [vmem:[%s2285_s18 + $0x20] sm:$0xff]  ;;  %v1223_v59 = vpack.c.bf16 %v1217_v53, %v1215_v52 }
  0x7c   : > { %1373 = vmatpush.bf16.msrb.mxu0 %v1879_v19  ;;  %v1220_v57 = vld [vmem:[%s2285_s18 + $0x30] sm:$0xff]  ;;  %v1225_v60 = vpack.c.bf16 %v1221_v55, %v1219_v54 }
  0x7d   : > { %1744 = vmatmul.msk.bf16.vlgmr.msra.gmra.mxu1 %vm1046_vm0, %v998_v22  ;;  %1195 = vmatpush.bf16.msra.mxu2 %v1859_v23  ;;  %v1224_v61 = vpack.c.bf16 %v1220_v57, %v1218_v56 }
  0x7e   : > { %1880 = vmatpush.bf16.msrb.mxu1 %v1879_v19  ;;  %v1944_v19 = vld [vmem:[%s984_s20] ss:$0 sm:$0xff] }
  0x7f   : > { %1358 = vmatpush.bf16.msra.mxu3 %v1867_v25 }
  0x80   : > { %1374 = vmatpush.bf16.msrb.mxu0 %v1878_v24 }
  0x81   : > { %1196 = vmatpush.bf16.msra.mxu2 %v1858_v26 }
  0x82   : > { %1881 = vmatpush.bf16.msrb.mxu1 %v1878_v24 }
  0x83   : > { %1359 = vmatpush.bf16.msra.mxu3 %v1866_v28 }
  0x84   : > { %1375 = vmatpush.bf16.msrb.mxu0 %v1877_v27 }
  0x85   : > { %1197 = vmatpush.bf16.msra.mxu2 %v1857_v29 }
  0x86   : > { %1882 = vmatpush.bf16.msrb.mxu1 %v1877_v27 }
  0x87   : > { %1360 = vmatpush.bf16.msra.mxu3 %v1865_v31 }
  0x88   : > { %1376 = vmatpush.bf16.msrb.mxu0 %v1876_v30 }
  0x89   : > { %1198 = vmatpush.bf16.msra.mxu2 %v1856_v32 }
  0x8a   : > { %1883 = vmatpush.bf16.msrb.mxu1 %v1876_v30 }
  0x8b   : > { %1361 = vmatpush.bf16.msra.mxu3 %v1864_v40  ;;  %1727 = vmatmul.msk.bf16.gmra.mxu0 %vm1046_vm0, %v1013_v43 }
  0x8c   : > { %1377 = vmatpush.bf16.msrb.mxu0 %v1875_v39  ;;  %1199 = vmatmul.bf16.vlgmr.msra.gmra.mxu2 %v1125_v44 }
  0x8d   : > { %1745 = vmatmul.msk.bf16.gmra.mxu1 %vm1046_vm0, %v999_v45 }
  0x8e   : > { %1884 = vmatpush.bf16.msrb.mxu1 %v1875_v39  ;;  %1362 = vmatmul.bf16.vlgmr.msra.gmra.mxu3 %v1222_v46 }
  0x90   : > { %1378 = vmatpush.bf16.msrb.mxu0 %v1874_v47 }
  0x92   : > { %1885 = vmatpush.bf16.msrb.mxu1 %v1874_v47 }
  0x94   : > { %1379 = vmatpush.bf16.msrb.mxu0 %v1873_v48 }
  0x96   : > { %1886 = vmatpush.bf16.msrb.mxu1 %v1873_v48 }
  0x98   : > { %1380 = vmatpush.bf16.msrb.mxu0 %v1872_v49 }
  0x9a   : > { %1887 = vmatpush.bf16.msrb.mxu1 %v1872_v49 }
  0x9b   : > { %1381 = vmatmul.bf16.vlgmr.msrb.gmra.mxu0 %v1223_v59 }
  0x9c   : > { %1204 = vmatmul.bf16.gmra.mxu2 %v1126_v58 }
  0x9d   : > { %1386 = vmatmul.bf16.vlgmr.msrb.gmra.mxu1 %v1225_v60 }
  0x9e   : > { %1367 = vmatmul.bf16.gmra.mxu3 %v1224_v61 }
  0xf8   : > { %v1062_v62 = vpop.f32.mrf.mxu0 }
  0xfa   : > { %v1111_v63 = vpop.f32.mrf.mxu1 }
  0xfb   : > { %v1112_v11 = vadd.f32 %v1111_v63, %v1062_v62 }
 0x100   : > { %v1064_v0 = vpop.f32.mrf.mxu0 }
 0x102   : > { %v1113_v1 = vpop.f32.mrf.mxu1 }
 0x103   : > { %v1114_v17 = vadd.f32 %v1113_v1, %v1064_v0 }
 0x108   : > { %v1067_v2 = vpop.f32.mrf.mxu0 }
 0x10a   : > { %v1116_v3 = vpop.f32.mrf.mxu1 }
 0x10b   : > { %v1117_v13 = vadd.f32 %v1116_v3, %v1067_v2 }
 0x10f   : > { %v1200_v4 = vpop.f32.mrf.mxu2 }
 0x110   : > { %v1069_v6 = vpop.f32.mrf.mxu0  ;;  %v1210_v14 = vadd.f32 %v1200_v4, %v1112_v11 }
 0x111   : > { %v1363_v5 = vpop.f32.mrf.mxu3 }
 0x112   : > { %v1118_v7 = vpop.f32.mrf.mxu1 }
 0x113   : > { %v1119_v30 = vadd.f32 %v1118_v7, %v1069_v6 }
 0x117   : > { %v1202_v8 = vpop.f32.mrf.mxu2 }
 0x118   : > { %v1382_v10 = vpop.f32.mrf.mxu0  ;;  %v1211_v23 = vadd.f32 %v1202_v8, %v1114_v17 }
 0x119   : > { %v1365_v9 = vpop.f32.mrf.mxu3  ;;  %v1383_v12 = vadd.f32 %v1382_v10, %v1363_v5 }
 0x11a   : > { %v1387_v15 = vpop.f32.mrf.mxu1 }
 0x11b   : > { %v1392_v18 = vadd.f32 %v1383_v12, %v1210_v14 }
 0x11d   : > { %v1400_v26 = vadd.f32 %v1944_v19, %v1392_v18 }
 0x11f   : > { %v1205_v16 = vpop.f32.mrf.mxu2  ;;  %v1408_v32 = vmul.f32 0.2, %v1400_v26  ;;  %vm1404_vm2 = vcmp.gt.f32.partialorder %v1400_v26, 0.0 }
 0x120   : > { %v1212_v20 = vadd.f32 %v1205_v16, %v1117_v13  ;;  %v1384_v22 = vpop.f32.mrf.mxu0 }
 0x121   : > { %v1368_v21 = vpop.f32.mrf.mxu3  ;;  %v1385_v25 = vadd.f32 %v1384_v22, %v1365_v9  ;;  %v1412_v40 = vsel %vm1404_vm2, %v1400_v26, %v1408_v32 }
 0x122   : > { %v1388_v24 = vadd.f32 %v1387_v15, %v1368_v21  ;;  %v1389_v35 = vpop.f32.mrf.mxu1 }
 0x123   : > { %v1393_v28 = vadd.f32 %v1385_v25, %v1211_v23 }
 0x124   : > { %v1394_v27 = vadd.f32 %v1388_v24, %v1212_v20 }
 0x125   : > { %v1401_v29 = vadd.f32 %v1944_v19, %v1393_v28 }
 0x126   : > { %v1402_v33 = vadd.f32 %v1944_v19, %v1394_v27 }
 0x127   : > { %v1207_v31 = vpop.f32.mrf.mxu2  ;;  %vm1405_vm1 = vcmp.gt.f32.partialorder %v1401_v29, 0.0  ;;  %v1409_v34 = vmul.f32 0.2, %v1401_v29 }
 0x128   : > { %v1213_v36 = vadd.f32 %v1207_v31, %v1119_v30  ;;  %v1410_v41 = vmul.f32 0.2, %v1402_v33  ;;  %vm1406_vm3 = vcmp.gt.f32.partialorder %v1402_v33, 0.0 }
 0x129   : > { %v1370_v37 = vpop.f32.mrf.mxu3  ;;  %v1413_v38 = vsel %vm1405_vm1, %v1401_v29, %v1409_v34 }
 0x12a   : > { %v1390_v39 = vadd.f32 %v1389_v35, %v1370_v37  ;;  %v1425_v43 = vadd.f32 %v1413_v38, %v1412_v40  ;;  %v1414_v45 = vsel %vm1406_vm3, %v1402_v33, %v1410_v41  ;;  %v1416_v49 = vmax.f32 %v1412_v40, %v1413_v38 }
 0x12c   : > { %v1395_v42 = vadd.f32 %v1390_v39, %v1213_v36  ;;  %v1426_v47 = vadd.f32 %v1425_v43, %v1414_v45 }
 0x12e   : > { %v1403_v44 = vadd.f32 %v1944_v19, %v1395_v42 }
 0x130   : > { %vm1407_vm4 = vcmp.gt.f32.partialorder %v1403_v44, 0.0  ;;  %v1411_v46 = vmul.f32 0.2, %v1403_v44 }
 0x132   : > { %v1415_v48 = vsel %vm1407_vm4, %v1403_v44, %v1411_v46 }
 0x133   : > { %v1417_v50 = vmax.f32 %v1414_v45, %v1415_v48  ;;  %v1427_v51 = vadd.f32 %v1426_v47, %v1415_v48 }
 0x135   : > { %v1418_v52 = vmax.f32 %v1416_v49, %v1417_v50  ;;  %v1428_v53 = vrot.slane %v1427_v51, 4 }
 0x137   : > { %v1419_v54 = vrot.slane %v1418_v52, 4  ;;  %v1429_v55 = vadd.f32 %v1428_v53, %v1427_v51 }
 0x139   : > { %v1420_v56 = vmax.f32 %v1418_v52, %v1419_v54  ;;  %v1430_v57 = vrot.slane %v1429_v55, 2 }
 0x13b   : > { %v1421_v58 = vrot.slane %v1420_v56, 2  ;;  %v1431_v59 = vadd.f32 %v1430_v57, %v1429_v55 }
 0x13d   : > { %v1422_v60 = vmax.f32 %v1420_v56, %v1421_v58  ;;  %v1432_v61 = vrot.slane %v1431_v59, 1 }
 0x13f   : > { %v1423_v62 = vrot.slane %v1422_v60, 1  ;;  %v1433_v63 = vadd.f32 %v1432_v61, %v1431_v59 }
 0x141   : > { %v1424_v0 = vmax.f32 %v1422_v60, %v1423_v62  ;;  %1439 = vst [vmem:[%s992_s23 + $0x1] sm:$0x1] %v1433_v63 }
 0x143   : > { %1438 = vst [vmem:[%s992_s23] sm:$0x1] %v1424_v0 }
 0x148   : > { %v1453_v1 = vld [vmem:[%s992_s23 + $0x1] sm:$0x1] }
 0x149   : > { %v1454_v2 = vmul.f32 0.03125, %v1453_v1 }
 0x14b   : > { %1455 = vst [vmem:[%s992_s23 + $0x1] sm:$0x1] %v1454_v2 }
 0x14c PF: > { %s19_s15 = sadd.s32 1, %s1999_s15   ;;  %s2353_s30 = smov %s1979_s10 }
 0x14d   : > { %p16_p12 = scmp.ge.s32.totalorder %s19_s15, 6   ;;  %s2354_s10 = smov %s2104_s21 }
 0x14e   : > { %s2355_s11 = smov %s1991_s13  ;;  %s2356_s12 = smov %s1995_s14 }
 0x14f   : > { %s2357_s13 = smov %s2360_s16  ;;  %s2358_s14 = smov %s2364_s17 }
 0x150   :  { %18 = sbr.rel (!%p16_p12) target bundleno = 4 (0x4), region = 306 }

// kernel: dgcnn_forward.19
= control target key start
LH: loop header
LB: loop body
LE: loop exit
PB: predicated region body
PF: predicated region fallthrough
CT: control target
= control target key end

     0   :  { %s4095_s0 = inlined_call_operand.vmem [shape: f32[2,512], index: 0, kind: input, shape index: {}]   ;;  %s4096_s1 = inlined_call_operand.vmem [shape: bf16[512,512], index: 1, kind: input, shape index: {}]   ;;  %s4097_s2 = inlined_call_operand.vmem [shape: f32[1,512], index: 2, kind: input, shape index: {}]   ;;  %s4098_s3 = inlined_call_operand.vmem [shape: bf16[512,256], index: 3, kind: input, shape index: {}]   ;;  %s4099_s4 = inlined_call_operand.vmem [shape: f32[1,256], index: 4, kind: input, shape index: {}]   ;;  %s4100_s5 = inlined_call_operand.vmem [shape: bf16[256,40], index: 5, kind: input, shape index: {}]   ;;  %s4101_s6 = inlined_call_operand.vmem [shape: f32[1,40], index: 6, kind: input, shape index: {}]   ;;  %s4102_s7 = inlined_call_operand.hbm [shape: f32[2,40], index: 7, kind: output, shape index: {}]  }
   0x1   :  { %v1848_v0 = vld [vmem:[%s4096_s1 + $0xe0] sm:$0xf]  ;;  %v2596_v1 = vld [vmem:[%s4096_s1 + $0xec] sm:$0xf0] }
   0x2   :  { %v1976_v2 = vld [vmem:[%s4096_s1 + $0x1e0] sm:$0xf]  ;;  %v1849_v3 = vor.u32 %v2596_v1, %v1848_v0  ;;  %v2628_v4 = vld [vmem:[%s4096_s1 + $0x1ec] sm:$0xf0] }
   0x3   :  { %v2104_v5 = vld [vmem:[%s4096_s1 + $0x2e0] sm:$0xf]  ;;  %v2660_v6 = vld [vmem:[%s4096_s1 + $0x2ec] sm:$0xf0]  ;;  %v1977_v7 = vor.u32 %v2628_v4, %v1976_v2 }
   0x4   :  { %v2105_v8 = vor.u32 %v2660_v6, %v2104_v5  ;;  %v2232_v9 = vld [vmem:[%s4096_s1 + $0x3e0] sm:$0xf]  ;;  %v2692_v10 = vld [vmem:[%s4096_s1 + $0x3ec] sm:$0xf0]  ;;  %820 = vmatpush.bf16.msra.mxu0 %v1849_v3 }
   0x5   :  { %v1832_v11 = vld [vmem:[%s4096_s1 + $0xc0] sm:$0xf]  ;;  %v2233_v12 = vor.u32 %v2692_v10, %v2232_v9  ;;  %v2592_v13 = vld [vmem:[%s4096_s1 + $0xcc] sm:$0xf0]  ;;  %833 = vmatpush.bf16.msra.mxu1 %v1977_v7 }
   0x6   :  { %v1960_v14 = vld [vmem:[%s4096_s1 + $0x1c0] sm:$0xf]  ;;  %v2624_v15 = vld [vmem:[%s4096_s1 + $0x1cc] sm:$0xf0]  ;;  %846 = vmatpush.bf16.msra.mxu2 %v2105_v8  ;;  %v1833_v16 = vor.u32 %v2592_v13, %v1832_v11 }
   0x7   :  { %v1961_v17 = vor.u32 %v2624_v15, %v1960_v14  ;;  %v2088_v18 = vld [vmem:[%s4096_s1 + $0x2c0] sm:$0xf]  ;;  %v2656_v19 = vld [vmem:[%s4096_s1 + $0x2cc] sm:$0xf0]  ;;  %859 = vmatpush.bf16.msra.mxu3 %v2233_v12 }
   0x8   :  { %v2216_v20 = vld [vmem:[%s4096_s1 + $0x3c0] sm:$0xf]  ;;  %v2089_v21 = vor.u32 %v2656_v19, %v2088_v18  ;;  %v2688_v22 = vld [vmem:[%s4096_s1 + $0x3cc] sm:$0xf0]  ;;  %821 = vmatpush.bf16.msra.mxu0 %v1833_v16 }
   0x9   :  { %v1816_v23 = vld [vmem:[%s4096_s1 + $0xa0] sm:$0xf]  ;;  %v2588_v24 = vld [vmem:[%s4096_s1 + $0xac] sm:$0xf0]  ;;  %v2217_v25 = vor.u32 %v2688_v22, %v2216_v20  ;;  %834 = vmatpush.bf16.msra.mxu1 %v1961_v17 }
   0xa   :  { %v1944_v26 = vld [vmem:[%s4096_s1 + $0x1a0] sm:$0xf]  ;;  %v2620_v27 = vld [vmem:[%s4096_s1 + $0x1ac] sm:$0xf0]  ;;  %v1817_v29 = vor.u32 %v2588_v24, %v1816_v23  ;;  %847 = vmatpush.bf16.msra.mxu2 %v2089_v21 }
   0xb   :  { %v2072_v28 = vld [vmem:[%s4096_s1 + $0x2a0] sm:$0xf]  ;;  %v2652_v30 = vld [vmem:[%s4096_s1 + $0x2ac] sm:$0xf0]  ;;  %v1945_v33 = vor.u32 %v2620_v27, %v1944_v26  ;;  %860 = vmatpush.bf16.msra.mxu3 %v2217_v25 }
   0xc   :  { %v2200_v31 = vld [vmem:[%s4096_s1 + $0x3a0] sm:$0xf]  ;;  %v2684_v32 = vld [vmem:[%s4096_s1 + $0x3ac] sm:$0xf0]  ;;  %v2073_v34 = vor.u32 %v2652_v30, %v2072_v28  ;;  %822 = vmatpush.bf16.msra.mxu0 %v1817_v29  ;;  %v2594_v29 = vld [vmem:[%s4096_s1 + $0xe4] sm:$0xf] }
   0xd   :  { %v1800_v35 = vld [vmem:[%s4096_s1 + $0x80] sm:$0xf]  ;;  %v2584_v36 = vld [vmem:[%s4096_s1 + $0x8c] sm:$0xf0]  ;;  %v2201_v38 = vor.u32 %v2684_v32, %v2200_v31  ;;  %835 = vmatpush.bf16.msra.mxu1 %v1945_v33  ;;  %v1850_v30 = vld [vmem:[%s4096_s1 + $0xf0] sm:$0xf0] }
   0xe   :  { %v1928_v37 = vld [vmem:[%s4096_s1 + $0x180] sm:$0xf]  ;;  %v2616_v39 = vld [vmem:[%s4096_s1 + $0x18c] sm:$0xf0]  ;;  %v1801_v44 = vor.u32 %v2584_v36, %v1800_v35  ;;  %848 = vmatpush.bf16.msra.mxu2 %v2073_v34  ;;  %v2626_v31 = vld [vmem:[%s4096_s1 + $0x1e4] sm:$0xf] }
   0xf   :  { %v2056_v40 = vld [vmem:[%s4096_s1 + $0x280] sm:$0xf]  ;;  %v2648_v41 = vld [vmem:[%s4096_s1 + $0x28c] sm:$0xf0]  ;;  %v1929_v45 = vor.u32 %v2616_v39, %v1928_v37  ;;  %861 = vmatpush.bf16.msra.mxu3 %v2201_v38  ;;  %v1978_v33 = vld [vmem:[%s4096_s1 + $0x1f0] sm:$0xf0] }
  0x10   :  { %v2184_v42 = vld [vmem:[%s4096_s1 + $0x380] sm:$0xf]  ;;  %v2680_v43 = vld [vmem:[%s4096_s1 + $0x38c] sm:$0xf0]  ;;  %v2057_v46 = vor.u32 %v2648_v41, %v2056_v40  ;;  %823 = vmatpush.bf16.msra.mxu0 %v1801_v44  ;;  %v2658_v34 = vld [vmem:[%s4096_s1 + $0x2e4] sm:$0xf]  ;;  %v1853_v41 = vor.u32 %v2594_v29, %v1850_v30  ;;  %v1981_v44 = vor.u32 %v2626_v31, %v1978_v33 }
  0x11   :  { %v1784_v47 = vld [vmem:[%s4096_s1 + $0x60] sm:$0xf]  ;;  %v2580_v48 = vld [vmem:[%s4096_s1 + $0x6c] sm:$0xf0]  ;;  %v2185_v50 = vor.u32 %v2680_v43, %v2184_v42  ;;  %836 = vmatpush.bf16.msra.mxu1 %v1929_v45  ;;  %v2106_v35 = vld [vmem:[%s4096_s1 + $0x2f0] sm:$0xf0] }
  0x12   :  { %v1912_v49 = vld [vmem:[%s4096_s1 + $0x160] sm:$0xf]  ;;  %v2612_v51 = vld [vmem:[%s4096_s1 + $0x16c] sm:$0xf0]  ;;  %v1785_v56 = vor.u32 %v2580_v48, %v1784_v47  ;;  %849 = vmatpush.bf16.msra.mxu2 %v2057_v46  ;;  %v2690_v38 = vld [vmem:[%s4096_s1 + $0x3e4] sm:$0xf]  ;;  %v2109_v45 = vor.u32 %v2658_v34, %v2106_v35 }
  0x13   :  { %v2040_v52 = vld [vmem:[%s4096_s1 + $0x260] sm:$0xf]  ;;  %v2644_v53 = vld [vmem:[%s4096_s1 + $0x26c] sm:$0xf0]  ;;  %v1913_v57 = vor.u32 %v2612_v51, %v1912_v49  ;;  %862 = vmatpush.bf16.msra.mxu3 %v2185_v50  ;;  %v2234_v39 = vld [vmem:[%s4096_s1 + $0x3f0] sm:$0xf0] }
  0x14   :  { %v2168_v54 = vld [vmem:[%s4096_s1 + $0x360] sm:$0xf]  ;;  %v2676_v55 = vld [vmem:[%s4096_s1 + $0x36c] sm:$0xf0]  ;;  %v2041_v58 = vor.u32 %v2644_v53, %v2040_v52  ;;  %824 = vmatpush.bf16.msra.mxu0 %v1785_v56  ;;  %v2590_v42 = vld [vmem:[%s4096_s1 + $0xc4] sm:$0xf]  ;;  %v2237_v49 = vor.u32 %v2690_v38, %v2234_v39 }
  0x15   :  { %v1768_v59 = vld [vmem:[%s4096_s1 + $0x40] sm:$0xf]  ;;  %v2576_v60 = vld [vmem:[%s4096_s1 + $0x4c] sm:$0xf0]  ;;  %v2169_v62 = vor.u32 %v2676_v55, %v2168_v54  ;;  %837 = vmatpush.bf16.msra.mxu1 %v1913_v57  ;;  %v1834_v43 = vld [vmem:[%s4096_s1 + $0xd0] sm:$0xf0] }
  0x16   :  { %v1896_v61 = vld [vmem:[%s4096_s1 + $0x140] sm:$0xf]  ;;  %v2608_v63 = vld [vmem:[%s4096_s1 + $0x14c] sm:$0xf0]  ;;  %v1769_v4 = vor.u32 %v2576_v60, %v1768_v59  ;;  %850 = vmatpush.bf16.msra.mxu2 %v2041_v58  ;;  %v2622_v46 = vld [vmem:[%s4096_s1 + $0x1c4] sm:$0xf]  ;;  %v1837_v54 = vor.u32 %v2590_v42, %v1834_v43 }
  0x17   :  { %v2024_v0 = vld [vmem:[%s4096_s1 + $0x240] sm:$0xf]  ;;  %v2640_v1 = vld [vmem:[%s4096_s1 + $0x24c] sm:$0xf0]  ;;  %v1897_v5 = vor.u32 %v2608_v63, %v1896_v61  ;;  %863 = vmatpush.bf16.msra.mxu3 %v2169_v62  ;;  %v1962_v47 = vld [vmem:[%s4096_s1 + $0x1d0] sm:$0xf0] }
  0x18   :  { %v2152_v2 = vld [vmem:[%s4096_s1 + $0x340] sm:$0xf]  ;;  %v2672_v3 = vld [vmem:[%s4096_s1 + $0x34c] sm:$0xf0]  ;;  %v2025_v6 = vor.u32 %v2640_v1, %v2024_v0  ;;  %825 = vmatpush.bf16.msra.mxu0 %v1769_v4  ;;  %v2654_v48 = vld [vmem:[%s4096_s1 + $0x2c4] sm:$0xf]  ;;  %v1965_v57 = vor.u32 %v2622_v46, %v1962_v47 }
  0x19   :  { %v1752_v7 = vld [vmem:[%s4096_s1 + $0x20] sm:$0xf]  ;;  %v2572_v8 = vld [vmem:[%s4096_s1 + $0x2c] sm:$0xf0]  ;;  %v2153_v10 = vor.u32 %v2672_v3, %v2152_v2  ;;  %838 = vmatpush.bf16.msra.mxu1 %v1897_v5  ;;  %v2090_v50 = vld [vmem:[%s4096_s1 + $0x2d0] sm:$0xf0] }
  0x1a   :  { %v1880_v9 = vld [vmem:[%s4096_s1 + $0x120] sm:$0xf]  ;;  %v2604_v11 = vld [vmem:[%s4096_s1 + $0x12c] sm:$0xf0]  ;;  %v1753_v17 = vor.u32 %v2572_v8, %v1752_v7  ;;  %851 = vmatpush.bf16.msra.mxu2 %v2025_v6  ;;  %v2686_v51 = vld [vmem:[%s4096_s1 + $0x3c4] sm:$0xf]  ;;  %v2093_v61 = vor.u32 %v2654_v48, %v2090_v50 }
  0x1b   :  { %v2008_v12 = vld [vmem:[%s4096_s1 + $0x220] sm:$0xf]  ;;  %v2636_v13 = vld [vmem:[%s4096_s1 + $0x22c] sm:$0xf0]  ;;  %v1881_v21 = vor.u32 %v2604_v11, %v1880_v9  ;;  %864 = vmatpush.bf16.msra.mxu3 %v2153_v10  ;;  %v2218_v52 = vld [vmem:[%s4096_s1 + $0x3d0] sm:$0xf0] }
  0x1c   :  { %v2136_v14 = vld [vmem:[%s4096_s1 + $0x320] sm:$0xf]  ;;  %v2668_v15 = vld [vmem:[%s4096_s1 + $0x32c] sm:$0xf0]  ;;  %v2009_v22 = vor.u32 %v2636_v13, %v2008_v12  ;;  %826 = vmatpush.bf16.msra.mxu0 %v1753_v17  ;;  %v2586_v0 = vld [vmem:[%s4096_s1 + $0xa4] sm:$0xf]  ;;  %v2221_v3 = vor.u32 %v2686_v51, %v2218_v52 }
  0x1d   :  { %v1736_v16 = vld [vmem:[%s4096_s1] sm:$0xf]  ;;  %v2568_v18 = vld [vmem:[%s4096_s1 + $0xc] sm:$0xf0]  ;;  %v2137_v26 = vor.u32 %v2668_v15, %v2136_v14  ;;  %839 = vmatpush.bf16.msra.mxu1 %v1881_v21  ;;  %v1818_v1 = vld [vmem:[%s4096_s1 + $0xb0] sm:$0xf0] }
  0x1e   :  { %v1864_v19 = vld [vmem:[%s4096_s1 + $0x100] sm:$0xf]  ;;  %v2600_v20 = vld [vmem:[%s4096_s1 + $0x10c] sm:$0xf0]  ;;  %v1737_v32 = vor.u32 %v2568_v18, %v1736_v16  ;;  %852 = vmatpush.bf16.msra.mxu2 %v2009_v22  ;;  %v2618_v2 = vld [vmem:[%s4096_s1 + $0x1a4] sm:$0xf]  ;;  %v1821_v9 = vor.u32 %v2586_v0, %v1818_v1 }
  0x1f   :  { %v1992_v23 = vld [vmem:[%s4096_s1 + $0x200] sm:$0xf]  ;;  %v2632_v24 = vld [vmem:[%s4096_s1 + $0x20c] sm:$0xf0]  ;;  %v1865_v36 = vor.u32 %v2600_v20, %v1864_v19  ;;  %865 = vmatpush.bf16.msra.mxu3 %v2137_v26  ;;  %v1946_v4 = vld [vmem:[%s4096_s1 + $0x1b0] sm:$0xf0] }
  0x20   :  { %v27_v25 = vld [vmem:[%s4095_s0] sm:$0xff]  ;;  %v2664_v28 = vld [vmem:[%s4096_s1 + $0x30c] sm:$0xf0]  ;;  %v1993_v37 = vor.u32 %v2632_v24, %v1992_v23  ;;  %827 = vmatpush.bf16.msra.mxu0 %v1737_v32  ;;  %v2074_v6 = vld [vmem:[%s4096_s1 + $0x2b0] sm:$0xf0]  ;;  %v1949_v10 = vor.u32 %v2618_v2, %v1946_v4 }
  0x21   :  { %v2120_v27 = vld [vmem:[%s4096_s1 + $0x300] sm:$0xf]  ;;  %29 = vst [vmem:[#allocation1] ss:$4 sm:$0xff] %v27_v25  ;;  %840 = vmatpush.bf16.msra.mxu1 %v1865_v36  ;;  %v2650_v5 = vld [vmem:[%s4096_s1 + $0x2a4] sm:$0xf] }
  0x22   :  { %v2121_v40 = vor.u32 %v2664_v28, %v2120_v27  ;;  %853 = vmatpush.bf16.msra.mxu2 %v1993_v37  ;;  %v2682_v7 = vld [vmem:[%s4096_s1 + $0x3a4] sm:$0xf]  ;;  %v2202_v8 = vld [vmem:[%s4096_s1 + $0x3b0] sm:$0xf0]  ;;  %v2077_v11 = vor.u32 %v2650_v5, %v2074_v6 }
  0x23   :  { %v2582_v12 = vld [vmem:[%s4096_s1 + $0x84] sm:$0xf]  ;;  %v1802_v13 = vld [vmem:[%s4096_s1 + $0x90] sm:$0xf0]  ;;  %v2205_v15 = vor.u32 %v2682_v7, %v2202_v8 }
  0x24   :  { %866 = vmatpush.bf16.msra.mxu3 %v2121_v40  ;;  %872 = vmatpush.bf16.msrb.mxu0 %v1853_v41  ;;  %v2614_v14 = vld [vmem:[%s4096_s1 + $0x184] sm:$0xf]  ;;  %v1930_v16 = vld [vmem:[%s4096_s1 + $0x190] sm:$0xf0]  ;;  %v1805_v21 = vor.u32 %v2582_v12, %v1802_v13  ;;  %v2629_v13 = vld [vmem:[%s4096_s1 + $0x1f4] sm:$0xf0] }
  0x25   :  { %885 = vmatpush.bf16.msrb.mxu1 %v1981_v44  ;;  %v2646_v17 = vld [vmem:[%s4096_s1 + $0x284] sm:$0xf]  ;;  %v2058_v18 = vld [vmem:[%s4096_s1 + $0x290] sm:$0xf0]  ;;  %v1933_v22 = vor.u32 %v2614_v14, %v1930_v16  ;;  %v2112_v14 = vld [vmem:[%s4096_s1 + $0x2e8] sm:$0xf] }
  0x26   :  { %898 = vmatpush.bf16.msrb.mxu2 %v2109_v45  ;;  %v2678_v19 = vld [vmem:[%s4096_s1 + $0x384] sm:$0xf]  ;;  %v2186_v20 = vld [vmem:[%s4096_s1 + $0x390] sm:$0xf0]  ;;  %v2061_v23 = vor.u32 %v2646_v17, %v2058_v18  ;;  %v2240_v18 = vld [vmem:[%s4096_s1 + $0x3e8] sm:$0xf] }
  0x27   :  { %v2578_v24 = vld [vmem:[%s4096_s1 + $0x64] sm:$0xf]  ;;  %v1786_v25 = vld [vmem:[%s4096_s1 + $0x70] sm:$0xf0]  ;;  %v2189_v27 = vor.u32 %v2678_v19, %v2186_v20  ;;  %v2693_v19 = vld [vmem:[%s4096_s1 + $0x3f4] sm:$0xf0] }
  0x28   :  { %v32_v53 = vld.sshfl [vmem:[#allocation1 + $0x10] sm:$0xff pattern:$0x73625140]  ;;  %v30_v55 = vld.sshfl [vmem:[#allocation1] sm:$0xff pattern:$0x73625140]  ;;  %911 = vmatpush.bf16.msrb.mxu3 %v2237_v49  ;;  %873 = vmatpush.bf16.msrb.mxu0 %v1837_v54  ;;  %v1789_v33 = vor.u32 %v2578_v24, %v1786_v25 }
  0x29   :  { %v3090_v56 = vpack.c.bf16 %v32_v53, %v32_v53  ;;  %v3092_v58 = vpack.c.bf16 %v30_v55, %v30_v55  ;;  %v33_v59 = vld.sshfl [vmem:[#allocation1 + $0x18] sm:$0xff pattern:$0x73625140]  ;;  %v31_v60 = vld.sshfl [vmem:[#allocation1 + $0x8] sm:$0xff pattern:$0x73625140]  ;;  %886 = vmatpush.bf16.msrb.mxu1 %v1965_v57 }
  0x2a   :  { %v3094_v62 = vpack.c.bf16 %v33_v59, %v33_v59  ;;  %v3096_v63 = vpack.c.bf16 %v31_v60, %v31_v60  ;;  %899 = vmatpush.bf16.msrb.mxu2 %v2093_v61  ;;  %v2610_v26 = vld [vmem:[%s4096_s1 + $0x164] sm:$0xf]  ;;  %v1914_v28 = vld [vmem:[%s4096_s1 + $0x170] sm:$0xf0]  ;;  %v1840_v24 = vld [vmem:[%s4096_s1 + $0xc8] sm:$0xf] }
  0x2b   :  { %854 = vmatmul.bf16.vlgmr.msra.gmra.mxu2 %v3090_v56  ;;  %828 = vmatmul.bf16.vlgmr.msra.gmra.mxu0 %v3092_v58  ;;  %v2642_v29 = vld [vmem:[%s4096_s1 + $0x264] sm:$0xf]  ;;  %v2042_v30 = vld [vmem:[%s4096_s1 + $0x270] sm:$0xf0]  ;;  %v1917_v34 = vor.u32 %v2610_v26, %v1914_v28  ;;  %v2593_v25 = vld [vmem:[%s4096_s1 + $0xd4] sm:$0xf0] }
  0x2c   :  { %867 = vmatmul.bf16.vlgmr.msra.gmra.mxu3 %v3094_v62  ;;  %841 = vmatmul.bf16.vlgmr.msra.gmra.mxu1 %v3096_v63  ;;  %v2674_v31 = vld [vmem:[%s4096_s1 + $0x364] sm:$0xf]  ;;  %v2170_v32 = vld [vmem:[%s4096_s1 + $0x370] sm:$0xf0]  ;;  %v2045_v35 = vor.u32 %v2642_v29, %v2042_v30  ;;  %v1968_v26 = vld [vmem:[%s4096_s1 + $0x1c8] sm:$0xf] }
  0x2d   :  { %912 = vmatpush.bf16.msrb.mxu3 %v2221_v3  ;;  %874 = vmatpush.bf16.msrb.mxu0 %v1821_v9  ;;  %v2574_v36 = vld [vmem:[%s4096_s1 + $0x44] sm:$0xf]  ;;  %v1770_v37 = vld [vmem:[%s4096_s1 + $0x50] sm:$0xf0]  ;;  %v2173_v39 = vor.u32 %v2674_v31, %v2170_v32  ;;  %v1856_v9 = vld [vmem:[%s4096_s1 + $0xe8] sm:$0xf] }
  0x2e   :  { %887 = vmatpush.bf16.msrb.mxu1 %v1949_v10  ;;  %900 = vmatpush.bf16.msrb.mxu2 %v2077_v11  ;;  %v2606_v38 = vld [vmem:[%s4096_s1 + $0x144] sm:$0xf]  ;;  %v1898_v40 = vld [vmem:[%s4096_s1 + $0x150] sm:$0xf0]  ;;  %v1773_v45 = vor.u32 %v2574_v36, %v1770_v37  ;;  %v2597_v10 = vld [vmem:[%s4096_s1 + $0xf4] sm:$0xf0] }
  0x2f   :  { %v2638_v41 = vld [vmem:[%s4096_s1 + $0x244] sm:$0xf]  ;;  %v2026_v42 = vld [vmem:[%s4096_s1 + $0x250] sm:$0xf0]  ;;  %v1901_v46 = vor.u32 %v2606_v38, %v1898_v40  ;;  %v1984_v11 = vld [vmem:[%s4096_s1 + $0x1e8] sm:$0xf] }
  0x30   :  { %v2670_v43 = vld [vmem:[%s4096_s1 + $0x344] sm:$0xf]  ;;  %v2154_v44 = vld [vmem:[%s4096_s1 + $0x350] sm:$0xf0]  ;;  %v2029_v47 = vor.u32 %v2638_v41, %v2026_v42  ;;  %v2625_v28 = vld [vmem:[%s4096_s1 + $0x1d4] sm:$0xf0] }
  0x31   :  { %913 = vmatpush.bf16.msrb.mxu3 %v2205_v15  ;;  %875 = vmatpush.bf16.msrb.mxu0 %v1805_v21  ;;  %v2570_v48 = vld [vmem:[%s4096_s1 + $0x24] sm:$0xf]  ;;  %v1754_v49 = vld [vmem:[%s4096_s1 + $0x30] sm:$0xf0]  ;;  %v2157_v51 = vor.u32 %v2670_v43, %v2154_v44  ;;  %v2661_v15 = vld [vmem:[%s4096_s1 + $0x2f4] sm:$0xf0]  ;;  %v1857_v21 = vor.u32 %v2597_v10, %v1856_v9 }
  0x32   :  { %888 = vmatpush.bf16.msrb.mxu1 %v1933_v22  ;;  %901 = vmatpush.bf16.msrb.mxu2 %v2061_v23  ;;  %v2602_v50 = vld [vmem:[%s4096_s1 + $0x124] sm:$0xf]  ;;  %v1882_v52 = vld [vmem:[%s4096_s1 + $0x130] sm:$0xf0]  ;;  %v1757_v59 = vor.u32 %v2570_v48, %v1754_v49  ;;  %v1985_v22 = vor.u32 %v2629_v13, %v1984_v11  ;;  %v2113_v23 = vor.u32 %v2661_v15, %v2112_v14  ;;  %v2096_v29 = vld [vmem:[%s4096_s1 + $0x2c8] sm:$0xf] }
  0x33   :  { %v2634_v53 = vld [vmem:[%s4096_s1 + $0x224] sm:$0xf]  ;;  %v2010_v54 = vld [vmem:[%s4096_s1 + $0x230] sm:$0xf0]  ;;  %v1885_v0 = vor.u32 %v2602_v50, %v1882_v52  ;;  %v2657_v30 = vld [vmem:[%s4096_s1 + $0x2d4] sm:$0xf0] }
  0x34   :  { %v2666_v55 = vld [vmem:[%s4096_s1 + $0x324] sm:$0xf]  ;;  %v2138_v57 = vld [vmem:[%s4096_s1 + $0x330] sm:$0xf0]  ;;  %v2013_v1 = vor.u32 %v2634_v53, %v2010_v54  ;;  %v2224_v31 = vld [vmem:[%s4096_s1 + $0x3c8] sm:$0xf] }
  0x35   :  { %914 = vmatpush.bf16.msrb.mxu3 %v2189_v27  ;;  %876 = vmatpush.bf16.msrb.mxu0 %v1789_v33  ;;  %v2566_v60 = vld [vmem:[%s4096_s1 + $0x4] sm:$0xf]  ;;  %v1738_v61 = vld [vmem:[%s4096_s1 + $0x10] sm:$0xf0]  ;;  %v2141_v5 = vor.u32 %v2666_v55, %v2138_v57  ;;  %v2241_v27 = vor.u32 %v2693_v19, %v2240_v18  ;;  %v2689_v32 = vld [vmem:[%s4096_s1 + $0x3d4] sm:$0xf0]  ;;  %v1841_v33 = vor.u32 %v2593_v25, %v1840_v24 }
  0x36   :  { %889 = vmatpush.bf16.msrb.mxu1 %v1917_v34  ;;  %902 = vmatpush.bf16.msrb.mxu2 %v2045_v35  ;;  %v2598_v2 = vld [vmem:[%s4096_s1 + $0x104] sm:$0xf]  ;;  %v1866_v3 = vld [vmem:[%s4096_s1 + $0x110] sm:$0xf0]  ;;  %v1741_v12 = vor.u32 %v2566_v60, %v1738_v61  ;;  %v1969_v34 = vor.u32 %v2625_v28, %v1968_v26  ;;  %v2097_v35 = vor.u32 %v2657_v30, %v2096_v29  ;;  %v1824_v36 = vld [vmem:[%s4096_s1 + $0xa8] sm:$0xf] }
  0x37   :  { %v2630_v4 = vld [vmem:[%s4096_s1 + $0x204] sm:$0xf]  ;;  %v1994_v6 = vld [vmem:[%s4096_s1 + $0x210] sm:$0xf0]  ;;  %v1869_v16 = vor.u32 %v2598_v2, %v1866_v3  ;;  %v2589_v37 = vld [vmem:[%s4096_s1 + $0xb4] sm:$0xf0] }
  0x38   :  { %v2662_v7 = vld [vmem:[%s4096_s1 + $0x304] sm:$0xf]  ;;  %v2122_v8 = vld [vmem:[%s4096_s1 + $0x310] sm:$0xf0]  ;;  %v1997_v17 = vor.u32 %v2630_v4, %v1994_v6  ;;  %v1952_v38 = vld [vmem:[%s4096_s1 + $0x1a8] sm:$0xf] }
  0x39   :  { %915 = vmatpush.bf16.msrb.mxu3 %v2173_v39  ;;  %877 = vmatpush.bf16.msrb.mxu0 %v1773_v45  ;;  %v2125_v20 = vor.u32 %v2662_v7, %v2122_v8  ;;  %v2225_v39 = vor.u32 %v2689_v32, %v2224_v31  ;;  %v2621_v40 = vld [vmem:[%s4096_s1 + $0x1b4] sm:$0xf0]  ;;  %v2080_v41 = vld [vmem:[%s4096_s1 + $0x2a8] sm:$0xf]  ;;  %v1825_v45 = vor.u32 %v2589_v37, %v1824_v36 }
  0x3a   :  { %890 = vmatpush.bf16.msrb.mxu1 %v1901_v46  ;;  %903 = vmatpush.bf16.msrb.mxu2 %v2029_v47  ;;  %v2653_v42 = vld [vmem:[%s4096_s1 + $0x2b4] sm:$0xf0]  ;;  %v2208_v43 = vld [vmem:[%s4096_s1 + $0x3a8] sm:$0xf]  ;;  %v1953_v46 = vor.u32 %v2621_v40, %v1952_v38 }
  0x3b   :  { %v2685_v44 = vld [vmem:[%s4096_s1 + $0x3b4] sm:$0xf0]  ;;  %v2081_v47 = vor.u32 %v2653_v42, %v2080_v41  ;;  %v1808_v48 = vld [vmem:[%s4096_s1 + $0x88] sm:$0xf] }
  0x3c   :  { %v2585_v49 = vld [vmem:[%s4096_s1 + $0x94] sm:$0xf0]  ;;  %v1936_v50 = vld [vmem:[%s4096_s1 + $0x188] sm:$0xf] }
  0x3d   :  { %916 = vmatpush.bf16.msrb.mxu3 %v2157_v51  ;;  %878 = vmatpush.bf16.msrb.mxu0 %v1757_v59  ;;  %v2209_v51 = vor.u32 %v2685_v44, %v2208_v43  ;;  %v2617_v52 = vld [vmem:[%s4096_s1 + $0x194] sm:$0xf0]  ;;  %v2064_v53 = vld [vmem:[%s4096_s1 + $0x288] sm:$0xf]  ;;  %v1809_v59 = vor.u32 %v2585_v49, %v1808_v48 }
  0x3e   :  { %891 = vmatpush.bf16.msrb.mxu1 %v1885_v0  ;;  %904 = vmatpush.bf16.msrb.mxu2 %v2013_v1  ;;  %v2649_v54 = vld [vmem:[%s4096_s1 + $0x294] sm:$0xf0]  ;;  %v2192_v55 = vld [vmem:[%s4096_s1 + $0x388] sm:$0xf]  ;;  %v1937_v60 = vor.u32 %v2617_v52, %v1936_v50 }
  0x3f   :  { %v2681_v57 = vld [vmem:[%s4096_s1 + $0x394] sm:$0xf0]  ;;  %v2065_v61 = vor.u32 %v2649_v54, %v2064_v53  ;;  %v1792_v0 = vld [vmem:[%s4096_s1 + $0x68] sm:$0xf] }
  0x40   :  { %v2581_v1 = vld [vmem:[%s4096_s1 + $0x74] sm:$0xf0]  ;;  %v1920_v2 = vld [vmem:[%s4096_s1 + $0x168] sm:$0xf]  ;;  %v2193_v3 = vor.u32 %v2681_v57, %v2192_v55 }
  0x41   :  { %917 = vmatpush.bf16.msrb.mxu3 %v2141_v5  ;;  %879 = vmatpush.bf16.msrb.mxu0 %v1741_v12  ;;  %v2613_v4 = vld [vmem:[%s4096_s1 + $0x174] sm:$0xf0]  ;;  %v2048_v5 = vld [vmem:[%s4096_s1 + $0x268] sm:$0xf]  ;;  %v1793_v9 = vor.u32 %v2581_v1, %v1792_v0 }
  0x42   :  { %892 = vmatpush.bf16.msrb.mxu1 %v1869_v16  ;;  %905 = vmatpush.bf16.msrb.mxu2 %v1997_v17  ;;  %v2645_v6 = vld [vmem:[%s4096_s1 + $0x274] sm:$0xf0]  ;;  %v2176_v7 = vld [vmem:[%s4096_s1 + $0x368] sm:$0xf]  ;;  %v1921_v10 = vor.u32 %v2613_v4, %v1920_v2 }
  0x43   :  { %v2677_v8 = vld [vmem:[%s4096_s1 + $0x374] sm:$0xf0]  ;;  %v2049_v11 = vor.u32 %v2645_v6, %v2048_v5  ;;  %v1776_v12 = vld [vmem:[%s4096_s1 + $0x48] sm:$0xf] }
  0x44   :  { %880 = vmatmul.bf16.vlgmr.msrb.gmra.mxu0 %v3092_v58  ;;  %v2577_v13 = vld [vmem:[%s4096_s1 + $0x54] sm:$0xf0]  ;;  %v1904_v14 = vld [vmem:[%s4096_s1 + $0x148] sm:$0xf]  ;;  %v2177_v15 = vor.u32 %v2677_v8, %v2176_v7 }
  0x45   :  { %918 = vmatpush.bf16.msrb.mxu3 %v2125_v20  ;;  %924 = vmatpush.bf16.msra.mxu0 %v1857_v21  ;;  %v2609_v16 = vld [vmem:[%s4096_s1 + $0x154] sm:$0xf0]  ;;  %v2032_v17 = vld [vmem:[%s4096_s1 + $0x248] sm:$0xf]  ;;  %v1777_v21 = vor.u32 %v2577_v13, %v1776_v12 }
  0x46   :  { %937 = vmatpush.bf16.msra.mxu1 %v1985_v22  ;;  %950 = vmatpush.bf16.msra.mxu2 %v2113_v23  ;;  %v2641_v18 = vld [vmem:[%s4096_s1 + $0x254] sm:$0xf0]  ;;  %v2160_v19 = vld [vmem:[%s4096_s1 + $0x348] sm:$0xf]  ;;  %v1905_v22 = vor.u32 %v2609_v16, %v1904_v14 }
  0x47   :  { %906 = vmatmul.bf16.vlgmr.msrb.gmra.mxu2 %v3090_v56  ;;  %893 = vmatmul.bf16.vlgmr.msrb.gmra.mxu1 %v3096_v63  ;;  %v2673_v20 = vld [vmem:[%s4096_s1 + $0x354] sm:$0xf0]  ;;  %v2033_v23 = vor.u32 %v2641_v18, %v2032_v17  ;;  %v1760_v24 = vld [vmem:[%s4096_s1 + $0x28] sm:$0xf] }
  0x48   :  { %919 = vmatmul.bf16.vlgmr.msrb.gmra.mxu3 %v3094_v62  ;;  %v2573_v25 = vld [vmem:[%s4096_s1 + $0x34] sm:$0xf0]  ;;  %v1888_v26 = vld [vmem:[%s4096_s1 + $0x128] sm:$0xf] }
  0x49   :  { %963 = vmatpush.bf16.msra.mxu3 %v2241_v27  ;;  %925 = vmatpush.bf16.msra.mxu0 %v1841_v33  ;;  %v2161_v27 = vor.u32 %v2673_v20, %v2160_v19  ;;  %v2605_v28 = vld [vmem:[%s4096_s1 + $0x134] sm:$0xf0]  ;;  %v2016_v29 = vld [vmem:[%s4096_s1 + $0x228] sm:$0xf]  ;;  %v1761_v33 = vor.u32 %v2573_v25, %v1760_v24 }
  0x4a   :  { %938 = vmatpush.bf16.msra.mxu1 %v1969_v34  ;;  %951 = vmatpush.bf16.msra.mxu2 %v2097_v35  ;;  %v2637_v30 = vld [vmem:[%s4096_s1 + $0x234] sm:$0xf0]  ;;  %v2144_v31 = vld [vmem:[%s4096_s1 + $0x328] sm:$0xf] }
  0x4b   :  { %v2669_v32 = vld [vmem:[%s4096_s1 + $0x334] sm:$0xf0]  ;;  %v1744_v34 = vld [vmem:[%s4096_s1 + $0x8] sm:$0xf] }
  0x4c   :  { %v2569_v35 = vld [vmem:[%s4096_s1 + $0x14] sm:$0xf0] }
  0x4d   :  { %964 = vmatpush.bf16.msra.mxu3 %v2225_v39  ;;  %926 = vmatpush.bf16.msra.mxu0 %v1825_v45 }
  0x4e   :  { %939 = vmatpush.bf16.msra.mxu1 %v1953_v46  ;;  %952 = vmatpush.bf16.msra.mxu2 %v2081_v47 }
  0x51   :  { %965 = vmatpush.bf16.msra.mxu3 %v2209_v51  ;;  %927 = vmatpush.bf16.msra.mxu0 %v1809_v59 }
  0x52   :  { %940 = vmatpush.bf16.msra.mxu1 %v1937_v60  ;;  %953 = vmatpush.bf16.msra.mxu2 %v2065_v61 }
  0x55   :  { %966 = vmatpush.bf16.msra.mxu3 %v2193_v3  ;;  %928 = vmatpush.bf16.msra.mxu0 %v1793_v9 }
  0x56   :  { %941 = vmatpush.bf16.msra.mxu1 %v1921_v10  ;;  %954 = vmatpush.bf16.msra.mxu2 %v2049_v11 }
  0x59   :  { %967 = vmatpush.bf16.msra.mxu3 %v2177_v15  ;;  %929 = vmatpush.bf16.msra.mxu0 %v1777_v21 }
  0x5a   :  { %12 = vsyncpa [#allocation3], 0  ;;  %942 = vmatpush.bf16.msra.mxu1 %v1905_v22  ;;  %955 = vmatpush.bf16.msra.mxu2 %v2033_v23  ;;  %v1889_v36 = vor.u32 %v2605_v28, %v1888_v26  ;;  %v2017_v37 = vor.u32 %v2637_v30, %v2016_v29  ;;  %v1872_v38 = vld [vmem:[%s4096_s1 + $0x108] sm:$0xf]  ;;  %v2601_v39 = vld [vmem:[%s4096_s1 + $0x114] sm:$0xf0]  ;;  %v2145_v41 = vor.u32 %v2669_v32, %v2144_v31 }
  0x5b   :  { %v2000_v40 = vld [vmem:[%s4096_s1 + $0x208] sm:$0xf]  ;;  %v2633_v42 = vld [vmem:[%s4096_s1 + $0x214] sm:$0xf0]  ;;  %v2595_v45 = vld [vmem:[%s4096_s1 + $0xec] sm:$0xf]  ;;  %v1745_v48 = vor.u32 %v2569_v35, %v1744_v34  ;;  %v1873_v52 = vor.u32 %v2601_v39, %v1872_v38 }
  0x5c   :  { %v2128_v43 = vld [vmem:[%s4096_s1 + $0x308] sm:$0xf]  ;;  %v2665_v44 = vld [vmem:[%s4096_s1 + $0x314] sm:$0xf0]  ;;  %v1858_v46 = vld [vmem:[%s4096_s1 + $0xf8] sm:$0xf0]  ;;  %v2001_v53 = vor.u32 %v2633_v42, %v2000_v40 }
  0x5d   :  { %968 = vmatpush.bf16.msra.mxu3 %v2161_v27  ;;  %v2627_v47 = vld [vmem:[%s4096_s1 + $0x1ec] sm:$0xf]  ;;  %930 = vmatpush.bf16.msra.mxu0 %v1761_v33  ;;  %v1986_v49 = vld [vmem:[%s4096_s1 + $0x1f8] sm:$0xf0]  ;;  %v2129_v57 = vor.u32 %v2665_v44, %v2128_v43  ;;  %v1861_v59 = vor.u32 %v2595_v45, %v1858_v46  ;;  %vm1704_vm6 = vcmask 320512   ;;  %s1725_s24 = sshll.u32 %s4102_s7, 4  ;;  %s1726_s24 = int_to_ptr.hbm [resolvable:$true] %s1725_s24 }
  0x5e   :  { %v2659_v50 = vld [vmem:[%s4096_s1 + $0x2ec] sm:$0xf]  ;;  %v2114_v51 = vld [vmem:[%s4096_s1 + $0x2f8] sm:$0xf0]  ;;  %943 = vmatpush.bf16.msra.mxu1 %v1889_v36  ;;  %956 = vmatpush.bf16.msra.mxu2 %v2017_v37  ;;  %v1989_v60 = vor.u32 %v2627_v47, %v1986_v49 }
  0x5f   :  { %v2691_v54 = vld [vmem:[%s4096_s1 + $0x3ec] sm:$0xf]  ;;  %v2242_v55 = vld [vmem:[%s4096_s1 + $0x3f8] sm:$0xf0]  ;;  %v2117_v61 = vor.u32 %v2659_v50, %v2114_v51 }
  0x60   :  { %v2591_v0 = vld [vmem:[%s4096_s1 + $0xcc] sm:$0xf]  ;;  %v1842_v1 = vld [vmem:[%s4096_s1 + $0xd8] sm:$0xf0]  ;;  %v2245_v3 = vor.u32 %v2691_v54, %v2242_v55 }
  0x61   :  { %969 = vmatpush.bf16.msra.mxu3 %v2145_v41  ;;  %v2623_v2 = vld [vmem:[%s4096_s1 + $0x1cc] sm:$0xf]  ;;  %931 = vmatpush.bf16.msra.mxu0 %v1745_v48  ;;  %v1970_v4 = vld [vmem:[%s4096_s1 + $0x1d8] sm:$0xf0]  ;;  %v1845_v9 = vor.u32 %v2591_v0, %v1842_v1 }
  0x62   :  { %v2655_v5 = vld [vmem:[%s4096_s1 + $0x2cc] sm:$0xf]  ;;  %v2098_v6 = vld [vmem:[%s4096_s1 + $0x2d8] sm:$0xf0]  ;;  %944 = vmatpush.bf16.msra.mxu1 %v1873_v52  ;;  %957 = vmatpush.bf16.msra.mxu2 %v2001_v53  ;;  %v1973_v10 = vor.u32 %v2623_v2, %v1970_v4 }
  0x63   :  { %v2687_v7 = vld [vmem:[%s4096_s1 + $0x3cc] sm:$0xf]  ;;  %v2226_v8 = vld [vmem:[%s4096_s1 + $0x3d8] sm:$0xf0]  ;;  %v2101_v11 = vor.u32 %v2655_v5, %v2098_v6 }
  0x64   :  { %v2587_v12 = vld [vmem:[%s4096_s1 + $0xac] sm:$0xf]  ;;  %v1826_v13 = vld [vmem:[%s4096_s1 + $0xb8] sm:$0xf0]  ;;  %v2229_v15 = vor.u32 %v2687_v7, %v2226_v8  ;;  %932 = vmatmul.bf16.vlgmr.msra.gmra.mxu0 %v3092_v58 }
  0x65   :  { %970 = vmatpush.bf16.msra.mxu3 %v2129_v57  ;;  %976 = vmatpush.bf16.msrb.mxu0 %v1861_v59  ;;  %v2619_v14 = vld [vmem:[%s4096_s1 + $0x1ac] sm:$0xf]  ;;  %v1954_v16 = vld [vmem:[%s4096_s1 + $0x1b8] sm:$0xf0]  ;;  %v1829_v21 = vor.u32 %v2587_v12, %v1826_v13 }
  0x66   :  { %989 = vmatpush.bf16.msrb.mxu1 %v1989_v60  ;;  %1002 = vmatpush.bf16.msrb.mxu2 %v2117_v61  ;;  %v2651_v17 = vld [vmem:[%s4096_s1 + $0x2ac] sm:$0xf]  ;;  %v2082_v18 = vld [vmem:[%s4096_s1 + $0x2b8] sm:$0xf0]  ;;  %v1957_v22 = vor.u32 %v2619_v14, %v1954_v16 }
  0x67   :  { %958 = vmatmul.bf16.vlgmr.msra.gmra.mxu2 %v3090_v56  ;;  %v2683_v19 = vld [vmem:[%s4096_s1 + $0x3ac] sm:$0xf]  ;;  %v2210_v20 = vld [vmem:[%s4096_s1 + $0x3b8] sm:$0xf0]  ;;  %945 = vmatmul.bf16.vlgmr.msra.gmra.mxu1 %v3096_v63  ;;  %v2085_v23 = vor.u32 %v2651_v17, %v2082_v18 }
  0x68   :  { %971 = vmatmul.bf16.vlgmr.msra.gmra.mxu3 %v3094_v62  ;;  %v2583_v24 = vld [vmem:[%s4096_s1 + $0x8c] sm:$0xf]  ;;  %v1810_v25 = vld [vmem:[%s4096_s1 + $0x98] sm:$0xf0]  ;;  %v2213_v27 = vor.u32 %v2683_v19, %v2210_v20 }
  0x69   :  { %1015 = vmatpush.bf16.msrb.mxu3 %v2245_v3  ;;  %977 = vmatpush.bf16.msrb.mxu0 %v1845_v9  ;;  %v2615_v26 = vld [vmem:[%s4096_s1 + $0x18c] sm:$0xf]  ;;  %v1938_v28 = vld [vmem:[%s4096_s1 + $0x198] sm:$0xf0]  ;;  %v1813_v33 = vor.u32 %v2583_v24, %v1810_v25 }
  0x6a   :  { %990 = vmatpush.bf16.msrb.mxu1 %v1973_v10  ;;  %1003 = vmatpush.bf16.msrb.mxu2 %v2101_v11  ;;  %v2647_v29 = vld [vmem:[%s4096_s1 + $0x28c] sm:$0xf]  ;;  %v2066_v30 = vld [vmem:[%s4096_s1 + $0x298] sm:$0xf0]  ;;  %v1941_v34 = vor.u32 %v2615_v26, %v1938_v28  ;;  %v2368_v28 = vld [vmem:[%s4098_s3 + $0xf0] sm:$0xf] }
  0x6b   :  { %v2679_v31 = vld [vmem:[%s4096_s1 + $0x38c] sm:$0xf]  ;;  %v2194_v32 = vld [vmem:[%s4096_s1 + $0x398] sm:$0xf0]  ;;  %v2069_v35 = vor.u32 %v2647_v29, %v2066_v30  ;;  %v2725_v29 = vld [vmem:[%s4098_s3 + $0xf4] sm:$0xf0] }
  0x6c   :  { %v2579_v36 = vld [vmem:[%s4096_s1 + $0x6c] sm:$0xf]  ;;  %v1794_v37 = vld [vmem:[%s4096_s1 + $0x78] sm:$0xf0]  ;;  %v2197_v39 = vor.u32 %v2679_v31, %v2194_v32  ;;  %v2296_v30 = vld [vmem:[%s4098_s3 + $0x60] sm:$0xf]  ;;  %v2369_v32 = vor.u32 %v2725_v29, %v2368_v28 }
  0x6d   :  { %1016 = vmatpush.bf16.msrb.mxu3 %v2229_v15  ;;  %978 = vmatpush.bf16.msrb.mxu0 %v1829_v21  ;;  %v2611_v38 = vld [vmem:[%s4096_s1 + $0x16c] sm:$0xf]  ;;  %v1922_v40 = vld [vmem:[%s4096_s1 + $0x178] sm:$0xf0]  ;;  %v1797_v45 = vor.u32 %v2579_v36, %v1794_v37  ;;  %v2304_v21 = vld [vmem:[%s4098_s3 + $0x70] sm:$0xf] }
  0x6e   :  { %991 = vmatpush.bf16.msrb.mxu1 %v1957_v22  ;;  %1004 = vmatpush.bf16.msrb.mxu2 %v2085_v23  ;;  %v2643_v41 = vld [vmem:[%s4096_s1 + $0x26c] sm:$0xf]  ;;  %v2050_v42 = vld [vmem:[%s4096_s1 + $0x278] sm:$0xf0]  ;;  %v1925_v46 = vor.u32 %v2611_v38, %v1922_v40  ;;  %v2709_v22 = vld [vmem:[%s4098_s3 + $0x74] sm:$0xf0] }
  0x6f   :  { %v2675_v43 = vld [vmem:[%s4096_s1 + $0x36c] sm:$0xf]  ;;  %v2178_v44 = vld [vmem:[%s4096_s1 + $0x378] sm:$0xf0]  ;;  %v2053_v47 = vor.u32 %v2643_v41, %v2050_v42  ;;  %v2707_v31 = vld [vmem:[%s4098_s3 + $0x64] sm:$0xf0] }
  0x70   :  { %v2575_v48 = vld [vmem:[%s4096_s1 + $0x4c] sm:$0xf]  ;;  %v1778_v49 = vld [vmem:[%s4096_s1 + $0x58] sm:$0xf0]  ;;  %v2181_v51 = vor.u32 %v2675_v43, %v2178_v44  ;;  %v2703_v37 = vld [vmem:[%s4098_s3 + $0x44] sm:$0xf0] }
  0x71   :  { %1017 = vmatpush.bf16.msrb.mxu3 %v2213_v27  ;;  %979 = vmatpush.bf16.msrb.mxu0 %v1813_v33  ;;  %v2607_v50 = vld [vmem:[%s4096_s1 + $0x14c] sm:$0xf]  ;;  %v1906_v52 = vld [vmem:[%s4096_s1 + $0x158] sm:$0xf0]  ;;  %v1781_v59 = vor.u32 %v2575_v48, %v1778_v49  ;;  %v2305_v27 = vor.u32 %v2709_v22, %v2304_v21  ;;  %v2297_v33 = vor.u32 %v2707_v31, %v2296_v30  ;;  %v2264_v42 = vld [vmem:[%s4098_s3 + $0x20] sm:$0xf] }
  0x72   :  { %992 = vmatpush.bf16.msrb.mxu1 %v1941_v34  ;;  %1005 = vmatpush.bf16.msrb.mxu2 %v2069_v35  ;;  %v2639_v53 = vld [vmem:[%s4096_s1 + $0x24c] sm:$0xf]  ;;  %v2034_v54 = vld [vmem:[%s4096_s1 + $0x258] sm:$0xf0]  ;;  %v1909_v60 = vor.u32 %v2607_v50, %v1906_v52  ;;  %v2288_v34 = vld [vmem:[%s4098_s3 + $0x50] sm:$0xf] }
  0x73   :  { %v2671_v55 = vld [vmem:[%s4096_s1 + $0x34c] sm:$0xf]  ;;  %v2162_v57 = vld [vmem:[%s4096_s1 + $0x358] sm:$0xf0]  ;;  %v2037_v61 = vor.u32 %v2639_v53, %v2034_v54  ;;  %v2705_v35 = vld [vmem:[%s4098_s3 + $0x54] sm:$0xf0] }
  0x74   :  { %v2571_v0 = vld [vmem:[%s4096_s1 + $0x2c] sm:$0xf]  ;;  %v1762_v1 = vld [vmem:[%s4096_s1 + $0x38] sm:$0xf0]  ;;  %v2165_v3 = vor.u32 %v2671_v55, %v2162_v57  ;;  %v2289_v36 = vor.u32 %v2705_v35, %v2288_v34  ;;  %v2699_v43 = vld [vmem:[%s4098_s3 + $0x24] sm:$0xf0] }
  0x75   :  { %1018 = vmatpush.bf16.msrb.mxu3 %v2197_v39  ;;  %980 = vmatpush.bf16.msrb.mxu0 %v1797_v45  ;;  %v2603_v2 = vld [vmem:[%s4096_s1 + $0x12c] sm:$0xf]  ;;  %v1890_v4 = vld [vmem:[%s4096_s1 + $0x138] sm:$0xf0]  ;;  %v1765_v9 = vor.u32 %v2571_v0, %v1762_v1  ;;  %v2723_v39 = vld [vmem:[%s4098_s3 + $0xe4] sm:$0xf0] }
  0x76   :  { %993 = vmatpush.bf16.msrb.mxu1 %v1925_v46  ;;  %1006 = vmatpush.bf16.msrb.mxu2 %v2053_v47  ;;  %v2635_v5 = vld [vmem:[%s4096_s1 + $0x22c] sm:$0xf]  ;;  %v2018_v6 = vld [vmem:[%s4096_s1 + $0x238] sm:$0xf0]  ;;  %v1893_v11 = vor.u32 %v2603_v2, %v1890_v4  ;;  %v2352_v44 = vld [vmem:[%s4098_s3 + $0xd0] sm:$0xf]  ;;  %v2265_v46 = vor.u32 %v2699_v43, %v2264_v42 }
  0x77   :  { %v2667_v7 = vld [vmem:[%s4096_s1 + $0x32c] sm:$0xf]  ;;  %v2146_v8 = vld [vmem:[%s4096_s1 + $0x338] sm:$0xf0]  ;;  %v2021_v12 = vor.u32 %v2635_v5, %v2018_v6  ;;  %v2721_v45 = vld [vmem:[%s4098_s3 + $0xd4] sm:$0xf0] }
  0x78   :  { %v2567_v10 = vld [vmem:[%s4096_s1 + $0xc] sm:$0xf]  ;;  %v1746_v13 = vld [vmem:[%s4096_s1 + $0x18] sm:$0xf0]  ;;  %v2149_v16 = vor.u32 %v2667_v7, %v2146_v8  ;;  %v2353_v47 = vor.u32 %v2721_v45, %v2352_v44  ;;  %v2256_v48 = vld [vmem:[%s4098_s3 + $0x10] sm:$0xf] }
  0x79   :  { %1019 = vmatpush.bf16.msrb.mxu3 %v2181_v51  ;;  %981 = vmatpush.bf16.msrb.mxu0 %v1781_v59  ;;  %v2599_v14 = vld [vmem:[%s4096_s1 + $0x10c] sm:$0xf]  ;;  %v1874_v15 = vld [vmem:[%s4096_s1 + $0x118] sm:$0xf0]  ;;  %v1749_v23 = vor.u32 %v2567_v10, %v1746_v13  ;;  %v2697_v49 = vld [vmem:[%s4098_s3 + $0x14] sm:$0xf0] }
  0x7a   :  { %994 = vmatpush.bf16.msrb.mxu1 %v1909_v60  ;;  %1007 = vmatpush.bf16.msrb.mxu2 %v2037_v61  ;;  %v2631_v17 = vld [vmem:[%s4096_s1 + $0x20c] sm:$0xf]  ;;  %v2002_v18 = vld [vmem:[%s4096_s1 + $0x218] sm:$0xf0]  ;;  %v1877_v24 = vor.u32 %v2599_v14, %v1874_v15  ;;  %v2344_v50 = vld [vmem:[%s4098_s3 + $0xc0] sm:$0xf]  ;;  %v2257_v52 = vor.u32 %v2697_v49, %v2256_v48 }
  0x7b   :  { %v2663_v19 = vld [vmem:[%s4096_s1 + $0x30c] sm:$0xf]  ;;  %v2130_v20 = vld [vmem:[%s4096_s1 + $0x318] sm:$0xf0]  ;;  %v2005_v25 = vor.u32 %v2631_v17, %v2002_v18  ;;  %v2719_v51 = vld [vmem:[%s4098_s3 + $0xc4] sm:$0xf0] }
  0x7c   :  { %v2133_v26 = vor.u32 %v2663_v19, %v2130_v20  ;;  %v2248_v53 = vld [vmem:[%s4098_s3] sm:$0xf]  ;;  %v2345_v54 = vor.u32 %v2719_v51, %v2344_v50  ;;  %v2695_v55 = vld [vmem:[%s4098_s3 + $0x4] sm:$0xf0]  ;;  %v2336_v57 = vld [vmem:[%s4098_s3 + $0xb0] sm:$0xf] }
  0x7d   :  { %1020 = vmatpush.bf16.msrb.mxu3 %v2165_v3  ;;  %982 = vmatpush.bf16.msrb.mxu0 %v1765_v9  ;;  %v2717_v59 = vld [vmem:[%s4098_s3 + $0xb4] sm:$0xf0]  ;;  %v2708_v60 = vld [vmem:[%s4098_s3 + $0x74] sm:$0xf]  ;;  %v2306_v61 = vld [vmem:[%s4098_s3 + $0x78] sm:$0xf0]  ;;  %v2249_v3 = vor.u32 %v2695_v55, %v2248_v53 }
  0x7e   :  { %995 = vmatpush.bf16.msrb.mxu1 %v1893_v11  ;;  %1008 = vmatpush.bf16.msrb.mxu2 %v2021_v12  ;;  %v2337_v0 = vor.u32 %v2717_v59, %v2336_v57  ;;  %v2328_v1 = vld [vmem:[%s4098_s3 + $0xa0] sm:$0xf]  ;;  %v2715_v2 = vld [vmem:[%s4098_s3 + $0xa4] sm:$0xf0]  ;;  %v2309_v4 = vor.u32 %v2708_v60, %v2306_v61  ;;  %v2432_v5 = vld [vmem:[%s4098_s3 + $0x170] sm:$0xf] }
  0x7f   :  { %v2706_v6 = vld [vmem:[%s4098_s3 + $0x64] sm:$0xf]  ;;  %v2298_v7 = vld [vmem:[%s4098_s3 + $0x68] sm:$0xf0]  ;;  %v2329_v8 = vor.u32 %v2715_v2, %v2328_v1  ;;  %v2741_v9 = vld [vmem:[%s4098_s3 + $0x174] sm:$0xf0] }
  0x80   :  { %v2320_v10 = vld [vmem:[%s4098_s3 + $0x90] sm:$0xf]  ;;  %v2713_v11 = vld [vmem:[%s4098_s3 + $0x94] sm:$0xf0]  ;;  %v2433_v12 = vor.u32 %v2741_v9, %v2432_v5  ;;  %v2301_v13 = vor.u32 %v2706_v6, %v2298_v7  ;;  %v2704_v14 = vld [vmem:[%s4098_s3 + $0x54] sm:$0xf] }
  0x81   :  { %1021 = vmatpush.bf16.msrb.mxu3 %v2149_v16  ;;  %983 = vmatpush.bf16.msrb.mxu0 %v1749_v23  ;;  %v2290_v15 = vld [vmem:[%s4098_s3 + $0x58] sm:$0xf0]  ;;  %v2321_v16 = vor.u32 %v2713_v11, %v2320_v10  ;;  %v2312_v17 = vld [vmem:[%s4098_s3 + $0x80] sm:$0xf]  ;;  %v2711_v18 = vld [vmem:[%s4098_s3 + $0x84] sm:$0xf0] }
  0x82   :  { %996 = vmatpush.bf16.msrb.mxu1 %v1877_v24  ;;  %1009 = vmatpush.bf16.msrb.mxu2 %v2005_v25  ;;  %v3765_v19 = vld [vmem:[%s4097_s2] sm:$0xf]  ;;  %v2724_v20 = vld [vmem:[%s4098_s3 + $0xf4] sm:$0xf]  ;;  %v2370_v21 = vld [vmem:[%s4098_s3 + $0xf8] sm:$0xf0]  ;;  %v2293_v22 = vor.u32 %v2704_v14, %v2290_v15  ;;  %v2313_v25 = vor.u32 %v2711_v18, %v2312_v17 }
  0x83   :  { %v2702_v23 = vld [vmem:[%s4098_s3 + $0x44] sm:$0xf]  ;;  %v2282_v24 = vld [vmem:[%s4098_s3 + $0x48] sm:$0xf0]  ;;  %v2700_v30 = vld [vmem:[%s4098_s3 + $0x34] sm:$0xf] }
  0x84   :  { %984 = vmatmul.bf16.vlgmr.msrb.gmra.mxu0 %v3092_v58  ;;  %v2280_v58 = vld [vmem:[%s4098_s3 + $0x40] sm:$0xf]  ;;  %v2285_v28 = vor.u32 %v2702_v23, %v2282_v24  ;;  %v2274_v31 = vld [vmem:[%s4098_s3 + $0x38] sm:$0xf0]  ;;  %v2739_v35 = vld [vmem:[%s4098_s3 + $0x164] sm:$0xf0] }
  0x85   :  { %1022 = vmatpush.bf16.msrb.mxu3 %v2133_v26  ;;  %1434 = vmatpush.bf16.msra.mxu0 %v2305_v27  ;;  %v2281_v38 = vor.u32 %v2703_v37, %v2280_v58  ;;  %v172_v26 = vperm.slane %v3765_v19, 0  ;;  %v2373_v27 = vor.u32 %v2724_v20, %v2370_v21  ;;  %v2424_v34 = vld [vmem:[%s4098_s3 + $0x160] sm:$0xf]  ;;  %v2362_v37 = vld [vmem:[%s4098_s3 + $0xe8] sm:$0xf0] }
  0x86   :  { %1447 = vmatpush.bf16.msra.mxu1 %v2369_v32  ;;  %1010 = vmatmul.bf16.vlgmr.msrb.gmra.mxu2 %v3090_v56  ;;  %v2701_v56 = vld [vmem:[%s4098_s3 + $0x34] sm:$0xf0]  ;;  %v2425_v58 = vor.u32 %v2739_v35, %v2424_v34  ;;  %v2416_v43 = vld [vmem:[%s4098_s3 + $0x150] sm:$0xf]  ;;  %v2720_v45 = vld [vmem:[%s4098_s3 + $0xd4] sm:$0xf] }
  0x87   :  { %997 = vmatmul.bf16.vlgmr.msrb.gmra.mxu1 %v3096_v63  ;;  %v2272_v63 = vld [vmem:[%s4098_s3 + $0x30] sm:$0xf]  ;;  %1460 = vmatpush.bf16.msra.mxu2 %v2433_v12  ;;  %v2737_v44 = vld [vmem:[%s4098_s3 + $0x154] sm:$0xf0]  ;;  %v2354_v48 = vld [vmem:[%s4098_s3 + $0xd8] sm:$0xf0] }
  0x88   :  { %1023 = vmatmul.bf16.vlgmr.msrb.gmra.mxu3 %v3094_v62  ;;  %v2360_v62 = vld [vmem:[%s4098_s3 + $0xe0] sm:$0xf]  ;;  %v2273_v41 = vor.u32 %v2701_v56, %v2272_v63  ;;  %v2277_v63 = vor.u32 %v2700_v30, %v2274_v31  ;;  %v2357_v51 = vor.u32 %v2720_v45, %v2354_v48  ;;  %v2696_v53 = vld [vmem:[%s4098_s3 + $0x14] sm:$0xf]  ;;  %v2735_v59 = vld [vmem:[%s4098_s3 + $0x144] sm:$0xf0] }
  0x89   :  { %1435 = vmatpush.bf16.msra.mxu0 %v2297_v33  ;;  %v2361_v40 = vor.u32 %v2723_v39, %v2360_v62  ;;  %v2698_v62 = vld [vmem:[%s4098_s3 + $0x24] sm:$0xf]  ;;  %v2266_v39 = vld [vmem:[%s4098_s3 + $0x28] sm:$0xf0]  ;;  %v2408_v57 = vld [vmem:[%s4098_s3 + $0x140] sm:$0xf] }
  0x8a   :  { %v2718_v60 = vld [vmem:[%s4098_s3 + $0xc4] sm:$0xf]  ;;  %v2346_v61 = vld [vmem:[%s4098_s3 + $0xc8] sm:$0xf0]  ;;  %v2733_v9 = vld [vmem:[%s4098_s3 + $0x134] sm:$0xf0] }
  0x8b   :  { %1448 = vmatpush.bf16.msra.mxu1 %v2361_v40  ;;  %1461 = vmatpush.bf16.msra.mxu2 %v2425_v58  ;;  %v2694_v2 = vld [vmem:[%s4098_s3 + $0x4] sm:$0xf]  ;;  %v2349_v5 = vor.u32 %v2718_v60, %v2346_v61  ;;  %v2716_v10 = vld [vmem:[%s4098_s3 + $0xb4] sm:$0xf]  ;;  %v2392_v14 = vld [vmem:[%s4098_s3 + $0x120] sm:$0xf] }
  0x8c   :  { %v2714_v17 = vld [vmem:[%s4098_s3 + $0xa4] sm:$0xf]  ;;  %v2330_v18 = vld [vmem:[%s4098_s3 + $0xa8] sm:$0xf0]  ;;  %v2384_v23 = vld [vmem:[%s4098_s3 + $0x110] sm:$0xf] }
  0x8d   :  { %1436 = vmatpush.bf16.msra.mxu0 %v2289_v36  ;;  %v2722_v36 = vld [vmem:[%s4098_s3 + $0xe4] sm:$0xf]  ;;  %v2496_v24 = vld [vmem:[%s4098_s3 + $0x1f0] sm:$0xf]  ;;  %v2314_v35 = vld [vmem:[%s4098_s3 + $0x88] sm:$0xf0] }
  0x8e   :  { %v2365_v56 = vor.u32 %v2722_v36, %v2362_v37  ;;  %v2710_v34 = vld [vmem:[%s4098_s3 + $0x84] sm:$0xf]  ;;  %v2740_v36 = vld [vmem:[%s4098_s3 + $0x174] sm:$0xf]  ;;  %v2434_v58 = vld [vmem:[%s4098_s3 + $0x178] sm:$0xf0] }
  0x8f   :  { %1449 = vmatpush.bf16.msra.mxu1 %v2353_v47  ;;  %v2417_v47 = vor.u32 %v2737_v44, %v2416_v43  ;;  %v2738_v43 = vld [vmem:[%s4098_s3 + $0x164] sm:$0xf]  ;;  %v2426_v45 = vld [vmem:[%s4098_s3 + $0x168] sm:$0xf0] }
  0x91   :  { %1437 = vmatpush.bf16.msra.mxu0 %v2281_v38  ;;  %1462 = vmatpush.bf16.msra.mxu2 %v2417_v47  ;;  %v2429_v47 = vor.u32 %v2738_v43, %v2426_v45  ;;  %v2752_v43 = vld [vmem:[%s4098_s3 + $0x1d4] sm:$0xf] }
  0x93   :  { %1450 = vmatpush.bf16.msra.mxu1 %v2345_v54  ;;  %v2258_v54 = vld [vmem:[%s4098_s3 + $0x18] sm:$0xf0] }
  0x94   :  { %v2261_v1 = vor.u32 %v2696_v53, %v2258_v54 }
  0x95   :  { %1438 = vmatpush.bf16.msra.mxu0 %v2273_v41 }
  0x97   :  { %1451 = vmatpush.bf16.msra.mxu1 %v2337_v0 }
  0x99   :  { %1439 = vmatpush.bf16.msra.mxu0 %v2265_v46  ;;  %v2269_v46 = vor.u32 %v2698_v62, %v2266_v39 }
  0x9b   :  { %1452 = vmatpush.bf16.msra.mxu1 %v2329_v8  ;;  %v2400_v8 = vld [vmem:[%s4098_s3 + $0x130] sm:$0xf] }
  0x9c   :  { %v2401_v12 = vor.u32 %v2733_v9, %v2400_v8 }
  0x9d   :  { %1440 = vmatpush.bf16.msra.mxu0 %v2257_v52 }
  0x9f   :  { %1453 = vmatpush.bf16.msra.mxu1 %v2321_v16  ;;  %v2731_v16 = vld [vmem:[%s4098_s3 + $0x124] sm:$0xf0] }
  0xa0   :  { %v2393_v21 = vor.u32 %v2731_v16, %v2392_v14  ;;  %v2456_v16 = vld [vmem:[%s4098_s3 + $0x1a0] sm:$0xf] }
  0xa1   :  { %1441 = vmatpush.bf16.msra.mxu0 %v2249_v3  ;;  %v2250_v3 = vld [vmem:[%s4098_s3 + $0x8] sm:$0xf0] }
  0xa2   :  { %v2253_v20 = vor.u32 %v2694_v2, %v2250_v3  ;;  %v2734_v2 = vld [vmem:[%s4098_s3 + $0x144] sm:$0xf] }
  0xa3   :  { %1454 = vmatpush.bf16.msra.mxu1 %v2313_v25  ;;  %v2757_v25 = vld [vmem:[%s4098_s3 + $0x1f4] sm:$0xf0] }
  0xa5   :  { %1486 = vmatpush.bf16.msrb.mxu0 %v2309_v4  ;;  %v2409_v4 = vor.u32 %v2735_v59, %v2408_v57 }
  0xa7   :  { %1499 = vmatpush.bf16.msrb.mxu1 %v2373_v27  ;;  %1463 = vmatpush.bf16.msra.mxu2 %v2409_v4  ;;  %v2712_v27 = vld [vmem:[%s4098_s3 + $0x94] sm:$0xf] }
  0xa8   :  { %v829_v29 = vpop.f32.mrf.mxu0 }
  0xa9   :  { %1487 = vmatpush.bf16.msrb.mxu0 %v2301_v13  ;;  %v830_v32 = vadd.f32 %v829_v29, %v172_v26  ;;  %v842_v33 = vpop.f32.mrf.mxu1  ;;  %v2338_v13 = vld [vmem:[%s4098_s3 + $0xb8] sm:$0xf0]  ;;  %v2729_v26 = vld [vmem:[%s4098_s3 + $0x114] sm:$0xf0]  ;;  %v2497_v29 = vor.u32 %v2757_v25, %v2496_v24  ;;  %v2448_v24 = vld [vmem:[%s4098_s3 + $0x190] sm:$0xf] }
  0xaa   :  { %v2341_v15 = vor.u32 %v2716_v10, %v2338_v13  ;;  %v2385_v30 = vor.u32 %v2729_v26, %v2384_v23  ;;  %v2464_v10 = vld [vmem:[%s4098_s3 + $0x1b0] sm:$0xf]  ;;  %v2745_v25 = vld [vmem:[%s4098_s3 + $0x194] sm:$0xf0]  ;;  %v2728_v26 = vld [vmem:[%s4098_s3 + $0x114] sm:$0xf] }
  0xab   :  { %v843_v38 = vadd.f32 %v842_v33, %v830_v32  ;;  %1500 = vmatpush.bf16.msrb.mxu1 %v2365_v56  ;;  %1464 = vmatpush.bf16.msra.mxu2 %v2401_v12  ;;  %v2376_v32 = vld [vmem:[%s4098_s3 + $0x100] sm:$0xf]  ;;  %v2727_v33 = vld [vmem:[%s4098_s3 + $0x104] sm:$0xf0]  ;;  %v2437_v56 = vor.u32 %v2740_v36, %v2434_v58  ;;  %v2732_v12 = vld [vmem:[%s4098_s3 + $0x134] sm:$0xf] }
  0xac   :  { %1473 = vmatpush.bf16.msra.mxu3 %v2497_v29  ;;  %v2377_v37 = vor.u32 %v2727_v33, %v2376_v32  ;;  %v2726_v32 = vld [vmem:[%s4098_s3 + $0x104] sm:$0xf]  ;;  %v2498_v36 = vld [vmem:[%s4098_s3 + $0x1f8] sm:$0xf0]  ;;  %v174_v58 = vperm.slane %v3765_v19, 2 }
  0xad   :  { %1488 = vmatpush.bf16.msrb.mxu0 %v2293_v22  ;;  %v2333_v22 = vor.u32 %v2714_v17, %v2330_v18  ;;  %v2747_v17 = vld [vmem:[%s4098_s3 + $0x1a4] sm:$0xf0] }
  0xae   :  { %v855_v40 = vpop.f32.mrf.mxu2 }
  0xaf   :  { %v856_v41 = vadd.f32 %v855_v40, %v843_v38  ;;  %v868_v42 = vpop.f32.mrf.mxu3  ;;  %1501 = vmatpush.bf16.msrb.mxu1 %v2357_v51  ;;  %1465 = vmatpush.bf16.msra.mxu2 %v2393_v21  ;;  %v2317_v38 = vor.u32 %v2710_v34, %v2314_v35  ;;  %v2736_v51 = vld [vmem:[%s4098_s3 + $0x154] sm:$0xf]  ;;  %v2394_v21 = vld [vmem:[%s4098_s3 + $0x128] sm:$0xf0] }
  0xb0   :  { %v831_v50 = vpop.f32.mrf.mxu0  ;;  %v2378_v34 = vld [vmem:[%s4098_s3 + $0x108] sm:$0xf0]  ;;  %v2756_v35 = vld [vmem:[%s4098_s3 + $0x1f4] sm:$0xf] }
  0xb1   :  { %1489 = vmatpush.bf16.msrb.mxu0 %v2285_v28  ;;  %v869_v49 = vadd.f32 %v868_v42, %v856_v41  ;;  %v844_v52 = vpop.f32.mrf.mxu1  ;;  %v2322_v28 = vld [vmem:[%s4098_s3 + $0x98] sm:$0xf0]  ;;  %v2488_v41 = vld [vmem:[%s4098_s3 + $0x1e0] sm:$0xf]  ;;  %v2755_v42 = vld [vmem:[%s4098_s3 + $0x1e4] sm:$0xf0] }
  0xb2   :  { %v2325_v31 = vor.u32 %v2712_v27, %v2322_v28  ;;  %v2489_v44 = vor.u32 %v2755_v42, %v2488_v41  ;;  %v2753_v50 = vld [vmem:[%s4098_s3 + $0x1d4] sm:$0xf0]  ;;  %v2386_v27 = vld [vmem:[%s4098_s3 + $0x118] sm:$0xf0]  ;;  %v2449_v28 = vor.u32 %v2745_v25, %v2448_v24 }
  0xb3   :  { %vm1028_vm0 = vcmp.gt.f32.partialorder %v869_v49, 0.0  ;;  %v1032_v55 = vmul.f32 0.2, %v869_v49  ;;  %1502 = vmatpush.bf16.msrb.mxu1 %v2349_v5  ;;  %1466 = vmatpush.bf16.msra.mxu2 %v2385_v30  ;;  %v2410_v5 = vld [vmem:[%s4098_s3 + $0x148] sm:$0xf0]  ;;  %v2389_v29 = vor.u32 %v2728_v26, %v2386_v27 }
  0xb4   :  { %1474 = vmatpush.bf16.msra.mxu3 %v2489_v44  ;;  %v2440_v30 = vld [vmem:[%s4098_s3 + $0x180] sm:$0xf]  ;;  %v2482_v44 = vld [vmem:[%s4098_s3 + $0x1d8] sm:$0xf0] }
  0xb5   :  { %1490 = vmatpush.bf16.msrb.mxu0 %v2277_v63  ;;  %v1036_v0 = vsel %vm1028_vm0, %v869_v49, %v1032_v55  ;;  %v173_v63 = vperm.slane %v3765_v19, 1  ;;  %v2480_v49 = vld [vmem:[%s4098_s3 + $0x1d0] sm:$0xf]  ;;  %v2418_v55 = vld [vmem:[%s4098_s3 + $0x158] sm:$0xf0] }
  0xb6   :  { %v1040_v6 = vpack.c.bf16 %v1036_v0, %v1036_v0  ;;  %v857_v7 = vpop.f32.mrf.mxu2  ;;  %v2481_v54 = vor.u32 %v2753_v50, %v2480_v49  ;;  %v2421_v57 = vor.u32 %v2736_v51, %v2418_v55  ;;  %v2472_v0 = vld [vmem:[%s4098_s3 + $0x1c0] sm:$0xf]  ;;  %v2750_v51 = vld [vmem:[%s4098_s3 + $0x1c4] sm:$0xf] }
  0xb7   :  { %v870_v11 = vpop.f32.mrf.mxu3  ;;  %1503 = vmatpush.bf16.msrb.mxu1 %v2341_v15  ;;  %1467 = vmatpush.bf16.msra.mxu2 %v2377_v37  ;;  %v2402_v15 = vld [vmem:[%s4098_s3 + $0x138] sm:$0xf0]  ;;  %v2381_v37 = vor.u32 %v2726_v32, %v2378_v34 }
  0xb8   :  { %1442 = vmatmul.bf16.vlgmr.msra.gmra.mxu0 %v1040_v6  ;;  %1475 = vmatpush.bf16.msra.mxu3 %v2481_v54  ;;  %v2749_v11 = vld [vmem:[%s4098_s3 + $0x1b4] sm:$0xf0]  ;;  %v2405_v18 = vor.u32 %v2732_v12, %v2402_v15  ;;  %v175_v12 = vperm.slane %v3765_v19, 3 }
  0xb9   :  { %1491 = vmatpush.bf16.msrb.mxu0 %v2269_v46  ;;  %v2465_v14 = vor.u32 %v2749_v11, %v2464_v10  ;;  %v2442_v10 = vld [vmem:[%s4098_s3 + $0x188] sm:$0xf0] }
  0xbb   :  { %1504 = vmatpush.bf16.msrb.mxu1 %v2333_v22  ;;  %1512 = vmatpush.bf16.msrb.mxu2 %v2437_v56  ;;  %v2457_v22 = vor.u32 %v2747_v17, %v2456_v16  ;;  %v2490_v56 = vld [vmem:[%s4098_s3 + $0x1e8] sm:$0xf0] }
  0xbd   :  { %1492 = vmatpush.bf16.msrb.mxu0 %v2261_v1  ;;  %v2751_v1 = vld [vmem:[%s4098_s3 + $0x1c4] sm:$0xf0] }
  0xbe   :  { %v2473_v4 = vor.u32 %v2751_v1, %v2472_v0 }
  0xbf   :  { %1505 = vmatpush.bf16.msrb.mxu1 %v2325_v31  ;;  %1513 = vmatpush.bf16.msrb.mxu2 %v2429_v47  ;;  %v2743_v31 = vld [vmem:[%s4098_s3 + $0x184] sm:$0xf0] }
  0xc0   :  { %1476 = vmatpush.bf16.msra.mxu3 %v2473_v4  ;;  %v2441_v33 = vor.u32 %v2743_v31, %v2440_v30 }
  0xc1   :  { %1493 = vmatpush.bf16.msrb.mxu0 %v2253_v20  ;;  %v881_v62 = vpop.f32.mrf.mxu0  ;;  %v2730_v20 = vld [vmem:[%s4098_s3 + $0x124] sm:$0xf] }
  0xc2   :  { %v882_v39 = vadd.f32 %v881_v62, %v173_v63  ;;  %v2397_v23 = vor.u32 %v2730_v20, %v2394_v21  ;;  %v2754_v63 = vld [vmem:[%s4098_s3 + $0x1e4] sm:$0xf] }
  0xc3   :  { %1506 = vmatpush.bf16.msrb.mxu1 %v2317_v38  ;;  %1514 = vmatpush.bf16.msrb.mxu2 %v2421_v57  ;;  %v2501_v38 = vor.u32 %v2756_v35, %v2498_v36  ;;  %v2764_v35 = vld [vmem:[%s4100_s5 + $0x30] sm:$0xff]  ;;  %v2763_v36 = vld [vmem:[%s4100_s5 + $0x28] sm:$0xff] }
  0xc4   :  { %v894_v40 = vpop.f32.mrf.mxu1  ;;  %1477 = vmatpush.bf16.msra.mxu3 %v2465_v14 }
  0xc5   :  { %v895_v46 = vadd.f32 %v894_v40, %v882_v39  ;;  %v2493_v39 = vor.u32 %v2754_v63, %v2490_v56  ;;  %v2761_v63 = vld [vmem:[%s4100_s5 + $0x18] sm:$0xff] }
  0xc8   :  { %1494 = vmatmul.bf16.vlgmr.msrb.gmra.mxu0 %v1040_v6  ;;  %v2413_v6 = vor.u32 %v2734_v2, %v2410_v5  ;;  %1478 = vmatpush.bf16.msra.mxu3 %v2457_v22  ;;  %v2746_v2 = vld [vmem:[%s4098_s3 + $0x1a4] sm:$0xf] }
  0xc9   :  { %v883_v60 = vpop.f32.mrf.mxu0 }
  0xca   :  { %v907_v48 = vpop.f32.mrf.mxu2  ;;  %1515 = vmatpush.bf16.msrb.mxu2 %v2413_v6  ;;  %v2466_v60 = vld [vmem:[%s4098_s3 + $0x1b8] sm:$0xf0]  ;;  %v2744_v6 = vld [vmem:[%s4098_s3 + $0x194] sm:$0xf] }
  0xcb   :  { %v908_v52 = vadd.f32 %v907_v48, %v895_v46  ;;  %v920_v53 = vpop.f32.mrf.mxu3  ;;  %v2485_v46 = vor.u32 %v2752_v43, %v2482_v44  ;;  %v2758_v43 = vld [vmem:[%s4100_s5] sm:$0xff] }
  0xcc   :  { %v896_v61 = vpop.f32.mrf.mxu1  ;;  %1479 = vmatpush.bf16.msra.mxu3 %v2449_v28  ;;  %v2770_v44 = vld [vmem:[%s4100_s5 + $0x60] sm:$0xff] }
  0xcd   :  { %v921_v59 = vadd.f32 %v920_v53, %v908_v52  ;;  %v2474_v52 = vld [vmem:[%s4098_s3 + $0x1c8] sm:$0xf0] }
  0xce   :  { %1516 = vmatpush.bf16.msrb.mxu2 %v2405_v18  ;;  %v2477_v54 = vor.u32 %v2750_v51, %v2474_v52  ;;  %v2766_v51 = vld [vmem:[%s4100_s5 + $0x40] sm:$0xff] }
  0xcf   :  { %vm1029_vm1 = vcmp.gt.f32.partialorder %v921_v59, 0.0  ;;  %v1033_v3 = vmul.f32 0.2, %v921_v59 }
  0xd0   :  { %1480 = vmatpush.bf16.msra.mxu3 %v2441_v33  ;;  %v2765_v33 = vld [vmem:[%s4100_s5 + $0x38] sm:$0xff] }
  0xd1   :  { %v1037_v7 = vsel %vm1029_vm1, %v921_v59, %v1033_v3  ;;  %v2748_v59 = vld [vmem:[%s4098_s3 + $0x1b4] sm:$0xf]  ;;  %v2458_v3 = vld [vmem:[%s4098_s3 + $0x1a8] sm:$0xf0]  ;;  %1678 = vmatpush.bf16.msra.mxu0 %v2765_v33 }
  0xd2   :  { %v1041_v8 = vpack.c.bf16 %v1037_v7, %v1037_v7  ;;  %v909_v9 = vpop.f32.mrf.mxu2  ;;  %1517 = vmatpush.bf16.msrb.mxu2 %v2397_v23  ;;  %v2469_v1 = vor.u32 %v2748_v59, %v2466_v60  ;;  %v2461_v5 = vor.u32 %v2746_v2, %v2458_v3  ;;  %v2450_v7 = vld [vmem:[%s4098_s3 + $0x198] sm:$0xf0] }
  0xd3   :  { %v922_v13 = vpop.f32.mrf.mxu3  ;;  %v2742_v9 = vld [vmem:[%s4098_s3 + $0x184] sm:$0xf] }
  0xd4   :  { %1455 = vmatmul.bf16.vlgmr.msra.gmra.mxu1 %v1041_v8  ;;  %1525 = vmatpush.bf16.msrb.mxu3 %v2501_v38  ;;  %v2445_v11 = vor.u32 %v2742_v9, %v2442_v10  ;;  %v2773_v38 = vld [vmem:[%s4100_s5 + $0x78] sm:$0xff] }
  0xd5   :  { %1679 = vmatpush.bf16.msra.mxu0 %v2764_v35  ;;  %1691 = vmatpush.bf16.msra.mxu1 %v2773_v38 }
  0xd6   :  { %1518 = vmatpush.bf16.msrb.mxu2 %v2389_v29 }
  0xd8   :  { %1526 = vmatpush.bf16.msrb.mxu3 %v2493_v39  ;;  %v2772_v39 = vld [vmem:[%s4100_s5 + $0x70] sm:$0xff] }
  0xd9   :  { %1680 = vmatpush.bf16.msra.mxu0 %v2763_v36  ;;  %1692 = vmatpush.bf16.msra.mxu1 %v2772_v39 }
  0xda   :  { %1519 = vmatpush.bf16.msrb.mxu2 %v2381_v37  ;;  %v2762_v37 = vld [vmem:[%s4100_s5 + $0x20] sm:$0xff] }
  0xdc   :  { %1527 = vmatpush.bf16.msrb.mxu3 %v2485_v46 }
  0xdd   :  { %1681 = vmatpush.bf16.msra.mxu0 %v2762_v37 }
  0xe0   :  { %1528 = vmatpush.bf16.msrb.mxu3 %v2477_v54 }
  0xe1   :  { %v933_v62 = vpop.f32.mrf.mxu0  ;;  %1682 = vmatpush.bf16.msra.mxu0 %v2761_v63 }
  0xe2   :  { %v934_v40 = vadd.f32 %v933_v62, %v174_v58  ;;  %v2760_v62 = vld [vmem:[%s4100_s5 + $0x10] sm:$0xff] }
  0xe4   :  { %1507 = vmatmul.bf16.vlgmr.msrb.gmra.mxu1 %v1041_v8  ;;  %v946_v41 = vpop.f32.mrf.mxu1  ;;  %1529 = vmatpush.bf16.msrb.mxu3 %v2469_v1  ;;  %v2453_v8 = vor.u32 %v2744_v6, %v2450_v7 }
  0xe5   :  { %v947_v42 = vadd.f32 %v946_v41, %v934_v40  ;;  %1683 = vmatpush.bf16.msra.mxu0 %v2760_v62  ;;  %v2759_v40 = vld [vmem:[%s4100_s5 + $0x8] sm:$0xff] }
  0xe6   :  { %v2771_v41 = vld [vmem:[%s4100_s5 + $0x68] sm:$0xff] }
  0xe7   :  { %1693 = vmatpush.bf16.msra.mxu1 %v2771_v41 }
  0xe8   :  { %1530 = vmatpush.bf16.msrb.mxu3 %v2461_v5 }
  0xe9   :  { %v935_v50 = vpop.f32.mrf.mxu0  ;;  %1684 = vmatpush.bf16.msra.mxu0 %v2759_v40 }
  0xea   :  { %v959_v45 = vpop.f32.mrf.mxu2  ;;  %v1108_v50 = vld [vmem:[%s4099_s4] sm:$0x3] }
  0xeb   :  { %v960_v47 = vadd.f32 %v959_v45, %v947_v42  ;;  %v972_v48 = vpop.f32.mrf.mxu3  ;;  %1694 = vmatpush.bf16.msra.mxu1 %v2770_v44  ;;  %v2769_v45 = vld [vmem:[%s4100_s5 + $0x58] sm:$0xff]  ;;  %v1110_v52 = vperm.slane %v1108_v50, 0  ;;  %v1111_v2 = vperm.slane %v1108_v50, 1 }
  0xec   :  { %v948_v53 = vpop.f32.mrf.mxu1  ;;  %1531 = vmatpush.bf16.msrb.mxu3 %v2453_v8 }
  0xed   :  { %v973_v49 = vadd.f32 %v972_v48, %v960_v47  ;;  %1685 = vmatpush.bf16.msra.mxu0 %v2758_v43  ;;  %v2768_v47 = vld [vmem:[%s4100_s5 + $0x50] sm:$0xff]  ;;  %v2767_v48 = vld [vmem:[%s4100_s5 + $0x48] sm:$0xff] }
  0xef   :  { %vm1030_vm2 = vcmp.gt.f32.partialorder %v973_v49, 0.0  ;;  %v1034_v55 = vmul.f32 0.2, %v973_v49  ;;  %1695 = vmatpush.bf16.msra.mxu1 %v2769_v45 }
  0xf0   :  { %1532 = vmatpush.bf16.msrb.mxu3 %v2445_v11 }
  0xf1   :  { %v1038_v57 = vsel %vm1030_vm2, %v973_v49, %v1034_v55 }
  0xf2   :  { %v1042_v61 = vpack.c.bf16 %v1038_v57, %v1038_v57  ;;  %v961_v0 = vpop.f32.mrf.mxu2 }
  0xf3   :  { %v974_v4 = vpop.f32.mrf.mxu3  ;;  %1696 = vmatpush.bf16.msra.mxu1 %v2768_v47 }
  0xf4   :  { %1468 = vmatmul.bf16.vlgmr.msra.gmra.mxu2 %v1042_v61 }
  0xf7   :  { %1697 = vmatpush.bf16.msra.mxu1 %v2767_v48 }
  0xfb   :  { %1698 = vmatpush.bf16.msra.mxu1 %v2766_v51 }
 0x101   :  { %v985_v13 = vpop.f32.mrf.mxu0 }
 0x102   :  { %v986_v14 = vadd.f32 %v985_v13, %v175_v12 }
 0x104   :  { %v998_v15 = vpop.f32.mrf.mxu1  ;;  %1520 = vmatmul.bf16.vlgmr.msrb.gmra.mxu2 %v1042_v61 }
 0x105   :  { %v999_v16 = vadd.f32 %v998_v15, %v986_v14  ;;  %v2775_v15 = vld [vmem:[%s4101_s6] ss:$0 sm:$0xff]  ;;  %s2806_s6 = smov [#allocation2]  }
 0x106   :  { %s1723_s21 = sshll.u32 %s2806_s6, 4  ;;  %s1724_s21 = int_to_ptr.vmem [resolvable:$true] %s1723_s21 }
 0x109   :  { %v1011_v17 = vpop.f32.mrf.mxu2  ;;  %v987_v21 = vpop.f32.mrf.mxu0 }
 0x10a   :  { %v1012_v18 = vadd.f32 %v1011_v17, %v999_v16 }
 0x10b   :  { %v1024_v20 = vpop.f32.mrf.mxu3 }
 0x10c   :  { %v1000_v22 = vpop.f32.mrf.mxu1  ;;  %v1025_v23 = vadd.f32 %v1024_v20, %v1012_v18 }
 0x10e   :  { %vm1031_vm3 = vcmp.gt.f32.partialorder %v1025_v23, 0.0  ;;  %v1035_v24 = vmul.f32 0.2, %v1025_v23 }
 0x110   :  { %v1039_v25 = vsel %vm1031_vm3, %v1025_v23, %v1035_v24 }
 0x111   :  { %v1043_v26 = vpack.c.bf16 %v1039_v25, %v1039_v25  ;;  %v1013_v27 = vpop.f32.mrf.mxu2 }
 0x113   :  { %v1026_v28 = vpop.f32.mrf.mxu3  ;;  %1481 = vmatmul.bf16.vlgmr.msra.gmra.mxu3 %v1043_v26 }
 0x123   :  { %1533 = vmatmul.bf16.vlgmr.msrb.gmra.mxu3 %v1043_v26 }
 0x135   :  { %v1443_v19 = vpop.f32.mrf.mxu0 }
 0x136   :  { %v1444_v54 = vadd.f32 %v1443_v19, %v1110_v52 }
 0x13d   :  { %v1445_v29 = vpop.f32.mrf.mxu0 }
 0x145   :  { %v1495_v30 = vpop.f32.mrf.mxu0 }
 0x146   :  { %v1496_v4 = vadd.f32 %v1495_v30, %v1111_v2 }
 0x14d   :  { %v1497_v31 = vpop.f32.mrf.mxu0 }
 0x151   :  { %v1456_v32 = vpop.f32.mrf.mxu1 }
 0x152   :  { %v1457_v55 = vadd.f32 %v1456_v32, %v1444_v54 }
 0x159   :  { %v1458_v34 = vpop.f32.mrf.mxu1 }
 0x161   :  { %v1508_v58 = vpop.f32.mrf.mxu1 }
 0x162   :  { %v1509_v5 = vadd.f32 %v1508_v58, %v1496_v4 }
 0x169   :  { %v1510_v56 = vpop.f32.mrf.mxu1 }
 0x177   :  { %v1469_v42 = vpop.f32.mrf.mxu2 }
 0x178   :  { %v1470_v57 = vadd.f32 %v1469_v42, %v1457_v55 }
 0x17f   :  { %v1471_v46 = vpop.f32.mrf.mxu2 }
 0x187   :  { %v1521_v49 = vpop.f32.mrf.mxu2 }
 0x188   :  { %v1522_v6 = vadd.f32 %v1521_v49, %v1509_v5 }
 0x18f   :  { %v1523_v53 = vpop.f32.mrf.mxu2 }
 0x196   :  { %v1482_v59 = vpop.f32.mrf.mxu3 }
 0x197   :  { %v1483_v60 = vadd.f32 %v1482_v59, %v1470_v57 }
 0x199   :  { %vm1538_vm4 = vcmp.gt.f32.partialorder %v1483_v60, 0.0  ;;  %v1540_v61 = vmul.f32 0.2, %v1483_v60 }
 0x19b   :  { %v1542_v0 = vsel %vm1538_vm4, %v1483_v60, %v1540_v61 }
 0x19c   :  { %v1544_v1 = vpack.c.bf16 %v1542_v0, %v1542_v0 }
 0x19e   :  { %v1484_v3 = vpop.f32.mrf.mxu3  ;;  %1686 = vmatmul.bf16.vlgmr.msra.gmra.mxu0 %v1544_v1 }
 0x1a6   :  { %v1534_v7 = vpop.f32.mrf.mxu3 }
 0x1a7   :  { %v1535_v8 = vadd.f32 %v1534_v7, %v1522_v6 }
 0x1a9   :  { %vm1539_vm5 = vcmp.gt.f32.partialorder %v1535_v8, 0.0  ;;  %v1541_v9 = vmul.f32 0.2, %v1535_v8 }
 0x1ab   :  { %v1543_v10 = vsel %vm1539_vm5, %v1535_v8, %v1541_v9 }
 0x1ac   :  { %v1545_v11 = vpack.c.bf16 %v1543_v10, %v1543_v10 }
 0x1ae   :  { %v1536_v12 = vpop.f32.mrf.mxu3  ;;  %1699 = vmatmul.bf16.vlgmr.msra.gmra.mxu1 %v1545_v11 }
 0x21b   :  { %v1687_v13 = vpop.f32.mrf.mxu0 }
 0x21c   :  { %v1688_v16 = vadd.f32 %v2775_v15, %v1687_v13 }
 0x223   :  { %v1689_v14 = vpop.f32.mrf.mxu0 }
 0x22b   :  { %v1700_v17 = vpop.f32.mrf.mxu1 }
 0x22c   :  { %v1701_v18 = vadd.f32 %v1700_v17, %v1688_v16 }
 0x22e   :  { %v1705_v20 = vsel %vm1704_vm6, %v1701_v18, -inf }
 0x22f   :  { %1706 = vmax.xlane.f32.xlu0 %v1705_v20 }
 0x233   :  { %v1702_v21 = vpop.f32.mrf.mxu1 }
 0x2a2   :  { %v1707_v22 = vpop.xlane.xlu0 %1706 }
 0x2a3   :  { %v1708_v23 = vsub.f32 %v1701_v18, %v1707_v22 }
 0x2a5   :  { %v1709_v24 = vmul.f32 1.442695, %v1708_v23 }
 0x2a7   :  { %2776 = vpow2.f32 %v1709_v24 }
 0x2ad   :  { %v2777_v25 = vpop.eup %2776 }
 0x2ae   :  { %v1711_v26 = vsel %vm1704_vm6, %v2777_v25, 0.0 }
 0x2af   :  { %1712 = vadd.xlane.f32.xlu0 %v1711_v26 }
 0x322   :  { %v1713_v27 = vpop.xlane.xlu0 %1712 }
 0x323   :  { %2778 = vlog2.f32 %v1713_v27 }
 0x329   :  { %v2779_v28 = vpop.eup %2778 }
 0x32a   :  { %v1715_v19 = vmul.f32 0.6931472, %v2779_v28 }
 0x32c   :  { %v1716_v29 = vsub.f32 %v1708_v23, %v1715_v19 }
 0x32e   :  { %1717 = vst.msk [vmem:[#allocation2] sm:$0x3] %vm1704_vm6, %v1716_v29 }
 0x32f   :  { %1728 = dma.vmem_to_hbm [thread:$0]  %s1724_s21, 32, %s1726_s24, [#allocation3]  }
 0x330   :  { %2804 = dma.done.wait [#allocation3], 32  }
 0x331   :  { %2805 = vsyncadd [#allocation3], 4294967264 }
 0x332   :  { %1733 = vsyncpa [#allocation3], 1 }

</bundles_post_ra>
